<compile_context>
chip_gen: v7x
topology: tpu7x:2x2x1
jax: 0.10.0
libtpu: 0.0.40
codegen_flags: <defaults>
</compile_context>

<pallas_src>
import functools

import jax
import jax.numpy as jnp
from jax.experimental import pallas as pl
from jax.experimental.pallas import tpu as pltpu

IN_DIM = 4096
HID_DIM = 1024
OUT_DIM = 1
TK = 2048          # K-tile for the first (4096-wide) matmul -> grid of 2
ROW_PAD = 16       # pad total rows to a multiple of 16 (bf16 sublane packing)


def _instance_da_kernel(x_ref, w1_ref, b1_ref, w2_ref, b2_ref, w3_ref, b3_ref,
                        out_ref, acc_ref):
    """Fused 3-layer MLP.  Grid axis 0 tiles the 4096-wide contraction of layer 1.

    acc_ref accumulates x @ W1 across K tiles (f32); on the last tile the rest
    of the network (bias+ReLU, layer 2, layer 3, sigmoid) runs in VMEM.
    """
    k = pl.program_id(0)

    @pl.when(k == 0)
    def _():
        acc_ref[...] = jnp.zeros_like(acc_ref)

    # Layer 1 partial contraction on the MXU (bf16 inputs, f32 accumulation).
    acc_ref[...] += jnp.dot(x_ref[...], w1_ref[...],
                            preferred_element_type=jnp.float32)

    @pl.when(k == pl.num_programs(0) - 1)
    def _():
        # grad_reverse is identity in forward; dropout is identity in eval mode.
        h1 = jnp.maximum(acc_ref[...] + b1_ref[...], 0.0)            # ReLU (f32)
        h2 = jnp.dot(h1.astype(w2_ref.dtype), w2_ref[...],           # bf16 MXU
                     preferred_element_type=jnp.float32)
        h2 = jnp.maximum(h2 + b2_ref[...], 0.0)                      # ReLU (f32)
        # Layer 3: output width 1 -> VPU multiply + lane reduction instead of
        # driving the full MXU for a single output lane.  w3 is a (1,1024) row.
        logits = jnp.sum(h2 * w3_ref[...], axis=-1, keepdims=True) + b3_ref[...]
        out_ref[...] = jax.nn.sigmoid(logits).astype(out_ref.dtype)


@jax.jit
def _instance_da_call(x, w1, b1, w2, b2, w3, b3):
    """Run the fused MLP on one padded batch x of shape (M, 4096), bf16."""
    m = x.shape[0]
    num_k = IN_DIM // TK
    grid_spec = pltpu.PrefetchScalarGridSpec(
        num_scalar_prefetch=0,
        grid=(num_k,),
        in_specs=[
            pl.BlockSpec((m, TK), lambda k: (0, k)),                # x tile (bf16)
            pl.BlockSpec((TK, HID_DIM), lambda k: (k, 0)),          # W1 tile (bf16)
            pl.BlockSpec((1, HID_DIM), lambda k: (0, 0)),           # b1 (resident)
            pl.BlockSpec((HID_DIM, HID_DIM), lambda k: (0, 0)),     # W2 (resident, bf16)
            pl.BlockSpec((1, HID_DIM), lambda k: (0, 0)),           # b2 (resident)
            pl.BlockSpec((1, HID_DIM), lambda k: (0, 0)),           # W3 row (resident)
            pl.BlockSpec((1, OUT_DIM), lambda k: (0, 0)),           # b3 (resident)
        ],
        out_specs=pl.BlockSpec((m, OUT_DIM), lambda k: (0, 0)),
        scratch_shapes=[pltpu.VMEM((m, HID_DIM), jnp.float32)],
    )
    return pl.pallas_call(
        _instance_da_kernel,
        out_shape=jax.ShapeDtypeStruct((m, OUT_DIM), jnp.float32),
        grid_spec=grid_spec,
        compiler_params=pltpu.CompilerParams(
            dimension_semantics=("arbitrary",),
            vmem_limit_bytes=32 << 20,
        ),
    )(x, w1, b1, w2, b2, w3, b3)


def instance_da_forward(x_true, x_virtual, params):
    """Mirrors _InstanceDA.forward: returns (y_true, y_virtual).

    Both domains are processed in a single pallas_call so the ~10 MiB of bf16
    weights are read from HBM once.
    """
    w1, b1, w2, b2, w3, b3 = params
    n_true = x_true.shape[0]
    n_virtual = x_virtual.shape[0]
    x = jnp.concatenate([x_true, x_virtual], axis=0)
    m = x.shape[0]
    m_pad = ((m + ROW_PAD - 1) // ROW_PAD) * ROW_PAD
    if m_pad != m:
        x = jnp.pad(x, ((0, m_pad - m), (0, 0)))
    x = x.astype(jnp.bfloat16)
    y = _instance_da_call(x, w1, b1, w2, b2, w3, b3)
    return y[:n_true], y[n_true:n_true + n_virtual]


def init_params(key):
    """Deterministic synthetic parameters matching nn.Linear shapes.

    PyTorch Linear stores weight as (out, in); W1/W2 are kept (in, out) in
    bf16 for the MXU; W3 (out=1) is kept as a (1, 1024) f32 row; biases f32.
    """
    k1, k2, k3, k4, k5, k6 = jax.random.split(key, 6)
    w1 = (jax.random.normal(k1, (IN_DIM, HID_DIM), jnp.float32) * 0.02
          ).astype(jnp.bfloat16)
    b1 = jax.random.normal(k2, (1, HID_DIM), jnp.float32) * 0.01
    w2 = (jax.random.normal(k3, (HID_DIM, HID_DIM), jnp.float32) * 0.02
          ).astype(jnp.bfloat16)
    b2 = jax.random.normal(k4, (1, HID_DIM), jnp.float32) * 0.01
    w3 = jax.random.normal(k5, (1, HID_DIM), jnp.float32) * 0.02
    b3 = jax.random.normal(k6, (1, OUT_DIM), jnp.float32) * 0.01
    return w1, b1, w2, b2, w3, b3


def _reference(x, params):
    """Plain-JAX reference with the same dtype discipline as the kernel."""
    w1, b1, w2, b2, w3, b3 = params
    xb = x.astype(jnp.bfloat16)
    h1 = jnp.maximum(
        jnp.dot(xb, w1, preferred_element_type=jnp.float32) + b1, 0.0)
    h2 = jnp.maximum(
        jnp.dot(h1.astype(jnp.bfloat16), w2,
                preferred_element_type=jnp.float32) + b2, 0.0)
    logits = jnp.sum(h2 * w3, axis=-1, keepdims=True) + b3
    return jax.nn.sigmoid(logits)


if __name__ == "__main__":
    key = jax.random.PRNGKey(0)
    kp, kx1, kx2 = jax.random.split(key, 3)
    params = init_params(kp)

    N = 8  # number of instance-level ROI features per domain
    x_true = jax.random.normal(kx1, (N, IN_DIM), jnp.float32)
    x_virtual = jax.random.normal(kx2, (N, IN_DIM), jnp.float32)

    y_true, y_virtual = instance_da_forward(x_true, x_virtual, params)
    jax.block_until_ready((y_true, y_virtual))

    # Correctness check against a plain-JAX reference (same bf16/f32 recipe).
    rt = _reference(x_true, params)
    rv = _reference(x_virtual, params)
    assert y_true.shape == (N, 1) and y_virtual.shape == (N, 1)
    assert jnp.allclose(y_true, rt, atol=2e-3, rtol=2e-3)
    assert jnp.allclose(y_virtual, rv, atol=2e-3, rtol=2e-3)

    print("KERNEL_OK")
</pallas_src>

<mosaic_0001>
module attributes {stable_mosaic.version = 11 : i64} {
  func.func @_instance_da_kernel(%arg0: i32, %arg1: memref<16x2048xbf16, #tpu.memory_space<vmem>>, %arg2: memref<2048x1024xbf16, #tpu.memory_space<vmem>>, %arg3: memref<1x1024xf32, #tpu.memory_space<vmem>>, %arg4: memref<1024x1024xbf16, #tpu.memory_space<vmem>>, %arg5: memref<1x1024xf32, #tpu.memory_space<vmem>>, %arg6: memref<1x1024xf32, #tpu.memory_space<vmem>>, %arg7: memref<1x1xf32, #tpu.memory_space<vmem>>, %arg8: memref<16x1xf32, #tpu.memory_space<vmem>>, %arg9: memref<16x1024xf32, #tpu.memory_space<vmem>>) attributes {dimension_semantics = [#tpu.dimension_semantics<arbitrary>], iteration_bounds = array<i64: 2>, scalar_prefetch = 0 : i64, scratch_operands = 1 : i64, tpu.core_type = #tpu.core_type<tc>, window_params = [{transform_indices = @transform_0, window_bounds = array<i64: 16, 2048>}, {transform_indices = @transform_1, window_bounds = array<i64: 2048, 1024>}, {pipeline_mode = #tpu.pipeline_mode<synchronous>, transform_indices = @transform_2, window_bounds = array<i64: 1, 1024>}, {pipeline_mode = #tpu.pipeline_mode<synchronous>, transform_indices = @transform_3, window_bounds = array<i64: 1024, 1024>}, {pipeline_mode = #tpu.pipeline_mode<synchronous>, transform_indices = @transform_4, window_bounds = array<i64: 1, 1024>}, {pipeline_mode = #tpu.pipeline_mode<synchronous>, transform_indices = @transform_5, window_bounds = array<i64: 1, 1024>}, {pipeline_mode = #tpu.pipeline_mode<synchronous>, transform_indices = @transform_6, window_bounds = array<i64: 1, 1>}, {pipeline_mode = #tpu.pipeline_mode<synchronous>, transform_indices = @transform_7, window_bounds = array<i64: 16, 1>}]} {
    %c0_i32 = arith.constant 0 : i32
    %0 = arith.cmpi eq, %arg0, %c0_i32 : i32
    %1 = arith.extui %0 : i1 to i32
    %c0_i32_0 = arith.constant 0 : i32
    %2 = arith.cmpi ne, %1, %c0_i32_0 : i32
    scf.if %2 {
      %cst_9 = arith.constant 0.000000e+00 : f32
      %12 = vector.broadcast %cst_9 : f32 to vector<16x1024xf32>
      %c0_10 = arith.constant 0 : index
      %c0_11 = arith.constant 0 : index
      %13 = vector.load %arg9[%c0_10, %c0_11] : memref<16x1024xf32, #tpu.memory_space<vmem>>, vector<16x1024xf32>
      tpu.vector_store %arg9[%c0_10, %c0_11], %12 {strides = array<i32>} : memref<16x1024xf32, #tpu.memory_space<vmem>>, vector<16x1024xf32>,
    } else {
    }
    %c0 = arith.constant 0 : index
    %c0_1 = arith.constant 0 : index
    %3 = vector.load %arg9[%c0, %c0_1] : memref<16x1024xf32, #tpu.memory_space<vmem>>, vector<16x1024xf32>
    %c0_2 = arith.constant 0 : index
    %c0_3 = arith.constant 0 : index
    %4 = vector.load %arg1[%c0_2, %c0_3] : memref<16x2048xbf16, #tpu.memory_space<vmem>>, vector<16x2048xbf16>
    %c0_4 = arith.constant 0 : index
    %c0_5 = arith.constant 0 : index
    %5 = vector.load %arg2[%c0_4, %c0_5] : memref<2048x1024xbf16, #tpu.memory_space<vmem>>, vector<2048x1024xbf16>
    %cst = arith.constant dense<0.000000e+00> : vector<16x1024xf32>
    %6 = tpu.matmul %4, %5, %cst {dimension_numbers = #tpu.dot_dimension_numbers<[1], [0], [0], [1], [0, 0, 1, 1], [], []>} : vector<16x2048xbf16>, vector<2048x1024xbf16>, vector<16x1024xf32> -> vector<16x1024xf32>
    %7 = arith.addf %3, %6 : vector<16x1024xf32>
    %c0_6 = arith.constant 0 : index
    %c0_7 = arith.constant 0 : index
    %8 = vector.load %arg9[%c0_6, %c0_7] : memref<16x1024xf32, #tpu.memory_space<vmem>>, vector<16x1024xf32>
    tpu.vector_store %arg9[%c0_6, %c0_7], %7 {strides = array<i32>} : memref<16x1024xf32, #tpu.memory_space<vmem>>, vector<16x1024xf32>,
    %c1_i32 = arith.constant 1 : i32
    %9 = arith.cmpi eq, %arg0, %c1_i32 : i32
    %10 = arith.extui %9 : i1 to i32
    %c0_i32_8 = arith.constant 0 : i32
    %11 = arith.cmpi ne, %10, %c0_i32_8 : i32
    scf.if %11 {
      %c0_9 = arith.constant 0 : index
      %c0_10 = arith.constant 0 : index
      %12 = vector.load %arg9[%c0_9, %c0_10] : memref<16x1024xf32, #tpu.memory_space<vmem>>, vector<16x1024xf32>
      %c0_11 = arith.constant 0 : index
      %c0_12 = arith.constant 0 : index
      %13 = vector.load %arg3[%c0_11, %c0_12] : memref<1x1024xf32, #tpu.memory_space<vmem>>, vector<1x1024xf32>
      %14 = vector.broadcast %13 : vector<1x1024xf32> to vector<16x1024xf32>
      %15 = arith.addf %12, %14 : vector<16x1024xf32>
      %cst_13 = arith.constant 0.000000e+00 : f32
      %16 = vector.broadcast %cst_13 : f32 to vector<16x1024xf32>
      %17 = arith.maximumf %15, %16 : vector<16x1024xf32>
      %18 = arith.truncf %17 : vector<16x1024xf32> to vector<16x1024xbf16>
      %c0_14 = arith.constant 0 : index
      %c0_15 = arith.constant 0 : index
      %19 = vector.load %arg4[%c0_14, %c0_15] : memref<1024x1024xbf16, #tpu.memory_space<vmem>>, vector<1024x1024xbf16>
      %cst_16 = arith.constant dense<0.000000e+00> : vector<16x1024xf32>
      %20 = tpu.matmul %18, %19, %cst_16 {dimension_numbers = #tpu.dot_dimension_numbers<[1], [0], [0], [1], [0, 0, 1, 1], [], []>} : vector<16x1024xbf16>, vector<1024x1024xbf16>, vector<16x1024xf32> -> vector<16x1024xf32>
      %c0_17 = arith.constant 0 : index
      %c0_18 = arith.constant 0 : index
      %21 = vector.load %arg5[%c0_17, %c0_18] : memref<1x1024xf32, #tpu.memory_space<vmem>>, vector<1x1024xf32>
      %22 = vector.broadcast %21 : vector<1x1024xf32> to vector<16x1024xf32>
      %23 = arith.addf %20, %22 : vector<16x1024xf32>
      %cst_19 = arith.constant 0.000000e+00 : f32
      %24 = vector.broadcast %cst_19 : f32 to vector<16x1024xf32>
      %25 = arith.maximumf %23, %24 : vector<16x1024xf32>
      %c0_20 = arith.constant 0 : index
      %c0_21 = arith.constant 0 : index
      %26 = vector.load %arg6[%c0_20, %c0_21] : memref<1x1024xf32, #tpu.memory_space<vmem>>, vector<1x1024xf32>
      %27 = vector.broadcast %26 : vector<1x1024xf32> to vector<16x1024xf32>
      %28 = arith.mulf %25, %27 : vector<16x1024xf32>
      %cst_22 = arith.constant dense<0.000000e+00> : vector<16xf32>
      %29 = vector.multi_reduction <add>, %28, %cst_22 [1] : vector<16x1024xf32> to vector<16xf32>
      %30 = vector.shape_cast %29 : vector<16xf32> to vector<16x1xf32>
      %c0_23 = arith.constant 0 : index
      %c0_24 = arith.constant 0 : index
      %31 = vector.load %arg7[%c0_23, %c0_24] : memref<1x1xf32, #tpu.memory_space<vmem>>, vector<1x1xf32>
      %32 = vector.broadcast %31 : vector<1x1xf32> to vector<16x1xf32>
      %33 = arith.addf %30, %32 : vector<16x1xf32>
      %34 = arith.negf %33 : vector<16x1xf32>
      %35 = math.exp %34 : vector<16x1xf32>
      %cst_25 = arith.constant 1.000000e+00 : f32
      %36 = vector.broadcast %cst_25 : f32 to vector<16x1xf32>
      %37 = arith.addf %36, %35 : vector<16x1xf32>
      %38 = arith.divf %36, %37 : vector<16x1xf32>
      %c0_26 = arith.constant 0 : index
      %c0_27 = arith.constant 0 : index
      %39 = vector.load %arg8[%c0_26, %c0_27] : memref<16x1xf32, #tpu.memory_space<vmem>>, vector<16x1xf32>
      tpu.vector_store %arg8[%c0_26, %c0_27], %38 {strides = array<i32>} : memref<16x1xf32, #tpu.memory_space<vmem>>, vector<16x1xf32>,
    } else {
    }
    return
  }
  func.func @transform_0(%arg0: i32) -> (i32, i32) {
    %c0_i32 = arith.constant 0 : i32
    %c0_i32_0 = arith.constant 0 : i32
    return %c0_i32, %arg0 : i32, i32
  }
  func.func @transform_1(%arg0: i32) -> (i32, i32) {
    %c0_i32 = arith.constant 0 : i32
    %c0_i32_0 = arith.constant 0 : i32
    return %arg0, %c0_i32 : i32, i32
  }
  func.func @transform_2(%arg0: i32) -> (i32, i32) {
    %c0_i32 = arith.constant 0 : i32
    %c0_i32_0 = arith.constant 0 : i32
    %c0_i32_1 = arith.constant 0 : i32
    return %c0_i32, %c0_i32_0 : i32, i32
  }
  func.func @transform_3(%arg0: i32) -> (i32, i32) {
    %c0_i32 = arith.constant 0 : i32
    %c0_i32_0 = arith.constant 0 : i32
    %c0_i32_1 = arith.constant 0 : i32
    return %c0_i32, %c0_i32_0 : i32, i32
  }
  func.func @transform_4(%arg0: i32) -> (i32, i32) {
    %c0_i32 = arith.constant 0 : i32
    %c0_i32_0 = arith.constant 0 : i32
    %c0_i32_1 = arith.constant 0 : i32
    return %c0_i32, %c0_i32_0 : i32, i32
  }
  func.func @transform_5(%arg0: i32) -> (i32, i32) {
    %c0_i32 = arith.constant 0 : i32
    %c0_i32_0 = arith.constant 0 : i32
    %c0_i32_1 = arith.constant 0 : i32
    return %c0_i32, %c0_i32_0 : i32, i32
  }
  func.func @transform_6(%arg0: i32) -> (i32, i32) {
    %c0_i32 = arith.constant 0 : i32
    %c0_i32_0 = arith.constant 0 : i32
    %c0_i32_1 = arith.constant 0 : i32
    return %c0_i32, %c0_i32_0 : i32, i32
  }
  func.func @transform_7(%arg0: i32) -> (i32, i32) {
    %c0_i32 = arith.constant 0 : i32
    %c0_i32_0 = arith.constant 0 : i32
    %c0_i32_1 = arith.constant 0 : i32
    return %c0_i32, %c0_i32_0 : i32, i32
  }
}

</mosaic_0001>

<bundles_post_ra>
// kernel: _instance_da_call.1
= control target key start
LH: loop header
LB: loop body
LE: loop exit
PB: predicated region body
PF: predicated region fallthrough
CT: control target
= control target key end

     0   :  { %s15962_s0 = inlined_call_operand.hbm [shape: bf16[16,4096], index: 0, kind: input, shape index: {}]   ;;  %s15963_s1 = inlined_call_operand.hbm [shape: bf16[4096,1024], index: 1, kind: input, shape index: {}]   ;;  %s15964_s2 = inlined_call_operand.hbm [shape: f32[1,1024], index: 2, kind: input, shape index: {}]   ;;  %s15965_s3 = inlined_call_operand.hbm [shape: bf16[1024,1024], index: 3, kind: input, shape index: {}]   ;;  %s15966_s4 = inlined_call_operand.hbm [shape: f32[1,1024], index: 4, kind: input, shape index: {}]   ;;  %s15967_s5 = inlined_call_operand.hbm [shape: f32[1,1024], index: 5, kind: input, shape index: {}]   ;;  %s15968_s6 = inlined_call_operand.<no memory space> [shape: f32[1,1], index: 6, kind: input, shape index: {}]   ;;  %s15969_s7 = inlined_call_operand.vmem [shape: f32[16,1], index: 7, kind: output, shape index: {}]  }
   0x1   :  { %15975 = sst [smem:[#allocation19_spill]] %s15962_s0  ;;  %v12_v0 = vstv %s15968_s6 }
   0x2   :  { %15976 = sst [smem:[#allocation20_spill]] %s15964_s2  ;;  %13 = vst [vmem:[#allocation3] sm:$0x1] %v12_v0 }
   0x3   :  { %14 = vsyncpa [#allocation5], 0 }
   0x4   :  { %16 = vsyncpa [#allocation5 + $0x1], 0 }
   0x5   :  { %17 = vsyncpa [#allocation7], 0 }
   0x6   :  { %19 = vsyncpa [#allocation7 + $0x1], 0 }
   0x7   :  { %20 = vsyncpa [#allocation10], 0 }
   0x8   :  { %21 = vsyncpa [#allocation13], 0  ;;  %s14323_s26 = smov 0   ;;  %s14325_s27 = smov 0  }
   0x9   :  { %s14327_s28 = smov 0   ;;  %s14329_s29 = smov 0  }
   0xa LB: > { %s14342_s6 = sadd.s32 4294967295, %s14266_s29   ;;  %p47_p0 = scmp.ne.s32.totalorder %s14258_s27, %s14254_s26  ;;  %s14266_s29 = sphi %s14329_s29, %s15998_s29   ;;  %s14262_s28 = sphi %s14327_s28, %s15997_s28   ;;  %s14258_s27 = sphi %s14325_s27, %s15996_s27   ;;  %s14254_s26 = sphi %s14323_s26, %s15995_s26  }
   0xb   : > { %p15970_p1 = scmp.eq.s32.totalorder %s14342_s6, 0  ;;  %p12186_p2 = scmp.ge.s32.totalorder %s14266_s29, 1 }
   0xc   : > { %p210_p3 = scmp.lt.s32.totalorder %s14266_s29, 3  ;;  %s14268_s9 = smov [#allocation8]  }
   0xd   : > { %p14351_p5 = por %p15970_p1, %p47_p0  ;;  %s223_s10 = sshll.u32 %s14268_s9, 4  ;;  %s224_s10 = int_to_ptr.vmem [resolvable:$true] %s223_s10 }
   0xe   : > { %p14355_p6 = pnand %p12186_p2, %p210_p3  ;;  %s14269_s11 = smov [#allocation9]  }
   0xf   : > { %s15977_s30 = scalar_select %p14351_p5, 1, 0 }
  0x10   : > { %s15978_s8 = scalar_select %p14355_p6, 1, 0 }
  0x11   : > { %p13964_p7 = pneg %p14355_p6  ;;  %s233_s12 = sshll.u32 %s14269_s11, 4  ;;  %s14367_s12 = int_to_ptr.vmem [resolvable:$true] %s233_s12 }
  0x12   : > { %s14270_s14 = smov [#allocation11]   ;;  %s15980_s2 = sld [smem:[#allocation20_spill]] }
  0x13   : > { %p14363_p8 = pnand %p13964_p7, %p15970_p1  ;;  %s14369_s15 = sshll.u32 %s14270_s14, 4  ;;  %s248_s15 = int_to_ptr.vmem [resolvable:$true] %s14369_s15 }
  0x15   : > { %p14379_p10 = pneg %p14363_p8 }
  0x18   : > { %s14044_s18 = scalar_lea.hbm %s15980_s2, 128 }
  0x19   : > { %p14045_p9 = scmp.ne.s32.totalorder %s15980_s2, %s14044_s18  ;;  %p14051_p13 = scmp.lt.u32.totalorder %s14044_s18, %s15980_s2 }
  0x1b   : > { %p14047_p11 = pnand %p14379_p10, %p14045_p9 }
  0x1d   : > { %p14048_p12 = pneg %p14047_p11 }
  0x1f   : > { %p14053_p0 = pnand %p14051_p13, %p14048_p12 }
  0x21   : > { %14056 = shalt.err (!%p14053_p0)
}
  0x22   : > { %s14057_s24 = scalar_lea.vmem %s224_s10, 128  ;;  %p14065_p4 = scmp.lt.s32.totalorder %s224_s10, %s224_s10 }
  0x23   : > { %p14058_p2 = scmp.ne.s32.totalorder %s224_s10, %s14057_s24  ;;  %p14066_p1 = scmp.lt.s32.totalorder %s14057_s24, %s14057_s24 }
  0x25   : > { %p14060_p3 = pnand %p14058_p2, %p14379_p10  ;;  %p14067_p5 = por %p14066_p1, %p14065_p4 }
  0x27   : > { %p14061_p7 = pneg %p14060_p3 }
  0x29   : > { %p14068_p6 = pnand %p14067_p5, %p14061_p7 }
  0x2b   : > { %14071 = shalt.err (!%p14068_p6)
}
  0x2c   : > { %13967 = dma.hbm_to_vmem [thread:$0]  (!%p14363_p8), %s15980_s2, 128, %s224_s10, [#allocation7]  }
  0x2d   : > { %s14072_s14 = scalar_lea.hbm %s15965_s3, 65536 }
  0x2e   : > { %p14073_p9 = scmp.ne.s32.totalorder %s15965_s3, %s14072_s14  ;;  %p14079_p4 = scmp.lt.u32.totalorder %s14072_s14, %s15965_s3 }
  0x30   : > { %p14075_p11 = pnand %p14073_p9, %p14379_p10 }
  0x32   : > { %p14076_p1 = pneg %p14075_p11 }
  0x34   : > { %p14081_p5 = pnand %p14079_p4, %p14076_p1 }
  0x36   : > { %14084 = shalt.err (!%p14081_p5)
}
  0x37   : > { %s14085_s10 = scalar_lea.vmem %s14367_s12, 65536  ;;  %p14093_p0 = scmp.lt.s32.totalorder %s14367_s12, %s14367_s12 }
  0x38   : > { %p14086_p6 = scmp.ne.s32.totalorder %s14367_s12, %s14085_s10  ;;  %p14094_p2 = scmp.lt.s32.totalorder %s14085_s10, %s14085_s10 }
  0x3a   : > { %p14088_p12 = pnand %p14086_p6, %p14379_p10  ;;  %p14095_p3 = por %p14094_p2, %p14093_p0 }
  0x3c   : > { %p14089_p13 = pneg %p14088_p12 }
  0x3e   : > { %p14096_p7 = pnand %p14095_p3, %p14089_p13 }
  0x40   : > { %14099 = shalt.err (!%p14096_p7)
}
  0x41   : > { %s15973_s20 = smov 512   ;;  %s15974_s22 = smov 32  }
  0x42   : > { %13970 = dma.hbm_to_vmem [thread:$0]  (!%p14363_p8), %s15965_s3, 65536, %s14367_s12, [#allocation10], %s15973_s20, %s15973_s20, %s15974_s22  }
  0x43   : > { %s14100_s9 = scalar_lea.hbm %s15966_s4, 128 }
  0x44   : > { %p14101_p9 = scmp.ne.s32.totalorder %s15966_s4, %s14100_s9  ;;  %p14107_p4 = scmp.lt.u32.totalorder %s14100_s9, %s15966_s4 }
  0x46   : > { %p14103_p11 = pnand %p14101_p9, %p14379_p10 }
  0x48   : > { %p14104_p1 = pneg %p14103_p11 }
  0x4a   : > { %p14109_p5 = pnand %p14107_p4, %p14104_p1 }
  0x4c   : > { %14112 = shalt.err (!%p14109_p5)
}
  0x4d   : > { %s14113_s18 = scalar_lea.vmem %s248_s15, 128  ;;  %p14121_p0 = scmp.lt.s32.totalorder %s248_s15, %s248_s15 }
  0x4e   : > { %p14114_p6 = scmp.ne.s32.totalorder %s248_s15, %s14113_s18  ;;  %p14122_p2 = scmp.lt.s32.totalorder %s14113_s18, %s14113_s18 }
  0x50   : > { %p14116_p12 = pnand %p14114_p6, %p14379_p10  ;;  %p14123_p3 = por %p14122_p2, %p14121_p0 }
  0x52   : > { %p14117_p13 = pneg %p14116_p12 }
  0x54   : > { %p14124_p7 = pnand %p14123_p3, %p14117_p13 }
  0x56   : > { %14127 = shalt.err (!%p14124_p7)
}
  0x57   : > { %13973 = dma.hbm_to_vmem [thread:$0]  (!%p14363_p8), %s15966_s4, 128, %s248_s15, [#allocation10]  }
  0x58   : > { %s14273_s10 = smov [#allocation12]   ;;  %s14128_s26 = scalar_lea.hbm %s15967_s5, 128 }
  0x59   : > { %s258_s23 = sshll.u32 %s14273_s10, 4  ;;  %p14129_p9 = scmp.ne.s32.totalorder %s15967_s5, %s14128_s26  ;;  %s259_s23 = int_to_ptr.vmem [resolvable:$true] %s258_s23 }
  0x5a   : > { %p14135_p4 = scmp.lt.u32.totalorder %s14128_s26, %s15967_s5 }
  0x5b   : > { %p14131_p11 = pnand %p14129_p9, %p14379_p10 }
  0x5d   : > { %p14132_p1 = pneg %p14131_p11 }
  0x5f   : > { %p14137_p5 = pnand %p14135_p4, %p14132_p1 }
  0x61   : > { %14140 = shalt.err (!%p14137_p5)
}
  0x62   : > { %s14141_s15 = scalar_lea.vmem %s259_s23, 128  ;;  %p14149_p0 = scmp.lt.s32.totalorder %s259_s23, %s259_s23 }
  0x63   : > { %p14142_p6 = scmp.ne.s32.totalorder %s259_s23, %s14141_s15  ;;  %p14150_p2 = scmp.lt.s32.totalorder %s14141_s15, %s14141_s15 }
  0x65   : > { %p14144_p12 = pnand %p14142_p6, %p14379_p10  ;;  %p14151_p3 = por %p14150_p2, %p14149_p0 }
  0x67   : > { %p14145_p13 = pneg %p14144_p12 }
  0x69   : > { %p14152_p7 = pnand %p14151_p3, %p14145_p13 }
  0x6b   : > { %14155 = shalt.err (!%p14152_p7)
}
  0x6c   : > { %13976 = dma.hbm_to_vmem [thread:$0]  (!%p14363_p8), %s15967_s5, 128, %s259_s23, [#allocation13]  }
  0x6d   : > { %s14459_s21 = sadd.s32 1, %s14266_s29   ;;  %s34_s12 = sadd.s32 1, %s14262_s28 }
  0x6e   : > { %s31_s13 = ssub.s32 %s14266_s29, %s14459_s21  ;;  %p41_p10 = scmp.ne.s32.totalorder %s14262_s28, %s14258_s27 }
  0x6f   : > { %p32_p9 = scmp.eq.s32.totalorder %s31_s13, 0  ;;  %p42_p11 = scmp.eq.s32.totalorder %s14266_s29, 0 }
  0x70   : > { %p13988_p1 = scmp.lt.s32.totalorder %s14266_s29, 2  ;;  %s14469_s19 = sand.u32 1, %s14262_s28  }
  0x71   : > { %s14472_s10 = scalar_select %p32_p9, %s14262_s28, %s34_s12  }
  0x72   : > { %p43_p4 = por %p42_p11, %p41_p10  ;;  %s12192_s24 = sshll.u32 %s14469_s19, 7 }
  0x73   : > { %s13765_s25 = sshll.u32 %s14266_s29, 10  ;;  %s15982_s0 = sld [smem:[#allocation19_spill]] }
  0x74   : > { %s276_s11 = scalar_lea.vmem [#allocation4], %s12192_s24  ;;  %p14481_p8 = pnand %p13988_p1, %p43_p4 }
  0x75   : > { %s283_s14 = sshll.u32 %s276_s11, 4  ;;  %s293_s15 = sand.u32 1, %s14266_s29   ;;  %s14485_s14 = int_to_ptr.vmem [resolvable:$true] %s283_s14 }
  0x76   : > { %s273_s17 = scalar_lea.sflag [#allocation5], %s14469_s19  ;;  %p14158_p6 = pneg %p14481_p8 }
  0x79   : > { %s14479_s9 = scalar_lea.hbm %s15982_s0, %s13765_s25  ;;  %s14161_s24 = scalar_lea.hbm %s15982_s0, 4096 }
  0x7a   : > { %s14156_s18 = scalar_lea.hbm %s14479_s9, 2048  ;;  %p14162_p0 = scmp.lt.u32.totalorder %s14479_s9, %s15982_s0 }
  0x7b   : > { %p14157_p5 = scmp.ne.s32.totalorder %s14479_s9, %s14156_s18  ;;  %p14163_p2 = scmp.lt.u32.totalorder %s14161_s24, %s14156_s18 }
  0x7c   : > { %p14165_p7 = scmp.lt.u32.totalorder %s14156_s18, %s14479_s9 }
  0x7d   : > { %p14159_p12 = pnand %p14158_p6, %p14157_p5  ;;  %p14164_p3 = por %p14163_p2, %p14162_p0 }
  0x7f   : > { %p14160_p13 = pneg %p14159_p12  ;;  %p14166_p10 = por %p14165_p7, %p14164_p3 }
  0x81   : > { %p14167_p9 = pnand %p14166_p10, %p14160_p13 }
  0x83   : > { %14170 = shalt.err (!%p14167_p9)
}
  0x84   : > { %s14171_s26 = scalar_lea.vmem %s14485_s14, 2048  ;;  %s14274_s11 = smov [#allocation4]  }
  0x85   : > { %p14172_p11 = scmp.ne.s32.totalorder %s14485_s14, %s14171_s26  ;;  %s14176_s12 = sshll.u32 %s14274_s11, 4  ;;  %s14177_s12 = int_to_ptr.vmem [resolvable:$false] %s14176_s12 }
  0x86   : > { %s14178_s13 = scalar_lea.vmem %s14177_s12, 4096  ;;  %p14179_p5 = scmp.lt.s32.totalorder %s14485_s14, %s14177_s12 }
  0x87   : > { %p14174_p1 = pnand %p14172_p11, %p14158_p6  ;;  %p14180_p12 = scmp.lt.s32.totalorder %s14178_s13, %s14171_s26 }
  0x89   : > { %p14175_p4 = pneg %p14174_p1  ;;  %p14181_p0 = por %p14180_p12, %p14179_p5 }
  0x8b   : > { %p14182_p2 = pnand %p14181_p0, %p14175_p4 }
  0x8d   : > { %14185 = shalt.err (!%p14182_p2)
}
  0x8e   : > { %s14275_s18 = smov 2048   ;;  %s14276_s24 = smov 1024  }
  0x8f   : > { %s14277_s25 = smov 64   ;;  %s12195_s23 = sshll.u32 %s14469_s19, 13 }
  0x90   : > { %13980 = dma.hbm_to_vmem [thread:$0]  (!%p14481_p8), %s14479_s9, 2048, %s14485_s14, %s273_s17, %s14275_s18, %s14276_s24, %s14277_s25  }
  0x91   : > { %s13767_s11 = sshll.u32 %s14266_s29, 17  ;;  %s297_s20 = scalar_lea.vmem [#allocation6], %s12195_s23 }
  0x92   : > { %s14521_s13 = scalar_lea.hbm %s15963_s1, %s13767_s11  ;;  %s305_s22 = sshll.u32 %s297_s20, 4  ;;  %s14523_s22 = int_to_ptr.vmem [resolvable:$true] %s305_s22 }
  0x93   : > { %s14527_s0 = scalar_lea.sflag [#allocation7], %s293_s15  ;;  %s14186_s2 = scalar_lea.hbm %s14521_s13, 131072 }
  0x94   : > { %p14187_p13 = scmp.ne.s32.totalorder %s14521_s13, %s14186_s2  ;;  %s14191_s14 = scalar_lea.hbm %s15963_s1, 262144 }
  0x95   : > { %p14192_p10 = scmp.lt.u32.totalorder %s14521_s13, %s15963_s1  ;;  %p14193_p9 = scmp.lt.u32.totalorder %s14191_s14, %s14186_s2 }
  0x96   : > { %p14189_p3 = pnand %p14187_p13, %p14158_p6  ;;  %p14195_p1 = scmp.lt.u32.totalorder %s14186_s2, %s14521_s13 }
  0x97   : > { %p14194_p11 = por %p14193_p9, %p14192_p10 }
  0x98   : > { %p14190_p7 = pneg %p14189_p3 }
  0x99   : > { %p14196_p4 = por %p14195_p1, %p14194_p11 }
  0x9b   : > { %p14197_p5 = pnand %p14196_p4, %p14190_p7 }
  0x9d   : > { %14200 = shalt.err (!%p14197_p5)
}
  0x9e   : > { %s14201_s29 = scalar_lea.vmem %s14523_s22, 131072  ;;  %s14278_s20 = smov [#allocation6]  }
  0x9f   : > { %p14202_p12 = scmp.ne.s32.totalorder %s14523_s22, %s14201_s29  ;;  %s14206_s15 = sshll.u32 %s14278_s20, 4  ;;  %s14207_s15 = int_to_ptr.vmem [resolvable:$false] %s14206_s15 }
  0xa0   : > { %s14208_s24 = scalar_lea.vmem %s14207_s15, 262144  ;;  %p14209_p13 = scmp.lt.s32.totalorder %s14523_s22, %s14207_s15 }
  0xa1   : > { %p14204_p0 = pnand %p14202_p12, %p14158_p6  ;;  %p14210_p3 = scmp.lt.s32.totalorder %s14208_s24, %s14201_s29 }
  0xa3   : > { %p14205_p2 = pneg %p14204_p0  ;;  %p14211_p10 = por %p14210_p3, %p14209_p13 }
  0xa5   : > { %p14212_p9 = pnand %p14211_p10, %p14205_p2 }
  0xa7   : > { %14215 = shalt.err (!%p14212_p9)
}
  0xa8   : > { %s15984_s2 = smov 32   ;;  %s15985_s25 = smov 512  }
  0xa9   : > { %13983 = dma.hbm_to_vmem [thread:$0]  (!%p14481_p8), %s14521_s13, 131072, %s14523_s22, %s14527_s0, %s15985_s25, %s15985_s25, %s15984_s2  }
  0xaa   : > { %p15986_p6 = scmp.ne.s32.totalorder %s15978_s8, 0 }
  0xab   : > { %s319_s23 = sand.u32 (!%p15986_p6), 1, %s14258_s27   ;;  %p15987_p7 = scmp.ne.s32.totalorder (!%p15986_p6), %s15977_s30, 0 }
  0xac   : > { %317 = sbr.rel (%p15986_p6) target bundleno = 2343 (0x927), region = 48  ;;  %s12200_s11 = sshll.u32 (!%p15986_p6), %s319_s23, 7 }
  0xad   : > { %s320_s26 = scalar_lea.sflag (!%p15986_p6), [#allocation5], %s319_s23  ;;  %s14559_s12 = scalar_lea.vmem (!%p15986_p6), [#allocation4], %s12200_s11 }
  0xb3   : > { %14233 = dma.done.wait (%p15987_p7), %s320_s26, 2048  }
  0xb4   : > { %14235 = vsyncadd (%p15987_p7), %s320_s26, 4294965248  ;;  %s328_s16 = sand.u32 1, %s14342_s6   ;;  %s12201_s19 = sshll.u32 %s319_s23, 13 }
  0xb5   : > { %s329_s0 = scalar_lea.sflag [#allocation7], %s328_s16  ;;  %s14566_s22 = scalar_lea.vmem [#allocation6], %s12201_s19 }
  0xb6   : > { %14237 = dma.done.wait (%p15987_p7), %s329_s0, 131072  }
  0xb7   : > { %14239 = vsyncadd (%p15987_p7), %s329_s0, 4294836224  ;;  %p15988_p8 = scmp.eq.s32.totalorder %s14342_s6, 0 }
  0xb9   : > { %14241 = dma.done.wait (%p15988_p8), [#allocation7], 128   ;;  %p15989_p11 = pmov %p15988_p8 }
  0xba   : > { %p15990_p1 = pmov %p15988_p8 }
  0xbb   : > { %14243 = vsyncadd (%p15989_p11), [#allocation7], 4294967168 }
  0xbc   : > { %14245 = dma.done.wait (%p15990_p1), [#allocation10], 65664   ;;  %p15991_p4 = pmov %p15990_p1 }
  0xbd   : > { %p15992_p5 = pmov %p15990_p1 }
  0xbe   : > { %14247 = vsyncadd (%p15991_p4), [#allocation10], 4294901632 }
  0xbf   : > { %14249 = dma.done.wait (%p15992_p5), [#allocation13], 128   ;;  %p15993_p12 = pmov %p15990_p1 }
  0xc0   : > { %p15994_p0 = scmp.ne.s32.totalorder %s14342_s6, 0 }
  0xc1   : > { %14251 = vsyncadd (%p15993_p12), [#allocation13], 4294967168  ;;  %v14279_v1 = vmov (!%p15994_p0), 0.0  }
  0xc2   : > { %384 = sbr.rel (%p15994_p0) target bundleno = 202 (0xca), region = 76  ;;  %385 = vst [vmem:[#allocation2] sm:$0xff] (!%p15994_p0), %v14279_v1  ;;  %386 = vst [vmem:[#allocation2 + $0x8] sm:$0xff] (!%p15994_p0), %v14279_v1 }
  0xc3   : > { %387 = vst [vmem:[#allocation2 + $0x10] sm:$0xff] (!%p15994_p0), %v14279_v1  ;;  %388 = vst [vmem:[#allocation2 + $0x18] sm:$0xff] (!%p15994_p0), %v14279_v1 }
  0xc4   : > { %389 = vst [vmem:[#allocation2 + $0x20] sm:$0xff] (!%p15994_p0), %v14279_v1  ;;  %390 = vst [vmem:[#allocation2 + $0x28] sm:$0xff] (!%p15994_p0), %v14279_v1 }
  0xc5   : > { %391 = vst [vmem:[#allocation2 + $0x30] sm:$0xff] (!%p15994_p0), %v14279_v1  ;;  %392 = vst [vmem:[#allocation2 + $0x38] sm:$0xff] (!%p15994_p0), %v14279_v1 }
  0xc6   : > { %393 = vst [vmem:[#allocation2 + $0x40] sm:$0xff] (!%p15994_p0), %v14279_v1  ;;  %394 = vst [vmem:[#allocation2 + $0x48] sm:$0xff] (!%p15994_p0), %v14279_v1 }
  0xc7   : > { %395 = vst [vmem:[#allocation2 + $0x50] sm:$0xff] (!%p15994_p0), %v14279_v1  ;;  %396 = vst [vmem:[#allocation2 + $0x58] sm:$0xff] (!%p15994_p0), %v14279_v1 }
  0xc8   : > { %397 = vst [vmem:[#allocation2 + $0x60] sm:$0xff] (!%p15994_p0), %v14279_v1  ;;  %398 = vst [vmem:[#allocation2 + $0x68] sm:$0xff] (!%p15994_p0), %v14279_v1 }
  0xc9   : > { %399 = vst [vmem:[#allocation2 + $0x70] sm:$0xff] %v14279_v1  ;;  %400 = vst [vmem:[#allocation2 + $0x78] sm:$0xff] %v14279_v1 }
  0xca PF: > { %v433_v2 = vld [vmem:[%s14566_s22] sm:$0xff]  ;;  %v434_v4 = vld [vmem:[%s14566_s22 + $0x8] sm:$0xff]  ;;  %p13247_p2 = scmp.ne.s32.totalorder %s14342_s6, 1 }
  0xcb   : > { %v437_v3 = vld [vmem:[%s14566_s22 + $0x20] sm:$0xff]  ;;  %v438_v6 = vld [vmem:[%s14566_s22 + $0x28] sm:$0xff]  ;;  %vm12082_vm0 = vcmask (!%p13247_p2), 7168  }
  0xcc   : > { %v12224_v5 = vcombine.high %v433_v2, %v437_v3  ;;  %v12223_v7 = vcombine.low %v433_v2, %v437_v3  ;;  %v441_v8 = vld [vmem:[%s14566_s22 + $0x40] sm:$0xff]  ;;  %v12226_v10 = vcombine.high %v434_v4, %v438_v6  ;;  %v12225_v11 = vcombine.low %v434_v4, %v438_v6  ;;  %v442_v13 = vld [vmem:[%s14566_s22 + $0x48] sm:$0xff] }
  0xcd   : > { %v445_v9 = vld [vmem:[%s14566_s22 + $0x60] sm:$0xff]  ;;  %v446_v14 = vld [vmem:[%s14566_s22 + $0x68] sm:$0xff] }
  0xce   : > { %v12232_v12 = vcombine.high %v441_v8, %v445_v9  ;;  %v449_v15 = vld [vmem:[%s14566_s22 + $0x80] sm:$0xff]  ;;  %6657 = vmatprep.subr.bf16.mxu0 %v12224_v5  ;;  %v12234_v16 = vcombine.high %v442_v13, %v446_v14  ;;  %v450_v18 = vld [vmem:[%s14566_s22 + $0x88] sm:$0xff]  ;;  %7001 = vmatprep.subr.bf16.mxu1 %v12226_v10  ;;  %v12231_v20 = vcombine.low %v441_v8, %v445_v9 }
  0xcf   : > { %v453_v17 = vld [vmem:[%s14566_s22 + $0xa0] sm:$0xff]  ;;  %v454_v19 = vld [vmem:[%s14566_s22 + $0xa8] sm:$0xff]  ;;  %6658 = vmatpush1.bf16.msra.mxu0 %v12223_v7  ;;  %7002 = vmatpush1.bf16.msra.mxu1 %v12225_v11  ;;  %v12233_v21 = vcombine.low %v442_v13, %v446_v14 }
  0xd0   : > { %6659 = vmatprep.subr.bf16.mxu0 %v12232_v12  ;;  %v12240_v22 = vcombine.high %v449_v15, %v453_v17  ;;  %7003 = vmatprep.subr.bf16.mxu1 %v12234_v16  ;;  %v12242_v23 = vcombine.high %v450_v18, %v454_v19  ;;  %v457_v24 = vld [vmem:[%s14566_s22 + $0xc0] sm:$0xff]  ;;  %v458_v26 = vld [vmem:[%s14566_s22 + $0xc8] sm:$0xff]  ;;  %v12239_v28 = vcombine.low %v449_v15, %v453_v17 }
  0xd1   : > { %v461_v25 = vld [vmem:[%s14566_s22 + $0xe0] sm:$0xff]  ;;  %v462_v27 = vld [vmem:[%s14566_s22 + $0xe8] sm:$0xff]  ;;  %v12241_v29 = vcombine.low %v450_v18, %v454_v19 }
  0xd2   : > { %v12248_v30 = vcombine.high %v457_v24, %v461_v25  ;;  %v12250_v31 = vcombine.high %v458_v26, %v462_v27  ;;  %v465_v32 = vld [vmem:[%s14566_s22 + $0x100] sm:$0xff]  ;;  %v466_v34 = vld [vmem:[%s14566_s22 + $0x108] sm:$0xff]  ;;  %v12247_v36 = vcombine.low %v457_v24, %v461_v25  ;;  %v12249_v37 = vcombine.low %v458_v26, %v462_v27 }
  0xd3   : > { %6660 = vmatpush1.bf16.msra.mxu0 %v12231_v20  ;;  %7004 = vmatpush1.bf16.msra.mxu1 %v12233_v21  ;;  %v469_v33 = vld [vmem:[%s14566_s22 + $0x120] sm:$0xff]  ;;  %v470_v35 = vld [vmem:[%s14566_s22 + $0x128] sm:$0xff] }
  0xd4   : > { %6661 = vmatprep.subr.bf16.mxu0 %v12240_v22  ;;  %7005 = vmatprep.subr.bf16.mxu1 %v12242_v23  ;;  %v12256_v38 = vcombine.high %v465_v32, %v469_v33  ;;  %v12258_v39 = vcombine.high %v466_v34, %v470_v35  ;;  %v473_v40 = vld [vmem:[%s14566_s22 + $0x140] sm:$0xff]  ;;  %v474_v42 = vld [vmem:[%s14566_s22 + $0x148] sm:$0xff]  ;;  %v12255_v44 = vcombine.low %v465_v32, %v469_v33 }
  0xd5   : > { %v477_v41 = vld [vmem:[%s14566_s22 + $0x160] sm:$0xff]  ;;  %v478_v43 = vld [vmem:[%s14566_s22 + $0x168] sm:$0xff]  ;;  %v12257_v45 = vcombine.low %v466_v34, %v470_v35 }
  0xd6   : > { %v12264_v46 = vcombine.high %v473_v40, %v477_v41  ;;  %v12266_v47 = vcombine.high %v474_v42, %v478_v43  ;;  %v481_v48 = vld [vmem:[%s14566_s22 + $0x180] sm:$0xff]  ;;  %v482_v50 = vld [vmem:[%s14566_s22 + $0x188] sm:$0xff]  ;;  %v12263_v52 = vcombine.low %v473_v40, %v477_v41  ;;  %v12265_v53 = vcombine.low %v474_v42, %v478_v43 }
  0xd7   : > { %6662 = vmatpush1.bf16.msra.mxu0 %v12239_v28  ;;  %7006 = vmatpush1.bf16.msra.mxu1 %v12241_v29  ;;  %v485_v49 = vld [vmem:[%s14566_s22 + $0x1a0] sm:$0xff]  ;;  %v486_v51 = vld [vmem:[%s14566_s22 + $0x1a8] sm:$0xff] }
  0xd8   : > { %6663 = vmatprep.subr.bf16.mxu0 %v12248_v30  ;;  %7007 = vmatprep.subr.bf16.mxu1 %v12250_v31  ;;  %v12272_v54 = vcombine.high %v481_v48, %v485_v49  ;;  %v14615_v55 = vld [vmem:[%s14559_s12] sm:$0xff]  ;;  %v12274_v57 = vcombine.high %v482_v50, %v486_v51  ;;  %v490_v61 = vld [vmem:[%s14566_s22 + $0x1c8] sm:$0xff]  ;;  %v12271_v63 = vcombine.low %v481_v48, %v485_v49 }
  0xd9   : > { %v14618_v56 = vld [vmem:[%s14559_s12 + $0x40] sm:$0xff]  ;;  %v494_v62 = vld [vmem:[%s14566_s22 + $0x1e8] sm:$0xff]  ;;  %v12273_v0 = vcombine.low %v482_v50, %v486_v51 }
  0xda   : > { %v489_v58 = vld [vmem:[%s14566_s22 + $0x1c0] sm:$0xff]  ;;  %v14624_v60 = vcombine.high %v14615_v55, %v14618_v56  ;;  %v12282_v2 = vcombine.high %v490_v61, %v494_v62  ;;  %v498_v5 = vld [vmem:[%s14566_s22 + $0x208] sm:$0xff]  ;;  %v12281_v8 = vcombine.low %v490_v61, %v494_v62 }
  0xdb   : > { %6664 = vmatpush1.bf16.msra.mxu0 %v12247_v36  ;;  %7008 = vmatpush1.bf16.msra.mxu1 %v12249_v37  ;;  %v493_v59 = vld [vmem:[%s14566_s22 + $0x1e0] sm:$0xff]  ;;  %v502_v6 = vld [vmem:[%s14566_s22 + $0x228] sm:$0xff] }
  0xdc   : > { %6665 = vmatprep.subr.bf16.mxu0 %v12256_v38  ;;  %7009 = vmatprep.subr.bf16.mxu1 %v12258_v39  ;;  %v12280_v1 = vcombine.high %v489_v58, %v493_v59  ;;  %v497_v3 = vld [vmem:[%s14566_s22 + $0x200] sm:$0xff]  ;;  %v12279_v7 = vcombine.low %v489_v58, %v493_v59  ;;  %v12290_v10 = vcombine.high %v498_v5, %v502_v6  ;;  %v506_v13 = vld [vmem:[%s14566_s22 + $0x248] sm:$0xff] }
  0xdd   : > { %6689 = vmatprep.mubr.bf16.mxu0 %v14624_v60  ;;  %v501_v4 = vld [vmem:[%s14566_s22 + $0x220] sm:$0xff]  ;;  %7033 = vmatprep.mubr.bf16.mxu1 %v14624_v60  ;;  %v510_v14 = vld [vmem:[%s14566_s22 + $0x268] sm:$0xff]  ;;  %v12289_v16 = vcombine.low %v498_v5, %v502_v6 }
  0xde   : > { %v12288_v9 = vcombine.high %v497_v3, %v501_v4  ;;  %v505_v11 = vld [vmem:[%s14566_s22 + $0x240] sm:$0xff]  ;;  %v12287_v15 = vcombine.low %v497_v3, %v501_v4  ;;  %v12298_v18 = vcombine.high %v506_v13, %v510_v14  ;;  %v514_v21 = vld [vmem:[%s14566_s22 + $0x288] sm:$0xff]  ;;  %v12297_v24 = vcombine.low %v506_v13, %v510_v14 }
  0xdf   : > { %6666 = vmatpush1.bf16.msra.mxu0 %v12255_v44  ;;  %7010 = vmatpush1.bf16.msra.mxu1 %v12257_v45  ;;  %v509_v12 = vld [vmem:[%s14566_s22 + $0x260] sm:$0xff]  ;;  %v518_v22 = vld [vmem:[%s14566_s22 + $0x2a8] sm:$0xff] }
  0xe0   : > { %6667 = vmatprep.subr.bf16.mxu0 %v12264_v46  ;;  %7011 = vmatprep.subr.bf16.mxu1 %v12266_v47  ;;  %v12296_v17 = vcombine.high %v505_v11, %v509_v12  ;;  %v513_v19 = vld [vmem:[%s14566_s22 + $0x280] sm:$0xff]  ;;  %v12295_v23 = vcombine.low %v505_v11, %v509_v12  ;;  %v12306_v26 = vcombine.high %v514_v21, %v518_v22  ;;  %v522_v29 = vld [vmem:[%s14566_s22 + $0x2c8] sm:$0xff] }
  0xe1   : > { %v517_v20 = vld [vmem:[%s14566_s22 + $0x2a0] sm:$0xff]  ;;  %v526_v30 = vld [vmem:[%s14566_s22 + $0x2e8] sm:$0xff]  ;;  %v12305_v32 = vcombine.low %v514_v21, %v518_v22 }
  0xe2   : > { %v12304_v25 = vcombine.high %v513_v19, %v517_v20  ;;  %v521_v27 = vld [vmem:[%s14566_s22 + $0x2c0] sm:$0xff]  ;;  %v12303_v31 = vcombine.low %v513_v19, %v517_v20  ;;  %v12314_v34 = vcombine.high %v522_v29, %v526_v30  ;;  %v530_v37 = vld [vmem:[%s14566_s22 + $0x308] sm:$0xff]  ;;  %v12313_v40 = vcombine.low %v522_v29, %v526_v30 }
  0xe3   : > { %6668 = vmatpush1.bf16.msra.mxu0 %v12263_v52  ;;  %7012 = vmatpush1.bf16.msra.mxu1 %v12265_v53  ;;  %v525_v28 = vld [vmem:[%s14566_s22 + $0x2e0] sm:$0xff]  ;;  %v534_v38 = vld [vmem:[%s14566_s22 + $0x328] sm:$0xff] }
  0xe4   : > { %6669 = vmatprep.subr.bf16.mxu0 %v12272_v54  ;;  %7013 = vmatprep.subr.bf16.mxu1 %v12274_v57  ;;  %v12312_v33 = vcombine.high %v521_v27, %v525_v28  ;;  %v529_v35 = vld [vmem:[%s14566_s22 + $0x300] sm:$0xff]  ;;  %v12311_v39 = vcombine.low %v521_v27, %v525_v28  ;;  %v12322_v42 = vcombine.high %v530_v37, %v534_v38  ;;  %v538_v45 = vld [vmem:[%s14566_s22 + $0x348] sm:$0xff] }
  0xe5   : > { %v533_v36 = vld [vmem:[%s14566_s22 + $0x320] sm:$0xff]  ;;  %v542_v46 = vld [vmem:[%s14566_s22 + $0x368] sm:$0xff]  ;;  %v12321_v48 = vcombine.low %v530_v37, %v534_v38 }
  0xe6   : > { %v12320_v41 = vcombine.high %v529_v35, %v533_v36  ;;  %v537_v43 = vld [vmem:[%s14566_s22 + $0x340] sm:$0xff]  ;;  %v12319_v47 = vcombine.low %v529_v35, %v533_v36  ;;  %v12330_v50 = vcombine.high %v538_v45, %v542_v46  ;;  %v546_v53 = vld [vmem:[%s14566_s22 + $0x388] sm:$0xff]  ;;  %v12329_v58 = vcombine.low %v538_v45, %v542_v46 }
  0xe7   : > { %6670 = vmatpush1.bf16.msra.mxu0 %v12271_v63  ;;  %7014 = vmatpush1.bf16.msra.mxu1 %v12273_v0  ;;  %v541_v44 = vld [vmem:[%s14566_s22 + $0x360] sm:$0xff]  ;;  %v550_v54 = vld [vmem:[%s14566_s22 + $0x3a8] sm:$0xff] }
  0xe8   : > { %6671 = vmatprep.subr.bf16.mxu0 %v12280_v1  ;;  %7015 = vmatprep.subr.bf16.mxu1 %v12282_v2  ;;  %v12328_v49 = vcombine.high %v537_v43, %v541_v44  ;;  %v545_v51 = vld [vmem:[%s14566_s22 + $0x380] sm:$0xff]  ;;  %v12327_v57 = vcombine.low %v537_v43, %v541_v44  ;;  %v12338_v61 = vcombine.high %v546_v53, %v550_v54  ;;  %v554_v0 = vld [vmem:[%s14566_s22 + $0x3c8] sm:$0xff] }
  0xe9   : > { %v549_v52 = vld [vmem:[%s14566_s22 + $0x3a0] sm:$0xff]  ;;  %v558_v1 = vld [vmem:[%s14566_s22 + $0x3e8] sm:$0xff]  ;;  %v12337_v3 = vcombine.low %v546_v53, %v550_v54 }
  0xea   : > { %v12336_v59 = vcombine.high %v545_v51, %v549_v52  ;;  %v553_v62 = vld [vmem:[%s14566_s22 + $0x3c0] sm:$0xff]  ;;  %v12335_v2 = vcombine.low %v545_v51, %v549_v52  ;;  %v12346_v5 = vcombine.high %v554_v0, %v558_v1  ;;  %v12345_v11 = vcombine.low %v554_v0, %v558_v1  ;;  %v14675_v19 = vld [vmem:[%s14559_s12 + $0x8] sm:$0xff] }
  0xeb   : > { %6672 = vmatpush1.bf16.msra.mxu0 %v12279_v7  ;;  %7016 = vmatpush1.bf16.msra.mxu1 %v12281_v8  ;;  %v557_v63 = vld [vmem:[%s14566_s22 + $0x3e0] sm:$0xff]  ;;  %v562_v8 = vld [vmem:[%s14566_s22 + $0x408] sm:$0xff] }
  0xec   : > { %6673 = vmatprep.subr.bf16.mxu0 %v12288_v9  ;;  %7017 = vmatprep.subr.bf16.mxu1 %v12290_v10  ;;  %v12344_v4 = vcombine.high %v553_v62, %v557_v63  ;;  %v561_v6 = vld [vmem:[%s14566_s22 + $0x400] sm:$0xff]  ;;  %v566_v9 = vld [vmem:[%s14566_s22 + $0x428] sm:$0xff]  ;;  %v12343_v10 = vcombine.low %v553_v62, %v557_v63 }
  0xed   : > { %v565_v7 = vld [vmem:[%s14566_s22 + $0x420] sm:$0xff]  ;;  %v12354_v13 = vcombine.high %v562_v8, %v566_v9  ;;  %v14678_v20 = vld [vmem:[%s14559_s12 + $0x48] sm:$0xff]  ;;  %v12353_v22 = vcombine.low %v562_v8, %v566_v9 }
  0xee   : > { %v12352_v12 = vcombine.high %v561_v6, %v565_v7  ;;  %v569_v14 = vld [vmem:[%s14566_s22 + $0x440] sm:$0xff]  ;;  %v12351_v21 = vcombine.low %v561_v6, %v565_v7  ;;  %v582_v27 = vld [vmem:[%s14566_s22 + $0x4a8] sm:$0xff] }
  0xef   : > { %6674 = vmatpush1.bf16.msra.mxu0 %v12287_v15  ;;  %7018 = vmatpush1.bf16.msra.mxu1 %v12289_v16  ;;  %v573_v15 = vld [vmem:[%s14566_s22 + $0x460] sm:$0xff]  ;;  %v570_v16 = vld [vmem:[%s14566_s22 + $0x448] sm:$0xff] }
  0xf0   : > { %6675 = vmatprep.subr.bf16.mxu0 %v12296_v17  ;;  %7019 = vmatprep.subr.bf16.mxu1 %v12298_v18  ;;  %v14671_v17 = vcombine.low %v14615_v55, %v14618_v56  ;;  %v574_v18 = vld [vmem:[%s14566_s22 + $0x468] sm:$0xff]  ;;  %v581_v55 = vld [vmem:[%s14566_s22 + $0x4a0] sm:$0xff]  ;;  %v14684_v56 = vcombine.high %v14675_v19, %v14678_v20  ;;  %v12359_v28 = vcombine.low %v569_v14, %v573_v15 }
  0xf1   : > { %v12361_v29 = vcombine.low %v570_v16, %v574_v18  ;;  %v590_v35 = vld [vmem:[%s14566_s22 + $0x4e8] sm:$0xff] }
  0xf2   : > { %v598_v43 = vld [vmem:[%s14566_s22 + $0x528] sm:$0xff] }
  0xf3   : > { %6676 = vmatpush1.bf16.msra.mxu0 %v12295_v23  ;;  %7020 = vmatpush1.bf16.msra.mxu1 %v12297_v24  ;;  %v12360_v23 = vcombine.high %v569_v14, %v573_v15  ;;  %v12362_v24 = vcombine.high %v570_v16, %v574_v18  ;;  %v606_v51 = vld [vmem:[%s14566_s22 + $0x568] sm:$0xff] }
  0xf4   : > { %6677 = vmatprep.subr.bf16.mxu0 %v12304_v25  ;;  %7021 = vmatprep.subr.bf16.mxu1 %v12306_v26  ;;  %v577_v25 = vld [vmem:[%s14566_s22 + $0x480] sm:$0xff]  ;;  %v578_v26 = vld [vmem:[%s14566_s22 + $0x488] sm:$0xff] }
  0xf5   : > { %v12368_v30 = vcombine.high %v577_v25, %v581_v55  ;;  %v12367_v36 = vcombine.low %v577_v25, %v581_v55  ;;  %v12369_v37 = vcombine.low %v578_v26, %v582_v27  ;;  %v614_v62 = vld [vmem:[%s14566_s22 + $0x5a8] sm:$0xff] }
  0xf6   : > { %v622_v6 = vld [vmem:[%s14566_s22 + $0x5e8] sm:$0xff] }
  0xf7   : > { %6678 = vmatpush1.bf16.msra.mxu0 %v12303_v31  ;;  %7022 = vmatpush1.bf16.msra.mxu1 %v12305_v32  ;;  %v12370_v31 = vcombine.high %v578_v26, %v582_v27  ;;  %v585_v32 = vld [vmem:[%s14566_s22 + $0x4c0] sm:$0xff]  ;;  %v630_v14 = vld [vmem:[%s14566_s22 + $0x628] sm:$0xff] }
  0xf8   : > { %6679 = vmatprep.subr.bf16.mxu0 %v12312_v33  ;;  %7023 = vmatprep.subr.bf16.mxu1 %v12314_v34  ;;  %v589_v33 = vld [vmem:[%s14566_s22 + $0x4e0] sm:$0xff]  ;;  %v586_v34 = vld [vmem:[%s14566_s22 + $0x4c8] sm:$0xff] }
  0xf9   : > { %v12376_v38 = vcombine.high %v585_v32, %v589_v33  ;;  %v12375_v44 = vcombine.low %v585_v32, %v589_v33  ;;  %v12377_v45 = vcombine.low %v586_v34, %v590_v35  ;;  %v638_v25 = vld [vmem:[%s14566_s22 + $0x668] sm:$0xff] }
  0xfa   : > { %v646_v32 = vld [vmem:[%s14566_s22 + $0x6a8] sm:$0xff] }
  0xfb   : > { %6680 = vmatpush1.bf16.msra.mxu0 %v12311_v39  ;;  %7024 = vmatpush1.bf16.msra.mxu1 %v12313_v40  ;;  %v12378_v39 = vcombine.high %v586_v34, %v590_v35  ;;  %v593_v40 = vld [vmem:[%s14566_s22 + $0x500] sm:$0xff] }
  0xfc   : > { %6681 = vmatprep.subr.bf16.mxu0 %v12320_v41  ;;  %7025 = vmatprep.subr.bf16.mxu1 %v12322_v42  ;;  %v597_v41 = vld [vmem:[%s14566_s22 + $0x520] sm:$0xff]  ;;  %v594_v42 = vld [vmem:[%s14566_s22 + $0x508] sm:$0xff] }
  0xfd   : > { %v12384_v46 = vcombine.high %v593_v40, %v597_v41  ;;  %v12383_v52 = vcombine.low %v593_v40, %v597_v41  ;;  %v12385_v53 = vcombine.low %v594_v42, %v598_v43  ;;  %v654_v40 = vld [vmem:[%s14566_s22 + $0x6e8] sm:$0xff] }
  0xff   : > { %6682 = vmatpush1.bf16.msra.mxu0 %v12319_v47  ;;  %7026 = vmatpush1.bf16.msra.mxu1 %v12321_v48  ;;  %v12386_v47 = vcombine.high %v594_v42, %v598_v43  ;;  %v601_v48 = vld [vmem:[%s14566_s22 + $0x540] sm:$0xff] }
 0x100   : > { %6683 = vmatprep.subr.bf16.mxu0 %v12328_v49  ;;  %7027 = vmatprep.subr.bf16.mxu1 %v12330_v50  ;;  %v605_v49 = vld [vmem:[%s14566_s22 + $0x560] sm:$0xff]  ;;  %v602_v50 = vld [vmem:[%s14566_s22 + $0x548] sm:$0xff] }
 0x101   : > { %v12392_v54 = vcombine.high %v601_v48, %v605_v49  ;;  %v12391_v63 = vcombine.low %v601_v48, %v605_v49  ;;  %v12393_v0 = vcombine.low %v602_v50, %v606_v51  ;;  %v662_v48 = vld [vmem:[%s14566_s22 + $0x728] sm:$0xff] }
 0x103   : > { %6684 = vmatpush1.bf16.msra.mxu0 %v12327_v57  ;;  %7028 = vmatpush1.bf16.msra.mxu1 %v12329_v58  ;;  %v12394_v57 = vcombine.high %v602_v50, %v606_v51  ;;  %v609_v58 = vld [vmem:[%s14566_s22 + $0x580] sm:$0xff] }
 0x104   : > { %6685 = vmatprep.subr.bf16.mxu0 %v12336_v59  ;;  %7029 = vmatprep.subr.bf16.mxu1 %v12338_v61  ;;  %v613_v59 = vld [vmem:[%s14566_s22 + $0x5a0] sm:$0xff]  ;;  %v610_v61 = vld [vmem:[%s14566_s22 + $0x588] sm:$0xff] }
 0x105   : > { %v12400_v1 = vcombine.high %v609_v58, %v613_v59  ;;  %v12399_v7 = vcombine.low %v609_v58, %v613_v59  ;;  %v12401_v8 = vcombine.low %v610_v61, %v614_v62  ;;  %v670_v58 = vld [vmem:[%s14566_s22 + $0x768] sm:$0xff] }
 0x107   : > { %6686 = vmatpush1.bf16.msra.mxu0 %v12335_v2  ;;  %7030 = vmatpush1.bf16.msra.mxu1 %v12337_v3  ;;  %v12402_v2 = vcombine.high %v610_v61, %v614_v62  ;;  %v617_v3 = vld [vmem:[%s14566_s22 + $0x5c0] sm:$0xff] }
 0x108   : > { %6687 = vmatprep.subr.bf16.mxu0 %v12344_v4  ;;  %7031 = vmatprep.subr.bf16.mxu1 %v12346_v5  ;;  %v621_v4 = vld [vmem:[%s14566_s22 + $0x5e0] sm:$0xff]  ;;  %v618_v5 = vld [vmem:[%s14566_s22 + $0x5c8] sm:$0xff] }
 0x109   : > { %v12408_v9 = vcombine.high %v617_v3, %v621_v4  ;;  %v12407_v15 = vcombine.low %v617_v3, %v621_v4  ;;  %v12409_v16 = vcombine.low %v618_v5, %v622_v6  ;;  %v678_v3 = vld [vmem:[%s14566_s22 + $0x7a8] sm:$0xff] }
 0x10b   : > { %6688 = vmatpush1.bf16.msra.mxu0 %v12343_v10  ;;  %7032 = vmatpush1.bf16.msra.mxu1 %v12345_v11  ;;  %v12410_v10 = vcombine.high %v618_v5, %v622_v6  ;;  %v625_v11 = vld [vmem:[%s14566_s22 + $0x600] sm:$0xff] }
 0x10c   : > { %6700 = vmatprep.subr.bf16.mxu0 %v12352_v12  ;;  %7044 = vmatprep.subr.bf16.mxu1 %v12354_v13  ;;  %v629_v12 = vld [vmem:[%s14566_s22 + $0x620] sm:$0xff]  ;;  %v626_v13 = vld [vmem:[%s14566_s22 + $0x608] sm:$0xff] }
 0x10d   : > { %v12416_v18 = vcombine.high %v625_v11, %v629_v12  ;;  %v12415_v55 = vcombine.low %v625_v11, %v629_v12  ;;  %v12417_v26 = vcombine.low %v626_v13, %v630_v14  ;;  %v686_v11 = vld [vmem:[%s14566_s22 + $0x7e8] sm:$0xff] }
 0x10e   : > { %6690 = vmatmul.mubr.bf16.vlgmr.msra.gmra.mrb[0].mxu0 %v14671_v17  ;;  %7034 = vmatmul.mubr.bf16.vlgmr.msra.gmra.mrb[0].mxu1 %v14671_v17 }
 0x10f   : > { %6701 = vmatpush1.bf16.msra.mxu0 %v12351_v21  ;;  %7045 = vmatpush1.bf16.msra.mxu1 %v12353_v22  ;;  %v12418_v21 = vcombine.high %v626_v13, %v630_v14  ;;  %v633_v22 = vld [vmem:[%s14566_s22 + $0x640] sm:$0xff] }
 0x110   : > { %6702 = vmatprep.subr.bf16.mxu0 %v12360_v23  ;;  %7046 = vmatprep.subr.bf16.mxu1 %v12362_v24  ;;  %v637_v23 = vld [vmem:[%s14566_s22 + $0x660] sm:$0xff]  ;;  %v634_v24 = vld [vmem:[%s14566_s22 + $0x648] sm:$0xff] }
 0x111   : > { %6732 = vmatprep.mubr.bf16.mxu0 %v14684_v56  ;;  %7076 = vmatprep.mubr.bf16.mxu1 %v14684_v56  ;;  %v12424_v27 = vcombine.high %v633_v22, %v637_v23  ;;  %v12423_v33 = vcombine.low %v633_v22, %v637_v23  ;;  %v12425_v34 = vcombine.low %v634_v24, %v638_v25  ;;  %v694_v22 = vld [vmem:[%s14566_s22 + $0x828] sm:$0xff] }
 0x113   : > { %6703 = vmatpush1.bf16.msra.mxu0 %v12359_v28  ;;  %7047 = vmatpush1.bf16.msra.mxu1 %v12361_v29  ;;  %v12426_v28 = vcombine.high %v634_v24, %v638_v25  ;;  %v641_v29 = vld [vmem:[%s14566_s22 + $0x680] sm:$0xff] }
 0x114   : > { %6704 = vmatprep.subr.bf16.mxu0 %v12368_v30  ;;  %7048 = vmatprep.subr.bf16.mxu1 %v12370_v31  ;;  %v645_v30 = vld [vmem:[%s14566_s22 + $0x6a0] sm:$0xff]  ;;  %v642_v31 = vld [vmem:[%s14566_s22 + $0x688] sm:$0xff] }
 0x115   : > { %v12432_v35 = vcombine.high %v641_v29, %v645_v30  ;;  %v12431_v41 = vcombine.low %v641_v29, %v645_v30  ;;  %v12433_v42 = vcombine.low %v642_v31, %v646_v32  ;;  %v14753_v29 = vcombine.low %v14675_v19, %v14678_v20  ;;  %v702_v30 = vld [vmem:[%s14566_s22 + $0x868] sm:$0xff]  ;;  %v709_v19 = vld [vmem:[%s14566_s22 + $0x8a0] sm:$0xff] }
 0x117   : > { %6705 = vmatpush1.bf16.msra.mxu0 %v12367_v36  ;;  %7049 = vmatpush1.bf16.msra.mxu1 %v12369_v37  ;;  %v12434_v36 = vcombine.high %v642_v31, %v646_v32  ;;  %v649_v37 = vld [vmem:[%s14566_s22 + $0x6c0] sm:$0xff]  ;;  %v14757_v31 = vld [vmem:[%s14559_s12 + $0x10] sm:$0xff] }
 0x118   : > { %6706 = vmatprep.subr.bf16.mxu0 %v12376_v38  ;;  %7050 = vmatprep.subr.bf16.mxu1 %v12378_v39  ;;  %v653_v38 = vld [vmem:[%s14566_s22 + $0x6e0] sm:$0xff]  ;;  %v650_v39 = vld [vmem:[%s14566_s22 + $0x6c8] sm:$0xff]  ;;  %v14760_v32 = vld [vmem:[%s14559_s12 + $0x50] sm:$0xff] }
 0x119   : > { %v12440_v43 = vcombine.high %v649_v37, %v653_v38  ;;  %v12439_v49 = vcombine.low %v649_v37, %v653_v38  ;;  %v12441_v50 = vcombine.low %v650_v39, %v654_v40  ;;  %v705_v37 = vld [vmem:[%s14566_s22 + $0x880] sm:$0xff]  ;;  %v14766_v20 = vcombine.high %v14757_v31, %v14760_v32  ;;  %v706_v38 = vld [vmem:[%s14566_s22 + $0x888] sm:$0xff] }
 0x11b   : > { %6707 = vmatpush1.bf16.msra.mxu0 %v12375_v44  ;;  %7051 = vmatpush1.bf16.msra.mxu1 %v12377_v45  ;;  %v12442_v44 = vcombine.high %v650_v39, %v654_v40  ;;  %v657_v45 = vld [vmem:[%s14566_s22 + $0x700] sm:$0xff]  ;;  %v710_v39 = vld [vmem:[%s14566_s22 + $0x8a8] sm:$0xff] }
 0x11c   : > { %6708 = vmatprep.subr.bf16.mxu0 %v12384_v46  ;;  %7052 = vmatprep.subr.bf16.mxu1 %v12386_v47  ;;  %v661_v46 = vld [vmem:[%s14566_s22 + $0x720] sm:$0xff]  ;;  %v658_v47 = vld [vmem:[%s14566_s22 + $0x708] sm:$0xff] }
 0x11d   : > { %v12448_v51 = vcombine.high %v657_v45, %v661_v46  ;;  %v12447_v59 = vcombine.low %v657_v45, %v661_v46  ;;  %v12449_v61 = vcombine.low %v658_v47, %v662_v48  ;;  %v717_v45 = vld [vmem:[%s14566_s22 + $0x8e0] sm:$0xff]  ;;  %v714_v46 = vld [vmem:[%s14566_s22 + $0x8c8] sm:$0xff] }
 0x11f   : > { %6709 = vmatpush1.bf16.msra.mxu0 %v12383_v52  ;;  %7053 = vmatpush1.bf16.msra.mxu1 %v12385_v53  ;;  %v12450_v52 = vcombine.high %v658_v47, %v662_v48  ;;  %v665_v53 = vld [vmem:[%s14566_s22 + $0x740] sm:$0xff]  ;;  %v718_v47 = vld [vmem:[%s14566_s22 + $0x8e8] sm:$0xff]  ;;  %v12495_v48 = vcombine.low %v705_v37, %v709_v19 }
 0x120   : > { %6710 = vmatprep.subr.bf16.mxu0 %v12392_v54  ;;  %7054 = vmatprep.subr.bf16.mxu1 %v12394_v57  ;;  %v669_v54 = vld [vmem:[%s14566_s22 + $0x760] sm:$0xff]  ;;  %v666_v57 = vld [vmem:[%s14566_s22 + $0x748] sm:$0xff] }
 0x121   : > { %v12456_v62 = vcombine.high %v665_v53, %v669_v54  ;;  %v12455_v4 = vcombine.low %v665_v53, %v669_v54  ;;  %v12457_v5 = vcombine.low %v666_v57, %v670_v58  ;;  %v725_v53 = vld [vmem:[%s14566_s22 + $0x920] sm:$0xff]  ;;  %v722_v54 = vld [vmem:[%s14566_s22 + $0x908] sm:$0xff] }
 0x123   : > { %6711 = vmatpush1.bf16.msra.mxu0 %v12391_v63  ;;  %7055 = vmatpush1.bf16.msra.mxu1 %v12393_v0  ;;  %v12458_v63 = vcombine.high %v666_v57, %v670_v58  ;;  %v673_v0 = vld [vmem:[%s14566_s22 + $0x780] sm:$0xff]  ;;  %v726_v57 = vld [vmem:[%s14566_s22 + $0x928] sm:$0xff] }
 0x124   : > { %6712 = vmatprep.subr.bf16.mxu0 %v12400_v1  ;;  %7056 = vmatprep.subr.bf16.mxu1 %v12402_v2  ;;  %v677_v1 = vld [vmem:[%s14566_s22 + $0x7a0] sm:$0xff]  ;;  %v674_v2 = vld [vmem:[%s14566_s22 + $0x788] sm:$0xff] }
 0x125   : > { %v12464_v6 = vcombine.high %v673_v0, %v677_v1  ;;  %v12463_v12 = vcombine.low %v673_v0, %v677_v1  ;;  %v12465_v13 = vcombine.low %v674_v2, %v678_v3  ;;  %v733_v0 = vld [vmem:[%s14566_s22 + $0x960] sm:$0xff]  ;;  %v730_v1 = vld [vmem:[%s14566_s22 + $0x948] sm:$0xff] }
 0x127   : > { %6713 = vmatpush1.bf16.msra.mxu0 %v12399_v7  ;;  %7057 = vmatpush1.bf16.msra.mxu1 %v12401_v8  ;;  %v12466_v7 = vcombine.high %v674_v2, %v678_v3  ;;  %v681_v8 = vld [vmem:[%s14566_s22 + $0x7c0] sm:$0xff]  ;;  %v734_v2 = vld [vmem:[%s14566_s22 + $0x968] sm:$0xff] }
 0x128   : > { %6714 = vmatprep.subr.bf16.mxu0 %v12408_v9  ;;  %7058 = vmatprep.subr.bf16.mxu1 %v12410_v10  ;;  %v685_v9 = vld [vmem:[%s14566_s22 + $0x7e0] sm:$0xff]  ;;  %v682_v10 = vld [vmem:[%s14566_s22 + $0x7c8] sm:$0xff] }
 0x129   : > { %v12472_v14 = vcombine.high %v681_v8, %v685_v9  ;;  %v12471_v23 = vcombine.low %v681_v8, %v685_v9  ;;  %v12473_v24 = vcombine.low %v682_v10, %v686_v11  ;;  %v741_v8 = vld [vmem:[%s14566_s22 + $0x9a0] sm:$0xff]  ;;  %v738_v9 = vld [vmem:[%s14566_s22 + $0x988] sm:$0xff] }
 0x12b   : > { %6715 = vmatpush1.bf16.msra.mxu0 %v12407_v15  ;;  %7059 = vmatpush1.bf16.msra.mxu1 %v12409_v16  ;;  %v12474_v15 = vcombine.high %v682_v10, %v686_v11  ;;  %v689_v16 = vld [vmem:[%s14566_s22 + $0x800] sm:$0xff]  ;;  %v742_v10 = vld [vmem:[%s14566_s22 + $0x9a8] sm:$0xff] }
 0x12c   : > { %6716 = vmatprep.subr.bf16.mxu0 %v12416_v18  ;;  %7060 = vmatprep.subr.bf16.mxu1 %v12418_v21  ;;  %v693_v18 = vld [vmem:[%s14566_s22 + $0x820] sm:$0xff]  ;;  %v690_v21 = vld [vmem:[%s14566_s22 + $0x808] sm:$0xff] }
 0x12d   : > { %v12480_v25 = vcombine.high %v689_v16, %v693_v18 }
 0x12f   : > { %6717 = vmatpush1.bf16.msra.mxu0 %v12415_v55  ;;  %7061 = vmatpush1.bf16.msra.mxu1 %v12417_v26  ;;  %v12482_v55 = vcombine.high %v690_v21, %v694_v22  ;;  %v697_v26 = vld [vmem:[%s14566_s22 + $0x840] sm:$0xff] }
 0x130   : > { %6718 = vmatprep.subr.bf16.mxu0 %v12424_v27  ;;  %7062 = vmatprep.subr.bf16.mxu1 %v12426_v28  ;;  %v701_v27 = vld [vmem:[%s14566_s22 + $0x860] sm:$0xff]  ;;  %v698_v28 = vld [vmem:[%s14566_s22 + $0x848] sm:$0xff] }
 0x131   : > { %v12487_v40 = vcombine.low %v697_v26, %v701_v27 }
 0x133   : > { %6719 = vmatpush1.bf16.msra.mxu0 %v12423_v33  ;;  %7063 = vmatpush1.bf16.msra.mxu1 %v12425_v34  ;;  %v12479_v33 = vcombine.low %v689_v16, %v693_v18  ;;  %v12481_v34 = vcombine.low %v690_v21, %v694_v22  ;;  %v749_v16 = vld [vmem:[%s14566_s22 + $0x9e0] sm:$0xff]  ;;  %v746_v18 = vld [vmem:[%s14566_s22 + $0x9c8] sm:$0xff] }
 0x134   : > { %6720 = vmatprep.subr.bf16.mxu0 %v12432_v35  ;;  %7064 = vmatprep.subr.bf16.mxu1 %v12434_v36  ;;  %v12488_v35 = vcombine.high %v697_v26, %v701_v27  ;;  %v12490_v36 = vcombine.high %v698_v28, %v702_v30  ;;  %v750_v21 = vld [vmem:[%s14566_s22 + $0x9e8] sm:$0xff]  ;;  %v757_v26 = vld [vmem:[%s14566_s22 + $0xa20] sm:$0xff] }
 0x135   : > { %v754_v27 = vld [vmem:[%s14566_s22 + $0xa08] sm:$0xff] }
 0x137   : > { %6721 = vmatpush1.bf16.msra.mxu0 %v12431_v41  ;;  %7065 = vmatpush1.bf16.msra.mxu1 %v12433_v42  ;;  %v12489_v41 = vcombine.low %v698_v28, %v702_v30  ;;  %v12496_v42 = vcombine.high %v705_v37, %v709_v19  ;;  %v758_v28 = vld [vmem:[%s14566_s22 + $0xa28] sm:$0xff]  ;;  %v765_v37 = vld [vmem:[%s14566_s22 + $0xa60] sm:$0xff] }
 0x138   : > { %6722 = vmatprep.subr.bf16.mxu0 %v12440_v43  ;;  %7066 = vmatprep.subr.bf16.mxu1 %v12442_v44  ;;  %v12498_v43 = vcombine.high %v706_v38, %v710_v39  ;;  %v713_v44 = vld [vmem:[%s14566_s22 + $0x8c0] sm:$0xff]  ;;  %v762_v19 = vld [vmem:[%s14566_s22 + $0xa48] sm:$0xff] }
 0x139   : > { %v12503_v58 = vcombine.low %v713_v44, %v717_v45 }
 0x13b   : > { %6723 = vmatpush1.bf16.msra.mxu0 %v12439_v49  ;;  %7067 = vmatpush1.bf16.msra.mxu1 %v12441_v50  ;;  %v12497_v49 = vcombine.low %v706_v38, %v710_v39  ;;  %v12504_v50 = vcombine.high %v713_v44, %v717_v45  ;;  %v766_v38 = vld [vmem:[%s14566_s22 + $0xa68] sm:$0xff]  ;;  %v773_v44 = vld [vmem:[%s14566_s22 + $0xaa0] sm:$0xff] }
 0x13c   : > { %6724 = vmatprep.subr.bf16.mxu0 %v12448_v51  ;;  %7068 = vmatprep.subr.bf16.mxu1 %v12450_v52  ;;  %v12506_v51 = vcombine.high %v714_v46, %v718_v47  ;;  %v721_v52 = vld [vmem:[%s14566_s22 + $0x900] sm:$0xff]  ;;  %v770_v45 = vld [vmem:[%s14566_s22 + $0xa88] sm:$0xff] }
 0x13d   : > { %v12511_v3 = vcombine.low %v721_v52, %v725_v53 }
 0x13f   : > { %6725 = vmatpush1.bf16.msra.mxu0 %v12447_v59  ;;  %7069 = vmatpush1.bf16.msra.mxu1 %v12449_v61  ;;  %v12505_v59 = vcombine.low %v714_v46, %v718_v47  ;;  %v12512_v61 = vcombine.high %v721_v52, %v725_v53  ;;  %v774_v46 = vld [vmem:[%s14566_s22 + $0xaa8] sm:$0xff]  ;;  %v781_v52 = vld [vmem:[%s14566_s22 + $0xae0] sm:$0xff] }
 0x140   : > { %6726 = vmatprep.subr.bf16.mxu0 %v12456_v62  ;;  %7070 = vmatprep.subr.bf16.mxu1 %v12458_v63  ;;  %v12514_v62 = vcombine.high %v722_v54, %v726_v57  ;;  %v729_v63 = vld [vmem:[%s14566_s22 + $0x940] sm:$0xff]  ;;  %v778_v53 = vld [vmem:[%s14566_s22 + $0xac8] sm:$0xff] }
 0x141   : > { %v12519_v11 = vcombine.low %v729_v63, %v733_v0 }
 0x143   : > { %6727 = vmatpush1.bf16.msra.mxu0 %v12455_v4  ;;  %7071 = vmatpush1.bf16.msra.mxu1 %v12457_v5  ;;  %v12513_v4 = vcombine.low %v722_v54, %v726_v57  ;;  %v12520_v5 = vcombine.high %v729_v63, %v733_v0  ;;  %v782_v54 = vld [vmem:[%s14566_s22 + $0xae8] sm:$0xff]  ;;  %v789_v63 = vld [vmem:[%s14566_s22 + $0xb20] sm:$0xff] }
 0x144   : > { %6728 = vmatprep.subr.bf16.mxu0 %v12464_v6  ;;  %7072 = vmatprep.subr.bf16.mxu1 %v12466_v7  ;;  %v12522_v6 = vcombine.high %v730_v1, %v734_v2  ;;  %v737_v7 = vld [vmem:[%s14566_s22 + $0x980] sm:$0xff]  ;;  %v786_v0 = vld [vmem:[%s14566_s22 + $0xb08] sm:$0xff] }
 0x145   : > { %v12527_v22 = vcombine.low %v737_v7, %v741_v8 }
 0x147   : > { %6729 = vmatpush1.bf16.msra.mxu0 %v12463_v12  ;;  %7073 = vmatpush1.bf16.msra.mxu1 %v12465_v13  ;;  %v12521_v12 = vcombine.low %v730_v1, %v734_v2  ;;  %v12528_v13 = vcombine.high %v737_v7, %v741_v8  ;;  %v790_v1 = vld [vmem:[%s14566_s22 + $0xb28] sm:$0xff]  ;;  %v797_v7 = vld [vmem:[%s14566_s22 + $0xb60] sm:$0xff] }
 0x148   : > { %6730 = vmatprep.subr.bf16.mxu0 %v12472_v14  ;;  %7074 = vmatprep.subr.bf16.mxu1 %v12474_v15  ;;  %v12530_v14 = vcombine.high %v738_v9, %v742_v10  ;;  %v745_v15 = vld [vmem:[%s14566_s22 + $0x9c0] sm:$0xff]  ;;  %v794_v8 = vld [vmem:[%s14566_s22 + $0xb48] sm:$0xff] }
 0x149   : > { %v12535_v30 = vcombine.low %v745_v15, %v749_v16 }
 0x14b   : > { %6731 = vmatpush1.bf16.msra.mxu0 %v12471_v23  ;;  %7075 = vmatpush1.bf16.msra.mxu1 %v12473_v24  ;;  %v12529_v23 = vcombine.low %v738_v9, %v742_v10  ;;  %v12536_v24 = vcombine.high %v745_v15, %v749_v16  ;;  %v798_v9 = vld [vmem:[%s14566_s22 + $0xb68] sm:$0xff]  ;;  %v805_v15 = vld [vmem:[%s14566_s22 + $0xba0] sm:$0xff] }
 0x14c   : > { %6743 = vmatprep.subr.bf16.mxu0 %v12480_v25  ;;  %7087 = vmatprep.subr.bf16.mxu1 %v12482_v55  ;;  %v12538_v25 = vcombine.high %v746_v18, %v750_v21  ;;  %v753_v55 = vld [vmem:[%s14566_s22 + $0xa00] sm:$0xff]  ;;  %v802_v16 = vld [vmem:[%s14566_s22 + $0xb88] sm:$0xff] }
 0x14d   : > { %v12543_v39 = vcombine.low %v753_v55, %v757_v26 }
 0x14e   : > { %6733 = vmatmul.mubr.bf16.vlgmr.msra.gmra.mrb[0].mxu0 %v14753_v29  ;;  %7077 = vmatmul.mubr.bf16.vlgmr.msra.gmra.mrb[0].mxu1 %v14753_v29 }
 0x14f   : > { %6744 = vmatpush1.bf16.msra.mxu0 %v12479_v33  ;;  %7088 = vmatpush1.bf16.msra.mxu1 %v12481_v34  ;;  %v12537_v33 = vcombine.low %v746_v18, %v750_v21  ;;  %v12544_v34 = vcombine.high %v753_v55, %v757_v26  ;;  %v806_v18 = vld [vmem:[%s14566_s22 + $0xba8] sm:$0xff]  ;;  %v813_v55 = vld [vmem:[%s14566_s22 + $0xbe0] sm:$0xff] }
 0x150   : > { %6745 = vmatprep.subr.bf16.mxu0 %v12488_v35  ;;  %7089 = vmatprep.subr.bf16.mxu1 %v12490_v36  ;;  %v12546_v35 = vcombine.high %v754_v27, %v758_v28  ;;  %v761_v36 = vld [vmem:[%s14566_s22 + $0xa40] sm:$0xff]  ;;  %v810_v26 = vld [vmem:[%s14566_s22 + $0xbc8] sm:$0xff] }
 0x151   : > { %6775 = vmatprep.mubr.bf16.mxu0 %v14766_v20  ;;  %7119 = vmatprep.mubr.bf16.mxu1 %v14766_v20  ;;  %v12551_v47 = vcombine.low %v761_v36, %v765_v37 }
 0x153   : > { %6746 = vmatpush1.bf16.msra.mxu0 %v12487_v40  ;;  %7090 = vmatpush1.bf16.msra.mxu1 %v12489_v41  ;;  %v12545_v40 = vcombine.low %v754_v27, %v758_v28  ;;  %v12552_v41 = vcombine.high %v761_v36, %v765_v37  ;;  %v814_v27 = vld [vmem:[%s14566_s22 + $0xbe8] sm:$0xff]  ;;  %v821_v36 = vld [vmem:[%s14566_s22 + $0xc20] sm:$0xff] }
 0x154   : > { %6747 = vmatprep.subr.bf16.mxu0 %v12496_v42  ;;  %7091 = vmatprep.subr.bf16.mxu1 %v12498_v43  ;;  %v12554_v42 = vcombine.high %v762_v19, %v766_v38  ;;  %v769_v43 = vld [vmem:[%s14566_s22 + $0xa80] sm:$0xff]  ;;  %v818_v37 = vld [vmem:[%s14566_s22 + $0xc08] sm:$0xff] }
 0x155   : > { %v12559_v57 = vcombine.low %v769_v43, %v773_v44 }
 0x157   : > { %6748 = vmatpush1.bf16.msra.mxu0 %v12495_v48  ;;  %7092 = vmatpush1.bf16.msra.mxu1 %v12497_v49  ;;  %v12553_v48 = vcombine.low %v762_v19, %v766_v38  ;;  %v12560_v49 = vcombine.high %v769_v43, %v773_v44  ;;  %v822_v19 = vld [vmem:[%s14566_s22 + $0xc28] sm:$0xff]  ;;  %v829_v43 = vld [vmem:[%s14566_s22 + $0xc60] sm:$0xff] }
 0x158   : > { %6749 = vmatprep.subr.bf16.mxu0 %v12504_v50  ;;  %7093 = vmatprep.subr.bf16.mxu1 %v12506_v51  ;;  %v12562_v50 = vcombine.high %v770_v45, %v774_v46  ;;  %v777_v51 = vld [vmem:[%s14566_s22 + $0xac0] sm:$0xff]  ;;  %v826_v44 = vld [vmem:[%s14566_s22 + $0xc48] sm:$0xff] }
 0x159   : > { %v12567_v2 = vcombine.low %v777_v51, %v781_v52 }
 0x15b   : > { %6750 = vmatpush1.bf16.msra.mxu0 %v12503_v58  ;;  %7094 = vmatpush1.bf16.msra.mxu1 %v12505_v59  ;;  %v12561_v58 = vcombine.low %v770_v45, %v774_v46  ;;  %v12568_v59 = vcombine.high %v777_v51, %v781_v52  ;;  %v14835_v45 = vcombine.low %v14757_v31, %v14760_v32  ;;  %v830_v46 = vld [vmem:[%s14566_s22 + $0xc68] sm:$0xff]  ;;  %v837_v31 = vld [vmem:[%s14566_s22 + $0xca0] sm:$0xff] }
 0x15c   : > { %6751 = vmatprep.subr.bf16.mxu0 %v12512_v61  ;;  %7095 = vmatprep.subr.bf16.mxu1 %v12514_v62  ;;  %v12570_v61 = vcombine.high %v778_v53, %v782_v54  ;;  %v785_v62 = vld [vmem:[%s14566_s22 + $0xb00] sm:$0xff]  ;;  %v12618_v52 = vcombine.high %v826_v44, %v830_v46 }
 0x15d   : > { %v12575_v10 = vcombine.low %v785_v62, %v789_v63 }
 0x15f   : > { %6752 = vmatpush1.bf16.msra.mxu0 %v12511_v3  ;;  %7096 = vmatpush1.bf16.msra.mxu1 %v12513_v4  ;;  %v12569_v3 = vcombine.low %v778_v53, %v782_v54  ;;  %v12576_v4 = vcombine.high %v785_v62, %v789_v63  ;;  %v833_v53 = vld [vmem:[%s14566_s22 + $0xc80] sm:$0xff]  ;;  %v834_v54 = vld [vmem:[%s14566_s22 + $0xc88] sm:$0xff] }
 0x160   : > { %6753 = vmatprep.subr.bf16.mxu0 %v12520_v5  ;;  %7097 = vmatprep.subr.bf16.mxu1 %v12522_v6  ;;  %v12578_v5 = vcombine.high %v786_v0, %v790_v1  ;;  %v793_v6 = vld [vmem:[%s14566_s22 + $0xb40] sm:$0xff] }
 0x161   : > { %v12583_v21 = vcombine.low %v793_v6, %v797_v7  ;;  %v841_v63 = vld [vmem:[%s14566_s22 + $0xcc0] sm:$0xff] }
 0x163   : > { %6754 = vmatpush1.bf16.msra.mxu0 %v12519_v11  ;;  %7098 = vmatpush1.bf16.msra.mxu1 %v12521_v12  ;;  %v12577_v11 = vcombine.low %v786_v0, %v790_v1  ;;  %v12584_v12 = vcombine.high %v793_v6, %v797_v7  ;;  %v845_v0 = vld [vmem:[%s14566_s22 + $0xce0] sm:$0xff]  ;;  %v842_v1 = vld [vmem:[%s14566_s22 + $0xcc8] sm:$0xff] }
 0x164   : > { %6755 = vmatprep.subr.bf16.mxu0 %v12528_v13  ;;  %7099 = vmatprep.subr.bf16.mxu1 %v12530_v14  ;;  %v12586_v13 = vcombine.high %v794_v8, %v798_v9  ;;  %v801_v14 = vld [vmem:[%s14566_s22 + $0xb80] sm:$0xff] }
 0x165   : > { %v12591_v28 = vcombine.low %v801_v14, %v805_v15  ;;  %v849_v7 = vld [vmem:[%s14566_s22 + $0xd00] sm:$0xff] }
 0x167   : > { %6756 = vmatpush1.bf16.msra.mxu0 %v12527_v22  ;;  %7100 = vmatpush1.bf16.msra.mxu1 %v12529_v23  ;;  %v12585_v22 = vcombine.low %v794_v8, %v798_v9  ;;  %v12592_v23 = vcombine.high %v801_v14, %v805_v15  ;;  %v853_v8 = vld [vmem:[%s14566_s22 + $0xd20] sm:$0xff]  ;;  %v850_v9 = vld [vmem:[%s14566_s22 + $0xd08] sm:$0xff] }
 0x168   : > { %6757 = vmatprep.subr.bf16.mxu0 %v12536_v24  ;;  %7101 = vmatprep.subr.bf16.mxu1 %v12538_v25  ;;  %v12594_v24 = vcombine.high %v802_v16, %v806_v18  ;;  %v809_v25 = vld [vmem:[%s14566_s22 + $0xbc0] sm:$0xff] }
 0x169   : > { %v12599_v38 = vcombine.low %v809_v25, %v813_v55  ;;  %v857_v15 = vld [vmem:[%s14566_s22 + $0xd40] sm:$0xff] }
 0x16b   : > { %6758 = vmatpush1.bf16.msra.mxu0 %v12535_v30  ;;  %7102 = vmatpush1.bf16.msra.mxu1 %v12537_v33  ;;  %v12593_v30 = vcombine.low %v802_v16, %v806_v18  ;;  %v12600_v33 = vcombine.high %v809_v25, %v813_v55  ;;  %v861_v16 = vld [vmem:[%s14566_s22 + $0xd60] sm:$0xff]  ;;  %v858_v18 = vld [vmem:[%s14566_s22 + $0xd48] sm:$0xff] }
 0x16c   : > { %6759 = vmatprep.subr.bf16.mxu0 %v12544_v34  ;;  %7103 = vmatprep.subr.bf16.mxu1 %v12546_v35  ;;  %v12602_v34 = vcombine.high %v810_v26, %v814_v27  ;;  %v817_v35 = vld [vmem:[%s14566_s22 + $0xc00] sm:$0xff] }
 0x16d   : > { %v865_v55 = vld [vmem:[%s14566_s22 + $0xd80] sm:$0xff] }
 0x16f   : > { %6760 = vmatpush1.bf16.msra.mxu0 %v12543_v39  ;;  %7104 = vmatpush1.bf16.msra.mxu1 %v12545_v40  ;;  %v12601_v39 = vcombine.low %v810_v26, %v814_v27  ;;  %v12608_v40 = vcombine.high %v817_v35, %v821_v36  ;;  %v869_v26 = vld [vmem:[%s14566_s22 + $0xda0] sm:$0xff]  ;;  %v866_v27 = vld [vmem:[%s14566_s22 + $0xd88] sm:$0xff] }
 0x170   : > { %6761 = vmatprep.subr.bf16.mxu0 %v12552_v41  ;;  %7105 = vmatprep.subr.bf16.mxu1 %v12554_v42  ;;  %v12610_v41 = vcombine.high %v818_v37, %v822_v19  ;;  %v825_v42 = vld [vmem:[%s14566_s22 + $0xc40] sm:$0xff] }
 0x171   : > { %v12616_v51 = vcombine.high %v825_v42, %v829_v43 }
 0x173   : > { %6762 = vmatpush1.bf16.msra.mxu0 %v12551_v47  ;;  %7106 = vmatpush1.bf16.msra.mxu1 %v12553_v48  ;;  %v14839_v47 = vld [vmem:[%s14559_s12 + $0x18] sm:$0xff] }
 0x174   : > { %6763 = vmatprep.subr.bf16.mxu0 %v12560_v49  ;;  %7107 = vmatprep.subr.bf16.mxu1 %v12562_v50  ;;  %v14842_v48 = vld [vmem:[%s14559_s12 + $0x58] sm:$0xff]  ;;  %v12607_v49 = vcombine.low %v817_v35, %v821_v36  ;;  %v12609_v50 = vcombine.low %v818_v37, %v822_v19  ;;  %v873_v36 = vld [vmem:[%s14566_s22 + $0xdc0] sm:$0xff]  ;;  %v874_v19 = vld [vmem:[%s14566_s22 + $0xdc8] sm:$0xff] }
 0x175   : > { %v14848_v32 = vcombine.high %v14839_v47, %v14842_v48  ;;  %v877_v37 = vld [vmem:[%s14566_s22 + $0xde0] sm:$0xff] }
 0x177   : > { %6764 = vmatpush1.bf16.msra.mxu0 %v12559_v57  ;;  %7108 = vmatpush1.bf16.msra.mxu1 %v12561_v58  ;;  %v838_v57 = vld [vmem:[%s14566_s22 + $0xca8] sm:$0xff]  ;;  %v12615_v58 = vcombine.low %v825_v42, %v829_v43  ;;  %v881_v43 = vld [vmem:[%s14566_s22 + $0xe00] sm:$0xff] }
 0x178   : > { %6765 = vmatprep.subr.bf16.mxu0 %v12568_v59  ;;  %7109 = vmatprep.subr.bf16.mxu1 %v12570_v61  ;;  %v12617_v59 = vcombine.low %v826_v44, %v830_v46  ;;  %v12624_v61 = vcombine.high %v833_v53, %v837_v31  ;;  %v12626_v62 = vcombine.high %v834_v54, %v838_v57  ;;  %v885_v44 = vld [vmem:[%s14566_s22 + $0xe20] sm:$0xff]  ;;  %v882_v46 = vld [vmem:[%s14566_s22 + $0xe08] sm:$0xff] }
 0x17b   : > { %6766 = vmatpush1.bf16.msra.mxu0 %v12567_v2  ;;  %7110 = vmatpush1.bf16.msra.mxu1 %v12569_v3  ;;  %v846_v2 = vld [vmem:[%s14566_s22 + $0xce8] sm:$0xff]  ;;  %v12623_v3 = vcombine.low %v833_v53, %v837_v31  ;;  %v889_v31 = vld [vmem:[%s14566_s22 + $0xe40] sm:$0xff] }
 0x17c   : > { %6767 = vmatprep.subr.bf16.mxu0 %v12576_v4  ;;  %7111 = vmatprep.subr.bf16.mxu1 %v12578_v5  ;;  %v12625_v4 = vcombine.low %v834_v54, %v838_v57  ;;  %v12632_v5 = vcombine.high %v841_v63, %v845_v0  ;;  %v12634_v6 = vcombine.high %v842_v1, %v846_v2  ;;  %v893_v54 = vld [vmem:[%s14566_s22 + $0xe60] sm:$0xff]  ;;  %v890_v57 = vld [vmem:[%s14566_s22 + $0xe48] sm:$0xff] }
 0x17f   : > { %6768 = vmatpush1.bf16.msra.mxu0 %v12575_v10  ;;  %7112 = vmatpush1.bf16.msra.mxu1 %v12577_v11  ;;  %v854_v10 = vld [vmem:[%s14566_s22 + $0xd28] sm:$0xff]  ;;  %v12631_v11 = vcombine.low %v841_v63, %v845_v0  ;;  %v897_v0 = vld [vmem:[%s14566_s22 + $0xe80] sm:$0xff] }
 0x180   : > { %6769 = vmatprep.subr.bf16.mxu0 %v12584_v12  ;;  %7113 = vmatprep.subr.bf16.mxu1 %v12586_v13  ;;  %v12633_v12 = vcombine.low %v842_v1, %v846_v2  ;;  %v12640_v13 = vcombine.high %v849_v7, %v853_v8  ;;  %v12642_v14 = vcombine.high %v850_v9, %v854_v10  ;;  %v901_v1 = vld [vmem:[%s14566_s22 + $0xea0] sm:$0xff]  ;;  %v898_v2 = vld [vmem:[%s14566_s22 + $0xe88] sm:$0xff] }
 0x183   : > { %6770 = vmatpush1.bf16.msra.mxu0 %v12583_v21  ;;  %7114 = vmatpush1.bf16.msra.mxu1 %v12585_v22  ;;  %v862_v21 = vld [vmem:[%s14566_s22 + $0xd68] sm:$0xff]  ;;  %v12639_v22 = vcombine.low %v849_v7, %v853_v8  ;;  %v905_v8 = vld [vmem:[%s14566_s22 + $0xec0] sm:$0xff] }
 0x184   : > { %6771 = vmatprep.subr.bf16.mxu0 %v12592_v23  ;;  %7115 = vmatprep.subr.bf16.mxu1 %v12594_v24  ;;  %v12641_v23 = vcombine.low %v850_v9, %v854_v10  ;;  %v12648_v24 = vcombine.high %v857_v15, %v861_v16  ;;  %v12650_v25 = vcombine.high %v858_v18, %v862_v21  ;;  %v909_v9 = vld [vmem:[%s14566_s22 + $0xee0] sm:$0xff]  ;;  %v906_v10 = vld [vmem:[%s14566_s22 + $0xec8] sm:$0xff] }
 0x187   : > { %6772 = vmatpush1.bf16.msra.mxu0 %v12591_v28  ;;  %7116 = vmatpush1.bf16.msra.mxu1 %v12593_v30  ;;  %v870_v28 = vld [vmem:[%s14566_s22 + $0xda8] sm:$0xff]  ;;  %v12647_v30 = vcombine.low %v857_v15, %v861_v16  ;;  %v913_v16 = vld [vmem:[%s14566_s22 + $0xf00] sm:$0xff] }
 0x188   : > { %6773 = vmatprep.subr.bf16.mxu0 %v12600_v33  ;;  %7117 = vmatprep.subr.bf16.mxu1 %v12602_v34  ;;  %v12649_v33 = vcombine.low %v858_v18, %v862_v21  ;;  %v12656_v34 = vcombine.high %v865_v55, %v869_v26  ;;  %v12658_v35 = vcombine.high %v866_v27, %v870_v28  ;;  %v917_v18 = vld [vmem:[%s14566_s22 + $0xf20] sm:$0xff]  ;;  %v914_v21 = vld [vmem:[%s14566_s22 + $0xf08] sm:$0xff] }
 0x18b   : > { %6774 = vmatpush1.bf16.msra.mxu0 %v12599_v38  ;;  %7118 = vmatpush1.bf16.msra.mxu1 %v12601_v39  ;;  %v878_v38 = vld [vmem:[%s14566_s22 + $0xde8] sm:$0xff]  ;;  %v12655_v39 = vcombine.low %v865_v55, %v869_v26  ;;  %v921_v26 = vld [vmem:[%s14566_s22 + $0xf40] sm:$0xff] }
 0x18c   : > { %6786 = vmatprep.subr.bf16.mxu0 %v12608_v40  ;;  %7130 = vmatprep.subr.bf16.mxu1 %v12610_v41  ;;  %v12657_v40 = vcombine.low %v866_v27, %v870_v28  ;;  %v12664_v41 = vcombine.high %v873_v36, %v877_v37  ;;  %v12666_v42 = vcombine.high %v874_v19, %v878_v38  ;;  %v925_v27 = vld [vmem:[%s14566_s22 + $0xf60] sm:$0xff]  ;;  %v922_v28 = vld [vmem:[%s14566_s22 + $0xf48] sm:$0xff] }
 0x18e   : > { %6776 = vmatmul.mubr.bf16.vlgmr.msra.gmra.mrb[0].mxu0 %v14835_v45  ;;  %7120 = vmatmul.mubr.bf16.vlgmr.msra.gmra.mrb[0].mxu1 %v14835_v45 }
 0x18f   : > { %6787 = vmatpush1.bf16.msra.mxu0 %v12607_v49  ;;  %7131 = vmatpush1.bf16.msra.mxu1 %v12609_v50  ;;  %v886_v49 = vld [vmem:[%s14566_s22 + $0xe28] sm:$0xff]  ;;  %v12663_v50 = vcombine.low %v873_v36, %v877_v37  ;;  %v929_v37 = vld [vmem:[%s14566_s22 + $0xf80] sm:$0xff] }
 0x190   : > { %6788 = vmatprep.subr.bf16.mxu0 %v12616_v51  ;;  %7132 = vmatprep.subr.bf16.mxu1 %v12618_v52  ;;  %v12665_v51 = vcombine.low %v874_v19, %v878_v38  ;;  %v12672_v52 = vcombine.high %v881_v43, %v885_v44  ;;  %v12674_v53 = vcombine.high %v882_v46, %v886_v49  ;;  %v933_v19 = vld [vmem:[%s14566_s22 + $0xfa0] sm:$0xff]  ;;  %v930_v38 = vld [vmem:[%s14566_s22 + $0xf88] sm:$0xff] }
 0x191   : > { %6818 = vmatprep.mubr.bf16.mxu0 %v14848_v32  ;;  %7162 = vmatprep.mubr.bf16.mxu1 %v14848_v32 }
 0x193   : > { %6789 = vmatpush1.bf16.msra.mxu0 %v12615_v58  ;;  %7133 = vmatpush1.bf16.msra.mxu1 %v12617_v59  ;;  %v894_v58 = vld [vmem:[%s14566_s22 + $0xe68] sm:$0xff]  ;;  %v12671_v59 = vcombine.low %v881_v43, %v885_v44  ;;  %v937_v44 = vld [vmem:[%s14566_s22 + $0xfc0] sm:$0xff] }
 0x194   : > { %6790 = vmatprep.subr.bf16.mxu0 %v12624_v61  ;;  %7134 = vmatprep.subr.bf16.mxu1 %v12626_v62  ;;  %v12673_v61 = vcombine.low %v882_v46, %v886_v49  ;;  %v12680_v62 = vcombine.high %v889_v31, %v893_v54  ;;  %v12682_v63 = vcombine.high %v890_v57, %v894_v58  ;;  %v941_v46 = vld [vmem:[%s14566_s22 + $0xfe0] sm:$0xff]  ;;  %v938_v49 = vld [vmem:[%s14566_s22 + $0xfc8] sm:$0xff] }
 0x197   : > { %6791 = vmatpush1.bf16.msra.mxu0 %v12623_v3  ;;  %7135 = vmatpush1.bf16.msra.mxu1 %v12625_v4  ;;  %v902_v3 = vld [vmem:[%s14566_s22 + $0xea8] sm:$0xff]  ;;  %v12679_v4 = vcombine.low %v889_v31, %v893_v54  ;;  %v945_v54 = vld [vmem:[%s14566_s22 + $0x1000] sm:$0xff] }
 0x198   : > { %6792 = vmatprep.subr.bf16.mxu0 %v12632_v5  ;;  %7136 = vmatprep.subr.bf16.mxu1 %v12634_v6  ;;  %v12681_v5 = vcombine.low %v890_v57, %v894_v58  ;;  %v12688_v6 = vcombine.high %v897_v0, %v901_v1  ;;  %v12690_v7 = vcombine.high %v898_v2, %v902_v3  ;;  %v949_v57 = vld [vmem:[%s14566_s22 + $0x1020] sm:$0xff]  ;;  %v946_v58 = vld [vmem:[%s14566_s22 + $0x1008] sm:$0xff] }
 0x19b   : > { %6793 = vmatpush1.bf16.msra.mxu0 %v12631_v11  ;;  %7137 = vmatpush1.bf16.msra.mxu1 %v12633_v12  ;;  %v910_v11 = vld [vmem:[%s14566_s22 + $0xee8] sm:$0xff]  ;;  %v12687_v12 = vcombine.low %v897_v0, %v901_v1  ;;  %v953_v1 = vld [vmem:[%s14566_s22 + $0x1040] sm:$0xff] }
 0x19c   : > { %6794 = vmatprep.subr.bf16.mxu0 %v12640_v13  ;;  %7138 = vmatprep.subr.bf16.mxu1 %v12642_v14  ;;  %v12689_v13 = vcombine.low %v898_v2, %v902_v3  ;;  %v12696_v14 = vcombine.high %v905_v8, %v909_v9  ;;  %v12698_v15 = vcombine.high %v906_v10, %v910_v11  ;;  %v957_v2 = vld [vmem:[%s14566_s22 + $0x1060] sm:$0xff]  ;;  %v954_v3 = vld [vmem:[%s14566_s22 + $0x1048] sm:$0xff] }
 0x19f   : > { %6795 = vmatpush1.bf16.msra.mxu0 %v12639_v22  ;;  %7139 = vmatpush1.bf16.msra.mxu1 %v12641_v23  ;;  %v918_v22 = vld [vmem:[%s14566_s22 + $0xf28] sm:$0xff]  ;;  %v12695_v23 = vcombine.low %v905_v8, %v909_v9  ;;  %v12735_v8 = vcombine.low %v945_v54, %v949_v57 }
 0x1a0   : > { %6796 = vmatprep.subr.bf16.mxu0 %v12648_v24  ;;  %7140 = vmatprep.subr.bf16.mxu1 %v12650_v25  ;;  %v12697_v24 = vcombine.low %v906_v10, %v910_v11  ;;  %v12704_v25 = vcombine.high %v913_v16, %v917_v18  ;;  %v12706_v55 = vcombine.high %v914_v21, %v918_v22 }
 0x1a1   : > { %v12744_v10 = vcombine.high %v953_v1, %v957_v2 }
 0x1a3   : > { %6797 = vmatpush1.bf16.msra.mxu0 %v12647_v30  ;;  %7141 = vmatpush1.bf16.msra.mxu1 %v12649_v33  ;;  %v926_v30 = vld [vmem:[%s14566_s22 + $0xf68] sm:$0xff]  ;;  %v12703_v33 = vcombine.low %v913_v16, %v917_v18 }
 0x1a4   : > { %6798 = vmatprep.subr.bf16.mxu0 %v12656_v34  ;;  %7142 = vmatprep.subr.bf16.mxu1 %v12658_v35  ;;  %v12705_v34 = vcombine.low %v914_v21, %v918_v22  ;;  %v12712_v35 = vcombine.high %v921_v26, %v925_v27  ;;  %v12714_v36 = vcombine.high %v922_v28, %v926_v30  ;;  %v969_v22 = vld [vmem:[%s14566_s22 + $0x10c0] sm:$0xff] }
 0x1a7   : > { %6799 = vmatpush1.bf16.msra.mxu0 %v12655_v39  ;;  %7143 = vmatpush1.bf16.msra.mxu1 %v12657_v40  ;;  %v934_v39 = vld [vmem:[%s14566_s22 + $0xfa8] sm:$0xff]  ;;  %v12711_v40 = vcombine.low %v921_v26, %v925_v27 }
 0x1a8   : > { %6800 = vmatprep.subr.bf16.mxu0 %v12664_v41  ;;  %7144 = vmatprep.subr.bf16.mxu1 %v12666_v42  ;;  %v12713_v41 = vcombine.low %v922_v28, %v926_v30  ;;  %v12720_v42 = vcombine.high %v929_v37, %v933_v19  ;;  %v12722_v43 = vcombine.high %v930_v38, %v934_v39  ;;  %v977_v30 = vld [vmem:[%s14566_s22 + $0x1100] sm:$0xff] }
 0x1ab   : > { %6801 = vmatpush1.bf16.msra.mxu0 %v12663_v50  ;;  %7145 = vmatpush1.bf16.msra.mxu1 %v12665_v51  ;;  %v942_v50 = vld [vmem:[%s14566_s22 + $0xfe8] sm:$0xff]  ;;  %v12719_v51 = vcombine.low %v929_v37, %v933_v19 }
 0x1ac   : > { %6802 = vmatprep.subr.bf16.mxu0 %v12672_v52  ;;  %7146 = vmatprep.subr.bf16.mxu1 %v12674_v53  ;;  %v12721_v52 = vcombine.low %v930_v38, %v934_v39  ;;  %v12728_v53 = vcombine.high %v937_v44, %v941_v46  ;;  %v12730_v31 = vcombine.high %v938_v49, %v942_v50  ;;  %v985_v39 = vld [vmem:[%s14566_s22 + $0x1140] sm:$0xff] }
 0x1af   : > { %6803 = vmatpush1.bf16.msra.mxu0 %v12671_v59  ;;  %7147 = vmatpush1.bf16.msra.mxu1 %v12673_v61  ;;  %v950_v59 = vld [vmem:[%s14566_s22 + $0x1028] sm:$0xff]  ;;  %v12727_v61 = vcombine.low %v937_v44, %v941_v46 }
 0x1b0   : > { %6804 = vmatprep.subr.bf16.mxu0 %v12680_v62  ;;  %7148 = vmatprep.subr.bf16.mxu1 %v12682_v63  ;;  %v12729_v62 = vcombine.low %v938_v49, %v942_v50  ;;  %v12736_v63 = vcombine.high %v945_v54, %v949_v57  ;;  %v12738_v0 = vcombine.high %v946_v58, %v950_v59  ;;  %v993_v50 = vld [vmem:[%s14566_s22 + $0x1180] sm:$0xff] }
 0x1b1   : > { %v12737_v9 = vcombine.low %v946_v58, %v950_v59  ;;  %v1001_v59 = vld [vmem:[%s14566_s22 + $0x11c0] sm:$0xff] }
 0x1b3   : > { %6805 = vmatpush1.bf16.msra.mxu0 %v12679_v4  ;;  %7149 = vmatpush1.bf16.msra.mxu1 %v12681_v5  ;;  %v14917_v4 = vcombine.low %v14839_v47, %v14842_v48  ;;  %v958_v5 = vld [vmem:[%s14566_s22 + $0x1068] sm:$0xff]  ;;  %v965_v47 = vld [vmem:[%s14566_s22 + $0x10a0] sm:$0xff] }
 0x1b4   : > { %6806 = vmatprep.subr.bf16.mxu0 %v12688_v6  ;;  %7150 = vmatprep.subr.bf16.mxu1 %v12690_v7  ;;  %v14921_v6 = vld [vmem:[%s14559_s12 + $0x20] sm:$0xff]  ;;  %v12746_v11 = vcombine.high %v954_v3, %v958_v5  ;;  %v12745_v16 = vcombine.low %v954_v3, %v958_v5 }
 0x1b5   : > { %v14924_v7 = vld [vmem:[%s14559_s12 + $0x60] sm:$0xff] }
 0x1b6   : > { %v14930_v48 = vcombine.high %v14921_v6, %v14924_v7  ;;  %v1009_v5 = vld [vmem:[%s14566_s22 + $0x1200] sm:$0xff] }
 0x1b7   : > { %6807 = vmatpush1.bf16.msra.mxu0 %v12687_v12  ;;  %7151 = vmatpush1.bf16.msra.mxu1 %v12689_v13  ;;  %v961_v12 = vld [vmem:[%s14566_s22 + $0x1080] sm:$0xff]  ;;  %v962_v13 = vld [vmem:[%s14566_s22 + $0x1088] sm:$0xff] }
 0x1b8   : > { %6808 = vmatprep.subr.bf16.mxu0 %v12696_v14  ;;  %7152 = vmatprep.subr.bf16.mxu1 %v12698_v15  ;;  %v966_v14 = vld [vmem:[%s14566_s22 + $0x10a8] sm:$0xff]  ;;  %v12743_v15 = vcombine.low %v953_v1, %v957_v2  ;;  %v12752_v18 = vcombine.high %v961_v12, %v965_v47 }
 0x1b9   : > { %v12754_v21 = vcombine.high %v962_v13, %v966_v14  ;;  %v12753_v26 = vcombine.low %v962_v13, %v966_v14  ;;  %v1017_v14 = vld [vmem:[%s14566_s22 + $0x1240] sm:$0xff] }
 0x1bb   : > { %6809 = vmatpush1.bf16.msra.mxu0 %v12695_v23  ;;  %7153 = vmatpush1.bf16.msra.mxu1 %v12697_v24  ;;  %v973_v23 = vld [vmem:[%s14566_s22 + $0x10e0] sm:$0xff]  ;;  %v970_v24 = vld [vmem:[%s14566_s22 + $0x10c8] sm:$0xff] }
 0x1bc   : > { %6810 = vmatprep.subr.bf16.mxu0 %v12704_v25  ;;  %7154 = vmatprep.subr.bf16.mxu1 %v12706_v55  ;;  %v974_v25 = vld [vmem:[%s14566_s22 + $0x10e8] sm:$0xff]  ;;  %v12751_v55 = vcombine.low %v961_v12, %v965_v47  ;;  %v12760_v27 = vcombine.high %v969_v22, %v973_v23 }
 0x1bd   : > { %v12762_v28 = vcombine.high %v970_v24, %v974_v25  ;;  %v12761_v37 = vcombine.low %v970_v24, %v974_v25  ;;  %v1025_v25 = vld [vmem:[%s14566_s22 + $0x1280] sm:$0xff] }
 0x1bf   : > { %6811 = vmatpush1.bf16.msra.mxu0 %v12703_v33  ;;  %7155 = vmatpush1.bf16.msra.mxu1 %v12705_v34  ;;  %v981_v33 = vld [vmem:[%s14566_s22 + $0x1120] sm:$0xff]  ;;  %v978_v34 = vld [vmem:[%s14566_s22 + $0x1108] sm:$0xff] }
 0x1c0   : > { %6812 = vmatprep.subr.bf16.mxu0 %v12712_v35  ;;  %7156 = vmatprep.subr.bf16.mxu1 %v12714_v36  ;;  %v982_v35 = vld [vmem:[%s14566_s22 + $0x1128] sm:$0xff]  ;;  %v12759_v36 = vcombine.low %v969_v22, %v973_v23  ;;  %v12768_v19 = vcombine.high %v977_v30, %v981_v33 }
 0x1c1   : > { %v12770_v38 = vcombine.high %v978_v34, %v982_v35  ;;  %v12769_v44 = vcombine.low %v978_v34, %v982_v35  ;;  %v1033_v35 = vld [vmem:[%s14566_s22 + $0x12c0] sm:$0xff] }
 0x1c3   : > { %6813 = vmatpush1.bf16.msra.mxu0 %v12711_v40  ;;  %7157 = vmatpush1.bf16.msra.mxu1 %v12713_v41  ;;  %v989_v40 = vld [vmem:[%s14566_s22 + $0x1160] sm:$0xff]  ;;  %v986_v41 = vld [vmem:[%s14566_s22 + $0x1148] sm:$0xff] }
 0x1c4   : > { %6814 = vmatprep.subr.bf16.mxu0 %v12720_v42  ;;  %7158 = vmatprep.subr.bf16.mxu1 %v12722_v43  ;;  %v990_v42 = vld [vmem:[%s14566_s22 + $0x1168] sm:$0xff]  ;;  %v12767_v43 = vcombine.low %v977_v30, %v981_v33  ;;  %v12776_v46 = vcombine.high %v985_v39, %v989_v40 }
 0x1c5   : > { %v12778_v49 = vcombine.high %v986_v41, %v990_v42  ;;  %v12777_v54 = vcombine.low %v986_v41, %v990_v42  ;;  %v1041_v42 = vld [vmem:[%s14566_s22 + $0x1300] sm:$0xff] }
 0x1c7   : > { %6815 = vmatpush1.bf16.msra.mxu0 %v12719_v51  ;;  %7159 = vmatpush1.bf16.msra.mxu1 %v12721_v52  ;;  %v997_v51 = vld [vmem:[%s14566_s22 + $0x11a0] sm:$0xff]  ;;  %v994_v52 = vld [vmem:[%s14566_s22 + $0x1188] sm:$0xff] }
 0x1c8   : > { %6816 = vmatprep.subr.bf16.mxu0 %v12728_v53  ;;  %7160 = vmatprep.subr.bf16.mxu1 %v12730_v31  ;;  %v998_v53 = vld [vmem:[%s14566_s22 + $0x11a8] sm:$0xff]  ;;  %v12775_v31 = vcombine.low %v985_v39, %v989_v40  ;;  %v12784_v57 = vcombine.high %v993_v50, %v997_v51 }
 0x1c9   : > { %v12786_v58 = vcombine.high %v994_v52, %v998_v53  ;;  %v12785_v1 = vcombine.low %v994_v52, %v998_v53  ;;  %v1049_v53 = vld [vmem:[%s14566_s22 + $0x1340] sm:$0xff] }
 0x1cb   : > { %6817 = vmatpush1.bf16.msra.mxu0 %v12727_v61  ;;  %7161 = vmatpush1.bf16.msra.mxu1 %v12729_v62  ;;  %v1005_v61 = vld [vmem:[%s14566_s22 + $0x11e0] sm:$0xff]  ;;  %v1002_v62 = vld [vmem:[%s14566_s22 + $0x11c8] sm:$0xff] }
 0x1cc   : > { %6829 = vmatprep.subr.bf16.mxu0 %v12736_v63  ;;  %7173 = vmatprep.subr.bf16.mxu1 %v12738_v0  ;;  %v1006_v63 = vld [vmem:[%s14566_s22 + $0x11e8] sm:$0xff]  ;;  %v12783_v0 = vcombine.low %v993_v50, %v997_v51  ;;  %v12792_v2 = vcombine.high %v1001_v59, %v1005_v61 }
 0x1cd   : > { %v12794_v3 = vcombine.high %v1002_v62, %v1006_v63  ;;  %v12793_v12 = vcombine.low %v1002_v62, %v1006_v63  ;;  %v1057_v63 = vld [vmem:[%s14566_s22 + $0x1380] sm:$0xff] }
 0x1ce   : > { %6819 = vmatmul.mubr.bf16.vlgmr.msra.gmra.mrb[0].mxu0 %v14917_v4  ;;  %7163 = vmatmul.mubr.bf16.vlgmr.msra.gmra.mrb[0].mxu1 %v14917_v4 }
 0x1cf   : > { %6830 = vmatpush1.bf16.msra.mxu0 %v12735_v8  ;;  %7174 = vmatpush1.bf16.msra.mxu1 %v12737_v9  ;;  %v1013_v8 = vld [vmem:[%s14566_s22 + $0x1220] sm:$0xff]  ;;  %v1010_v9 = vld [vmem:[%s14566_s22 + $0x1208] sm:$0xff] }
 0x1d0   : > { %6831 = vmatprep.subr.bf16.mxu0 %v12744_v10  ;;  %7175 = vmatprep.subr.bf16.mxu1 %v12746_v11  ;;  %v1014_v10 = vld [vmem:[%s14566_s22 + $0x1228] sm:$0xff]  ;;  %v12791_v11 = vcombine.low %v1001_v59, %v1005_v61  ;;  %v12800_v47 = vcombine.high %v1009_v5, %v1013_v8 }
 0x1d1   : > { %6861 = vmatprep.mubr.bf16.mxu0 %v14930_v48  ;;  %7205 = vmatprep.mubr.bf16.mxu1 %v14930_v48  ;;  %v12802_v13 = vcombine.high %v1010_v9, %v1014_v10  ;;  %v12801_v22 = vcombine.low %v1010_v9, %v1014_v10  ;;  %v1065_v10 = vld [vmem:[%s14566_s22 + $0x13c0] sm:$0xff] }
 0x1d3   : > { %6832 = vmatpush1.bf16.msra.mxu0 %v12743_v15  ;;  %7176 = vmatpush1.bf16.msra.mxu1 %v12745_v16  ;;  %v1021_v15 = vld [vmem:[%s14566_s22 + $0x1260] sm:$0xff]  ;;  %v1018_v16 = vld [vmem:[%s14566_s22 + $0x1248] sm:$0xff] }
 0x1d4   : > { %6833 = vmatprep.subr.bf16.mxu0 %v12752_v18  ;;  %7177 = vmatprep.subr.bf16.mxu1 %v12754_v21  ;;  %v1022_v18 = vld [vmem:[%s14566_s22 + $0x1268] sm:$0xff]  ;;  %v12799_v21 = vcombine.low %v1009_v5, %v1013_v8  ;;  %v12808_v23 = vcombine.high %v1017_v14, %v1021_v15 }
 0x1d5   : > { %v12810_v24 = vcombine.high %v1018_v16, %v1022_v18  ;;  %v12809_v30 = vcombine.low %v1018_v16, %v1022_v18  ;;  %v1073_v18 = vld [vmem:[%s14566_s22 + $0x1400] sm:$0xff] }
 0x1d7   : > { %6834 = vmatpush1.bf16.msra.mxu0 %v12751_v55  ;;  %7178 = vmatpush1.bf16.msra.mxu1 %v12753_v26  ;;  %v1029_v55 = vld [vmem:[%s14566_s22 + $0x12a0] sm:$0xff]  ;;  %v1026_v26 = vld [vmem:[%s14566_s22 + $0x1288] sm:$0xff] }
 0x1d8   : > { %6835 = vmatprep.subr.bf16.mxu0 %v12760_v27  ;;  %7179 = vmatprep.subr.bf16.mxu1 %v12762_v28  ;;  %v1030_v27 = vld [vmem:[%s14566_s22 + $0x12a8] sm:$0xff]  ;;  %v12807_v28 = vcombine.low %v1017_v14, %v1021_v15  ;;  %v12816_v33 = vcombine.high %v1025_v25, %v1029_v55 }
 0x1d9   : > { %v12818_v34 = vcombine.high %v1026_v26, %v1030_v27  ;;  %v12817_v39 = vcombine.low %v1026_v26, %v1030_v27  ;;  %v1081_v27 = vld [vmem:[%s14566_s22 + $0x1440] sm:$0xff] }
 0x1db   : > { %6836 = vmatpush1.bf16.msra.mxu0 %v12759_v36  ;;  %7180 = vmatpush1.bf16.msra.mxu1 %v12761_v37  ;;  %v1037_v36 = vld [vmem:[%s14566_s22 + $0x12e0] sm:$0xff]  ;;  %v1034_v37 = vld [vmem:[%s14566_s22 + $0x12c8] sm:$0xff] }
 0x1dc   : > { %6837 = vmatprep.subr.bf16.mxu0 %v12768_v19  ;;  %7181 = vmatprep.subr.bf16.mxu1 %v12770_v38  ;;  %v1038_v19 = vld [vmem:[%s14566_s22 + $0x12e8] sm:$0xff]  ;;  %v12815_v38 = vcombine.low %v1025_v25, %v1029_v55  ;;  %v12824_v40 = vcombine.high %v1033_v35, %v1037_v36 }
 0x1dd   : > { %v12826_v41 = vcombine.high %v1034_v37, %v1038_v19  ;;  %v12825_v50 = vcombine.low %v1034_v37, %v1038_v19 }
 0x1df   : > { %6838 = vmatpush1.bf16.msra.mxu0 %v12767_v43  ;;  %7182 = vmatpush1.bf16.msra.mxu1 %v12769_v44  ;;  %v1045_v43 = vld [vmem:[%s14566_s22 + $0x1320] sm:$0xff]  ;;  %v1042_v44 = vld [vmem:[%s14566_s22 + $0x1308] sm:$0xff] }
 0x1e0   : > { %6839 = vmatprep.subr.bf16.mxu0 %v12776_v46  ;;  %7183 = vmatprep.subr.bf16.mxu1 %v12778_v49  ;;  %v1046_v46 = vld [vmem:[%s14566_s22 + $0x1328] sm:$0xff]  ;;  %v12823_v49 = vcombine.low %v1033_v35, %v1037_v36  ;;  %v12832_v51 = vcombine.high %v1041_v42, %v1045_v43 }
 0x1e1   : > { %v12834_v52 = vcombine.high %v1042_v44, %v1046_v46  ;;  %v12833_v59 = vcombine.low %v1042_v44, %v1046_v46  ;;  %v15003_v35 = vld [vmem:[%s14559_s12 + $0x28] sm:$0xff] }
 0x1e2   : > { %v15006_v36 = vld [vmem:[%s14559_s12 + $0x68] sm:$0xff] }
 0x1e3   : > { %6840 = vmatpush1.bf16.msra.mxu0 %v12775_v31  ;;  %7184 = vmatpush1.bf16.msra.mxu1 %v12777_v54  ;;  %v1053_v31 = vld [vmem:[%s14566_s22 + $0x1360] sm:$0xff]  ;;  %v1050_v54 = vld [vmem:[%s14566_s22 + $0x1348] sm:$0xff] }
 0x1e4   : > { %6841 = vmatprep.subr.bf16.mxu0 %v12784_v57  ;;  %7185 = vmatprep.subr.bf16.mxu1 %v12786_v58  ;;  %v1054_v57 = vld [vmem:[%s14566_s22 + $0x1368] sm:$0xff]  ;;  %v12831_v58 = vcombine.low %v1041_v42, %v1045_v43  ;;  %v12840_v61 = vcombine.high %v1049_v53, %v1053_v31 }
 0x1e5   : > { %v12842_v62 = vcombine.high %v1050_v54, %v1054_v57  ;;  %v12841_v5 = vcombine.low %v1050_v54, %v1054_v57  ;;  %v1094_v42 = vld [vmem:[%s14566_s22 + $0x14a8] sm:$0xff] }
 0x1e7   : > { %6842 = vmatpush1.bf16.msra.mxu0 %v12783_v0  ;;  %7186 = vmatpush1.bf16.msra.mxu1 %v12785_v1  ;;  %v1061_v0 = vld [vmem:[%s14566_s22 + $0x13a0] sm:$0xff]  ;;  %v1058_v1 = vld [vmem:[%s14566_s22 + $0x1388] sm:$0xff] }
 0x1e8   : > { %6843 = vmatprep.subr.bf16.mxu0 %v12792_v2  ;;  %7187 = vmatprep.subr.bf16.mxu1 %v12794_v3  ;;  %v1062_v2 = vld [vmem:[%s14566_s22 + $0x13a8] sm:$0xff]  ;;  %v12839_v3 = vcombine.low %v1049_v53, %v1053_v31  ;;  %v12848_v8 = vcombine.high %v1057_v63, %v1061_v0 }
 0x1e9   : > { %v12850_v9 = vcombine.high %v1058_v1, %v1062_v2  ;;  %v12849_v14 = vcombine.low %v1058_v1, %v1062_v2  ;;  %v1102_v53 = vld [vmem:[%s14566_s22 + $0x14e8] sm:$0xff] }
 0x1eb   : > { %6844 = vmatpush1.bf16.msra.mxu0 %v12791_v11  ;;  %7188 = vmatpush1.bf16.msra.mxu1 %v12793_v12  ;;  %v1069_v11 = vld [vmem:[%s14566_s22 + $0x13e0] sm:$0xff]  ;;  %v1066_v12 = vld [vmem:[%s14566_s22 + $0x13c8] sm:$0xff] }
 0x1ec   : > { %6845 = vmatprep.subr.bf16.mxu0 %v12800_v47  ;;  %7189 = vmatprep.subr.bf16.mxu1 %v12802_v13  ;;  %v1070_v47 = vld [vmem:[%s14566_s22 + $0x13e8] sm:$0xff]  ;;  %v12847_v13 = vcombine.low %v1057_v63, %v1061_v0  ;;  %v12856_v15 = vcombine.high %v1065_v10, %v1069_v11 }
 0x1ed   : > { %v12858_v16 = vcombine.high %v1066_v12, %v1070_v47  ;;  %v12857_v25 = vcombine.low %v1066_v12, %v1070_v47  ;;  %v1110_v63 = vld [vmem:[%s14566_s22 + $0x1528] sm:$0xff] }
 0x1ef   : > { %6846 = vmatpush1.bf16.msra.mxu0 %v12799_v21  ;;  %7190 = vmatpush1.bf16.msra.mxu1 %v12801_v22  ;;  %v1077_v21 = vld [vmem:[%s14566_s22 + $0x1420] sm:$0xff]  ;;  %v1074_v22 = vld [vmem:[%s14566_s22 + $0x1408] sm:$0xff] }
 0x1f0   : > { %6847 = vmatprep.subr.bf16.mxu0 %v12808_v23  ;;  %7191 = vmatprep.subr.bf16.mxu1 %v12810_v24  ;;  %v1078_v23 = vld [vmem:[%s14566_s22 + $0x1428] sm:$0xff]  ;;  %v12855_v24 = vcombine.low %v1065_v10, %v1069_v11  ;;  %v12864_v55 = vcombine.high %v1073_v18, %v1077_v21  ;;  %v12863_v37 = vcombine.low %v1073_v18, %v1077_v21 }
 0x1f1   : > { %v12866_v26 = vcombine.high %v1074_v22, %v1078_v23  ;;  %v12865_v19 = vcombine.low %v1074_v22, %v1078_v23  ;;  %v1118_v10 = vld [vmem:[%s14566_s22 + $0x1568] sm:$0xff] }
 0x1f2   : > { %v1126_v18 = vld [vmem:[%s14566_s22 + $0x15a8] sm:$0xff] }
 0x1f3   : > { %6848 = vmatpush1.bf16.msra.mxu0 %v12807_v28  ;;  %7192 = vmatpush1.bf16.msra.mxu1 %v12809_v30  ;;  %v1085_v28 = vld [vmem:[%s14566_s22 + $0x1460] sm:$0xff]  ;;  %v1082_v30 = vld [vmem:[%s14566_s22 + $0x1448] sm:$0xff] }
 0x1f4   : > { %6849 = vmatprep.subr.bf16.mxu0 %v12816_v33  ;;  %7193 = vmatprep.subr.bf16.mxu1 %v12818_v34  ;;  %v14999_v33 = vcombine.low %v14921_v6, %v14924_v7  ;;  %v1086_v34 = vld [vmem:[%s14566_s22 + $0x1468] sm:$0xff]  ;;  %v1093_v6 = vld [vmem:[%s14566_s22 + $0x14a0] sm:$0xff]  ;;  %v15012_v7 = vcombine.high %v15003_v35, %v15006_v36  ;;  %v12871_v43 = vcombine.low %v1081_v27, %v1085_v28 }
 0x1f5   : > { %v12873_v44 = vcombine.low %v1082_v30, %v1086_v34 }
 0x1f7   : > { %6850 = vmatpush1.bf16.msra.mxu0 %v12815_v38  ;;  %7194 = vmatpush1.bf16.msra.mxu1 %v12817_v39  ;;  %v12872_v38 = vcombine.high %v1081_v27, %v1085_v28  ;;  %v12874_v39 = vcombine.high %v1082_v30, %v1086_v34  ;;  %v1134_v27 = vld [vmem:[%s14566_s22 + $0x15e8] sm:$0xff] }
 0x1f8   : > { %6851 = vmatprep.subr.bf16.mxu0 %v12824_v40  ;;  %7195 = vmatprep.subr.bf16.mxu1 %v12826_v41  ;;  %v1089_v40 = vld [vmem:[%s14566_s22 + $0x1480] sm:$0xff]  ;;  %v1090_v41 = vld [vmem:[%s14566_s22 + $0x1488] sm:$0xff] }
 0x1f9   : > { %v12880_v46 = vcombine.high %v1089_v40, %v1093_v6  ;;  %v12879_v31 = vcombine.low %v1089_v40, %v1093_v6  ;;  %v12881_v54 = vcombine.low %v1090_v41, %v1094_v42  ;;  %v1142_v40 = vld [vmem:[%s14566_s22 + $0x1628] sm:$0xff] }
 0x1fb   : > { %6852 = vmatpush1.bf16.msra.mxu0 %v12823_v49  ;;  %7196 = vmatpush1.bf16.msra.mxu1 %v12825_v50  ;;  %v12882_v49 = vcombine.high %v1090_v41, %v1094_v42  ;;  %v1097_v50 = vld [vmem:[%s14566_s22 + $0x14c0] sm:$0xff] }
 0x1fc   : > { %6853 = vmatprep.subr.bf16.mxu0 %v12832_v51  ;;  %7197 = vmatprep.subr.bf16.mxu1 %v12834_v52  ;;  %v1101_v51 = vld [vmem:[%s14566_s22 + $0x14e0] sm:$0xff]  ;;  %v1098_v52 = vld [vmem:[%s14566_s22 + $0x14c8] sm:$0xff] }
 0x1fd   : > { %v12888_v57 = vcombine.high %v1097_v50, %v1101_v51  ;;  %v12887_v0 = vcombine.low %v1097_v50, %v1101_v51  ;;  %v12889_v1 = vcombine.low %v1098_v52, %v1102_v53  ;;  %v1150_v50 = vld [vmem:[%s14566_s22 + $0x1668] sm:$0xff] }
 0x1ff   : > { %6854 = vmatpush1.bf16.msra.mxu0 %v12831_v58  ;;  %7198 = vmatpush1.bf16.msra.mxu1 %v12833_v59  ;;  %v12890_v58 = vcombine.high %v1098_v52, %v1102_v53  ;;  %v1105_v59 = vld [vmem:[%s14566_s22 + $0x1500] sm:$0xff] }
 0x200   : > { %6855 = vmatprep.subr.bf16.mxu0 %v12840_v61  ;;  %7199 = vmatprep.subr.bf16.mxu1 %v12842_v62  ;;  %v1109_v61 = vld [vmem:[%s14566_s22 + $0x1520] sm:$0xff]  ;;  %v1106_v62 = vld [vmem:[%s14566_s22 + $0x1508] sm:$0xff] }
 0x201   : > { %v12896_v2 = vcombine.high %v1105_v59, %v1109_v61  ;;  %v12895_v11 = vcombine.low %v1105_v59, %v1109_v61  ;;  %v12897_v12 = vcombine.low %v1106_v62, %v1110_v63  ;;  %v1158_v59 = vld [vmem:[%s14566_s22 + $0x16a8] sm:$0xff] }
 0x203   : > { %6856 = vmatpush1.bf16.msra.mxu0 %v12839_v3  ;;  %7200 = vmatpush1.bf16.msra.mxu1 %v12841_v5  ;;  %v12898_v3 = vcombine.high %v1106_v62, %v1110_v63  ;;  %v1113_v5 = vld [vmem:[%s14566_s22 + $0x1540] sm:$0xff] }
 0x204   : > { %6857 = vmatprep.subr.bf16.mxu0 %v12848_v8  ;;  %7201 = vmatprep.subr.bf16.mxu1 %v12850_v9  ;;  %v1117_v8 = vld [vmem:[%s14566_s22 + $0x1560] sm:$0xff]  ;;  %v1114_v9 = vld [vmem:[%s14566_s22 + $0x1548] sm:$0xff] }
 0x205   : > { %v12904_v47 = vcombine.high %v1113_v5, %v1117_v8  ;;  %v12903_v21 = vcombine.low %v1113_v5, %v1117_v8  ;;  %v12905_v22 = vcombine.low %v1114_v9, %v1118_v10  ;;  %v1166_v5 = vld [vmem:[%s14566_s22 + $0x16e8] sm:$0xff] }
 0x207   : > { %6858 = vmatpush1.bf16.msra.mxu0 %v12847_v13  ;;  %7202 = vmatpush1.bf16.msra.mxu1 %v12849_v14  ;;  %v12906_v13 = vcombine.high %v1114_v9, %v1118_v10  ;;  %v1121_v14 = vld [vmem:[%s14566_s22 + $0x1580] sm:$0xff] }
 0x208   : > { %6859 = vmatprep.subr.bf16.mxu0 %v12856_v15  ;;  %7203 = vmatprep.subr.bf16.mxu1 %v12858_v16  ;;  %v1125_v15 = vld [vmem:[%s14566_s22 + $0x15a0] sm:$0xff]  ;;  %v1122_v16 = vld [vmem:[%s14566_s22 + $0x1588] sm:$0xff] }
 0x209   : > { %v12912_v23 = vcombine.high %v1121_v14, %v1125_v15  ;;  %v12911_v28 = vcombine.low %v1121_v14, %v1125_v15  ;;  %v12913_v30 = vcombine.low %v1122_v16, %v1126_v18  ;;  %v1174_v14 = vld [vmem:[%s14566_s22 + $0x1728] sm:$0xff] }
 0x20b   : > { %6860 = vmatpush1.bf16.msra.mxu0 %v12855_v24  ;;  %7204 = vmatpush1.bf16.msra.mxu1 %v12857_v25  ;;  %v12914_v24 = vcombine.high %v1122_v16, %v1126_v18  ;;  %v1129_v25 = vld [vmem:[%s14566_s22 + $0x15c0] sm:$0xff] }
 0x20c   : > { %6872 = vmatprep.subr.bf16.mxu0 %v12864_v55  ;;  %7216 = vmatprep.subr.bf16.mxu1 %v12866_v26  ;;  %v1133_v55 = vld [vmem:[%s14566_s22 + $0x15e0] sm:$0xff]  ;;  %v1130_v26 = vld [vmem:[%s14566_s22 + $0x15c8] sm:$0xff] }
 0x20d   : > { %v12920_v34 = vcombine.high %v1129_v25, %v1133_v55  ;;  %v12919_v6 = vcombine.low %v1129_v25, %v1133_v55  ;;  %v12921_v41 = vcombine.low %v1130_v26, %v1134_v27  ;;  %v1182_v25 = vld [vmem:[%s14566_s22 + $0x1768] sm:$0xff] }
 0x20e   : > { %6862 = vmatmul.mubr.bf16.vlgmr.msra.gmra.mrb[0].mxu0 %v14999_v33  ;;  %7206 = vmatmul.mubr.bf16.vlgmr.msra.gmra.mrb[0].mxu1 %v14999_v33 }
 0x20f   : > { %6873 = vmatpush1.bf16.msra.mxu0 %v12863_v37  ;;  %7217 = vmatpush1.bf16.msra.mxu1 %v12865_v19  ;;  %v12922_v37 = vcombine.high %v1130_v26, %v1134_v27  ;;  %v1137_v19 = vld [vmem:[%s14566_s22 + $0x1600] sm:$0xff] }
 0x210   : > { %6874 = vmatprep.subr.bf16.mxu0 %v12872_v38  ;;  %7218 = vmatprep.subr.bf16.mxu1 %v12874_v39  ;;  %v1141_v38 = vld [vmem:[%s14566_s22 + $0x1620] sm:$0xff]  ;;  %v1138_v39 = vld [vmem:[%s14566_s22 + $0x1608] sm:$0xff] }
 0x211   : > { %6904 = vmatprep.mubr.bf16.mxu0 %v15012_v7  ;;  %7248 = vmatprep.mubr.bf16.mxu1 %v15012_v7  ;;  %v12928_v42 = vcombine.high %v1137_v19, %v1141_v38  ;;  %v12927_v51 = vcombine.low %v1137_v19, %v1141_v38  ;;  %v12929_v52 = vcombine.low %v1138_v39, %v1142_v40  ;;  %v1190_v19 = vld [vmem:[%s14566_s22 + $0x17a8] sm:$0xff] }
 0x213   : > { %6875 = vmatpush1.bf16.msra.mxu0 %v12871_v43  ;;  %7219 = vmatpush1.bf16.msra.mxu1 %v12873_v44  ;;  %v12930_v43 = vcombine.high %v1138_v39, %v1142_v40  ;;  %v1145_v44 = vld [vmem:[%s14566_s22 + $0x1640] sm:$0xff] }
 0x214   : > { %6876 = vmatprep.subr.bf16.mxu0 %v12880_v46  ;;  %7220 = vmatprep.subr.bf16.mxu1 %v12882_v49  ;;  %v1149_v46 = vld [vmem:[%s14566_s22 + $0x1660] sm:$0xff]  ;;  %v1146_v49 = vld [vmem:[%s14566_s22 + $0x1648] sm:$0xff] }
 0x215   : > { %v12936_v53 = vcombine.high %v1145_v44, %v1149_v46  ;;  %v12935_v61 = vcombine.low %v1145_v44, %v1149_v46  ;;  %v12937_v62 = vcombine.low %v1146_v49, %v1150_v50  ;;  %v1198_v44 = vld [vmem:[%s14566_s22 + $0x17e8] sm:$0xff] }
 0x217   : > { %6877 = vmatpush1.bf16.msra.mxu0 %v12879_v31  ;;  %7221 = vmatpush1.bf16.msra.mxu1 %v12881_v54  ;;  %v12938_v31 = vcombine.high %v1146_v49, %v1150_v50  ;;  %v1153_v54 = vld [vmem:[%s14566_s22 + $0x1680] sm:$0xff] }
 0x218   : > { %6878 = vmatprep.subr.bf16.mxu0 %v12888_v57  ;;  %7222 = vmatprep.subr.bf16.mxu1 %v12890_v58  ;;  %v1157_v57 = vld [vmem:[%s14566_s22 + $0x16a0] sm:$0xff]  ;;  %v1154_v58 = vld [vmem:[%s14566_s22 + $0x1688] sm:$0xff] }
 0x219   : > { %v12944_v63 = vcombine.high %v1153_v54, %v1157_v57  ;;  %v12943_v8 = vcombine.low %v1153_v54, %v1157_v57  ;;  %v12945_v9 = vcombine.low %v1154_v58, %v1158_v59  ;;  %v1206_v54 = vld [vmem:[%s14566_s22 + $0x1828] sm:$0xff] }
 0x21b   : > { %6879 = vmatpush1.bf16.msra.mxu0 %v12887_v0  ;;  %7223 = vmatpush1.bf16.msra.mxu1 %v12889_v1  ;;  %v12946_v0 = vcombine.high %v1154_v58, %v1158_v59  ;;  %v1161_v1 = vld [vmem:[%s14566_s22 + $0x16c0] sm:$0xff] }
 0x21c   : > { %6880 = vmatprep.subr.bf16.mxu0 %v12896_v2  ;;  %7224 = vmatprep.subr.bf16.mxu1 %v12898_v3  ;;  %v1165_v2 = vld [vmem:[%s14566_s22 + $0x16e0] sm:$0xff]  ;;  %v1162_v3 = vld [vmem:[%s14566_s22 + $0x16c8] sm:$0xff] }
 0x21d   : > { %v12952_v10 = vcombine.high %v1161_v1, %v1165_v2  ;;  %v12951_v15 = vcombine.low %v1161_v1, %v1165_v2  ;;  %v12953_v16 = vcombine.low %v1162_v3, %v1166_v5  ;;  %v15081_v1 = vcombine.low %v15003_v35, %v15006_v36  ;;  %v1214_v2 = vld [vmem:[%s14566_s22 + $0x1868] sm:$0xff]  ;;  %v1221_v35 = vld [vmem:[%s14566_s22 + $0x18a0] sm:$0xff] }
 0x21f   : > { %6881 = vmatpush1.bf16.msra.mxu0 %v12895_v11  ;;  %7225 = vmatpush1.bf16.msra.mxu1 %v12897_v12  ;;  %v12954_v11 = vcombine.high %v1162_v3, %v1166_v5  ;;  %v1169_v12 = vld [vmem:[%s14566_s22 + $0x1700] sm:$0xff]  ;;  %v15085_v3 = vld [vmem:[%s14559_s12 + $0x30] sm:$0xff] }
 0x220   : > { %6882 = vmatprep.subr.bf16.mxu0 %v12904_v47  ;;  %7226 = vmatprep.subr.bf16.mxu1 %v12906_v13  ;;  %v1173_v47 = vld [vmem:[%s14566_s22 + $0x1720] sm:$0xff]  ;;  %v1170_v13 = vld [vmem:[%s14566_s22 + $0x1708] sm:$0xff]  ;;  %v15088_v5 = vld [vmem:[%s14559_s12 + $0x70] sm:$0xff] }
 0x221   : > { %v12960_v18 = vcombine.high %v1169_v12, %v1173_v47  ;;  %v12959_v55 = vcombine.low %v1169_v12, %v1173_v47  ;;  %v12961_v26 = vcombine.low %v1170_v13, %v1174_v14  ;;  %v1217_v12 = vld [vmem:[%s14566_s22 + $0x1880] sm:$0xff]  ;;  %v15094_v36 = vcombine.high %v15085_v3, %v15088_v5  ;;  %v1218_v47 = vld [vmem:[%s14566_s22 + $0x1888] sm:$0xff] }
 0x223   : > { %6883 = vmatpush1.bf16.msra.mxu0 %v12903_v21  ;;  %7227 = vmatpush1.bf16.msra.mxu1 %v12905_v22  ;;  %v12962_v21 = vcombine.high %v1170_v13, %v1174_v14  ;;  %v1177_v22 = vld [vmem:[%s14566_s22 + $0x1740] sm:$0xff]  ;;  %v1222_v13 = vld [vmem:[%s14566_s22 + $0x18a8] sm:$0xff] }
 0x224   : > { %6884 = vmatprep.subr.bf16.mxu0 %v12912_v23  ;;  %7228 = vmatprep.subr.bf16.mxu1 %v12914_v24  ;;  %v1181_v23 = vld [vmem:[%s14566_s22 + $0x1760] sm:$0xff]  ;;  %v1178_v24 = vld [vmem:[%s14566_s22 + $0x1748] sm:$0xff] }
 0x225   : > { %v12968_v27 = vcombine.high %v1177_v22, %v1181_v23  ;;  %v12967_v38 = vcombine.low %v1177_v22, %v1181_v23  ;;  %v12969_v39 = vcombine.low %v1178_v24, %v1182_v25  ;;  %v1229_v22 = vld [vmem:[%s14566_s22 + $0x18e0] sm:$0xff]  ;;  %v1226_v23 = vld [vmem:[%s14566_s22 + $0x18c8] sm:$0xff] }
 0x227   : > { %6885 = vmatpush1.bf16.msra.mxu0 %v12911_v28  ;;  %7229 = vmatpush1.bf16.msra.mxu1 %v12913_v30  ;;  %v12970_v28 = vcombine.high %v1178_v24, %v1182_v25  ;;  %v1185_v30 = vld [vmem:[%s14566_s22 + $0x1780] sm:$0xff]  ;;  %v1230_v24 = vld [vmem:[%s14566_s22 + $0x18e8] sm:$0xff]  ;;  %v13007_v25 = vcombine.low %v1217_v12, %v1221_v35 }
 0x228   : > { %6886 = vmatprep.subr.bf16.mxu0 %v12920_v34  ;;  %7230 = vmatprep.subr.bf16.mxu1 %v12922_v37  ;;  %v1189_v34 = vld [vmem:[%s14566_s22 + $0x17a0] sm:$0xff]  ;;  %v1186_v37 = vld [vmem:[%s14566_s22 + $0x1788] sm:$0xff] }
 0x229   : > { %v12976_v40 = vcombine.high %v1185_v30, %v1189_v34  ;;  %v12975_v46 = vcombine.low %v1185_v30, %v1189_v34  ;;  %v12977_v49 = vcombine.low %v1186_v37, %v1190_v19  ;;  %v1237_v30 = vld [vmem:[%s14566_s22 + $0x1920] sm:$0xff]  ;;  %v1234_v34 = vld [vmem:[%s14566_s22 + $0x1908] sm:$0xff] }
 0x22b   : > { %6887 = vmatpush1.bf16.msra.mxu0 %v12919_v6  ;;  %7231 = vmatpush1.bf16.msra.mxu1 %v12921_v41  ;;  %v12978_v6 = vcombine.high %v1186_v37, %v1190_v19  ;;  %v1193_v41 = vld [vmem:[%s14566_s22 + $0x17c0] sm:$0xff]  ;;  %v1238_v37 = vld [vmem:[%s14566_s22 + $0x1928] sm:$0xff] }
 0x22c   : > { %6888 = vmatprep.subr.bf16.mxu0 %v12928_v42  ;;  %7232 = vmatprep.subr.bf16.mxu1 %v12930_v43  ;;  %v1197_v42 = vld [vmem:[%s14566_s22 + $0x17e0] sm:$0xff]  ;;  %v1194_v43 = vld [vmem:[%s14566_s22 + $0x17c8] sm:$0xff] }
 0x22d   : > { %v12984_v50 = vcombine.high %v1193_v41, %v1197_v42  ;;  %v12983_v57 = vcombine.low %v1193_v41, %v1197_v42  ;;  %v12985_v58 = vcombine.low %v1194_v43, %v1198_v44  ;;  %v1245_v41 = vld [vmem:[%s14566_s22 + $0x1960] sm:$0xff]  ;;  %v1242_v42 = vld [vmem:[%s14566_s22 + $0x1948] sm:$0xff] }
 0x22f   : > { %6889 = vmatpush1.bf16.msra.mxu0 %v12927_v51  ;;  %7233 = vmatpush1.bf16.msra.mxu1 %v12929_v52  ;;  %v12986_v51 = vcombine.high %v1194_v43, %v1198_v44  ;;  %v1201_v52 = vld [vmem:[%s14566_s22 + $0x1800] sm:$0xff]  ;;  %v1246_v43 = vld [vmem:[%s14566_s22 + $0x1968] sm:$0xff] }
 0x230   : > { %6890 = vmatprep.subr.bf16.mxu0 %v12936_v53  ;;  %7234 = vmatprep.subr.bf16.mxu1 %v12938_v31  ;;  %v1205_v53 = vld [vmem:[%s14566_s22 + $0x1820] sm:$0xff]  ;;  %v1202_v31 = vld [vmem:[%s14566_s22 + $0x1808] sm:$0xff] }
 0x231   : > { %v12992_v59 = vcombine.high %v1201_v52, %v1205_v53 }
 0x233   : > { %6891 = vmatpush1.bf16.msra.mxu0 %v12935_v61  ;;  %7235 = vmatpush1.bf16.msra.mxu1 %v12937_v62  ;;  %v12994_v61 = vcombine.high %v1202_v31, %v1206_v54  ;;  %v1209_v62 = vld [vmem:[%s14566_s22 + $0x1840] sm:$0xff] }
 0x234   : > { %6892 = vmatprep.subr.bf16.mxu0 %v12944_v63  ;;  %7236 = vmatprep.subr.bf16.mxu1 %v12946_v0  ;;  %v1213_v63 = vld [vmem:[%s14566_s22 + $0x1860] sm:$0xff]  ;;  %v1210_v0 = vld [vmem:[%s14566_s22 + $0x1848] sm:$0xff] }
 0x235   : > { %v12999_v14 = vcombine.low %v1209_v62, %v1213_v63 }
 0x237   : > { %6893 = vmatpush1.bf16.msra.mxu0 %v12943_v8  ;;  %7237 = vmatpush1.bf16.msra.mxu1 %v12945_v9  ;;  %v12991_v8 = vcombine.low %v1201_v52, %v1205_v53  ;;  %v12993_v9 = vcombine.low %v1202_v31, %v1206_v54  ;;  %v1253_v52 = vld [vmem:[%s14566_s22 + $0x19a0] sm:$0xff]  ;;  %v1250_v53 = vld [vmem:[%s14566_s22 + $0x1988] sm:$0xff] }
 0x238   : > { %6894 = vmatprep.subr.bf16.mxu0 %v12952_v10  ;;  %7238 = vmatprep.subr.bf16.mxu1 %v12954_v11  ;;  %v13000_v10 = vcombine.high %v1209_v62, %v1213_v63  ;;  %v13002_v11 = vcombine.high %v1210_v0, %v1214_v2  ;;  %v1254_v31 = vld [vmem:[%s14566_s22 + $0x19a8] sm:$0xff]  ;;  %v1261_v62 = vld [vmem:[%s14566_s22 + $0x19e0] sm:$0xff] }
 0x239   : > { %v1258_v63 = vld [vmem:[%s14566_s22 + $0x19c8] sm:$0xff] }
 0x23b   : > { %6895 = vmatpush1.bf16.msra.mxu0 %v12951_v15  ;;  %7239 = vmatpush1.bf16.msra.mxu1 %v12953_v16  ;;  %v13001_v15 = vcombine.low %v1210_v0, %v1214_v2  ;;  %v13008_v16 = vcombine.high %v1217_v12, %v1221_v35  ;;  %v1262_v0 = vld [vmem:[%s14566_s22 + $0x19e8] sm:$0xff]  ;;  %v1269_v12 = vld [vmem:[%s14566_s22 + $0x1a20] sm:$0xff] }
 0x23c   : > { %6896 = vmatprep.subr.bf16.mxu0 %v12960_v18  ;;  %7240 = vmatprep.subr.bf16.mxu1 %v12962_v21  ;;  %v13010_v18 = vcombine.high %v1218_v47, %v1222_v13  ;;  %v1225_v21 = vld [vmem:[%s14566_s22 + $0x18c0] sm:$0xff]  ;;  %v1266_v35 = vld [vmem:[%s14566_s22 + $0x1a08] sm:$0xff] }
 0x23d   : > { %v13015_v19 = vcombine.low %v1225_v21, %v1229_v22 }
 0x23f   : > { %6897 = vmatpush1.bf16.msra.mxu0 %v12959_v55  ;;  %7241 = vmatpush1.bf16.msra.mxu1 %v12961_v26  ;;  %v13009_v55 = vcombine.low %v1218_v47, %v1222_v13  ;;  %v13016_v26 = vcombine.high %v1225_v21, %v1229_v22  ;;  %v1270_v47 = vld [vmem:[%s14566_s22 + $0x1a28] sm:$0xff]  ;;  %v1277_v21 = vld [vmem:[%s14566_s22 + $0x1a60] sm:$0xff] }
 0x240   : > { %6898 = vmatprep.subr.bf16.mxu0 %v12968_v27  ;;  %7242 = vmatprep.subr.bf16.mxu1 %v12970_v28  ;;  %v13018_v27 = vcombine.high %v1226_v23, %v1230_v24  ;;  %v1233_v28 = vld [vmem:[%s14566_s22 + $0x1900] sm:$0xff]  ;;  %v1274_v22 = vld [vmem:[%s14566_s22 + $0x1a48] sm:$0xff] }
 0x241   : > { %v13023_v44 = vcombine.low %v1233_v28, %v1237_v30 }
 0x243   : > { %6899 = vmatpush1.bf16.msra.mxu0 %v12967_v38  ;;  %7243 = vmatpush1.bf16.msra.mxu1 %v12969_v39  ;;  %v13017_v38 = vcombine.low %v1226_v23, %v1230_v24  ;;  %v13024_v39 = vcombine.high %v1233_v28, %v1237_v30  ;;  %v1278_v23 = vld [vmem:[%s14566_s22 + $0x1a68] sm:$0xff]  ;;  %v1285_v28 = vld [vmem:[%s14566_s22 + $0x1aa0] sm:$0xff] }
 0x244   : > { %6900 = vmatprep.subr.bf16.mxu0 %v12976_v40  ;;  %7244 = vmatprep.subr.bf16.mxu1 %v12978_v6  ;;  %v13026_v40 = vcombine.high %v1234_v34, %v1238_v37  ;;  %v1241_v6 = vld [vmem:[%s14566_s22 + $0x1940] sm:$0xff]  ;;  %v1282_v30 = vld [vmem:[%s14566_s22 + $0x1a88] sm:$0xff] }
 0x245   : > { %v13031_v54 = vcombine.low %v1241_v6, %v1245_v41 }
 0x247   : > { %6901 = vmatpush1.bf16.msra.mxu0 %v12975_v46  ;;  %7245 = vmatpush1.bf16.msra.mxu1 %v12977_v49  ;;  %v13025_v46 = vcombine.low %v1234_v34, %v1238_v37  ;;  %v13032_v49 = vcombine.high %v1241_v6, %v1245_v41  ;;  %v1286_v34 = vld [vmem:[%s14566_s22 + $0x1aa8] sm:$0xff]  ;;  %v1293_v6 = vld [vmem:[%s14566_s22 + $0x1ae0] sm:$0xff] }
 0x248   : > { %6902 = vmatprep.subr.bf16.mxu0 %v12984_v50  ;;  %7246 = vmatprep.subr.bf16.mxu1 %v12986_v51  ;;  %v13034_v50 = vcombine.high %v1242_v42, %v1246_v43  ;;  %v1249_v51 = vld [vmem:[%s14566_s22 + $0x1980] sm:$0xff]  ;;  %v1290_v41 = vld [vmem:[%s14566_s22 + $0x1ac8] sm:$0xff] }
 0x249   : > { %v13039_v2 = vcombine.low %v1249_v51, %v1253_v52 }
 0x24b   : > { %6903 = vmatpush1.bf16.msra.mxu0 %v12983_v57  ;;  %7247 = vmatpush1.bf16.msra.mxu1 %v12985_v58  ;;  %v13033_v57 = vcombine.low %v1242_v42, %v1246_v43  ;;  %v13040_v58 = vcombine.high %v1249_v51, %v1253_v52  ;;  %v1294_v42 = vld [vmem:[%s14566_s22 + $0x1ae8] sm:$0xff]  ;;  %v1301_v51 = vld [vmem:[%s14566_s22 + $0x1b20] sm:$0xff] }
 0x24c   : > { %6915 = vmatprep.subr.bf16.mxu0 %v12992_v59  ;;  %7259 = vmatprep.subr.bf16.mxu1 %v12994_v61  ;;  %v13042_v59 = vcombine.high %v1250_v53, %v1254_v31  ;;  %v1257_v61 = vld [vmem:[%s14566_s22 + $0x19c0] sm:$0xff]  ;;  %v1298_v52 = vld [vmem:[%s14566_s22 + $0x1b08] sm:$0xff] }
 0x24d   : > { %v13047_v13 = vcombine.low %v1257_v61, %v1261_v62 }
 0x24e   : > { %6905 = vmatmul.mubr.bf16.vlgmr.msra.gmra.mrb[0].mxu0 %v15081_v1  ;;  %7249 = vmatmul.mubr.bf16.vlgmr.msra.gmra.mrb[0].mxu1 %v15081_v1 }
 0x24f   : > { %6916 = vmatpush1.bf16.msra.mxu0 %v12991_v8  ;;  %7260 = vmatpush1.bf16.msra.mxu1 %v12993_v9  ;;  %v13041_v8 = vcombine.low %v1250_v53, %v1254_v31  ;;  %v13048_v9 = vcombine.high %v1257_v61, %v1261_v62  ;;  %v1302_v53 = vld [vmem:[%s14566_s22 + $0x1b28] sm:$0xff]  ;;  %v1309_v61 = vld [vmem:[%s14566_s22 + $0x1b60] sm:$0xff] }
 0x250   : > { %6917 = vmatprep.subr.bf16.mxu0 %v13000_v10  ;;  %7261 = vmatprep.subr.bf16.mxu1 %v13002_v11  ;;  %v13050_v10 = vcombine.high %v1258_v63, %v1262_v0  ;;  %v1265_v11 = vld [vmem:[%s14566_s22 + $0x1a00] sm:$0xff]  ;;  %v1306_v62 = vld [vmem:[%s14566_s22 + $0x1b48] sm:$0xff] }
 0x251   : > { %6947 = vmatprep.mubr.bf16.mxu0 %v15094_v36  ;;  %7291 = vmatprep.mubr.bf16.mxu1 %v15094_v36  ;;  %v13055_v24 = vcombine.low %v1265_v11, %v1269_v12 }
 0x253   : > { %6918 = vmatpush1.bf16.msra.mxu0 %v12999_v14  ;;  %7262 = vmatpush1.bf16.msra.mxu1 %v13001_v15  ;;  %v13049_v14 = vcombine.low %v1258_v63, %v1262_v0  ;;  %v13056_v15 = vcombine.high %v1265_v11, %v1269_v12  ;;  %v1310_v63 = vld [vmem:[%s14566_s22 + $0x1b68] sm:$0xff]  ;;  %v1317_v11 = vld [vmem:[%s14566_s22 + $0x1ba0] sm:$0xff] }
 0x254   : > { %6919 = vmatprep.subr.bf16.mxu0 %v13008_v16  ;;  %7263 = vmatprep.subr.bf16.mxu1 %v13010_v18  ;;  %v13058_v16 = vcombine.high %v1266_v35, %v1270_v47  ;;  %v1273_v18 = vld [vmem:[%s14566_s22 + $0x1a40] sm:$0xff]  ;;  %v1314_v12 = vld [vmem:[%s14566_s22 + $0x1b88] sm:$0xff] }
 0x255   : > { %v13063_v37 = vcombine.low %v1273_v18, %v1277_v21 }
 0x257   : > { %6920 = vmatpush1.bf16.msra.mxu0 %v13007_v25  ;;  %7264 = vmatpush1.bf16.msra.mxu1 %v13009_v55  ;;  %v13057_v25 = vcombine.low %v1266_v35, %v1270_v47  ;;  %v13064_v55 = vcombine.high %v1273_v18, %v1277_v21  ;;  %v1318_v35 = vld [vmem:[%s14566_s22 + $0x1ba8] sm:$0xff]  ;;  %v1325_v18 = vld [vmem:[%s14566_s22 + $0x1be0] sm:$0xff] }
 0x258   : > { %6921 = vmatprep.subr.bf16.mxu0 %v13016_v26  ;;  %7265 = vmatprep.subr.bf16.mxu1 %v13018_v27  ;;  %v13066_v26 = vcombine.high %v1274_v22, %v1278_v23  ;;  %v1281_v27 = vld [vmem:[%s14566_s22 + $0x1a80] sm:$0xff]  ;;  %v1322_v21 = vld [vmem:[%s14566_s22 + $0x1bc8] sm:$0xff] }
 0x259   : > { %v13071_v43 = vcombine.low %v1281_v27, %v1285_v28 }
 0x25b   : > { %6922 = vmatpush1.bf16.msra.mxu0 %v13015_v19  ;;  %7266 = vmatpush1.bf16.msra.mxu1 %v13017_v38  ;;  %v13065_v19 = vcombine.low %v1274_v22, %v1278_v23  ;;  %v13072_v38 = vcombine.high %v1281_v27, %v1285_v28  ;;  %v1326_v22 = vld [vmem:[%s14566_s22 + $0x1be8] sm:$0xff]  ;;  %v1333_v27 = vld [vmem:[%s14566_s22 + $0x1c20] sm:$0xff] }
 0x25c   : > { %6923 = vmatprep.subr.bf16.mxu0 %v13024_v39  ;;  %7267 = vmatprep.subr.bf16.mxu1 %v13026_v40  ;;  %v13074_v39 = vcombine.high %v1282_v30, %v1286_v34  ;;  %v1289_v40 = vld [vmem:[%s14566_s22 + $0x1ac0] sm:$0xff]  ;;  %v1330_v28 = vld [vmem:[%s14566_s22 + $0x1c08] sm:$0xff] }
 0x25d   : > { %v13079_v31 = vcombine.low %v1289_v40, %v1293_v6 }
 0x25f   : > { %6924 = vmatpush1.bf16.msra.mxu0 %v13023_v44  ;;  %7268 = vmatpush1.bf16.msra.mxu1 %v13025_v46  ;;  %v13073_v44 = vcombine.low %v1282_v30, %v1286_v34  ;;  %v13080_v46 = vcombine.high %v1289_v40, %v1293_v6  ;;  %v1334_v30 = vld [vmem:[%s14566_s22 + $0x1c28] sm:$0xff]  ;;  %v1341_v40 = vld [vmem:[%s14566_s22 + $0x1c60] sm:$0xff] }
 0x260   : > { %6925 = vmatprep.subr.bf16.mxu0 %v13032_v49  ;;  %7269 = vmatprep.subr.bf16.mxu1 %v13034_v50  ;;  %v13082_v49 = vcombine.high %v1290_v41, %v1294_v42  ;;  %v1297_v50 = vld [vmem:[%s14566_s22 + $0x1b00] sm:$0xff]  ;;  %v1338_v6 = vld [vmem:[%s14566_s22 + $0x1c48] sm:$0xff] }
 0x261   : > { %v13087_v0 = vcombine.low %v1297_v50, %v1301_v51 }
 0x263   : > { %6926 = vmatpush1.bf16.msra.mxu0 %v13031_v54  ;;  %7270 = vmatpush1.bf16.msra.mxu1 %v13033_v57  ;;  %v13081_v54 = vcombine.low %v1290_v41, %v1294_v42  ;;  %v13088_v57 = vcombine.high %v1297_v50, %v1301_v51  ;;  %v15163_v41 = vcombine.low %v15085_v3, %v15088_v5  ;;  %v1342_v42 = vld [vmem:[%s14566_s22 + $0x1c68] sm:$0xff]  ;;  %v1349_v3 = vld [vmem:[%s14566_s22 + $0x1ca0] sm:$0xff] }
 0x264   : > { %6927 = vmatprep.subr.bf16.mxu0 %v13040_v58  ;;  %7271 = vmatprep.subr.bf16.mxu1 %v13042_v59  ;;  %v13090_v58 = vcombine.high %v1298_v52, %v1302_v53  ;;  %v1305_v59 = vld [vmem:[%s14566_s22 + $0x1b40] sm:$0xff]  ;;  %v13130_v51 = vcombine.high %v1338_v6, %v1342_v42 }
 0x265   : > { %v13095_v47 = vcombine.low %v1305_v59, %v1309_v61 }
 0x267   : > { %6928 = vmatpush1.bf16.msra.mxu0 %v13039_v2  ;;  %7272 = vmatpush1.bf16.msra.mxu1 %v13041_v8  ;;  %v13089_v2 = vcombine.low %v1298_v52, %v1302_v53  ;;  %v13096_v8 = vcombine.high %v1305_v59, %v1309_v61  ;;  %v1345_v52 = vld [vmem:[%s14566_s22 + $0x1c80] sm:$0xff]  ;;  %v1346_v53 = vld [vmem:[%s14566_s22 + $0x1c88] sm:$0xff] }
 0x268   : > { %6929 = vmatprep.subr.bf16.mxu0 %v13048_v9  ;;  %7273 = vmatprep.subr.bf16.mxu1 %v13050_v10  ;;  %v13098_v9 = vcombine.high %v1306_v62, %v1310_v63  ;;  %v1313_v10 = vld [vmem:[%s14566_s22 + $0x1b80] sm:$0xff] }
 0x269   : > { %v13103_v23 = vcombine.low %v1313_v10, %v1317_v11  ;;  %v1353_v61 = vld [vmem:[%s14566_s22 + $0x1cc0] sm:$0xff] }
 0x26b   : > { %6930 = vmatpush1.bf16.msra.mxu0 %v13047_v13  ;;  %7274 = vmatpush1.bf16.msra.mxu1 %v13049_v14  ;;  %v13097_v13 = vcombine.low %v1306_v62, %v1310_v63  ;;  %v13104_v14 = vcombine.high %v1313_v10, %v1317_v11  ;;  %v1357_v62 = vld [vmem:[%s14566_s22 + $0x1ce0] sm:$0xff]  ;;  %v1354_v63 = vld [vmem:[%s14566_s22 + $0x1cc8] sm:$0xff] }
 0x26c   : > { %6931 = vmatprep.subr.bf16.mxu0 %v13056_v15  ;;  %7275 = vmatprep.subr.bf16.mxu1 %v13058_v16  ;;  %v13106_v15 = vcombine.high %v1314_v12, %v1318_v35  ;;  %v1321_v16 = vld [vmem:[%s14566_s22 + $0x1bc0] sm:$0xff] }
 0x26d   : > { %v13111_v34 = vcombine.low %v1321_v16, %v1325_v18  ;;  %v1361_v11 = vld [vmem:[%s14566_s22 + $0x1d00] sm:$0xff] }
 0x26f   : > { %6932 = vmatpush1.bf16.msra.mxu0 %v13055_v24  ;;  %7276 = vmatpush1.bf16.msra.mxu1 %v13057_v25  ;;  %v13105_v24 = vcombine.low %v1314_v12, %v1318_v35  ;;  %v13112_v25 = vcombine.high %v1321_v16, %v1325_v18  ;;  %v1365_v12 = vld [vmem:[%s14566_s22 + $0x1d20] sm:$0xff]  ;;  %v1362_v35 = vld [vmem:[%s14566_s22 + $0x1d08] sm:$0xff] }
 0x270   : > { %6933 = vmatprep.subr.bf16.mxu0 %v13064_v55  ;;  %7277 = vmatprep.subr.bf16.mxu1 %v13066_v26  ;;  %v13114_v55 = vcombine.high %v1322_v21, %v1326_v22  ;;  %v1329_v26 = vld [vmem:[%s14566_s22 + $0x1c00] sm:$0xff] }
 0x271   : > { %v1369_v18 = vld [vmem:[%s14566_s22 + $0x1d40] sm:$0xff] }
 0x273   : > { %6934 = vmatpush1.bf16.msra.mxu0 %v13063_v37  ;;  %7278 = vmatpush1.bf16.msra.mxu1 %v13065_v19  ;;  %v13113_v37 = vcombine.low %v1322_v21, %v1326_v22  ;;  %v13120_v19 = vcombine.high %v1329_v26, %v1333_v27  ;;  %v1373_v21 = vld [vmem:[%s14566_s22 + $0x1d60] sm:$0xff]  ;;  %v1370_v22 = vld [vmem:[%s14566_s22 + $0x1d48] sm:$0xff] }
 0x274   : > { %6935 = vmatprep.subr.bf16.mxu0 %v13072_v38  ;;  %7279 = vmatprep.subr.bf16.mxu1 %v13074_v39  ;;  %v13122_v38 = vcombine.high %v1330_v28, %v1334_v30  ;;  %v1337_v39 = vld [vmem:[%s14566_s22 + $0x1c40] sm:$0xff] }
 0x275   : > { %v13128_v50 = vcombine.high %v1337_v39, %v1341_v40 }
 0x277   : > { %6936 = vmatpush1.bf16.msra.mxu0 %v13071_v43  ;;  %7280 = vmatpush1.bf16.msra.mxu1 %v13073_v44  ;;  %v15167_v43 = vld [vmem:[%s14559_s12 + $0x38] sm:$0xff] }
 0x278   : > { %6937 = vmatprep.subr.bf16.mxu0 %v13080_v46  ;;  %7281 = vmatprep.subr.bf16.mxu1 %v13082_v49  ;;  %v15170_v44 = vld [vmem:[%s14559_s12 + $0x78] sm:$0xff]  ;;  %v13119_v46 = vcombine.low %v1329_v26, %v1333_v27  ;;  %v13121_v49 = vcombine.low %v1330_v28, %v1334_v30  ;;  %v1377_v27 = vld [vmem:[%s14566_s22 + $0x1d80] sm:$0xff]  ;;  %v1378_v30 = vld [vmem:[%s14566_s22 + $0x1d88] sm:$0xff] }
 0x279   : > { %v15176_v5 = vcombine.high %v15167_v43, %v15170_v44  ;;  %v1381_v28 = vld [vmem:[%s14566_s22 + $0x1da0] sm:$0xff] }
 0x27b   : > { %6938 = vmatpush1.bf16.msra.mxu0 %v13079_v31  ;;  %7282 = vmatpush1.bf16.msra.mxu1 %v13081_v54  ;;  %v1350_v31 = vld [vmem:[%s14566_s22 + $0x1ca8] sm:$0xff]  ;;  %v13127_v54 = vcombine.low %v1337_v39, %v1341_v40  ;;  %v1385_v40 = vld [vmem:[%s14566_s22 + $0x1dc0] sm:$0xff] }
 0x27c   : > { %6939 = vmatprep.subr.bf16.mxu0 %v13088_v57  ;;  %7283 = vmatprep.subr.bf16.mxu1 %v13090_v58  ;;  %v13129_v57 = vcombine.low %v1338_v6, %v1342_v42  ;;  %v13136_v58 = vcombine.high %v1345_v52, %v1349_v3  ;;  %v13138_v59 = vcombine.high %v1346_v53, %v1350_v31  ;;  %v1389_v6 = vld [vmem:[%s14566_s22 + $0x1de0] sm:$0xff]  ;;  %v1386_v42 = vld [vmem:[%s14566_s22 + $0x1dc8] sm:$0xff] }
 0x27f   : > { %6940 = vmatpush1.bf16.msra.mxu0 %v13087_v0  ;;  %7284 = vmatpush1.bf16.msra.mxu1 %v13089_v2  ;;  %v1358_v0 = vld [vmem:[%s14566_s22 + $0x1ce8] sm:$0xff]  ;;  %v13135_v2 = vcombine.low %v1345_v52, %v1349_v3  ;;  %v1393_v3 = vld [vmem:[%s14566_s22 + $0x1e00] sm:$0xff] }
 0x280   : > { %6941 = vmatprep.subr.bf16.mxu0 %v13096_v8  ;;  %7285 = vmatprep.subr.bf16.mxu1 %v13098_v9  ;;  %v13137_v8 = vcombine.low %v1346_v53, %v1350_v31  ;;  %v13144_v9 = vcombine.high %v1353_v61, %v1357_v62  ;;  %v13146_v10 = vcombine.high %v1354_v63, %v1358_v0  ;;  %v1397_v53 = vld [vmem:[%s14566_s22 + $0x1e20] sm:$0xff]  ;;  %v1394_v31 = vld [vmem:[%s14566_s22 + $0x1e08] sm:$0xff] }
 0x283   : > { %6942 = vmatpush1.bf16.msra.mxu0 %v13095_v47  ;;  %7286 = vmatpush1.bf16.msra.mxu1 %v13097_v13  ;;  %v1366_v47 = vld [vmem:[%s14566_s22 + $0x1d28] sm:$0xff]  ;;  %v13143_v13 = vcombine.low %v1353_v61, %v1357_v62  ;;  %v1401_v62 = vld [vmem:[%s14566_s22 + $0x1e40] sm:$0xff] }
 0x284   : > { %6943 = vmatprep.subr.bf16.mxu0 %v13104_v14  ;;  %7287 = vmatprep.subr.bf16.mxu1 %v13106_v15  ;;  %v13145_v14 = vcombine.low %v1354_v63, %v1358_v0  ;;  %v13152_v15 = vcombine.high %v1361_v11, %v1365_v12  ;;  %v13154_v16 = vcombine.high %v1362_v35, %v1366_v47  ;;  %v1405_v63 = vld [vmem:[%s14566_s22 + $0x1e60] sm:$0xff]  ;;  %v1402_v0 = vld [vmem:[%s14566_s22 + $0x1e48] sm:$0xff] }
 0x287   : > { %6944 = vmatpush1.bf16.msra.mxu0 %v13103_v23  ;;  %7288 = vmatpush1.bf16.msra.mxu1 %v13105_v24  ;;  %v1374_v23 = vld [vmem:[%s14566_s22 + $0x1d68] sm:$0xff]  ;;  %v13151_v24 = vcombine.low %v1361_v11, %v1365_v12  ;;  %v1409_v12 = vld [vmem:[%s14566_s22 + $0x1e80] sm:$0xff] }
 0x288   : > { %6945 = vmatprep.subr.bf16.mxu0 %v13112_v25  ;;  %7289 = vmatprep.subr.bf16.mxu1 %v13114_v55  ;;  %v13153_v25 = vcombine.low %v1362_v35, %v1366_v47  ;;  %v13160_v55 = vcombine.high %v1369_v18, %v1373_v21  ;;  %v13162_v26 = vcombine.high %v1370_v22, %v1374_v23  ;;  %v1413_v35 = vld [vmem:[%s14566_s22 + $0x1ea0] sm:$0xff]  ;;  %v1410_v47 = vld [vmem:[%s14566_s22 + $0x1e88] sm:$0xff] }
 0x28b   : > { %6946 = vmatpush1.bf16.msra.mxu0 %v13111_v34  ;;  %7290 = vmatpush1.bf16.msra.mxu1 %v13113_v37  ;;  %v1382_v34 = vld [vmem:[%s14566_s22 + $0x1da8] sm:$0xff]  ;;  %v13159_v37 = vcombine.low %v1369_v18, %v1373_v21  ;;  %v1417_v21 = vld [vmem:[%s14566_s22 + $0x1ec0] sm:$0xff] }
 0x28c   : > { %6958 = vmatprep.subr.bf16.mxu0 %v13120_v19  ;;  %7302 = vmatprep.subr.bf16.mxu1 %v13122_v38  ;;  %v13161_v19 = vcombine.low %v1370_v22, %v1374_v23  ;;  %v13168_v38 = vcombine.high %v1377_v27, %v1381_v28  ;;  %v13170_v39 = vcombine.high %v1378_v30, %v1382_v34  ;;  %v1421_v22 = vld [vmem:[%s14566_s22 + $0x1ee0] sm:$0xff]  ;;  %v1418_v23 = vld [vmem:[%s14566_s22 + $0x1ec8] sm:$0xff] }
 0x28e   : > { %6948 = vmatmul.mubr.bf16.vlgmr.msra.gmra.mrb[0].mxu0 %v15163_v41  ;;  %7292 = vmatmul.mubr.bf16.vlgmr.msra.gmra.mrb[0].mxu1 %v15163_v41 }
 0x28f   : > { %6959 = vmatpush1.bf16.msra.mxu0 %v13119_v46  ;;  %7303 = vmatpush1.bf16.msra.mxu1 %v13121_v49  ;;  %v1390_v46 = vld [vmem:[%s14566_s22 + $0x1de8] sm:$0xff]  ;;  %v13167_v49 = vcombine.low %v1377_v27, %v1381_v28  ;;  %v1425_v28 = vld [vmem:[%s14566_s22 + $0x1f00] sm:$0xff] }
 0x290   : > { %6960 = vmatprep.subr.bf16.mxu0 %v13128_v50  ;;  %7304 = vmatprep.subr.bf16.mxu1 %v13130_v51  ;;  %v13169_v50 = vcombine.low %v1378_v30, %v1382_v34  ;;  %v13176_v51 = vcombine.high %v1385_v40, %v1389_v6  ;;  %v13178_v52 = vcombine.high %v1386_v42, %v1390_v46  ;;  %v1429_v30 = vld [vmem:[%s14566_s22 + $0x1f20] sm:$0xff]  ;;  %v1426_v34 = vld [vmem:[%s14566_s22 + $0x1f08] sm:$0xff] }
 0x291   : > { %6990 = vmatprep.mubr.bf16.mxu0 %v15176_v5  ;;  %7334 = vmatprep.mubr.bf16.mxu1 %v15176_v5 }
 0x293   : > { %6961 = vmatpush1.bf16.msra.mxu0 %v13127_v54  ;;  %7305 = vmatpush1.bf16.msra.mxu1 %v13129_v57  ;;  %v1398_v54 = vld [vmem:[%s14566_s22 + $0x1e28] sm:$0xff]  ;;  %v13175_v57 = vcombine.low %v1385_v40, %v1389_v6  ;;  %v1433_v6 = vld [vmem:[%s14566_s22 + $0x1f40] sm:$0xff] }
 0x294   : > { %6962 = vmatprep.subr.bf16.mxu0 %v13136_v58  ;;  %7306 = vmatprep.subr.bf16.mxu1 %v13138_v59  ;;  %v13177_v58 = vcombine.low %v1386_v42, %v1390_v46  ;;  %v13184_v59 = vcombine.high %v1393_v3, %v1397_v53  ;;  %v13186_v61 = vcombine.high %v1394_v31, %v1398_v54  ;;  %v1437_v42 = vld [vmem:[%s14566_s22 + $0x1f60] sm:$0xff]  ;;  %v1434_v46 = vld [vmem:[%s14566_s22 + $0x1f48] sm:$0xff] }
 0x297   : > { %6963 = vmatpush1.bf16.msra.mxu0 %v13135_v2  ;;  %7307 = vmatpush1.bf16.msra.mxu1 %v13137_v8  ;;  %v1406_v2 = vld [vmem:[%s14566_s22 + $0x1e68] sm:$0xff]  ;;  %v13183_v8 = vcombine.low %v1393_v3, %v1397_v53  ;;  %v1441_v53 = vld [vmem:[%s14566_s22 + $0x1f80] sm:$0xff] }
 0x298   : > { %6964 = vmatprep.subr.bf16.mxu0 %v13144_v9  ;;  %7308 = vmatprep.subr.bf16.mxu1 %v13146_v10  ;;  %v13185_v9 = vcombine.low %v1394_v31, %v1398_v54  ;;  %v13192_v10 = vcombine.high %v1401_v62, %v1405_v63  ;;  %v13194_v11 = vcombine.high %v1402_v0, %v1406_v2  ;;  %v1445_v31 = vld [vmem:[%s14566_s22 + $0x1fa0] sm:$0xff]  ;;  %v1442_v54 = vld [vmem:[%s14566_s22 + $0x1f88] sm:$0xff] }
 0x29b   : > { %6965 = vmatpush1.bf16.msra.mxu0 %v13143_v13  ;;  %7309 = vmatpush1.bf16.msra.mxu1 %v13145_v14  ;;  %v1414_v13 = vld [vmem:[%s14566_s22 + $0x1ea8] sm:$0xff]  ;;  %v13191_v14 = vcombine.low %v1401_v62, %v1405_v63  ;;  %v1449_v63 = vld [vmem:[%s14566_s22 + $0x1fc0] sm:$0xff] }
 0x29c   : > { %6966 = vmatprep.subr.bf16.mxu0 %v13152_v15  ;;  %7310 = vmatprep.subr.bf16.mxu1 %v13154_v16  ;;  %v13193_v15 = vcombine.low %v1402_v0, %v1406_v2  ;;  %v13200_v16 = vcombine.high %v1409_v12, %v1413_v35  ;;  %v13202_v18 = vcombine.high %v1410_v47, %v1414_v13  ;;  %v1453_v0 = vld [vmem:[%s14566_s22 + $0x1fe0] sm:$0xff]  ;;  %v1450_v2 = vld [vmem:[%s14566_s22 + $0x1fc8] sm:$0xff] }
 0x29f   : > { %6967 = vmatpush1.bf16.msra.mxu0 %v13151_v24  ;;  %7311 = vmatpush1.bf16.msra.mxu1 %v13153_v25  ;;  %v1422_v24 = vld [vmem:[%s14566_s22 + $0x1ee8] sm:$0xff]  ;;  %v13199_v25 = vcombine.low %v1409_v12, %v1413_v35  ;;  %v435_v35 = vld [vmem:[%s14566_s22 + $0x10] sm:$0xff] }
 0x2a0   : > { %6968 = vmatprep.subr.bf16.mxu0 %v13160_v55  ;;  %7312 = vmatprep.subr.bf16.mxu1 %v13162_v26  ;;  %v13201_v55 = vcombine.low %v1410_v47, %v1414_v13  ;;  %v13208_v26 = vcombine.high %v1417_v21, %v1421_v22  ;;  %v13210_v27 = vcombine.high %v1418_v23, %v1422_v24  ;;  %v439_v47 = vld [vmem:[%s14566_s22 + $0x30] sm:$0xff]  ;;  %v436_v13 = vld [vmem:[%s14566_s22 + $0x18] sm:$0xff] }
 0x2a3   : > { %6969 = vmatpush1.bf16.msra.mxu0 %v13159_v37  ;;  %7313 = vmatpush1.bf16.msra.mxu1 %v13161_v19  ;;  %v1430_v37 = vld [vmem:[%s14566_s22 + $0x1f28] sm:$0xff]  ;;  %v13207_v19 = vcombine.low %v1417_v21, %v1421_v22  ;;  %v443_v22 = vld [vmem:[%s14566_s22 + $0x50] sm:$0xff] }
 0x2a4   : > { %6970 = vmatprep.subr.bf16.mxu0 %v13168_v38  ;;  %7314 = vmatprep.subr.bf16.mxu1 %v13170_v39  ;;  %v13209_v38 = vcombine.low %v1418_v23, %v1422_v24  ;;  %v13216_v39 = vcombine.high %v1425_v28, %v1429_v30  ;;  %v13218_v40 = vcombine.high %v1426_v34, %v1430_v37  ;;  %v447_v23 = vld [vmem:[%s14566_s22 + $0x70] sm:$0xff] }
 0x2a5   : > { %v15244_v24 = vcombine.low %v15167_v43, %v15170_v44  ;;  %v452_v43 = vld [vmem:[%s14566_s22 + $0x98] sm:$0xff] }
 0x2a6   : > { %v456_v44 = vld [vmem:[%s14566_s22 + $0xb8] sm:$0xff] }
 0x2a7   : > { %6971 = vmatpush1.bf16.msra.mxu0 %v13167_v49  ;;  %7315 = vmatpush1.bf16.msra.mxu1 %v13169_v50  ;;  %v1438_v49 = vld [vmem:[%s14566_s22 + $0x1f68] sm:$0xff]  ;;  %v13215_v50 = vcombine.low %v1425_v28, %v1429_v30  ;;  %v12236_v28 = vcombine.high %v443_v22, %v447_v23 }
 0x2a8   : > { %6972 = vmatprep.subr.bf16.mxu0 %v13176_v51  ;;  %7316 = vmatprep.subr.bf16.mxu1 %v13178_v52  ;;  %v13217_v51 = vcombine.low %v1426_v34, %v1430_v37  ;;  %v13224_v52 = vcombine.high %v1433_v6, %v1437_v42  ;;  %v13226_v3 = vcombine.high %v1434_v46, %v1438_v49  ;;  %v451_v34 = vld [vmem:[%s14566_s22 + $0x90] sm:$0xff] }
 0x2a9   : > { %v455_v37 = vld [vmem:[%s14566_s22 + $0xb0] sm:$0xff] }
 0x2ab   : > { %6973 = vmatpush1.bf16.msra.mxu0 %v13175_v57  ;;  %7317 = vmatpush1.bf16.msra.mxu1 %v13177_v58  ;;  %v1446_v57 = vld [vmem:[%s14566_s22 + $0x1fa8] sm:$0xff]  ;;  %v13223_v58 = vcombine.low %v1433_v6, %v1437_v42  ;;  %v459_v6 = vld [vmem:[%s14566_s22 + $0xd0] sm:$0xff] }
 0x2ac   : > { %6974 = vmatprep.subr.bf16.mxu0 %v13184_v59  ;;  %7318 = vmatprep.subr.bf16.mxu1 %v13186_v61  ;;  %v13225_v59 = vcombine.low %v1434_v46, %v1438_v49  ;;  %v13232_v61 = vcombine.high %v1441_v53, %v1445_v31  ;;  %v13234_v62 = vcombine.high %v1442_v54, %v1446_v57  ;;  %v463_v42 = vld [vmem:[%s14566_s22 + $0xf0] sm:$0xff]  ;;  %v460_v46 = vld [vmem:[%s14566_s22 + $0xd8] sm:$0xff] }
 0x2ad   : > { %v464_v49 = vld [vmem:[%s14566_s22 + $0xf8] sm:$0xff] }
 0x2af   : > { %6975 = vmatpush1.bf16.msra.mxu0 %v13183_v8  ;;  %7319 = vmatpush1.bf16.msra.mxu1 %v13185_v9  ;;  %v1454_v8 = vld [vmem:[%s14566_s22 + $0x1fe8] sm:$0xff]  ;;  %v13231_v9 = vcombine.low %v1441_v53, %v1445_v31  ;;  %v467_v53 = vld [vmem:[%s14566_s22 + $0x110] sm:$0xff] }
 0x2b0   : > { %6976 = vmatprep.subr.bf16.mxu0 %v13192_v10  ;;  %7320 = vmatprep.subr.bf16.mxu1 %v13194_v11  ;;  %v13233_v10 = vcombine.low %v1442_v54, %v1446_v57  ;;  %v13240_v11 = vcombine.high %v1449_v63, %v1453_v0  ;;  %v13242_v12 = vcombine.high %v1450_v2, %v1454_v8  ;;  %v471_v31 = vld [vmem:[%s14566_s22 + $0x130] sm:$0xff]  ;;  %v468_v54 = vld [vmem:[%s14566_s22 + $0x118] sm:$0xff] }
 0x2b1   : > { %v472_v57 = vld [vmem:[%s14566_s22 + $0x138] sm:$0xff] }
 0x2b3   : > { %6977 = vmatpush1.bf16.msra.mxu0 %v13191_v14  ;;  %7321 = vmatpush1.bf16.msra.mxu1 %v13193_v15  ;;  %v440_v14 = vld [vmem:[%s14566_s22 + $0x38] sm:$0xff]  ;;  %v13239_v15 = vcombine.low %v1449_v63, %v1453_v0  ;;  %v479_v63 = vld [vmem:[%s14566_s22 + $0x170] sm:$0xff] }
 0x2b4   : > { %6978 = vmatprep.subr.bf16.mxu0 %v13200_v16  ;;  %7322 = vmatprep.subr.bf16.mxu1 %v13202_v18  ;;  %v13241_v16 = vcombine.low %v1450_v2, %v1454_v8  ;;  %v12228_v18 = vcombine.high %v435_v35, %v439_v47  ;;  %v12230_v21 = vcombine.high %v436_v13, %v440_v14  ;;  %v476_v0 = vld [vmem:[%s14566_s22 + $0x158] sm:$0xff] }
 0x2b5   : > { %v480_v2 = vld [vmem:[%s14566_s22 + $0x178] sm:$0xff]  ;;  %v12259_v8 = vcombine.low %v467_v53, %v471_v31 }
 0x2b7   : > { %6979 = vmatpush1.bf16.msra.mxu0 %v13199_v25  ;;  %7323 = vmatpush1.bf16.msra.mxu1 %v13201_v55  ;;  %v444_v25 = vld [vmem:[%s14566_s22 + $0x58] sm:$0xff] }
 0x2b8   : > { %6980 = vmatprep.subr.bf16.mxu0 %v13208_v26  ;;  %7324 = vmatprep.subr.bf16.mxu1 %v13210_v27  ;;  %v448_v55 = vld [vmem:[%s14566_s22 + $0x78] sm:$0xff]  ;;  %v12227_v26 = vcombine.low %v435_v35, %v439_v47  ;;  %v12229_v27 = vcombine.low %v436_v13, %v440_v14  ;;  %v487_v35 = vld [vmem:[%s14566_s22 + $0x1b0] sm:$0xff] }
 0x2b9   : > { %v12238_v30 = vcombine.high %v444_v25, %v448_v55  ;;  %v484_v47 = vld [vmem:[%s14566_s22 + $0x198] sm:$0xff] }
 0x2ba   : > { %v488_v13 = vld [vmem:[%s14566_s22 + $0x1b8] sm:$0xff] }
 0x2bb   : > { %6981 = vmatpush1.bf16.msra.mxu0 %v13207_v19  ;;  %7325 = vmatpush1.bf16.msra.mxu1 %v13209_v38  ;;  %v12235_v19 = vcombine.low %v443_v22, %v447_v23  ;;  %v12237_v38 = vcombine.low %v444_v25, %v448_v55  ;;  %v495_v22 = vld [vmem:[%s14566_s22 + $0x1f0] sm:$0xff]  ;;  %v492_v23 = vld [vmem:[%s14566_s22 + $0x1d8] sm:$0xff] }
 0x2bc   : > { %6982 = vmatprep.subr.bf16.mxu0 %v13216_v39  ;;  %7326 = vmatprep.subr.bf16.mxu1 %v13218_v40  ;;  %v12244_v39 = vcombine.high %v451_v34, %v455_v37  ;;  %v12246_v40 = vcombine.high %v452_v43, %v456_v44  ;;  %v496_v25 = vld [vmem:[%s14566_s22 + $0x1f8] sm:$0xff] }
 0x2bf   : > { %6983 = vmatpush1.bf16.msra.mxu0 %v13215_v50  ;;  %7327 = vmatpush1.bf16.msra.mxu1 %v13217_v51  ;;  %v12243_v50 = vcombine.low %v451_v34, %v455_v37  ;;  %v12245_v51 = vcombine.low %v452_v43, %v456_v44  ;;  %v503_v34 = vld [vmem:[%s14566_s22 + $0x230] sm:$0xff]  ;;  %v500_v37 = vld [vmem:[%s14566_s22 + $0x218] sm:$0xff] }
 0x2c0   : > { %6984 = vmatprep.subr.bf16.mxu0 %v13224_v52  ;;  %7328 = vmatprep.subr.bf16.mxu1 %v13226_v3  ;;  %v12252_v52 = vcombine.high %v459_v6, %v463_v42  ;;  %v12254_v3 = vcombine.high %v460_v46, %v464_v49  ;;  %v504_v43 = vld [vmem:[%s14566_s22 + $0x238] sm:$0xff] }
 0x2c3   : > { %6985 = vmatpush1.bf16.msra.mxu0 %v13223_v58  ;;  %7329 = vmatpush1.bf16.msra.mxu1 %v13225_v59  ;;  %v12251_v58 = vcombine.low %v459_v6, %v463_v42  ;;  %v12260_v59 = vcombine.high %v467_v53, %v471_v31  ;;  %v511_v6 = vld [vmem:[%s14566_s22 + $0x270] sm:$0xff]  ;;  %v508_v42 = vld [vmem:[%s14566_s22 + $0x258] sm:$0xff] }
 0x2c4   : > { %6986 = vmatprep.subr.bf16.mxu0 %v13232_v61  ;;  %7330 = vmatprep.subr.bf16.mxu1 %v13234_v62  ;;  %v12262_v61 = vcombine.high %v468_v54, %v472_v57  ;;  %v475_v62 = vld [vmem:[%s14566_s22 + $0x150] sm:$0xff]  ;;  %v516_v31 = vld [vmem:[%s14566_s22 + $0x298] sm:$0xff] }
 0x2c5   : > { %v12267_v14 = vcombine.low %v475_v62, %v479_v63  ;;  %v519_v53 = vld [vmem:[%s14566_s22 + $0x2b0] sm:$0xff] }
 0x2c7   : > { %6987 = vmatpush1.bf16.msra.mxu0 %v13231_v9  ;;  %7331 = vmatpush1.bf16.msra.mxu1 %v13233_v10  ;;  %v12261_v9 = vcombine.low %v468_v54, %v472_v57  ;;  %v12268_v10 = vcombine.high %v475_v62, %v479_v63  ;;  %v520_v54 = vld [vmem:[%s14566_s22 + $0x2b8] sm:$0xff]  ;;  %v527_v62 = vld [vmem:[%s14566_s22 + $0x2f0] sm:$0xff] }
 0x2c8   : > { %6988 = vmatprep.subr.bf16.mxu0 %v13240_v11  ;;  %7332 = vmatprep.subr.bf16.mxu1 %v13242_v12  ;;  %v12270_v11 = vcombine.high %v476_v0, %v480_v2  ;;  %v483_v12 = vld [vmem:[%s14566_s22 + $0x190] sm:$0xff]  ;;  %v524_v63 = vld [vmem:[%s14566_s22 + $0x2d8] sm:$0xff] }
 0x2c9   : > { %v12275_v55 = vcombine.low %v483_v12, %v487_v35 }
 0x2cb   : > { %6989 = vmatpush1.bf16.msra.mxu0 %v13239_v15  ;;  %7333 = vmatpush1.bf16.msra.mxu1 %v13241_v16  ;;  %v12269_v15 = vcombine.low %v476_v0, %v480_v2  ;;  %v12276_v16 = vcombine.high %v483_v12, %v487_v35  ;;  %v528_v0 = vld [vmem:[%s14566_s22 + $0x2f8] sm:$0xff]  ;;  %v535_v12 = vld [vmem:[%s14566_s22 + $0x330] sm:$0xff] }
 0x2cc   : > { %7345 = vmatprep.subr.bf16.mxu0 %v12228_v18  ;;  %7689 = vmatprep.subr.bf16.mxu1 %v12230_v21  ;;  %v12278_v18 = vcombine.high %v484_v47, %v488_v13  ;;  %v491_v21 = vld [vmem:[%s14566_s22 + $0x1d0] sm:$0xff]  ;;  %v532_v35 = vld [vmem:[%s14566_s22 + $0x318] sm:$0xff] }
 0x2cd   : > { %v12283_v44 = vcombine.low %v491_v21, %v495_v22 }
 0x2ce   : > { %6991 = vmatmul.mubr.bf16.vlgmr.msra.gmra.mrb[0].mxu0 %v15244_v24  ;;  %7335 = vmatmul.mubr.bf16.vlgmr.msra.gmra.mrb[0].mxu1 %v15244_v24 }
 0x2cf   : > { %7346 = vmatpush1.bf16.msra.mxu0 %v12227_v26  ;;  %7690 = vmatpush1.bf16.msra.mxu1 %v12229_v27  ;;  %v12277_v26 = vcombine.low %v484_v47, %v488_v13  ;;  %v12284_v27 = vcombine.high %v491_v21, %v495_v22  ;;  %v536_v47 = vld [vmem:[%s14566_s22 + $0x338] sm:$0xff]  ;;  %v543_v21 = vld [vmem:[%s14566_s22 + $0x370] sm:$0xff] }
 0x2d0   : > { %7347 = vmatprep.subr.bf16.mxu0 %v12236_v28  ;;  %7691 = vmatprep.subr.bf16.mxu1 %v12238_v30  ;;  %v12286_v28 = vcombine.high %v492_v23, %v496_v25  ;;  %v499_v30 = vld [vmem:[%s14566_s22 + $0x210] sm:$0xff]  ;;  %v540_v22 = vld [vmem:[%s14566_s22 + $0x358] sm:$0xff] }
 0x2d1   : > { %7377 = vmatprep.mubr.bf16.mxu0 %v14624_v60  ;;  %7721 = vmatprep.mubr.bf16.mxu1 %v14624_v60  ;;  %v12253_v60 = vcombine.low %v460_v46, %v464_v49  ;;  %v512_v46 = vld [vmem:[%s14566_s22 + $0x278] sm:$0xff]  ;;  %v12291_v49 = vcombine.low %v499_v30, %v503_v34 }
 0x2d3   : > { %7348 = vmatpush1.bf16.msra.mxu0 %v12235_v19  ;;  %7692 = vmatpush1.bf16.msra.mxu1 %v12237_v38  ;;  %v12285_v19 = vcombine.low %v492_v23, %v496_v25  ;;  %v12292_v38 = vcombine.high %v499_v30, %v503_v34  ;;  %v544_v23 = vld [vmem:[%s14566_s22 + $0x378] sm:$0xff]  ;;  %v551_v30 = vld [vmem:[%s14566_s22 + $0x3b0] sm:$0xff] }
 0x2d4   : > { %7349 = vmatprep.subr.bf16.mxu0 %v12244_v39  ;;  %7693 = vmatprep.subr.bf16.mxu1 %v12246_v40  ;;  %v12294_v39 = vcombine.high %v500_v37, %v504_v43  ;;  %v507_v40 = vld [vmem:[%s14566_s22 + $0x250] sm:$0xff]  ;;  %v548_v34 = vld [vmem:[%s14566_s22 + $0x398] sm:$0xff] }
 0x2d5   : > { %v12299_v57 = vcombine.low %v507_v40, %v511_v6 }
 0x2d7   : > { %7350 = vmatpush1.bf16.msra.mxu0 %v12243_v50  ;;  %7694 = vmatpush1.bf16.msra.mxu1 %v12245_v51  ;;  %v12293_v50 = vcombine.low %v500_v37, %v504_v43  ;;  %v12300_v51 = vcombine.high %v507_v40, %v511_v6  ;;  %v552_v37 = vld [vmem:[%s14566_s22 + $0x3b8] sm:$0xff]  ;;  %v559_v40 = vld [vmem:[%s14566_s22 + $0x3f0] sm:$0xff] }
 0x2d8   : > { %7351 = vmatprep.subr.bf16.mxu0 %v12252_v52  ;;  %7695 = vmatprep.subr.bf16.mxu1 %v12254_v3  ;;  %v12302_v52 = vcombine.high %v508_v42, %v512_v46  ;;  %v515_v3 = vld [vmem:[%s14566_s22 + $0x290] sm:$0xff]  ;;  %v556_v6 = vld [vmem:[%s14566_s22 + $0x3d8] sm:$0xff] }
 0x2d9   : > { %v12307_v2 = vcombine.low %v515_v3, %v519_v53 }
 0x2db   : > { %7352 = vmatpush1.bf16.msra.mxu0 %v12251_v58  ;;  %7696 = vmatpush1.bf16.msra.mxu1 %v12253_v60  ;;  %v12301_v58 = vcombine.low %v508_v42, %v512_v46  ;;  %v12308_v60 = vcombine.high %v515_v3, %v519_v53  ;;  %v560_v42 = vld [vmem:[%s14566_s22 + $0x3f8] sm:$0xff]  ;;  %v567_v3 = vld [vmem:[%s14566_s22 + $0x430] sm:$0xff] }
 0x2dc   : > { %7353 = vmatprep.subr.bf16.mxu0 %v12260_v59  ;;  %7697 = vmatprep.subr.bf16.mxu1 %v12262_v61  ;;  %v12310_v59 = vcombine.high %v516_v31, %v520_v54  ;;  %v523_v61 = vld [vmem:[%s14566_s22 + $0x2d0] sm:$0xff]  ;;  %v564_v53 = vld [vmem:[%s14566_s22 + $0x418] sm:$0xff] }
 0x2dd   : > { %v12315_v13 = vcombine.low %v523_v61, %v527_v62 }
 0x2df   : > { %7354 = vmatpush1.bf16.msra.mxu0 %v12259_v8  ;;  %7698 = vmatpush1.bf16.msra.mxu1 %v12261_v9  ;;  %v12309_v8 = vcombine.low %v516_v31, %v520_v54  ;;  %v12316_v9 = vcombine.high %v523_v61, %v527_v62  ;;  %v568_v31 = vld [vmem:[%s14566_s22 + $0x438] sm:$0xff]  ;;  %v575_v61 = vld [vmem:[%s14566_s22 + $0x470] sm:$0xff] }
 0x2e0   : > { %7355 = vmatprep.subr.bf16.mxu0 %v12268_v10  ;;  %7699 = vmatprep.subr.bf16.mxu1 %v12270_v11  ;;  %v12318_v10 = vcombine.high %v524_v63, %v528_v0  ;;  %v531_v11 = vld [vmem:[%s14566_s22 + $0x310] sm:$0xff]  ;;  %v572_v62 = vld [vmem:[%s14566_s22 + $0x458] sm:$0xff] }
 0x2e1   : > { %v12323_v25 = vcombine.low %v531_v11, %v535_v12 }
 0x2e3   : > { %7356 = vmatpush1.bf16.msra.mxu0 %v12267_v14  ;;  %7700 = vmatpush1.bf16.msra.mxu1 %v12269_v15  ;;  %v12317_v14 = vcombine.low %v524_v63, %v528_v0  ;;  %v12324_v15 = vcombine.high %v531_v11, %v535_v12  ;;  %v576_v63 = vld [vmem:[%s14566_s22 + $0x478] sm:$0xff]  ;;  %v583_v11 = vld [vmem:[%s14566_s22 + $0x4b0] sm:$0xff] }
 0x2e4   : > { %7357 = vmatprep.subr.bf16.mxu0 %v12276_v16  ;;  %7701 = vmatprep.subr.bf16.mxu1 %v12278_v18  ;;  %v12326_v16 = vcombine.high %v532_v35, %v536_v47  ;;  %v539_v18 = vld [vmem:[%s14566_s22 + $0x350] sm:$0xff]  ;;  %v580_v12 = vld [vmem:[%s14566_s22 + $0x498] sm:$0xff] }
 0x2e5   : > { %v12331_v43 = vcombine.low %v539_v18, %v543_v21 }
 0x2e7   : > { %7358 = vmatpush1.bf16.msra.mxu0 %v12275_v55  ;;  %7702 = vmatpush1.bf16.msra.mxu1 %v12277_v26  ;;  %v12325_v55 = vcombine.low %v532_v35, %v536_v47  ;;  %v12332_v26 = vcombine.high %v539_v18, %v543_v21  ;;  %v584_v35 = vld [vmem:[%s14566_s22 + $0x4b8] sm:$0xff]  ;;  %v591_v18 = vld [vmem:[%s14566_s22 + $0x4f0] sm:$0xff] }
 0x2e8   : > { %7359 = vmatprep.subr.bf16.mxu0 %v12284_v27  ;;  %7703 = vmatprep.subr.bf16.mxu1 %v12286_v28  ;;  %v12334_v27 = vcombine.high %v540_v22, %v544_v23  ;;  %v547_v28 = vld [vmem:[%s14566_s22 + $0x390] sm:$0xff]  ;;  %v588_v21 = vld [vmem:[%s14566_s22 + $0x4d8] sm:$0xff] }
 0x2e9   : > { %v12339_v46 = vcombine.low %v547_v28, %v551_v30 }
 0x2eb   : > { %7360 = vmatpush1.bf16.msra.mxu0 %v12283_v44  ;;  %7704 = vmatpush1.bf16.msra.mxu1 %v12285_v19  ;;  %v12333_v44 = vcombine.low %v540_v22, %v544_v23  ;;  %v12340_v19 = vcombine.high %v547_v28, %v551_v30  ;;  %v592_v22 = vld [vmem:[%s14566_s22 + $0x4f8] sm:$0xff]  ;;  %v12373_v23 = vcombine.low %v580_v12, %v584_v35 }
 0x2ec   : > { %7361 = vmatprep.subr.bf16.mxu0 %v12292_v38  ;;  %7705 = vmatprep.subr.bf16.mxu1 %v12294_v39  ;;  %v12342_v38 = vcombine.high %v548_v34, %v552_v37  ;;  %v555_v39 = vld [vmem:[%s14566_s22 + $0x3d0] sm:$0xff]  ;;  %v596_v28 = vld [vmem:[%s14566_s22 + $0x518] sm:$0xff] }
 0x2ed   : > { %v12347_v54 = vcombine.low %v555_v39, %v559_v40  ;;  %v600_v30 = vld [vmem:[%s14566_s22 + $0x538] sm:$0xff] }
 0x2ef   : > { %7362 = vmatpush1.bf16.msra.mxu0 %v12291_v49  ;;  %7706 = vmatpush1.bf16.msra.mxu1 %v12293_v50  ;;  %v12341_v49 = vcombine.low %v548_v34, %v552_v37  ;;  %v12348_v50 = vcombine.high %v555_v39, %v559_v40  ;;  %v608_v39 = vld [vmem:[%s14566_s22 + $0x578] sm:$0xff] }
 0x2f0   : > { %7363 = vmatprep.subr.bf16.mxu0 %v12300_v51  ;;  %7707 = vmatprep.subr.bf16.mxu1 %v12302_v52  ;;  %v12350_v51 = vcombine.high %v556_v6, %v560_v42  ;;  %v563_v52 = vld [vmem:[%s14566_s22 + $0x410] sm:$0xff] }
 0x2f1   : > { %v12355_v0 = vcombine.low %v563_v52, %v567_v3 }
 0x2f3   : > { %7364 = vmatpush1.bf16.msra.mxu0 %v12299_v57  ;;  %7708 = vmatpush1.bf16.msra.mxu1 %v12301_v58  ;;  %v12349_v57 = vcombine.low %v556_v6, %v560_v42  ;;  %v12356_v58 = vcombine.high %v563_v52, %v567_v3  ;;  %v12389_v6 = vcombine.low %v596_v28, %v600_v30  ;;  %v616_v52 = vld [vmem:[%s14566_s22 + $0x5b8] sm:$0xff] }
 0x2f4   : > { %7365 = vmatprep.subr.bf16.mxu0 %v12308_v60  ;;  %7709 = vmatprep.subr.bf16.mxu1 %v12310_v59  ;;  %v12358_v60 = vcombine.high %v564_v53, %v568_v31  ;;  %v571_v59 = vld [vmem:[%s14566_s22 + $0x450] sm:$0xff] }
 0x2f5   : > { %v12363_v47 = vcombine.low %v571_v59, %v575_v61 }
 0x2f7   : > { %7366 = vmatpush1.bf16.msra.mxu0 %v12307_v2  ;;  %7710 = vmatpush1.bf16.msra.mxu1 %v12309_v8  ;;  %v12357_v2 = vcombine.low %v564_v53, %v568_v31  ;;  %v12364_v8 = vcombine.high %v571_v59, %v575_v61  ;;  %v624_v59 = vld [vmem:[%s14566_s22 + $0x5f8] sm:$0xff] }
 0x2f8   : > { %7367 = vmatprep.subr.bf16.mxu0 %v12316_v9  ;;  %7711 = vmatprep.subr.bf16.mxu1 %v12318_v10  ;;  %v12366_v9 = vcombine.high %v572_v62, %v576_v63  ;;  %v579_v10 = vld [vmem:[%s14566_s22 + $0x490] sm:$0xff] }
 0x2fb   : > { %7368 = vmatpush1.bf16.msra.mxu0 %v12315_v13  ;;  %7712 = vmatpush1.bf16.msra.mxu1 %v12317_v14  ;;  %v12365_v13 = vcombine.low %v572_v62, %v576_v63  ;;  %v12372_v14 = vcombine.high %v579_v10, %v583_v11 }
 0x2fc   : > { %7369 = vmatprep.subr.bf16.mxu0 %v12324_v15  ;;  %7713 = vmatprep.subr.bf16.mxu1 %v12326_v16  ;;  %v12374_v15 = vcombine.high %v580_v12, %v584_v35  ;;  %v587_v16 = vld [vmem:[%s14566_s22 + $0x4d0] sm:$0xff] }
 0x2fd   : > { %v12379_v34 = vcombine.low %v587_v16, %v591_v18 }
 0x2ff   : > { %7370 = vmatpush1.bf16.msra.mxu0 %v12323_v25  ;;  %7714 = vmatpush1.bf16.msra.mxu1 %v12325_v55  ;;  %v12380_v25 = vcombine.high %v587_v16, %v591_v18  ;;  %v12382_v55 = vcombine.high %v588_v21, %v592_v22  ;;  %v640_v16 = vld [vmem:[%s14566_s22 + $0x678] sm:$0xff] }
 0x300   : > { %7371 = vmatprep.subr.bf16.mxu0 %v12332_v26  ;;  %7715 = vmatprep.subr.bf16.mxu1 %v12334_v27  ;;  %v595_v26 = vld [vmem:[%s14566_s22 + $0x510] sm:$0xff] }
 0x301   : > { %v599_v27 = vld [vmem:[%s14566_s22 + $0x530] sm:$0xff] }
 0x302   : > { %v12388_v37 = vcombine.high %v595_v26, %v599_v27  ;;  %v12387_v40 = vcombine.low %v595_v26, %v599_v27  ;;  %v648_v26 = vld [vmem:[%s14566_s22 + $0x6b8] sm:$0xff] }
 0x303   : > { %7372 = vmatpush1.bf16.msra.mxu0 %v12331_v43  ;;  %7716 = vmatpush1.bf16.msra.mxu1 %v12333_v44  ;;  %v12390_v43 = vcombine.high %v596_v28, %v600_v30  ;;  %v603_v44 = vld [vmem:[%s14566_s22 + $0x550] sm:$0xff] }
 0x304   : > { %7373 = vmatprep.subr.bf16.mxu0 %v12340_v19  ;;  %7717 = vmatprep.subr.bf16.mxu1 %v12342_v38  ;;  %v607_v19 = vld [vmem:[%s14566_s22 + $0x570] sm:$0xff]  ;;  %v604_v38 = vld [vmem:[%s14566_s22 + $0x558] sm:$0xff] }
 0x305   : > { %v12396_v42 = vcombine.high %v603_v44, %v607_v19  ;;  %v12395_v3 = vcombine.low %v603_v44, %v607_v19  ;;  %v12397_v53 = vcombine.low %v604_v38, %v608_v39  ;;  %v656_v44 = vld [vmem:[%s14566_s22 + $0x6f8] sm:$0xff] }
 0x307   : > { %7374 = vmatpush1.bf16.msra.mxu0 %v12339_v46  ;;  %7718 = vmatpush1.bf16.msra.mxu1 %v12341_v49  ;;  %v12398_v46 = vcombine.high %v604_v38, %v608_v39  ;;  %v611_v49 = vld [vmem:[%s14566_s22 + $0x590] sm:$0xff] }
 0x308   : > { %7375 = vmatprep.subr.bf16.mxu0 %v12348_v50  ;;  %7719 = vmatprep.subr.bf16.mxu1 %v12350_v51  ;;  %v615_v50 = vld [vmem:[%s14566_s22 + $0x5b0] sm:$0xff]  ;;  %v612_v51 = vld [vmem:[%s14566_s22 + $0x598] sm:$0xff] }
 0x309   : > { %v12404_v31 = vcombine.high %v611_v49, %v615_v50  ;;  %v12403_v61 = vcombine.low %v611_v49, %v615_v50  ;;  %v12405_v62 = vcombine.low %v612_v51, %v616_v52  ;;  %v664_v49 = vld [vmem:[%s14566_s22 + $0x738] sm:$0xff] }
 0x30b   : > { %7376 = vmatpush1.bf16.msra.mxu0 %v12347_v54  ;;  %7720 = vmatpush1.bf16.msra.mxu1 %v12349_v57  ;;  %v12406_v54 = vcombine.high %v612_v51, %v616_v52  ;;  %v619_v57 = vld [vmem:[%s14566_s22 + $0x5d0] sm:$0xff] }
 0x30c   : > { %7388 = vmatprep.subr.bf16.mxu0 %v12356_v58  ;;  %7732 = vmatprep.subr.bf16.mxu1 %v12358_v60  ;;  %v623_v58 = vld [vmem:[%s14566_s22 + $0x5f0] sm:$0xff]  ;;  %v620_v60 = vld [vmem:[%s14566_s22 + $0x5d8] sm:$0xff] }
 0x30d   : > { %v12412_v63 = vcombine.high %v619_v57, %v623_v58  ;;  %v12413_v12 = vcombine.low %v620_v60, %v624_v59 }
 0x30e   : > { %7378 = vmatmul.mubr.bf16.vlgmr.msra.gmra.mrb[4].mxu0 %v14671_v17  ;;  %7722 = vmatmul.mubr.bf16.vlgmr.msra.gmra.mrb[4].mxu1 %v14671_v17  ;;  %v12371_v17 = vcombine.low %v579_v10, %v583_v11  ;;  %v632_v10 = vld [vmem:[%s14566_s22 + $0x638] sm:$0xff]  ;;  %v12411_v11 = vcombine.low %v619_v57, %v623_v58 }
 0x30f   : > { %7389 = vmatpush1.bf16.msra.mxu0 %v12355_v0  ;;  %7733 = vmatpush1.bf16.msra.mxu1 %v12357_v2  ;;  %v12414_v0 = vcombine.high %v620_v60, %v624_v59  ;;  %v627_v2 = vld [vmem:[%s14566_s22 + $0x610] sm:$0xff]  ;;  %v672_v57 = vld [vmem:[%s14566_s22 + $0x778] sm:$0xff] }
 0x310   : > { %7390 = vmatprep.subr.bf16.mxu0 %v12364_v8  ;;  %7734 = vmatprep.subr.bf16.mxu1 %v12366_v9  ;;  %v631_v8 = vld [vmem:[%s14566_s22 + $0x630] sm:$0xff]  ;;  %v628_v9 = vld [vmem:[%s14566_s22 + $0x618] sm:$0xff] }
 0x311   : > { %7420 = vmatprep.mubr.bf16.mxu0 %v14684_v56  ;;  %7764 = vmatprep.mubr.bf16.mxu1 %v14684_v56  ;;  %v12381_v56 = vcombine.low %v588_v21, %v592_v22  ;;  %v12420_v35 = vcombine.high %v627_v2, %v631_v8  ;;  %v12419_v18 = vcombine.low %v627_v2, %v631_v8  ;;  %v680_v2 = vld [vmem:[%s14566_s22 + $0x7b8] sm:$0xff] }
 0x312   : > { %v12421_v21 = vcombine.low %v628_v9, %v632_v10 }
 0x313   : > { %7391 = vmatpush1.bf16.msra.mxu0 %v12363_v47  ;;  %7735 = vmatpush1.bf16.msra.mxu1 %v12365_v13  ;;  %v12422_v47 = vcombine.high %v628_v9, %v632_v10  ;;  %v635_v13 = vld [vmem:[%s14566_s22 + $0x650] sm:$0xff] }
 0x314   : > { %7392 = vmatprep.subr.bf16.mxu0 %v12372_v14  ;;  %7736 = vmatprep.subr.bf16.mxu1 %v12374_v15  ;;  %v639_v14 = vld [vmem:[%s14566_s22 + $0x670] sm:$0xff]  ;;  %v636_v15 = vld [vmem:[%s14566_s22 + $0x658] sm:$0xff] }
 0x315   : > { %v12428_v22 = vcombine.high %v635_v13, %v639_v14  ;;  %v12427_v27 = vcombine.low %v635_v13, %v639_v14  ;;  %v12429_v28 = vcombine.low %v636_v15, %v640_v16  ;;  %v688_v13 = vld [vmem:[%s14566_s22 + $0x7f8] sm:$0xff] }
 0x317   : > { %7393 = vmatpush1.bf16.msra.mxu0 %v12371_v17  ;;  %7737 = vmatpush1.bf16.msra.mxu1 %v12373_v23  ;;  %v12430_v17 = vcombine.high %v636_v15, %v640_v16  ;;  %v643_v23 = vld [vmem:[%s14566_s22 + $0x690] sm:$0xff] }
 0x318   : > { %7394 = vmatprep.subr.bf16.mxu0 %v12380_v25  ;;  %7738 = vmatprep.subr.bf16.mxu1 %v12382_v55  ;;  %v647_v25 = vld [vmem:[%s14566_s22 + $0x6b0] sm:$0xff]  ;;  %v644_v55 = vld [vmem:[%s14566_s22 + $0x698] sm:$0xff] }
 0x319   : > { %v12436_v30 = vcombine.high %v643_v23, %v647_v25  ;;  %v12435_v19 = vcombine.low %v643_v23, %v647_v25  ;;  %v12437_v38 = vcombine.low %v644_v55, %v648_v26  ;;  %v696_v23 = vld [vmem:[%s14566_s22 + $0x838] sm:$0xff] }
 0x31b   : > { %7395 = vmatpush1.bf16.msra.mxu0 %v12379_v34  ;;  %7739 = vmatpush1.bf16.msra.mxu1 %v12381_v56  ;;  %v12438_v34 = vcombine.high %v644_v55, %v648_v26  ;;  %v651_v56 = vld [vmem:[%s14566_s22 + $0x6d0] sm:$0xff] }
 0x31c   : > { %7396 = vmatprep.subr.bf16.mxu0 %v12388_v37  ;;  %7740 = vmatprep.subr.bf16.mxu1 %v12390_v43  ;;  %v655_v37 = vld [vmem:[%s14566_s22 + $0x6f0] sm:$0xff]  ;;  %v652_v43 = vld [vmem:[%s14566_s22 + $0x6d8] sm:$0xff] }
 0x31d   : > { %v12444_v39 = vcombine.high %v651_v56, %v655_v37  ;;  %v12443_v50 = vcombine.low %v651_v56, %v655_v37  ;;  %v12445_v51 = vcombine.low %v652_v43, %v656_v44  ;;  %v704_v56 = vld [vmem:[%s14566_s22 + $0x878] sm:$0xff] }
 0x31f   : > { %7397 = vmatpush1.bf16.msra.mxu0 %v12387_v40  ;;  %7741 = vmatpush1.bf16.msra.mxu1 %v12389_v6  ;;  %v12446_v40 = vcombine.high %v652_v43, %v656_v44  ;;  %v659_v6 = vld [vmem:[%s14566_s22 + $0x710] sm:$0xff] }
 0x320   : > { %7398 = vmatprep.subr.bf16.mxu0 %v12396_v42  ;;  %7742 = vmatprep.subr.bf16.mxu1 %v12398_v46  ;;  %v663_v42 = vld [vmem:[%s14566_s22 + $0x730] sm:$0xff]  ;;  %v660_v46 = vld [vmem:[%s14566_s22 + $0x718] sm:$0xff] }
 0x321   : > { %v12452_v52 = vcombine.high %v659_v6, %v663_v42  ;;  %v12451_v58 = vcombine.low %v659_v6, %v663_v42  ;;  %v12453_v60 = vcombine.low %v660_v46, %v664_v49  ;;  %v712_v6 = vld [vmem:[%s14566_s22 + $0x8b8] sm:$0xff] }
 0x323   : > { %7399 = vmatpush1.bf16.msra.mxu0 %v12395_v3  ;;  %7743 = vmatpush1.bf16.msra.mxu1 %v12397_v53  ;;  %v12454_v3 = vcombine.high %v660_v46, %v664_v49  ;;  %v667_v53 = vld [vmem:[%s14566_s22 + $0x750] sm:$0xff] }
 0x324   : > { %7400 = vmatprep.subr.bf16.mxu0 %v12404_v31  ;;  %7744 = vmatprep.subr.bf16.mxu1 %v12406_v54  ;;  %v671_v31 = vld [vmem:[%s14566_s22 + $0x770] sm:$0xff]  ;;  %v668_v54 = vld [vmem:[%s14566_s22 + $0x758] sm:$0xff] }
 0x325   : > { %v12460_v59 = vcombine.high %v667_v53, %v671_v31  ;;  %v12459_v8 = vcombine.low %v667_v53, %v671_v31  ;;  %v12461_v9 = vcombine.low %v668_v54, %v672_v57  ;;  %v720_v53 = vld [vmem:[%s14566_s22 + $0x8f8] sm:$0xff] }
 0x327   : > { %7401 = vmatpush1.bf16.msra.mxu0 %v12403_v61  ;;  %7745 = vmatpush1.bf16.msra.mxu1 %v12405_v62  ;;  %v12462_v61 = vcombine.high %v668_v54, %v672_v57  ;;  %v675_v62 = vld [vmem:[%s14566_s22 + $0x790] sm:$0xff] }
 0x328   : > { %7402 = vmatprep.subr.bf16.mxu0 %v12412_v63  ;;  %7746 = vmatprep.subr.bf16.mxu1 %v12414_v0  ;;  %v679_v63 = vld [vmem:[%s14566_s22 + $0x7b0] sm:$0xff]  ;;  %v676_v0 = vld [vmem:[%s14566_s22 + $0x798] sm:$0xff] }
 0x329   : > { %v12468_v10 = vcombine.high %v675_v62, %v679_v63  ;;  %v12467_v14 = vcombine.low %v675_v62, %v679_v63  ;;  %v12469_v15 = vcombine.low %v676_v0, %v680_v2 }
 0x32b   : > { %7403 = vmatpush1.bf16.msra.mxu0 %v12411_v11  ;;  %7747 = vmatpush1.bf16.msra.mxu1 %v12413_v12  ;;  %v12470_v11 = vcombine.high %v676_v0, %v680_v2  ;;  %v683_v12 = vld [vmem:[%s14566_s22 + $0x7d0] sm:$0xff] }
 0x32c   : > { %7404 = vmatprep.subr.bf16.mxu0 %v12420_v35  ;;  %7748 = vmatprep.subr.bf16.mxu1 %v12422_v47  ;;  %v687_v35 = vld [vmem:[%s14566_s22 + $0x7f0] sm:$0xff]  ;;  %v684_v47 = vld [vmem:[%s14566_s22 + $0x7d8] sm:$0xff] }
 0x32d   : > { %v12476_v16 = vcombine.high %v683_v12, %v687_v35  ;;  %v12475_v25 = vcombine.low %v683_v12, %v687_v35  ;;  %v12477_v55 = vcombine.low %v684_v47, %v688_v13  ;;  %v731_v2 = vld [vmem:[%s14566_s22 + $0x950] sm:$0xff] }
 0x32f   : > { %7405 = vmatpush1.bf16.msra.mxu0 %v12419_v18  ;;  %7749 = vmatpush1.bf16.msra.mxu1 %v12421_v21  ;;  %v12478_v18 = vcombine.high %v684_v47, %v688_v13  ;;  %v691_v21 = vld [vmem:[%s14566_s22 + $0x810] sm:$0xff] }
 0x330   : > { %7406 = vmatprep.subr.bf16.mxu0 %v12428_v22  ;;  %7750 = vmatprep.subr.bf16.mxu1 %v12430_v17  ;;  %v695_v22 = vld [vmem:[%s14566_s22 + $0x830] sm:$0xff]  ;;  %v692_v17 = vld [vmem:[%s14566_s22 + $0x818] sm:$0xff] }
 0x331   : > { %v12484_v26 = vcombine.high %v691_v21, %v695_v22  ;;  %v12483_v37 = vcombine.low %v691_v21, %v695_v22  ;;  %v12485_v43 = vcombine.low %v692_v17, %v696_v23  ;;  %v739_v13 = vld [vmem:[%s14566_s22 + $0x990] sm:$0xff] }
 0x333   : > { %7407 = vmatpush1.bf16.msra.mxu0 %v12427_v27  ;;  %7751 = vmatpush1.bf16.msra.mxu1 %v12429_v28  ;;  %v12486_v27 = vcombine.high %v692_v17, %v696_v23  ;;  %v699_v28 = vld [vmem:[%s14566_s22 + $0x850] sm:$0xff] }
 0x334   : > { %7408 = vmatprep.subr.bf16.mxu0 %v12436_v30  ;;  %7752 = vmatprep.subr.bf16.mxu1 %v12438_v34  ;;  %v703_v30 = vld [vmem:[%s14566_s22 + $0x870] sm:$0xff]  ;;  %v700_v34 = vld [vmem:[%s14566_s22 + $0x858] sm:$0xff] }
 0x335   : > { %v12492_v44 = vcombine.high %v699_v28, %v703_v30  ;;  %v12491_v42 = vcombine.low %v699_v28, %v703_v30  ;;  %v12493_v46 = vcombine.low %v700_v34, %v704_v56  ;;  %v747_v23 = vld [vmem:[%s14566_s22 + $0x9d0] sm:$0xff] }
 0x337   : > { %7409 = vmatpush1.bf16.msra.mxu0 %v12435_v19  ;;  %7753 = vmatpush1.bf16.msra.mxu1 %v12437_v38  ;;  %v12494_v19 = vcombine.high %v700_v34, %v704_v56  ;;  %v707_v38 = vld [vmem:[%s14566_s22 + $0x890] sm:$0xff] }
 0x338   : > { %7410 = vmatprep.subr.bf16.mxu0 %v12444_v39  ;;  %7754 = vmatprep.subr.bf16.mxu1 %v12446_v40  ;;  %v711_v39 = vld [vmem:[%s14566_s22 + $0x8b0] sm:$0xff]  ;;  %v708_v40 = vld [vmem:[%s14566_s22 + $0x898] sm:$0xff] }
 0x339   : > { %v12500_v49 = vcombine.high %v707_v38, %v711_v39  ;;  %v12501_v31 = vcombine.low %v708_v40, %v712_v6  ;;  %v755_v56 = vld [vmem:[%s14566_s22 + $0xa10] sm:$0xff] }
 0x33b   : > { %7411 = vmatpush1.bf16.msra.mxu0 %v12443_v50  ;;  %7755 = vmatpush1.bf16.msra.mxu1 %v12445_v51  ;;  %v12502_v50 = vcombine.high %v708_v40, %v712_v6  ;;  %v715_v51 = vld [vmem:[%s14566_s22 + $0x8d0] sm:$0xff] }
 0x33c   : > { %7412 = vmatprep.subr.bf16.mxu0 %v12452_v52  ;;  %7756 = vmatprep.subr.bf16.mxu1 %v12454_v3  ;;  %v719_v52 = vld [vmem:[%s14566_s22 + $0x8f0] sm:$0xff]  ;;  %v716_v3 = vld [vmem:[%s14566_s22 + $0x8d8] sm:$0xff] }
 0x33d   : > { %v12508_v54 = vcombine.high %v715_v51, %v719_v52  ;;  %v12510_v57 = vcombine.high %v716_v3, %v720_v53  ;;  %v12507_v62 = vcombine.low %v715_v51, %v719_v52  ;;  %v763_v6 = vld [vmem:[%s14566_s22 + $0xa50] sm:$0xff] }
 0x33f   : > { %7413 = vmatpush1.bf16.msra.mxu0 %v12451_v58  ;;  %7757 = vmatpush1.bf16.msra.mxu1 %v12453_v60  ;;  %v723_v58 = vld [vmem:[%s14566_s22 + $0x910] sm:$0xff] }
 0x340   : > { %7414 = vmatprep.subr.bf16.mxu0 %v12460_v59  ;;  %7758 = vmatprep.subr.bf16.mxu1 %v12462_v61  ;;  %v727_v60 = vld [vmem:[%s14566_s22 + $0x930] sm:$0xff]  ;;  %v724_v59 = vld [vmem:[%s14566_s22 + $0x918] sm:$0xff] }
 0x341   : > { %v728_v61 = vld [vmem:[%s14566_s22 + $0x938] sm:$0xff]  ;;  %v12516_v63 = vcombine.high %v723_v58, %v727_v60 }
 0x342   : > { %v12518_v0 = vcombine.high %v724_v59, %v728_v61  ;;  %v12517_v12 = vcombine.low %v724_v59, %v728_v61  ;;  %v779_v61 = vld [vmem:[%s14566_s22 + $0xad0] sm:$0xff] }
 0x343   : > { %7415 = vmatpush1.bf16.msra.mxu0 %v12459_v8  ;;  %7759 = vmatpush1.bf16.msra.mxu1 %v12461_v9  ;;  %v735_v8 = vld [vmem:[%s14566_s22 + $0x970] sm:$0xff]  ;;  %v732_v9 = vld [vmem:[%s14566_s22 + $0x958] sm:$0xff] }
 0x344   : > { %7416 = vmatprep.subr.bf16.mxu0 %v12468_v10  ;;  %7760 = vmatprep.subr.bf16.mxu1 %v12470_v11  ;;  %v736_v10 = vld [vmem:[%s14566_s22 + $0x978] sm:$0xff]  ;;  %v12515_v11 = vcombine.low %v723_v58, %v727_v60  ;;  %v12524_v35 = vcombine.high %v731_v2, %v735_v8 }
 0x345   : > { %v12526_v47 = vcombine.high %v732_v9, %v736_v10  ;;  %v12525_v21 = vcombine.low %v732_v9, %v736_v10  ;;  %v787_v10 = vld [vmem:[%s14566_s22 + $0xb10] sm:$0xff] }
 0x347   : > { %7417 = vmatpush1.bf16.msra.mxu0 %v12467_v14  ;;  %7761 = vmatpush1.bf16.msra.mxu1 %v12469_v15  ;;  %v743_v14 = vld [vmem:[%s14566_s22 + $0x9b0] sm:$0xff]  ;;  %v740_v15 = vld [vmem:[%s14566_s22 + $0x998] sm:$0xff] }
 0x348   : > { %7418 = vmatprep.subr.bf16.mxu0 %v12476_v16  ;;  %7762 = vmatprep.subr.bf16.mxu1 %v12478_v18  ;;  %v744_v16 = vld [vmem:[%s14566_s22 + $0x9b8] sm:$0xff]  ;;  %v12523_v18 = vcombine.low %v731_v2, %v735_v8  ;;  %v12532_v22 = vcombine.high %v739_v13, %v743_v14 }
 0x349   : > { %v12534_v17 = vcombine.high %v740_v15, %v744_v16  ;;  %v12533_v28 = vcombine.low %v740_v15, %v744_v16  ;;  %v795_v16 = vld [vmem:[%s14566_s22 + $0xb50] sm:$0xff] }
 0x34b   : > { %7419 = vmatpush1.bf16.msra.mxu0 %v12475_v25  ;;  %7763 = vmatpush1.bf16.msra.mxu1 %v12477_v55  ;;  %v751_v25 = vld [vmem:[%s14566_s22 + $0x9f0] sm:$0xff]  ;;  %v748_v55 = vld [vmem:[%s14566_s22 + $0x9d8] sm:$0xff] }
 0x34c   : > { %7431 = vmatprep.subr.bf16.mxu0 %v12484_v26  ;;  %7775 = vmatprep.subr.bf16.mxu1 %v12486_v27  ;;  %v752_v26 = vld [vmem:[%s14566_s22 + $0x9f8] sm:$0xff]  ;;  %v12531_v27 = vcombine.low %v739_v13, %v743_v14  ;;  %v12540_v30 = vcombine.high %v747_v23, %v751_v25 }
 0x34d   : > { %v12542_v34 = vcombine.high %v748_v55, %v752_v26 }
 0x34e   : > { %7421 = vmatmul.mubr.bf16.vlgmr.msra.gmra.mrb[4].mxu0 %v14753_v29  ;;  %7765 = vmatmul.mubr.bf16.vlgmr.msra.gmra.mrb[4].mxu1 %v14753_v29  ;;  %v12499_v29 = vcombine.low %v707_v38, %v711_v39  ;;  %v12541_v38 = vcombine.low %v748_v55, %v752_v26  ;;  %v803_v26 = vld [vmem:[%s14566_s22 + $0xb90] sm:$0xff] }
 0x34f   : > { %7432 = vmatpush1.bf16.msra.mxu0 %v12483_v37  ;;  %7776 = vmatpush1.bf16.msra.mxu1 %v12485_v43  ;;  %v759_v37 = vld [vmem:[%s14566_s22 + $0xa30] sm:$0xff]  ;;  %v756_v43 = vld [vmem:[%s14566_s22 + $0xa18] sm:$0xff] }
 0x350   : > { %7433 = vmatprep.subr.bf16.mxu0 %v12492_v44  ;;  %7777 = vmatprep.subr.bf16.mxu1 %v12494_v19  ;;  %v760_v44 = vld [vmem:[%s14566_s22 + $0xa38] sm:$0xff]  ;;  %v12539_v19 = vcombine.low %v747_v23, %v751_v25  ;;  %v12548_v39 = vcombine.high %v755_v56, %v759_v37 }
 0x351   : > { %7463 = vmatprep.mubr.bf16.mxu0 %v14766_v20  ;;  %7807 = vmatprep.mubr.bf16.mxu1 %v14766_v20  ;;  %v12509_v20 = vcombine.low %v716_v3, %v720_v53  ;;  %v12550_v40 = vcombine.high %v756_v43, %v760_v44  ;;  %v12549_v51 = vcombine.low %v756_v43, %v760_v44  ;;  %v771_v53 = vld [vmem:[%s14566_s22 + $0xa90] sm:$0xff] }
 0x352   : > { %v811_v44 = vld [vmem:[%s14566_s22 + $0xbd0] sm:$0xff] }
 0x353   : > { %7434 = vmatpush1.bf16.msra.mxu0 %v12491_v42  ;;  %7778 = vmatpush1.bf16.msra.mxu1 %v12493_v46  ;;  %v767_v42 = vld [vmem:[%s14566_s22 + $0xa70] sm:$0xff]  ;;  %v764_v46 = vld [vmem:[%s14566_s22 + $0xa58] sm:$0xff] }
 0x354   : > { %7435 = vmatprep.subr.bf16.mxu0 %v12500_v49  ;;  %7779 = vmatprep.subr.bf16.mxu1 %v12502_v50  ;;  %v768_v49 = vld [vmem:[%s14566_s22 + $0xa78] sm:$0xff]  ;;  %v12547_v50 = vcombine.low %v755_v56, %v759_v37  ;;  %v12556_v52 = vcombine.high %v763_v6, %v767_v42 }
 0x355   : > { %v12558_v3 = vcombine.high %v764_v46, %v768_v49  ;;  %v12557_v58 = vcombine.low %v764_v46, %v768_v49  ;;  %v819_v49 = vld [vmem:[%s14566_s22 + $0xc10] sm:$0xff] }
 0x357   : > { %7436 = vmatpush1.bf16.msra.mxu0 %v12499_v29  ;;  %7780 = vmatpush1.bf16.msra.mxu1 %v12501_v31  ;;  %v775_v29 = vld [vmem:[%s14566_s22 + $0xab0] sm:$0xff]  ;;  %v772_v31 = vld [vmem:[%s14566_s22 + $0xa98] sm:$0xff] }
 0x358   : > { %7437 = vmatprep.subr.bf16.mxu0 %v12508_v54  ;;  %7781 = vmatprep.subr.bf16.mxu1 %v12510_v57  ;;  %v776_v54 = vld [vmem:[%s14566_s22 + $0xab8] sm:$0xff]  ;;  %v12555_v57 = vcombine.low %v763_v6, %v767_v42  ;;  %v12564_v60 = vcombine.high %v771_v53, %v775_v29 }
 0x359   : > { %v12566_v59 = vcombine.high %v772_v31, %v776_v54  ;;  %v12565_v2 = vcombine.low %v772_v31, %v776_v54  ;;  %v827_v54 = vld [vmem:[%s14566_s22 + $0xc50] sm:$0xff] }
 0x35b   : > { %7438 = vmatpush1.bf16.msra.mxu0 %v12507_v62  ;;  %7782 = vmatpush1.bf16.msra.mxu1 %v12509_v20  ;;  %v783_v62 = vld [vmem:[%s14566_s22 + $0xaf0] sm:$0xff]  ;;  %v780_v20 = vld [vmem:[%s14566_s22 + $0xad8] sm:$0xff] }
 0x35c   : > { %7439 = vmatprep.subr.bf16.mxu0 %v12516_v63  ;;  %7783 = vmatprep.subr.bf16.mxu1 %v12518_v0  ;;  %v784_v63 = vld [vmem:[%s14566_s22 + $0xaf8] sm:$0xff]  ;;  %v12563_v0 = vcombine.low %v771_v53, %v775_v29  ;;  %v12572_v8 = vcombine.high %v779_v61, %v783_v62 }
 0x35d   : > { %v12574_v9 = vcombine.high %v780_v20, %v784_v63  ;;  %v12573_v13 = vcombine.low %v780_v20, %v784_v63  ;;  %v835_v63 = vld [vmem:[%s14566_s22 + $0xc90] sm:$0xff] }
 0x35f   : > { %7440 = vmatpush1.bf16.msra.mxu0 %v12515_v11  ;;  %7784 = vmatpush1.bf16.msra.mxu1 %v12517_v12  ;;  %v791_v11 = vld [vmem:[%s14566_s22 + $0xb30] sm:$0xff]  ;;  %v788_v12 = vld [vmem:[%s14566_s22 + $0xb18] sm:$0xff] }
 0x360   : > { %7441 = vmatprep.subr.bf16.mxu0 %v12524_v35  ;;  %7785 = vmatprep.subr.bf16.mxu1 %v12526_v47  ;;  %v792_v35 = vld [vmem:[%s14566_s22 + $0xb38] sm:$0xff]  ;;  %v12571_v47 = vcombine.low %v779_v61, %v783_v62  ;;  %v12580_v14 = vcombine.high %v787_v10, %v791_v11 }
 0x361   : > { %v12582_v15 = vcombine.high %v788_v12, %v792_v35  ;;  %v12581_v23 = vcombine.low %v788_v12, %v792_v35  ;;  %v843_v35 = vld [vmem:[%s14566_s22 + $0xcd0] sm:$0xff] }
 0x363   : > { %7442 = vmatpush1.bf16.msra.mxu0 %v12523_v18  ;;  %7786 = vmatpush1.bf16.msra.mxu1 %v12525_v21  ;;  %v799_v18 = vld [vmem:[%s14566_s22 + $0xb70] sm:$0xff]  ;;  %v796_v21 = vld [vmem:[%s14566_s22 + $0xb58] sm:$0xff] }
 0x364   : > { %7443 = vmatprep.subr.bf16.mxu0 %v12532_v22  ;;  %7787 = vmatprep.subr.bf16.mxu1 %v12534_v17  ;;  %v800_v22 = vld [vmem:[%s14566_s22 + $0xb78] sm:$0xff]  ;;  %v12579_v17 = vcombine.low %v787_v10, %v791_v11  ;;  %v12588_v25 = vcombine.high %v795_v16, %v799_v18 }
 0x365   : > { %v12590_v55 = vcombine.high %v796_v21, %v800_v22  ;;  %v12589_v56 = vcombine.low %v796_v21, %v800_v22  ;;  %v851_v21 = vld [vmem:[%s14566_s22 + $0xd10] sm:$0xff] }
 0x366   : > { %v855_v22 = vld [vmem:[%s14566_s22 + $0xd30] sm:$0xff] }
 0x367   : > { %7444 = vmatpush1.bf16.msra.mxu0 %v12531_v27  ;;  %7788 = vmatpush1.bf16.msra.mxu1 %v12533_v28  ;;  %v807_v27 = vld [vmem:[%s14566_s22 + $0xbb0] sm:$0xff]  ;;  %v804_v28 = vld [vmem:[%s14566_s22 + $0xb98] sm:$0xff] }
 0x368   : > { %7445 = vmatprep.subr.bf16.mxu0 %v12540_v30  ;;  %7789 = vmatprep.subr.bf16.mxu1 %v12542_v34  ;;  %v808_v30 = vld [vmem:[%s14566_s22 + $0xbb8] sm:$0xff]  ;;  %v12587_v34 = vcombine.low %v795_v16, %v799_v18  ;;  %v12596_v37 = vcombine.high %v803_v26, %v807_v27 }
 0x369   : > { %v12598_v43 = vcombine.high %v804_v28, %v808_v30  ;;  %v12597_v6 = vcombine.low %v804_v28, %v808_v30  ;;  %v863_v28 = vld [vmem:[%s14566_s22 + $0xd70] sm:$0xff]  ;;  %v860_v30 = vld [vmem:[%s14566_s22 + $0xd58] sm:$0xff] }
 0x36b   : > { %7446 = vmatpush1.bf16.msra.mxu0 %v12539_v19  ;;  %7790 = vmatpush1.bf16.msra.mxu1 %v12541_v38  ;;  %v815_v19 = vld [vmem:[%s14566_s22 + $0xbf0] sm:$0xff]  ;;  %v812_v38 = vld [vmem:[%s14566_s22 + $0xbd8] sm:$0xff] }
 0x36c   : > { %7447 = vmatprep.subr.bf16.mxu0 %v12548_v39  ;;  %7791 = vmatprep.subr.bf16.mxu1 %v12550_v40  ;;  %v816_v39 = vld [vmem:[%s14566_s22 + $0xbf8] sm:$0xff]  ;;  %v12595_v40 = vcombine.low %v803_v26, %v807_v27  ;;  %v12604_v42 = vcombine.high %v811_v44, %v815_v19  ;;  %v859_v27 = vld [vmem:[%s14566_s22 + $0xd50] sm:$0xff] }
 0x36d   : > { %v12606_v46 = vcombine.high %v812_v38, %v816_v39  ;;  %v12605_v53 = vcombine.low %v812_v38, %v816_v39  ;;  %v871_v38 = vld [vmem:[%s14566_s22 + $0xdb0] sm:$0xff]  ;;  %v868_v39 = vld [vmem:[%s14566_s22 + $0xd98] sm:$0xff] }
 0x36f   : > { %7448 = vmatpush1.bf16.msra.mxu0 %v12547_v50  ;;  %7792 = vmatpush1.bf16.msra.mxu1 %v12549_v51  ;;  %v823_v50 = vld [vmem:[%s14566_s22 + $0xc30] sm:$0xff]  ;;  %v820_v51 = vld [vmem:[%s14566_s22 + $0xc18] sm:$0xff] }
 0x370   : > { %7449 = vmatprep.subr.bf16.mxu0 %v12556_v52  ;;  %7793 = vmatprep.subr.bf16.mxu1 %v12558_v3  ;;  %v824_v52 = vld [vmem:[%s14566_s22 + $0xc38] sm:$0xff]  ;;  %v12603_v3 = vcombine.low %v811_v44, %v815_v19  ;;  %v12612_v29 = vcombine.high %v819_v49, %v823_v50  ;;  %v867_v19 = vld [vmem:[%s14566_s22 + $0xd90] sm:$0xff] }
 0x371   : > { %v12614_v31 = vcombine.high %v820_v51, %v824_v52  ;;  %v12613_v61 = vcombine.low %v820_v51, %v824_v52  ;;  %v409_v52 = vld [vmem:[#allocation2 + $0x40] sm:$0xff] }
 0x373   : > { %7450 = vmatpush1.bf16.msra.mxu0 %v12555_v57  ;;  %7794 = vmatpush1.bf16.msra.mxu1 %v12557_v58  ;;  %v831_v57 = vld [vmem:[%s14566_s22 + $0xc70] sm:$0xff]  ;;  %v828_v58 = vld [vmem:[%s14566_s22 + $0xc58] sm:$0xff] }
 0x374   : > { %7451 = vmatprep.subr.bf16.mxu0 %v12564_v60  ;;  %7795 = vmatprep.subr.bf16.mxu1 %v12566_v59  ;;  %v832_v60 = vld [vmem:[%s14566_s22 + $0xc78] sm:$0xff]  ;;  %v12611_v59 = vcombine.low %v819_v49, %v823_v50  ;;  %v12620_v62 = vcombine.high %v827_v54, %v831_v57  ;;  %v402_v49 = vld [vmem:[#allocation2 + $0x8] sm:$0xff] }
 0x375   : > { %v12622_v20 = vcombine.high %v828_v58, %v832_v60  ;;  %v12621_v10 = vcombine.low %v828_v58, %v832_v60  ;;  %v404_v50 = vld [vmem:[#allocation2 + $0x18] sm:$0xff] }
 0x377   : > { %7452 = vmatpush1.bf16.msra.mxu0 %v12563_v0  ;;  %7796 = vmatpush1.bf16.msra.mxu1 %v12565_v2  ;;  %v839_v0 = vld [vmem:[%s14566_s22 + $0xcb0] sm:$0xff]  ;;  %v836_v2 = vld [vmem:[%s14566_s22 + $0xc98] sm:$0xff] }
 0x378   : > { %7453 = vmatprep.subr.bf16.mxu0 %v12572_v8  ;;  %7797 = vmatprep.subr.bf16.mxu1 %v12574_v9  ;;  %v840_v8 = vld [vmem:[%s14566_s22 + $0xcb8] sm:$0xff]  ;;  %v12619_v9 = vcombine.low %v827_v54, %v831_v57  ;;  %v12628_v11 = vcombine.high %v835_v63, %v839_v0  ;;  %v875_v54 = vld [vmem:[%s14566_s22 + $0xdd0] sm:$0xff] }
 0x379   : > { %v12630_v12 = vcombine.high %v836_v2, %v840_v8  ;;  %v879_v57 = vld [vmem:[%s14566_s22 + $0xdf0] sm:$0xff] }
 0x37b   : > { %7454 = vmatpush1.bf16.msra.mxu0 %v12571_v47  ;;  %7798 = vmatpush1.bf16.msra.mxu1 %v12573_v13  ;;  %v847_v47 = vld [vmem:[%s14566_s22 + $0xcf0] sm:$0xff]  ;;  %v844_v13 = vld [vmem:[%s14566_s22 + $0xcd8] sm:$0xff] }
 0x37c   : > { %7455 = vmatprep.subr.bf16.mxu0 %v12580_v14  ;;  %7799 = vmatprep.subr.bf16.mxu1 %v12582_v15  ;;  %v848_v14 = vld [vmem:[%s14566_s22 + $0xcf8] sm:$0xff]  ;;  %v12629_v15 = vcombine.low %v836_v2, %v840_v8  ;;  %v12636_v16 = vcombine.high %v843_v35, %v847_v47 }
 0x37d   : > { %v12638_v18 = vcombine.high %v844_v13, %v848_v14 }
 0x37f   : > { %7456 = vmatpush1.bf16.msra.mxu0 %v12579_v17  ;;  %7800 = vmatpush1.bf16.msra.mxu1 %v12581_v23  ;;  %v852_v17 = vld [vmem:[%s14566_s22 + $0xd18] sm:$0xff] }
 0x380   : > { %7457 = vmatprep.subr.bf16.mxu0 %v12588_v25  ;;  %7801 = vmatprep.subr.bf16.mxu1 %v12590_v55  ;;  %v856_v23 = vld [vmem:[%s14566_s22 + $0xd38] sm:$0xff]  ;;  %v12635_v25 = vcombine.low %v843_v35, %v847_v47  ;;  %v12644_v55 = vcombine.high %v851_v21, %v855_v22 }
 0x381   : > { %v12646_v26 = vcombine.high %v852_v17, %v856_v23 }
 0x383   : > { %7458 = vmatpush1.bf16.msra.mxu0 %v12587_v34  ;;  %7802 = vmatpush1.bf16.msra.mxu1 %v12589_v56  ;;  %v864_v34 = vld [vmem:[%s14566_s22 + $0xd78] sm:$0xff]  ;;  %v12643_v56 = vcombine.low %v851_v21, %v855_v22  ;;  %v883_v21 = vld [vmem:[%s14566_s22 + $0xe10] sm:$0xff] }
 0x384   : > { %7459 = vmatprep.subr.bf16.mxu0 %v12596_v37  ;;  %7803 = vmatprep.subr.bf16.mxu1 %v12598_v43  ;;  %v12645_v37 = vcombine.low %v852_v17, %v856_v23  ;;  %v12652_v43 = vcombine.high %v859_v27, %v863_v28  ;;  %v12654_v44 = vcombine.high %v860_v30, %v864_v34  ;;  %v887_v22 = vld [vmem:[%s14566_s22 + $0xe30] sm:$0xff]  ;;  %v884_v23 = vld [vmem:[%s14566_s22 + $0xe18] sm:$0xff] }
 0x385   : > { %v12653_v51 = vcombine.low %v860_v30, %v864_v34  ;;  %v895_v30 = vld [vmem:[%s14566_s22 + $0xe70] sm:$0xff]  ;;  %v892_v34 = vld [vmem:[%s14566_s22 + $0xe58] sm:$0xff] }
 0x387   : > { %7460 = vmatpush1.bf16.msra.mxu0 %v12595_v40  ;;  %7804 = vmatpush1.bf16.msra.mxu1 %v12597_v6  ;;  %v872_v40 = vld [vmem:[%s14566_s22 + $0xdb8] sm:$0xff] }
 0x388   : > { %7461 = vmatprep.subr.bf16.mxu0 %v12604_v42  ;;  %7805 = vmatprep.subr.bf16.mxu1 %v12606_v46  ;;  %v401_v6 = vld [vmem:[#allocation2] sm:$0xff]  ;;  %v403_v42 = vld [vmem:[#allocation2 + $0x10] sm:$0xff]  ;;  %v12651_v46 = vcombine.low %v859_v27, %v863_v28 }
 0x389   : > { %v891_v28 = vld [vmem:[%s14566_s22 + $0xe50] sm:$0xff] }
 0x38b   : > { %7462 = vmatpush1.bf16.msra.mxu0 %v12603_v3  ;;  %7806 = vmatpush1.bf16.msra.mxu1 %v12605_v53  ;;  %v12660_v3 = vcombine.high %v867_v19, %v871_v38 }
 0x38c   : > { %7474 = vmatprep.subr.bf16.mxu0 %v12612_v29  ;;  %7818 = vmatprep.subr.bf16.mxu1 %v12614_v31  ;;  %v411_v29 = vld [vmem:[#allocation2 + $0x50] sm:$0xff]  ;;  %v12662_v31 = vcombine.high %v868_v39, %v872_v40 }
 0x38e   : > { %7464 = vmatmul.mubr.bf16.vlgmr.msra.gmra.mrb[4].mxu0 %v14835_v45  ;;  %7808 = vmatmul.mubr.bf16.vlgmr.msra.gmra.mrb[4].mxu1 %v14835_v45  ;;  %v12627_v45 = vcombine.low %v835_v63, %v839_v0 }
 0x38f   : > { %7475 = vmatpush1.bf16.msra.mxu0 %v12611_v59  ;;  %7819 = vmatpush1.bf16.msra.mxu1 %v12613_v61  ;;  %v410_v61 = vld [vmem:[#allocation2 + $0x48] sm:$0xff] }
 0x390   : > { %7476 = vmatprep.subr.bf16.mxu0 %v12620_v62  ;;  %7820 = vmatprep.subr.bf16.mxu1 %v12622_v20  ;;  %v876_v62 = vld [vmem:[%s14566_s22 + $0xdd8] sm:$0xff] }
 0x391   : > { %7506 = vmatprep.mubr.bf16.mxu0 %v14848_v32  ;;  %7850 = vmatprep.mubr.bf16.mxu1 %v14848_v32  ;;  %v12637_v32 = vcombine.low %v844_v13, %v848_v14  ;;  %v880_v20 = vld [vmem:[%s14566_s22 + $0xdf8] sm:$0xff]  ;;  %v12668_v14 = vcombine.high %v875_v54, %v879_v57 }
 0x393   : > { %7477 = vmatpush1.bf16.msra.mxu0 %v12619_v9  ;;  %7821 = vmatpush1.bf16.msra.mxu1 %v12621_v10  ;;  %v412_v9 = vld [vmem:[#allocation2 + $0x58] sm:$0xff]  ;;  %v12659_v10 = vcombine.low %v867_v19, %v871_v38 }
 0x394   : > { %7478 = vmatprep.subr.bf16.mxu0 %v12628_v11  ;;  %7822 = vmatprep.subr.bf16.mxu1 %v12630_v12  ;;  %v12661_v11 = vcombine.low %v868_v39, %v872_v40  ;;  %v899_v38 = vld [vmem:[%s14566_s22 + $0xe90] sm:$0xff]  ;;  %v900_v40 = vld [vmem:[%s14566_s22 + $0xe98] sm:$0xff] }
 0x395   : > { %v903_v39 = vld [vmem:[%s14566_s22 + $0xeb0] sm:$0xff] }
 0x397   : > { %7479 = vmatpush1.bf16.msra.mxu0 %v12627_v45  ;;  %7823 = vmatpush1.bf16.msra.mxu1 %v12629_v15 }
 0x398   : > { %7480 = vmatprep.subr.bf16.mxu0 %v12636_v16  ;;  %7824 = vmatprep.subr.bf16.mxu1 %v12638_v18  ;;  %v12670_v18 = vcombine.high %v876_v62, %v880_v20 }
 0x39b   : > { %7481 = vmatpush1.bf16.msra.mxu0 %v12635_v25  ;;  %7825 = vmatpush1.bf16.msra.mxu1 %v12637_v32  ;;  %v888_v25 = vld [vmem:[%s14566_s22 + $0xe38] sm:$0xff]  ;;  %v12667_v32 = vcombine.low %v875_v54, %v879_v57 }
 0x39c   : > { %7482 = vmatprep.subr.bf16.mxu0 %v12644_v55  ;;  %7826 = vmatprep.subr.bf16.mxu1 %v12646_v26  ;;  %v12669_v55 = vcombine.low %v876_v62, %v880_v20  ;;  %v12676_v26 = vcombine.high %v883_v21, %v887_v22  ;;  %v12678_v27 = vcombine.high %v884_v23, %v888_v25 }
 0x39f   : > { %7483 = vmatpush1.bf16.msra.mxu0 %v12643_v56  ;;  %7827 = vmatpush1.bf16.msra.mxu1 %v12645_v37  ;;  %v896_v56 = vld [vmem:[%s14566_s22 + $0xe78] sm:$0xff]  ;;  %v12675_v37 = vcombine.low %v883_v21, %v887_v22 }
 0x3a0   : > { %7484 = vmatprep.subr.bf16.mxu0 %v12652_v43  ;;  %7828 = vmatprep.subr.bf16.mxu1 %v12654_v44  ;;  %v12677_v43 = vcombine.low %v884_v23, %v888_v25  ;;  %v12684_v44 = vcombine.high %v891_v28, %v895_v30  ;;  %v12686_v19 = vcombine.high %v892_v34, %v896_v56  ;;  %v943_v23 = vld [vmem:[%s14566_s22 + $0xff0] sm:$0xff]  ;;  %v940_v25 = vld [vmem:[%s14566_s22 + $0xfd8] sm:$0xff] }
 0x3a1   : > { %v6992_v53 = vpop.f32.mrb[0].mxu0  ;;  %v7336_v60 = vpop.f32.mrb[0].mxu1 }
 0x3a2   : > { %v8033_v58 = vadd.f32 %v6992_v53, %v401_v6  ;;  %v6994_v59 = vpop.f32.mrb[1].mxu0  ;;  %v8035_v63 = vadd.f32 %v7336_v60, %v403_v42  ;;  %v7338_v2 = vpop.f32.mrb[1].mxu1  ;;  %v904_v6 = vld [vmem:[%s14566_s22 + $0xeb8] sm:$0xff]  ;;  %v12683_v42 = vcombine.low %v891_v28, %v895_v30  ;;  %v919_v60 = vld [vmem:[%s14566_s22 + $0xf30] sm:$0xff] }
 0x3a3   : > { %v8034_v0 = vadd.f32 %v6994_v59, %v402_v49  ;;  %v6996_v8 = vpop.f32.mrb[2].mxu0  ;;  %7485 = vmatpush1.bf16.msra.mxu0 %v12651_v46  ;;  %v8036_v12 = vadd.f32 %v7338_v2, %v404_v50  ;;  %v7340_v47 = vpop.f32.mrb[2].mxu1  ;;  %7829 = vmatpush1.bf16.msra.mxu1 %v12653_v51  ;;  %v12685_v46 = vcombine.low %v892_v34, %v896_v56  ;;  %v907_v51 = vld [vmem:[%s14566_s22 + $0xed0] sm:$0xff]  ;;  %v912_v53 = vld [vmem:[%s14566_s22 + $0xef8] sm:$0xff] }
 0x3a4   : > { %8049 = vst [vmem:[#allocation2] sm:$0xff] %v8033_v58  ;;  %v8041_v35 = vadd.f32 %v6996_v8, %v409_v52  ;;  %v6998_v13 = vpop.f32.mrb[3].mxu0  ;;  %7486 = vmatprep.subr.bf16.mxu0 %v12660_v3  ;;  %8051 = vst [vmem:[#allocation2 + $0x10] sm:$0xff] %v8035_v63  ;;  %v8043_v45 = vadd.f32 %v7340_v47, %v411_v29  ;;  %v7342_v16 = vpop.f32.mrb[3].mxu1  ;;  %7830 = vmatprep.subr.bf16.mxu1 %v12662_v31  ;;  %v911_v52 = vld [vmem:[%s14566_s22 + $0xef0] sm:$0xff]  ;;  %v908_v3 = vld [vmem:[%s14566_s22 + $0xed8] sm:$0xff] }
 0x3a5   : > { %8050 = vst [vmem:[#allocation2 + $0x8] sm:$0xff] %v8034_v0  ;;  %v8042_v15 = vadd.f32 %v6998_v13, %v410_v61  ;;  %8052 = vst [vmem:[#allocation2 + $0x18] sm:$0xff] %v8036_v12  ;;  %v8044_v17 = vadd.f32 %v7342_v16, %v412_v9  ;;  %v12692_v49 = vcombine.high %v899_v38, %v903_v39  ;;  %v915_v58 = vld [vmem:[%s14566_s22 + $0xf10] sm:$0xff]  ;;  %v916_v59 = vld [vmem:[%s14566_s22 + $0xf18] sm:$0xff] }
 0x3a6   : > { %8057 = vst [vmem:[#allocation2 + $0x40] sm:$0xff] %v8041_v35  ;;  %8059 = vst [vmem:[#allocation2 + $0x50] sm:$0xff] %v8043_v45  ;;  %v12694_v50 = vcombine.high %v900_v40, %v904_v6  ;;  %v12691_v29 = vcombine.low %v899_v38, %v903_v39  ;;  %v12693_v31 = vcombine.low %v900_v40, %v904_v6  ;;  %v920_v61 = vld [vmem:[%s14566_s22 + $0xf38] sm:$0xff]  ;;  %v923_v2 = vld [vmem:[%s14566_s22 + $0xf50] sm:$0xff] }
 0x3a7   : > { %8058 = vst [vmem:[#allocation2 + $0x48] sm:$0xff] %v8042_v15  ;;  %7487 = vmatpush1.bf16.msra.mxu0 %v12659_v10  ;;  %8060 = vst [vmem:[#allocation2 + $0x58] sm:$0xff] %v8044_v17  ;;  %7831 = vmatpush1.bf16.msra.mxu1 %v12661_v11  ;;  %v12700_v54 = vcombine.high %v907_v51, %v911_v52  ;;  %v12702_v57 = vcombine.high %v908_v3, %v912_v53  ;;  %v927_v8 = vld [vmem:[%s14566_s22 + $0xf70] sm:$0xff]  ;;  %v924_v9 = vld [vmem:[%s14566_s22 + $0xf58] sm:$0xff] }
 0x3a8   : > { %7488 = vmatprep.subr.bf16.mxu0 %v12668_v14  ;;  %7832 = vmatprep.subr.bf16.mxu1 %v12670_v18  ;;  %v12699_v62 = vcombine.low %v907_v51, %v911_v52  ;;  %v12701_v20 = vcombine.low %v908_v3, %v912_v53  ;;  %v12708_v63 = vcombine.high %v915_v58, %v919_v60  ;;  %v928_v10 = vld [vmem:[%s14566_s22 + $0xf78] sm:$0xff]  ;;  %v931_v13 = vld [vmem:[%s14566_s22 + $0xf90] sm:$0xff] }
 0x3a9   : > { %v12710_v0 = vcombine.high %v916_v59, %v920_v61  ;;  %v12707_v11 = vcombine.low %v915_v58, %v919_v60  ;;  %v12709_v12 = vcombine.low %v916_v59, %v920_v61  ;;  %v12716_v35 = vcombine.high %v923_v2, %v927_v8  ;;  %v935_v14 = vld [vmem:[%s14566_s22 + $0xfb0] sm:$0xff]  ;;  %v932_v45 = vld [vmem:[%s14566_s22 + $0xf98] sm:$0xff] }
 0x3aa   : > { %v12718_v47 = vcombine.high %v924_v9, %v928_v10  ;;  %v936_v15 = vld [vmem:[%s14566_s22 + $0xfb8] sm:$0xff]  ;;  %v12715_v16 = vcombine.low %v923_v2, %v927_v8  ;;  %v12717_v18 = vcombine.low %v924_v9, %v928_v10  ;;  %v12724_v21 = vcombine.high %v931_v13, %v935_v14  ;;  %v939_v17 = vld [vmem:[%s14566_s22 + $0xfd0] sm:$0xff] }
 0x3ab   : > { %7489 = vmatpush1.bf16.msra.mxu0 %v12667_v32  ;;  %7833 = vmatpush1.bf16.msra.mxu1 %v12669_v55  ;;  %v12726_v22 = vcombine.high %v932_v45, %v936_v15  ;;  %v944_v32 = vld [vmem:[%s14566_s22 + $0xff8] sm:$0xff]  ;;  %v12723_v55 = vcombine.low %v931_v13, %v935_v14  ;;  %v947_v30 = vld [vmem:[%s14566_s22 + $0x1010] sm:$0xff] }
 0x3ac   : > { %7490 = vmatprep.subr.bf16.mxu0 %v12676_v26  ;;  %7834 = vmatprep.subr.bf16.mxu1 %v12678_v27  ;;  %v12725_v26 = vcombine.low %v932_v45, %v936_v15  ;;  %v12732_v27 = vcombine.high %v939_v17, %v943_v23  ;;  %v12734_v28 = vcombine.high %v940_v25, %v944_v32  ;;  %v951_v34 = vld [vmem:[%s14566_s22 + $0x1030] sm:$0xff]  ;;  %v948_v56 = vld [vmem:[%s14566_s22 + $0x1018] sm:$0xff] }
 0x3ad   : > { %v955_v39 = vld [vmem:[%s14566_s22 + $0x1050] sm:$0xff]  ;;  %v956_v6 = vld [vmem:[%s14566_s22 + $0x1058] sm:$0xff] }
 0x3ae   : > { %v959_v40 = vld [vmem:[%s14566_s22 + $0x1070] sm:$0xff]  ;;  %v964_v53 = vld [vmem:[%s14566_s22 + $0x1098] sm:$0xff] }
 0x3af   : > { %7491 = vmatpush1.bf16.msra.mxu0 %v12675_v37  ;;  %7835 = vmatpush1.bf16.msra.mxu1 %v12677_v43  ;;  %v952_v37 = vld [vmem:[%s14566_s22 + $0x1038] sm:$0xff]  ;;  %v12731_v43 = vcombine.low %v939_v17, %v943_v23  ;;  %v963_v52 = vld [vmem:[%s14566_s22 + $0x1090] sm:$0xff] }
 0x3b0   : > { %7492 = vmatprep.subr.bf16.mxu0 %v12684_v44  ;;  %7836 = vmatprep.subr.bf16.mxu1 %v12686_v19  ;;  %v12733_v44 = vcombine.low %v940_v25, %v944_v32  ;;  %v12740_v19 = vcombine.high %v947_v30, %v951_v34  ;;  %v12742_v38 = vcombine.high %v948_v56, %v952_v37  ;;  %v967_v3 = vld [vmem:[%s14566_s22 + $0x10b0] sm:$0xff]  ;;  %v972_v61 = vld [vmem:[%s14566_s22 + $0x10d8] sm:$0xff] }
 0x3b1   : > { %v971_v60 = vld [vmem:[%s14566_s22 + $0x10d0] sm:$0xff]  ;;  %v980_v9 = vld [vmem:[%s14566_s22 + $0x1118] sm:$0xff] }
 0x3b2   : > { %v975_v59 = vld [vmem:[%s14566_s22 + $0x10f0] sm:$0xff]  ;;  %v984_v10 = vld [vmem:[%s14566_s22 + $0x1138] sm:$0xff] }
 0x3b3   : > { %7493 = vmatpush1.bf16.msra.mxu0 %v12683_v42  ;;  %7837 = vmatpush1.bf16.msra.mxu1 %v12685_v46  ;;  %v960_v42 = vld [vmem:[%s14566_s22 + $0x1078] sm:$0xff]  ;;  %v12739_v46 = vcombine.low %v947_v30, %v951_v34  ;;  %v979_v2 = vld [vmem:[%s14566_s22 + $0x1110] sm:$0xff] }
 0x3b4   : > { %7494 = vmatprep.subr.bf16.mxu0 %v12692_v49  ;;  %7838 = vmatprep.subr.bf16.mxu1 %v12694_v50  ;;  %v12741_v49 = vcombine.low %v948_v56, %v952_v37  ;;  %v12748_v50 = vcombine.high %v955_v39, %v959_v40  ;;  %v12750_v51 = vcombine.high %v956_v6, %v960_v42  ;;  %v983_v8 = vld [vmem:[%s14566_s22 + $0x1130] sm:$0xff]  ;;  %v988_v14 = vld [vmem:[%s14566_s22 + $0x1158] sm:$0xff] }
 0x3b5   : > { %v991_v13 = vld [vmem:[%s14566_s22 + $0x1170] sm:$0xff]  ;;  %v992_v45 = vld [vmem:[%s14566_s22 + $0x1178] sm:$0xff]  ;;  %v12771_v15 = vcombine.low %v979_v2, %v983_v8 }
 0x3b6   : > { %v999_v17 = vld [vmem:[%s14566_s22 + $0x11b0] sm:$0xff]  ;;  %v996_v23 = vld [vmem:[%s14566_s22 + $0x1198] sm:$0xff] }
 0x3b7   : > { %7495 = vmatpush1.bf16.msra.mxu0 %v12691_v29  ;;  %7839 = vmatpush1.bf16.msra.mxu1 %v12693_v31  ;;  %v968_v29 = vld [vmem:[%s14566_s22 + $0x10b8] sm:$0xff]  ;;  %v12747_v31 = vcombine.low %v955_v39, %v959_v40  ;;  %v1007_v30 = vld [vmem:[%s14566_s22 + $0x11f0] sm:$0xff] }
 0x3b8   : > { %7496 = vmatprep.subr.bf16.mxu0 %v12700_v54  ;;  %7840 = vmatprep.subr.bf16.mxu1 %v12702_v57  ;;  %v12749_v54 = vcombine.low %v956_v6, %v960_v42  ;;  %v12756_v57 = vcombine.high %v963_v52, %v967_v3  ;;  %v12758_v58 = vcombine.high %v964_v53, %v968_v29  ;;  %v1000_v25 = vld [vmem:[%s14566_s22 + $0x11b8] sm:$0xff]  ;;  %v1015_v39 = vld [vmem:[%s14566_s22 + $0x1230] sm:$0xff] }
 0x3b9   : > { %v1004_v34 = vld [vmem:[%s14566_s22 + $0x11d8] sm:$0xff] }
 0x3ba   : > { %v1008_v56 = vld [vmem:[%s14566_s22 + $0x11f8] sm:$0xff] }
 0x3bb   : > { %7497 = vmatpush1.bf16.msra.mxu0 %v12699_v62  ;;  %7841 = vmatpush1.bf16.msra.mxu1 %v12701_v20  ;;  %v976_v62 = vld [vmem:[%s14566_s22 + $0x10f8] sm:$0xff]  ;;  %v12757_v20 = vcombine.low %v964_v53, %v968_v29 }
 0x3bc   : > { %7498 = vmatprep.subr.bf16.mxu0 %v12708_v63  ;;  %7842 = vmatprep.subr.bf16.mxu1 %v12710_v0  ;;  %v12764_v63 = vcombine.high %v971_v60, %v975_v59  ;;  %v12766_v0 = vcombine.high %v972_v61, %v976_v62  ;;  %v1012_v40 = vld [vmem:[%s14566_s22 + $0x1218] sm:$0xff] }
 0x3bd   : > { %v1016_v6 = vld [vmem:[%s14566_s22 + $0x1238] sm:$0xff] }
 0x3be   : > { %v1024_v53 = vld [vmem:[%s14566_s22 + $0x1278] sm:$0xff] }
 0x3bf   : > { %7499 = vmatpush1.bf16.msra.mxu0 %v12707_v11  ;;  %7843 = vmatpush1.bf16.msra.mxu1 %v12709_v12  ;;  %v12763_v11 = vcombine.low %v971_v60, %v975_v59  ;;  %v12772_v12 = vcombine.high %v979_v2, %v983_v8  ;;  %v1031_v60 = vld [vmem:[%s14566_s22 + $0x12b0] sm:$0xff]  ;;  %v1028_v59 = vld [vmem:[%s14566_s22 + $0x1298] sm:$0xff] }
 0x3c0   : > { %7500 = vmatprep.subr.bf16.mxu0 %v12716_v35  ;;  %7844 = vmatprep.subr.bf16.mxu1 %v12718_v47  ;;  %v12774_v35 = vcombine.high %v980_v9, %v984_v10  ;;  %v987_v47 = vld [vmem:[%s14566_s22 + $0x1150] sm:$0xff]  ;;  %v1036_v8 = vld [vmem:[%s14566_s22 + $0x12d8] sm:$0xff] }
 0x3c1   : > { %v12779_v32 = vcombine.low %v987_v47, %v991_v13  ;;  %v1039_v2 = vld [vmem:[%s14566_s22 + $0x12f0] sm:$0xff] }
 0x3c3   : > { %7501 = vmatpush1.bf16.msra.mxu0 %v12715_v16  ;;  %7845 = vmatpush1.bf16.msra.mxu1 %v12717_v18  ;;  %v12773_v16 = vcombine.low %v980_v9, %v984_v10  ;;  %v12780_v18 = vcombine.high %v987_v47, %v991_v13  ;;  %v1040_v9 = vld [vmem:[%s14566_s22 + $0x12f8] sm:$0xff]  ;;  %v1047_v47 = vld [vmem:[%s14566_s22 + $0x1330] sm:$0xff] }
 0x3c4   : > { %7502 = vmatprep.subr.bf16.mxu0 %v12724_v21  ;;  %7846 = vmatprep.subr.bf16.mxu1 %v12726_v22  ;;  %v12782_v21 = vcombine.high %v988_v14, %v992_v45  ;;  %v995_v22 = vld [vmem:[%s14566_s22 + $0x1190] sm:$0xff]  ;;  %v1044_v13 = vld [vmem:[%s14566_s22 + $0x1318] sm:$0xff] }
 0x3c5   : > { %v12787_v37 = vcombine.low %v995_v22, %v999_v17 }
 0x3c7   : > { %7503 = vmatpush1.bf16.msra.mxu0 %v12723_v55  ;;  %7847 = vmatpush1.bf16.msra.mxu1 %v12725_v26  ;;  %v12781_v55 = vcombine.low %v988_v14, %v992_v45  ;;  %v12788_v26 = vcombine.high %v995_v22, %v999_v17  ;;  %v1048_v14 = vld [vmem:[%s14566_s22 + $0x1338] sm:$0xff]  ;;  %v1055_v22 = vld [vmem:[%s14566_s22 + $0x1370] sm:$0xff] }
 0x3c8   : > { %7504 = vmatprep.subr.bf16.mxu0 %v12732_v27  ;;  %7848 = vmatprep.subr.bf16.mxu1 %v12734_v28  ;;  %v12790_v27 = vcombine.high %v996_v23, %v1000_v25  ;;  %v1003_v28 = vld [vmem:[%s14566_s22 + $0x11d0] sm:$0xff]  ;;  %v1052_v17 = vld [vmem:[%s14566_s22 + $0x1358] sm:$0xff] }
 0x3c9   : > { %v12795_v42 = vcombine.low %v1003_v28, %v1007_v30 }
 0x3cb   : > { %7505 = vmatpush1.bf16.msra.mxu0 %v12731_v43  ;;  %7849 = vmatpush1.bf16.msra.mxu1 %v12733_v44  ;;  %v12789_v43 = vcombine.low %v996_v23, %v1000_v25  ;;  %v12796_v44 = vcombine.high %v1003_v28, %v1007_v30  ;;  %v1056_v23 = vld [vmem:[%s14566_s22 + $0x1378] sm:$0xff]  ;;  %v1063_v28 = vld [vmem:[%s14566_s22 + $0x13b0] sm:$0xff] }
 0x3cc   : > { %7517 = vmatprep.subr.bf16.mxu0 %v12740_v19  ;;  %7861 = vmatprep.subr.bf16.mxu1 %v12742_v38  ;;  %v12798_v19 = vcombine.high %v1004_v34, %v1008_v56  ;;  %v1011_v38 = vld [vmem:[%s14566_s22 + $0x1210] sm:$0xff]  ;;  %v1060_v30 = vld [vmem:[%s14566_s22 + $0x1398] sm:$0xff] }
 0x3cd   : > { %v12803_v29 = vcombine.low %v1011_v38, %v1015_v39 }
 0x3ce   : > { %7507 = vmatmul.mubr.bf16.vlgmr.msra.gmra.mrb[4].mxu0 %v14917_v4  ;;  %7851 = vmatmul.mubr.bf16.vlgmr.msra.gmra.mrb[4].mxu1 %v14917_v4  ;;  %v12755_v4 = vcombine.low %v963_v52, %v967_v3  ;;  %v1023_v52 = vld [vmem:[%s14566_s22 + $0x1270] sm:$0xff]  ;;  %v1020_v3 = vld [vmem:[%s14566_s22 + $0x1258] sm:$0xff] }
 0x3cf   : > { %7518 = vmatpush1.bf16.msra.mxu0 %v12739_v46  ;;  %7862 = vmatpush1.bf16.msra.mxu1 %v12741_v49  ;;  %v12797_v46 = vcombine.low %v1004_v34, %v1008_v56  ;;  %v12804_v49 = vcombine.high %v1011_v38, %v1015_v39  ;;  %v1064_v34 = vld [vmem:[%s14566_s22 + $0x13b8] sm:$0xff]  ;;  %v1071_v38 = vld [vmem:[%s14566_s22 + $0x13f0] sm:$0xff] }
 0x3d0   : > { %7519 = vmatprep.subr.bf16.mxu0 %v12748_v50  ;;  %7863 = vmatprep.subr.bf16.mxu1 %v12750_v51  ;;  %v12806_v50 = vcombine.high %v1012_v40, %v1016_v6  ;;  %v1019_v51 = vld [vmem:[%s14566_s22 + $0x1250] sm:$0xff]  ;;  %v1068_v39 = vld [vmem:[%s14566_s22 + $0x13d8] sm:$0xff] }
 0x3d1   : > { %7549 = vmatprep.mubr.bf16.mxu0 %v14930_v48  ;;  %7893 = vmatprep.mubr.bf16.mxu1 %v14930_v48  ;;  %v12765_v48 = vcombine.low %v972_v61, %v976_v62  ;;  %v1032_v61 = vld [vmem:[%s14566_s22 + $0x12b8] sm:$0xff]  ;;  %v12811_v62 = vcombine.low %v1019_v51, %v1023_v52 }
 0x3d3   : > { %7520 = vmatpush1.bf16.msra.mxu0 %v12747_v31  ;;  %7864 = vmatpush1.bf16.msra.mxu1 %v12749_v54  ;;  %v12805_v31 = vcombine.low %v1012_v40, %v1016_v6  ;;  %v12812_v54 = vcombine.high %v1019_v51, %v1023_v52  ;;  %v1072_v40 = vld [vmem:[%s14566_s22 + $0x13f8] sm:$0xff]  ;;  %v1079_v51 = vld [vmem:[%s14566_s22 + $0x1430] sm:$0xff] }
 0x3d4   : > { %7521 = vmatprep.subr.bf16.mxu0 %v12756_v57  ;;  %7865 = vmatprep.subr.bf16.mxu1 %v12758_v58  ;;  %v12814_v57 = vcombine.high %v1020_v3, %v1024_v53  ;;  %v1027_v58 = vld [vmem:[%s14566_s22 + $0x1290] sm:$0xff]  ;;  %v1076_v52 = vld [vmem:[%s14566_s22 + $0x1418] sm:$0xff] }
 0x3d5   : > { %v12819_v10 = vcombine.low %v1027_v58, %v1031_v60 }
 0x3d7   : > { %7522 = vmatpush1.bf16.msra.mxu0 %v12755_v4  ;;  %7866 = vmatpush1.bf16.msra.mxu1 %v12757_v20  ;;  %v12813_v4 = vcombine.low %v1020_v3, %v1024_v53  ;;  %v12820_v20 = vcombine.high %v1027_v58, %v1031_v60  ;;  %v1080_v3 = vld [vmem:[%s14566_s22 + $0x1438] sm:$0xff]  ;;  %v1087_v58 = vld [vmem:[%s14566_s22 + $0x1470] sm:$0xff] }
 0x3d8   : > { %7523 = vmatprep.subr.bf16.mxu0 %v12764_v63  ;;  %7867 = vmatprep.subr.bf16.mxu1 %v12766_v0  ;;  %v12822_v63 = vcombine.high %v1028_v59, %v1032_v61  ;;  %v1035_v0 = vld [vmem:[%s14566_s22 + $0x12d0] sm:$0xff]  ;;  %v1084_v60 = vld [vmem:[%s14566_s22 + $0x1458] sm:$0xff] }
 0x3d9   : > { %v12827_v45 = vcombine.low %v1035_v0, %v1039_v2 }
 0x3db   : > { %7524 = vmatpush1.bf16.msra.mxu0 %v12763_v11  ;;  %7868 = vmatpush1.bf16.msra.mxu1 %v12765_v48  ;;  %v12821_v11 = vcombine.low %v1028_v59, %v1032_v61  ;;  %v12828_v48 = vcombine.high %v1035_v0, %v1039_v2  ;;  %v1088_v59 = vld [vmem:[%s14566_s22 + $0x1478] sm:$0xff]  ;;  %v1095_v0 = vld [vmem:[%s14566_s22 + $0x14b0] sm:$0xff] }
 0x3dc   : > { %7525 = vmatprep.subr.bf16.mxu0 %v12772_v12  ;;  %7869 = vmatprep.subr.bf16.mxu1 %v12774_v35  ;;  %v12830_v12 = vcombine.high %v1036_v8, %v1040_v9  ;;  %v1043_v35 = vld [vmem:[%s14566_s22 + $0x1310] sm:$0xff]  ;;  %v1092_v2 = vld [vmem:[%s14566_s22 + $0x1498] sm:$0xff] }
 0x3dd   : > { %v12835_v25 = vcombine.low %v1043_v35, %v1047_v47 }
 0x3df   : > { %7526 = vmatpush1.bf16.msra.mxu0 %v12771_v15  ;;  %7870 = vmatpush1.bf16.msra.mxu1 %v12773_v16  ;;  %v12829_v15 = vcombine.low %v1036_v8, %v1040_v9  ;;  %v12836_v16 = vcombine.high %v1043_v35, %v1047_v47  ;;  %v1096_v8 = vld [vmem:[%s14566_s22 + $0x14b8] sm:$0xff]  ;;  %v1103_v35 = vld [vmem:[%s14566_s22 + $0x14f0] sm:$0xff] }
 0x3e0   : > { %7527 = vmatprep.subr.bf16.mxu0 %v12780_v18  ;;  %7871 = vmatprep.subr.bf16.mxu1 %v12782_v21  ;;  %v12838_v18 = vcombine.high %v1044_v13, %v1048_v14  ;;  %v1051_v21 = vld [vmem:[%s14566_s22 + $0x1350] sm:$0xff]  ;;  %v1100_v47 = vld [vmem:[%s14566_s22 + $0x14d8] sm:$0xff] }
 0x3e1   : > { %v12843_v56 = vcombine.low %v1051_v21, %v1055_v22 }
 0x3e3   : > { %7528 = vmatpush1.bf16.msra.mxu0 %v12779_v32  ;;  %7872 = vmatpush1.bf16.msra.mxu1 %v12781_v55  ;;  %v12837_v32 = vcombine.low %v1044_v13, %v1048_v14  ;;  %v12844_v55 = vcombine.high %v1051_v21, %v1055_v22  ;;  %v1104_v13 = vld [vmem:[%s14566_s22 + $0x14f8] sm:$0xff]  ;;  %v12885_v14 = vcombine.low %v1092_v2, %v1096_v8 }
 0x3e4   : > { %7529 = vmatprep.subr.bf16.mxu0 %v12788_v26  ;;  %7873 = vmatprep.subr.bf16.mxu1 %v12790_v27  ;;  %v12846_v26 = vcombine.high %v1052_v17, %v1056_v23  ;;  %v1059_v27 = vld [vmem:[%s14566_s22 + $0x1390] sm:$0xff]  ;;  %v1108_v21 = vld [vmem:[%s14566_s22 + $0x1518] sm:$0xff] }
 0x3e5   : > { %v12851_v6 = vcombine.low %v1059_v27, %v1063_v28  ;;  %v1112_v22 = vld [vmem:[%s14566_s22 + $0x1538] sm:$0xff] }
 0x3e7   : > { %7530 = vmatpush1.bf16.msra.mxu0 %v12787_v37  ;;  %7874 = vmatpush1.bf16.msra.mxu1 %v12789_v43  ;;  %v12845_v37 = vcombine.low %v1052_v17, %v1056_v23  ;;  %v12852_v43 = vcombine.high %v1059_v27, %v1063_v28  ;;  %v1120_v27 = vld [vmem:[%s14566_s22 + $0x1578] sm:$0xff] }
 0x3e8   : > { %7531 = vmatprep.subr.bf16.mxu0 %v12796_v44  ;;  %7875 = vmatprep.subr.bf16.mxu1 %v12798_v19  ;;  %v12854_v44 = vcombine.high %v1060_v30, %v1064_v34  ;;  %v1067_v19 = vld [vmem:[%s14566_s22 + $0x13d0] sm:$0xff] }
 0x3e9   : > { %v12859_v53 = vcombine.low %v1067_v19, %v1071_v38 }
 0x3eb   : > { %7532 = vmatpush1.bf16.msra.mxu0 %v12795_v42  ;;  %7876 = vmatpush1.bf16.msra.mxu1 %v12797_v46  ;;  %v12853_v42 = vcombine.low %v1060_v30, %v1064_v34  ;;  %v12860_v46 = vcombine.high %v1067_v19, %v1071_v38  ;;  %v12901_v30 = vcombine.low %v1108_v21, %v1112_v22  ;;  %v1128_v19 = vld [vmem:[%s14566_s22 + $0x15b8] sm:$0xff] }
 0x3ec   : > { %7533 = vmatprep.subr.bf16.mxu0 %v12804_v49  ;;  %7877 = vmatprep.subr.bf16.mxu1 %v12806_v50  ;;  %v12862_v49 = vcombine.high %v1068_v39, %v1072_v40  ;;  %v1075_v50 = vld [vmem:[%s14566_s22 + $0x1410] sm:$0xff] }
 0x3ed   : > { %v12867_v61 = vcombine.low %v1075_v50, %v1079_v51 }
 0x3ef   : > { %7534 = vmatpush1.bf16.msra.mxu0 %v12803_v29  ;;  %7878 = vmatpush1.bf16.msra.mxu1 %v12805_v31  ;;  %v12861_v29 = vcombine.low %v1068_v39, %v1072_v40  ;;  %v12868_v31 = vcombine.high %v1075_v50, %v1079_v51  ;;  %v1136_v50 = vld [vmem:[%s14566_s22 + $0x15f8] sm:$0xff] }
 0x3f0   : > { %7535 = vmatprep.subr.bf16.mxu0 %v12812_v54  ;;  %7879 = vmatprep.subr.bf16.mxu1 %v12814_v57  ;;  %v12870_v54 = vcombine.high %v1076_v52, %v1080_v3  ;;  %v1083_v57 = vld [vmem:[%s14566_s22 + $0x1450] sm:$0xff] }
 0x3f1   : > { %v12875_v9 = vcombine.low %v1083_v57, %v1087_v58 }
 0x3f3   : > { %7536 = vmatpush1.bf16.msra.mxu0 %v12811_v62  ;;  %7880 = vmatpush1.bf16.msra.mxu1 %v12813_v4  ;;  %v12869_v62 = vcombine.low %v1076_v52, %v1080_v3  ;;  %v12876_v4 = vcombine.high %v1083_v57, %v1087_v58  ;;  %v1144_v57 = vld [vmem:[%s14566_s22 + $0x1638] sm:$0xff] }
 0x3f4   : > { %7537 = vmatprep.subr.bf16.mxu0 %v12820_v20  ;;  %7881 = vmatprep.subr.bf16.mxu1 %v12822_v63  ;;  %v12878_v20 = vcombine.high %v1084_v60, %v1088_v59  ;;  %v1091_v63 = vld [vmem:[%s14566_s22 + $0x1490] sm:$0xff] }
 0x3f7   : > { %7538 = vmatpush1.bf16.msra.mxu0 %v12819_v10  ;;  %7882 = vmatpush1.bf16.msra.mxu1 %v12821_v11  ;;  %v12877_v10 = vcombine.low %v1084_v60, %v1088_v59  ;;  %v12884_v11 = vcombine.high %v1091_v63, %v1095_v0 }
 0x3f8   : > { %7539 = vmatprep.subr.bf16.mxu0 %v12828_v48  ;;  %7883 = vmatprep.subr.bf16.mxu1 %v12830_v12  ;;  %v12886_v48 = vcombine.high %v1092_v2, %v1096_v8  ;;  %v1099_v12 = vld [vmem:[%s14566_s22 + $0x14d0] sm:$0xff] }
 0x3f9   : > { %v12891_v17 = vcombine.low %v1099_v12, %v1103_v35 }
 0x3fb   : > { %7540 = vmatpush1.bf16.msra.mxu0 %v12827_v45  ;;  %7884 = vmatpush1.bf16.msra.mxu1 %v12829_v15  ;;  %v12892_v45 = vcombine.high %v1099_v12, %v1103_v35  ;;  %v12894_v15 = vcombine.high %v1100_v47, %v1104_v13  ;;  %v1160_v12 = vld [vmem:[%s14566_s22 + $0x16b8] sm:$0xff] }
 0x3fc   : > { %7541 = vmatprep.subr.bf16.mxu0 %v12836_v16  ;;  %7885 = vmatprep.subr.bf16.mxu1 %v12838_v18  ;;  %v1107_v16 = vld [vmem:[%s14566_s22 + $0x1510] sm:$0xff] }
 0x3fd   : > { %v1111_v18 = vld [vmem:[%s14566_s22 + $0x1530] sm:$0xff] }
 0x3fe   : > { %v12900_v23 = vcombine.high %v1107_v16, %v1111_v18  ;;  %v12899_v28 = vcombine.low %v1107_v16, %v1111_v18  ;;  %v1168_v16 = vld [vmem:[%s14566_s22 + $0x16f8] sm:$0xff] }
 0x3ff   : > { %7542 = vmatpush1.bf16.msra.mxu0 %v12835_v25  ;;  %7886 = vmatpush1.bf16.msra.mxu1 %v12837_v32  ;;  %v12902_v25 = vcombine.high %v1108_v21, %v1112_v22  ;;  %v1115_v32 = vld [vmem:[%s14566_s22 + $0x1550] sm:$0xff] }
 0x400   : > { %7543 = vmatprep.subr.bf16.mxu0 %v12844_v55  ;;  %7887 = vmatprep.subr.bf16.mxu1 %v12846_v26  ;;  %v1119_v55 = vld [vmem:[%s14566_s22 + $0x1570] sm:$0xff]  ;;  %v1116_v26 = vld [vmem:[%s14566_s22 + $0x1558] sm:$0xff] }
 0x401   : > { %v12908_v34 = vcombine.high %v1115_v32, %v1119_v55  ;;  %v12907_v38 = vcombine.low %v1115_v32, %v1119_v55  ;;  %v12909_v39 = vcombine.low %v1116_v26, %v1120_v27  ;;  %v1176_v32 = vld [vmem:[%s14566_s22 + $0x1738] sm:$0xff] }
 0x403   : > { %7544 = vmatpush1.bf16.msra.mxu0 %v12843_v56  ;;  %7888 = vmatpush1.bf16.msra.mxu1 %v12845_v37  ;;  %v12910_v56 = vcombine.high %v1116_v26, %v1120_v27  ;;  %v1123_v37 = vld [vmem:[%s14566_s22 + $0x1590] sm:$0xff] }
 0x404   : > { %7545 = vmatprep.subr.bf16.mxu0 %v12852_v43  ;;  %7889 = vmatprep.subr.bf16.mxu1 %v12854_v44  ;;  %v1127_v43 = vld [vmem:[%s14566_s22 + $0x15b0] sm:$0xff]  ;;  %v1124_v44 = vld [vmem:[%s14566_s22 + $0x1598] sm:$0xff] }
 0x405   : > { %v12916_v40 = vcombine.high %v1123_v37, %v1127_v43  ;;  %v12915_v51 = vcombine.low %v1123_v37, %v1127_v43  ;;  %v12917_v52 = vcombine.low %v1124_v44, %v1128_v19  ;;  %v1184_v37 = vld [vmem:[%s14566_s22 + $0x1778] sm:$0xff] }
 0x407   : > { %7546 = vmatpush1.bf16.msra.mxu0 %v12851_v6  ;;  %7890 = vmatpush1.bf16.msra.mxu1 %v12853_v42  ;;  %v12918_v6 = vcombine.high %v1124_v44, %v1128_v19  ;;  %v1131_v42 = vld [vmem:[%s14566_s22 + $0x15d0] sm:$0xff] }
 0x408   : > { %7547 = vmatprep.subr.bf16.mxu0 %v12860_v46  ;;  %7891 = vmatprep.subr.bf16.mxu1 %v12862_v49  ;;  %v1135_v46 = vld [vmem:[%s14566_s22 + $0x15f0] sm:$0xff]  ;;  %v1132_v49 = vld [vmem:[%s14566_s22 + $0x15d8] sm:$0xff] }
 0x409   : > { %v12924_v3 = vcombine.high %v1131_v42, %v1135_v46  ;;  %v12923_v58 = vcombine.low %v1131_v42, %v1135_v46  ;;  %v12925_v60 = vcombine.low %v1132_v49, %v1136_v50  ;;  %v1192_v42 = vld [vmem:[%s14566_s22 + $0x17b8] sm:$0xff] }
 0x40b   : > { %7548 = vmatpush1.bf16.msra.mxu0 %v12859_v53  ;;  %7892 = vmatpush1.bf16.msra.mxu1 %v12861_v29  ;;  %v12926_v53 = vcombine.high %v1132_v49, %v1136_v50  ;;  %v1139_v29 = vld [vmem:[%s14566_s22 + $0x1610] sm:$0xff] }
 0x40c   : > { %7560 = vmatprep.subr.bf16.mxu0 %v12868_v31  ;;  %7904 = vmatprep.subr.bf16.mxu1 %v12870_v54  ;;  %v1143_v31 = vld [vmem:[%s14566_s22 + $0x1630] sm:$0xff]  ;;  %v1140_v54 = vld [vmem:[%s14566_s22 + $0x1618] sm:$0xff] }
 0x40d   : > { %v12932_v59 = vcombine.high %v1139_v29, %v1143_v31  ;;  %v12933_v2 = vcombine.low %v1140_v54, %v1144_v57 }
 0x40e   : > { %7550 = vmatmul.mubr.bf16.vlgmr.msra.gmra.mrb[4].mxu0 %v14999_v33  ;;  %7894 = vmatmul.mubr.bf16.vlgmr.msra.gmra.mrb[4].mxu1 %v14999_v33  ;;  %v12883_v33 = vcombine.low %v1091_v63, %v1095_v0  ;;  %v1152_v63 = vld [vmem:[%s14566_s22 + $0x1678] sm:$0xff]  ;;  %v12931_v0 = vcombine.low %v1139_v29, %v1143_v31 }
 0x40f   : > { %7561 = vmatpush1.bf16.msra.mxu0 %v12867_v61  ;;  %7905 = vmatpush1.bf16.msra.mxu1 %v12869_v62  ;;  %v12934_v61 = vcombine.high %v1140_v54, %v1144_v57  ;;  %v1147_v62 = vld [vmem:[%s14566_s22 + $0x1650] sm:$0xff]  ;;  %v1200_v29 = vld [vmem:[%s14566_s22 + $0x17f8] sm:$0xff] }
 0x410   : > { %7562 = vmatprep.subr.bf16.mxu0 %v12876_v4  ;;  %7906 = vmatprep.subr.bf16.mxu1 %v12878_v20  ;;  %v1151_v4 = vld [vmem:[%s14566_s22 + $0x1670] sm:$0xff]  ;;  %v1148_v20 = vld [vmem:[%s14566_s22 + $0x1658] sm:$0xff] }
 0x411   : > { %7592 = vmatprep.mubr.bf16.mxu0 %v15012_v7  ;;  %7936 = vmatprep.mubr.bf16.mxu1 %v15012_v7  ;;  %v12893_v7 = vcombine.low %v1100_v47, %v1104_v13  ;;  %v12940_v8 = vcombine.high %v1147_v62, %v1151_v4  ;;  %v12939_v35 = vcombine.low %v1147_v62, %v1151_v4  ;;  %v1208_v62 = vld [vmem:[%s14566_s22 + $0x1838] sm:$0xff] }
 0x412   : > { %v12941_v47 = vcombine.low %v1148_v20, %v1152_v63 }
 0x413   : > { %7563 = vmatpush1.bf16.msra.mxu0 %v12875_v9  ;;  %7907 = vmatpush1.bf16.msra.mxu1 %v12877_v10  ;;  %v12942_v9 = vcombine.high %v1148_v20, %v1152_v63  ;;  %v1155_v10 = vld [vmem:[%s14566_s22 + $0x1690] sm:$0xff] }
 0x414   : > { %7564 = vmatprep.subr.bf16.mxu0 %v12884_v11  ;;  %7908 = vmatprep.subr.bf16.mxu1 %v12886_v48  ;;  %v1159_v11 = vld [vmem:[%s14566_s22 + $0x16b0] sm:$0xff]  ;;  %v1156_v48 = vld [vmem:[%s14566_s22 + $0x1698] sm:$0xff] }
 0x415   : > { %v12948_v13 = vcombine.high %v1155_v10, %v1159_v11  ;;  %v12947_v18 = vcombine.low %v1155_v10, %v1159_v11  ;;  %v12949_v21 = vcombine.low %v1156_v48, %v1160_v12  ;;  %v1216_v10 = vld [vmem:[%s14566_s22 + $0x1878] sm:$0xff] }
 0x417   : > { %7565 = vmatpush1.bf16.msra.mxu0 %v12883_v33  ;;  %7909 = vmatpush1.bf16.msra.mxu1 %v12885_v14  ;;  %v12950_v33 = vcombine.high %v1156_v48, %v1160_v12  ;;  %v1163_v14 = vld [vmem:[%s14566_s22 + $0x16d0] sm:$0xff] }
 0x418   : > { %7566 = vmatprep.subr.bf16.mxu0 %v12892_v45  ;;  %7910 = vmatprep.subr.bf16.mxu1 %v12894_v15  ;;  %v1167_v45 = vld [vmem:[%s14566_s22 + $0x16f0] sm:$0xff]  ;;  %v1164_v15 = vld [vmem:[%s14566_s22 + $0x16d8] sm:$0xff] }
 0x419   : > { %v12956_v22 = vcombine.high %v1163_v14, %v1167_v45  ;;  %v12955_v55 = vcombine.low %v1163_v14, %v1167_v45  ;;  %v12957_v26 = vcombine.low %v1164_v15, %v1168_v16  ;;  %v1224_v14 = vld [vmem:[%s14566_s22 + $0x18b8] sm:$0xff] }
 0x41b   : > { %7567 = vmatpush1.bf16.msra.mxu0 %v12891_v17  ;;  %7911 = vmatpush1.bf16.msra.mxu1 %v12893_v7  ;;  %v12958_v17 = vcombine.high %v1164_v15, %v1168_v16  ;;  %v1171_v7 = vld [vmem:[%s14566_s22 + $0x1710] sm:$0xff] }
 0x41c   : > { %7568 = vmatprep.subr.bf16.mxu0 %v12900_v23  ;;  %7912 = vmatprep.subr.bf16.mxu1 %v12902_v25  ;;  %v1175_v23 = vld [vmem:[%s14566_s22 + $0x1730] sm:$0xff]  ;;  %v1172_v25 = vld [vmem:[%s14566_s22 + $0x1718] sm:$0xff] }
 0x41d   : > { %v12964_v27 = vcombine.high %v1171_v7, %v1175_v23  ;;  %v12963_v43 = vcombine.low %v1171_v7, %v1175_v23  ;;  %v12965_v44 = vcombine.low %v1172_v25, %v1176_v32  ;;  %v1232_v7 = vld [vmem:[%s14566_s22 + $0x18f8] sm:$0xff] }
 0x41f   : > { %7569 = vmatpush1.bf16.msra.mxu0 %v12899_v28  ;;  %7913 = vmatpush1.bf16.msra.mxu1 %v12901_v30  ;;  %v12966_v28 = vcombine.high %v1172_v25, %v1176_v32  ;;  %v1179_v30 = vld [vmem:[%s14566_s22 + $0x1750] sm:$0xff] }
 0x420   : > { %7570 = vmatprep.subr.bf16.mxu0 %v12908_v34  ;;  %7914 = vmatprep.subr.bf16.mxu1 %v12910_v56  ;;  %v1183_v34 = vld [vmem:[%s14566_s22 + $0x1770] sm:$0xff]  ;;  %v1180_v56 = vld [vmem:[%s14566_s22 + $0x1758] sm:$0xff] }
 0x421   : > { %v12972_v19 = vcombine.high %v1179_v30, %v1183_v34  ;;  %v12971_v46 = vcombine.low %v1179_v30, %v1183_v34  ;;  %v12973_v49 = vcombine.low %v1180_v56, %v1184_v37 }
 0x423   : > { %7571 = vmatpush1.bf16.msra.mxu0 %v12907_v38  ;;  %7915 = vmatpush1.bf16.msra.mxu1 %v12909_v39  ;;  %v12974_v38 = vcombine.high %v1180_v56, %v1184_v37  ;;  %v1187_v39 = vld [vmem:[%s14566_s22 + $0x1790] sm:$0xff] }
 0x424   : > { %7572 = vmatprep.subr.bf16.mxu0 %v12916_v40  ;;  %7916 = vmatprep.subr.bf16.mxu1 %v12918_v6  ;;  %v1191_v40 = vld [vmem:[%s14566_s22 + $0x17b0] sm:$0xff]  ;;  %v1188_v6 = vld [vmem:[%s14566_s22 + $0x1798] sm:$0xff] }
 0x425   : > { %v12980_v50 = vcombine.high %v1187_v39, %v1191_v40  ;;  %v12979_v31 = vcombine.low %v1187_v39, %v1191_v40  ;;  %v12981_v54 = vcombine.low %v1188_v6, %v1192_v42  ;;  %v1243_v37 = vld [vmem:[%s14566_s22 + $0x1950] sm:$0xff] }
 0x427   : > { %7573 = vmatpush1.bf16.msra.mxu0 %v12915_v51  ;;  %7917 = vmatpush1.bf16.msra.mxu1 %v12917_v52  ;;  %v12982_v51 = vcombine.high %v1188_v6, %v1192_v42  ;;  %v1195_v52 = vld [vmem:[%s14566_s22 + $0x17d0] sm:$0xff] }
 0x428   : > { %7574 = vmatprep.subr.bf16.mxu0 %v12924_v3  ;;  %7918 = vmatprep.subr.bf16.mxu1 %v12926_v53  ;;  %v1199_v3 = vld [vmem:[%s14566_s22 + $0x17f0] sm:$0xff]  ;;  %v1196_v53 = vld [vmem:[%s14566_s22 + $0x17d8] sm:$0xff] }
 0x429   : > { %v12988_v57 = vcombine.high %v1195_v52, %v1199_v3  ;;  %v12987_v4 = vcombine.low %v1195_v52, %v1199_v3  ;;  %v12989_v20 = vcombine.low %v1196_v53, %v1200_v29  ;;  %v1251_v42 = vld [vmem:[%s14566_s22 + $0x1990] sm:$0xff] }
 0x42b   : > { %7575 = vmatpush1.bf16.msra.mxu0 %v12923_v58  ;;  %7919 = vmatpush1.bf16.msra.mxu1 %v12925_v60  ;;  %v12990_v58 = vcombine.high %v1196_v53, %v1200_v29  ;;  %v1203_v60 = vld [vmem:[%s14566_s22 + $0x1810] sm:$0xff] }
 0x42c   : > { %7576 = vmatprep.subr.bf16.mxu0 %v12932_v59  ;;  %7920 = vmatprep.subr.bf16.mxu1 %v12934_v61  ;;  %v1207_v59 = vld [vmem:[%s14566_s22 + $0x1830] sm:$0xff]  ;;  %v1204_v61 = vld [vmem:[%s14566_s22 + $0x1818] sm:$0xff] }
 0x42d   : > { %v12996_v63 = vcombine.high %v1203_v60, %v1207_v59  ;;  %v12995_v11 = vcombine.low %v1203_v60, %v1207_v59  ;;  %v12997_v48 = vcombine.low %v1204_v61, %v1208_v62  ;;  %v1259_v29 = vld [vmem:[%s14566_s22 + $0x19d0] sm:$0xff] }
 0x42f   : > { %7577 = vmatpush1.bf16.msra.mxu0 %v12931_v0  ;;  %7921 = vmatpush1.bf16.msra.mxu1 %v12933_v2  ;;  %v12998_v0 = vcombine.high %v1204_v61, %v1208_v62  ;;  %v1211_v2 = vld [vmem:[%s14566_s22 + $0x1850] sm:$0xff] }
 0x430   : > { %7578 = vmatprep.subr.bf16.mxu0 %v12940_v8  ;;  %7922 = vmatprep.subr.bf16.mxu1 %v12942_v9  ;;  %v1215_v8 = vld [vmem:[%s14566_s22 + $0x1870] sm:$0xff]  ;;  %v1212_v9 = vld [vmem:[%s14566_s22 + $0x1858] sm:$0xff] }
 0x431   : > { %v13004_v12 = vcombine.high %v1211_v2, %v1215_v8  ;;  %v13003_v45 = vcombine.low %v1211_v2, %v1215_v8  ;;  %v13005_v15 = vcombine.low %v1212_v9, %v1216_v10  ;;  %v1267_v62 = vld [vmem:[%s14566_s22 + $0x1a10] sm:$0xff] }
 0x433   : > { %7579 = vmatpush1.bf16.msra.mxu0 %v12939_v35  ;;  %7923 = vmatpush1.bf16.msra.mxu1 %v12941_v47  ;;  %v13006_v35 = vcombine.high %v1212_v9, %v1216_v10  ;;  %v1219_v47 = vld [vmem:[%s14566_s22 + $0x1890] sm:$0xff] }
 0x434   : > { %7580 = vmatprep.subr.bf16.mxu0 %v12948_v13  ;;  %7924 = vmatprep.subr.bf16.mxu1 %v12950_v33  ;;  %v1223_v13 = vld [vmem:[%s14566_s22 + $0x18b0] sm:$0xff]  ;;  %v1220_v33 = vld [vmem:[%s14566_s22 + $0x1898] sm:$0xff] }
 0x435   : > { %v13012_v16 = vcombine.high %v1219_v47, %v1223_v13  ;;  %v13013_v23 = vcombine.low %v1220_v33, %v1224_v14  ;;  %v1275_v10 = vld [vmem:[%s14566_s22 + $0x1a50] sm:$0xff] }
 0x437   : > { %7581 = vmatpush1.bf16.msra.mxu0 %v12947_v18  ;;  %7925 = vmatpush1.bf16.msra.mxu1 %v12949_v21  ;;  %v13014_v18 = vcombine.high %v1220_v33, %v1224_v14  ;;  %v1227_v21 = vld [vmem:[%s14566_s22 + $0x18d0] sm:$0xff] }
 0x438   : > { %7582 = vmatprep.subr.bf16.mxu0 %v12956_v22  ;;  %7926 = vmatprep.subr.bf16.mxu1 %v12958_v17  ;;  %v1231_v22 = vld [vmem:[%s14566_s22 + $0x18f0] sm:$0xff]  ;;  %v1228_v17 = vld [vmem:[%s14566_s22 + $0x18d8] sm:$0xff] }
 0x439   : > { %v13020_v25 = vcombine.high %v1227_v21, %v1231_v22  ;;  %v13022_v32 = vcombine.high %v1228_v17, %v1232_v7  ;;  %v13019_v30 = vcombine.low %v1227_v21, %v1231_v22  ;;  %v1283_v14 = vld [vmem:[%s14566_s22 + $0x1a90] sm:$0xff] }
 0x43b   : > { %7583 = vmatpush1.bf16.msra.mxu0 %v12955_v55  ;;  %7927 = vmatpush1.bf16.msra.mxu1 %v12957_v26  ;;  %v1235_v55 = vld [vmem:[%s14566_s22 + $0x1910] sm:$0xff] }
 0x43c   : > { %7584 = vmatprep.subr.bf16.mxu0 %v12964_v27  ;;  %7928 = vmatprep.subr.bf16.mxu1 %v12966_v28  ;;  %v1239_v26 = vld [vmem:[%s14566_s22 + $0x1930] sm:$0xff]  ;;  %v1236_v27 = vld [vmem:[%s14566_s22 + $0x1918] sm:$0xff] }
 0x43d   : > { %v1240_v28 = vld [vmem:[%s14566_s22 + $0x1938] sm:$0xff]  ;;  %v13028_v34 = vcombine.high %v1235_v55, %v1239_v26 }
 0x43e   : > { %v13030_v56 = vcombine.high %v1236_v27, %v1240_v28  ;;  %v13029_v39 = vcombine.low %v1236_v27, %v1240_v28  ;;  %v1299_v28 = vld [vmem:[%s14566_s22 + $0x1b10] sm:$0xff] }
 0x43f   : > { %7585 = vmatpush1.bf16.msra.mxu0 %v12963_v43  ;;  %7929 = vmatpush1.bf16.msra.mxu1 %v12965_v44  ;;  %v1247_v43 = vld [vmem:[%s14566_s22 + $0x1970] sm:$0xff]  ;;  %v1244_v44 = vld [vmem:[%s14566_s22 + $0x1958] sm:$0xff] }
 0x440   : > { %7586 = vmatprep.subr.bf16.mxu0 %v12972_v19  ;;  %7930 = vmatprep.subr.bf16.mxu1 %v12974_v38  ;;  %v1248_v19 = vld [vmem:[%s14566_s22 + $0x1978] sm:$0xff]  ;;  %v13027_v38 = vcombine.low %v1235_v55, %v1239_v26  ;;  %v13036_v40 = vcombine.high %v1243_v37, %v1247_v43 }
 0x441   : > { %v13038_v6 = vcombine.high %v1244_v44, %v1248_v19  ;;  %v13037_v52 = vcombine.low %v1244_v44, %v1248_v19  ;;  %v1307_v19 = vld [vmem:[%s14566_s22 + $0x1b50] sm:$0xff] }
 0x443   : > { %7587 = vmatpush1.bf16.msra.mxu0 %v12971_v46  ;;  %7931 = vmatpush1.bf16.msra.mxu1 %v12973_v49  ;;  %v1255_v46 = vld [vmem:[%s14566_s22 + $0x19b0] sm:$0xff]  ;;  %v1252_v49 = vld [vmem:[%s14566_s22 + $0x1998] sm:$0xff] }
 0x444   : > { %7588 = vmatprep.subr.bf16.mxu0 %v12980_v50  ;;  %7932 = vmatprep.subr.bf16.mxu1 %v12982_v51  ;;  %v1256_v50 = vld [vmem:[%s14566_s22 + $0x19b8] sm:$0xff]  ;;  %v13035_v51 = vcombine.low %v1243_v37, %v1247_v43  ;;  %v13044_v3 = vcombine.high %v1251_v42, %v1255_v46 }
 0x445   : > { %v13046_v53 = vcombine.high %v1252_v49, %v1256_v50  ;;  %v13045_v60 = vcombine.low %v1252_v49, %v1256_v50  ;;  %v1315_v50 = vld [vmem:[%s14566_s22 + $0x1b90] sm:$0xff] }
 0x447   : > { %7589 = vmatpush1.bf16.msra.mxu0 %v12979_v31  ;;  %7933 = vmatpush1.bf16.msra.mxu1 %v12981_v54  ;;  %v1263_v31 = vld [vmem:[%s14566_s22 + $0x19f0] sm:$0xff]  ;;  %v1260_v54 = vld [vmem:[%s14566_s22 + $0x19d8] sm:$0xff] }
 0x448   : > { %7590 = vmatprep.subr.bf16.mxu0 %v12988_v57  ;;  %7934 = vmatprep.subr.bf16.mxu1 %v12990_v58  ;;  %v1264_v57 = vld [vmem:[%s14566_s22 + $0x19f8] sm:$0xff]  ;;  %v13043_v58 = vcombine.low %v1251_v42, %v1255_v46  ;;  %v13052_v59 = vcombine.high %v1259_v29, %v1263_v31 }
 0x449   : > { %v13054_v61 = vcombine.high %v1260_v54, %v1264_v57  ;;  %v13053_v2 = vcombine.low %v1260_v54, %v1264_v57  ;;  %v1323_v57 = vld [vmem:[%s14566_s22 + $0x1bd0] sm:$0xff] }
 0x44b   : > { %7591 = vmatpush1.bf16.msra.mxu0 %v12987_v4  ;;  %7935 = vmatpush1.bf16.msra.mxu1 %v12989_v20  ;;  %v1271_v4 = vld [vmem:[%s14566_s22 + $0x1a30] sm:$0xff]  ;;  %v1268_v20 = vld [vmem:[%s14566_s22 + $0x1a18] sm:$0xff] }
 0x44c   : > { %7603 = vmatprep.subr.bf16.mxu0 %v12996_v63  ;;  %7947 = vmatprep.subr.bf16.mxu1 %v12998_v0  ;;  %v1272_v63 = vld [vmem:[%s14566_s22 + $0x1a38] sm:$0xff]  ;;  %v13051_v0 = vcombine.low %v1259_v29, %v1263_v31  ;;  %v13060_v8 = vcombine.high %v1267_v62, %v1271_v4 }
 0x44d   : > { %v13062_v9 = vcombine.high %v1268_v20, %v1272_v63 }
 0x44e   : > { %7593 = vmatmul.mubr.bf16.vlgmr.msra.gmra.mrb[4].mxu0 %v15081_v1  ;;  %7937 = vmatmul.mubr.bf16.vlgmr.msra.gmra.mrb[4].mxu1 %v15081_v1  ;;  %v13011_v1 = vcombine.low %v1219_v47, %v1223_v13  ;;  %v13061_v47 = vcombine.low %v1268_v20, %v1272_v63  ;;  %v1331_v63 = vld [vmem:[%s14566_s22 + $0x1c10] sm:$0xff] }
 0x44f   : > { %7604 = vmatpush1.bf16.msra.mxu0 %v12995_v11  ;;  %7948 = vmatpush1.bf16.msra.mxu1 %v12997_v48  ;;  %v1279_v11 = vld [vmem:[%s14566_s22 + $0x1a70] sm:$0xff]  ;;  %v1276_v48 = vld [vmem:[%s14566_s22 + $0x1a58] sm:$0xff] }
 0x450   : > { %7605 = vmatprep.subr.bf16.mxu0 %v13004_v12  ;;  %7949 = vmatprep.subr.bf16.mxu1 %v13006_v35  ;;  %v1280_v12 = vld [vmem:[%s14566_s22 + $0x1a78] sm:$0xff]  ;;  %v13059_v35 = vcombine.low %v1267_v62, %v1271_v4  ;;  %v13068_v13 = vcombine.high %v1275_v10, %v1279_v11 }
 0x451   : > { %7635 = vmatprep.mubr.bf16.mxu0 %v15094_v36  ;;  %7979 = vmatprep.mubr.bf16.mxu1 %v15094_v36  ;;  %v13021_v36 = vcombine.low %v1228_v17, %v1232_v7  ;;  %v13070_v33 = vcombine.high %v1276_v48, %v1280_v12  ;;  %v13069_v21 = vcombine.low %v1276_v48, %v1280_v12  ;;  %v1291_v7 = vld [vmem:[%s14566_s22 + $0x1ad0] sm:$0xff] }
 0x452   : > { %v1339_v12 = vld [vmem:[%s14566_s22 + $0x1c50] sm:$0xff] }
 0x453   : > { %7606 = vmatpush1.bf16.msra.mxu0 %v13003_v45  ;;  %7950 = vmatpush1.bf16.msra.mxu1 %v13005_v15  ;;  %v1287_v45 = vld [vmem:[%s14566_s22 + $0x1ab0] sm:$0xff]  ;;  %v1284_v15 = vld [vmem:[%s14566_s22 + $0x1a98] sm:$0xff] }
 0x454   : > { %7607 = vmatprep.subr.bf16.mxu0 %v13012_v16  ;;  %7951 = vmatprep.subr.bf16.mxu1 %v13014_v18  ;;  %v1288_v16 = vld [vmem:[%s14566_s22 + $0x1ab8] sm:$0xff]  ;;  %v13067_v18 = vcombine.low %v1275_v10, %v1279_v11  ;;  %v13076_v22 = vcombine.high %v1283_v14, %v1287_v45 }
 0x455   : > { %v13078_v17 = vcombine.high %v1284_v15, %v1288_v16  ;;  %v13077_v55 = vcombine.low %v1284_v15, %v1288_v16  ;;  %v1347_v16 = vld [vmem:[%s14566_s22 + $0x1c90] sm:$0xff] }
 0x457   : > { %7608 = vmatpush1.bf16.msra.mxu0 %v13011_v1  ;;  %7952 = vmatpush1.bf16.msra.mxu1 %v13013_v23  ;;  %v1295_v1 = vld [vmem:[%s14566_s22 + $0x1af0] sm:$0xff]  ;;  %v1292_v23 = vld [vmem:[%s14566_s22 + $0x1ad8] sm:$0xff] }
 0x458   : > { %7609 = vmatprep.subr.bf16.mxu0 %v13020_v25  ;;  %7953 = vmatprep.subr.bf16.mxu1 %v13022_v32  ;;  %v1296_v25 = vld [vmem:[%s14566_s22 + $0x1af8] sm:$0xff]  ;;  %v13075_v32 = vcombine.low %v1283_v14, %v1287_v45  ;;  %v13084_v26 = vcombine.high %v1291_v7, %v1295_v1 }
 0x459   : > { %v13086_v27 = vcombine.high %v1292_v23, %v1296_v25  ;;  %v13085_v37 = vcombine.low %v1292_v23, %v1296_v25  ;;  %v1355_v25 = vld [vmem:[%s14566_s22 + $0x1cd0] sm:$0xff] }
 0x45b   : > { %7610 = vmatpush1.bf16.msra.mxu0 %v13019_v30  ;;  %7954 = vmatpush1.bf16.msra.mxu1 %v13021_v36  ;;  %v1303_v30 = vld [vmem:[%s14566_s22 + $0x1b30] sm:$0xff]  ;;  %v1300_v36 = vld [vmem:[%s14566_s22 + $0x1b18] sm:$0xff] }
 0x45c   : > { %7611 = vmatprep.subr.bf16.mxu0 %v13028_v34  ;;  %7955 = vmatprep.subr.bf16.mxu1 %v13030_v56  ;;  %v1304_v34 = vld [vmem:[%s14566_s22 + $0x1b38] sm:$0xff]  ;;  %v13083_v56 = vcombine.low %v1291_v7, %v1295_v1  ;;  %v13092_v43 = vcombine.high %v1299_v28, %v1303_v30 }
 0x45d   : > { %v13094_v44 = vcombine.high %v1300_v36, %v1304_v34  ;;  %v13093_v42 = vcombine.low %v1300_v36, %v1304_v34  ;;  %v1363_v36 = vld [vmem:[%s14566_s22 + $0x1d10] sm:$0xff] }
 0x45e   : > { %v1367_v34 = vld [vmem:[%s14566_s22 + $0x1d30] sm:$0xff] }
 0x45f   : > { %7612 = vmatpush1.bf16.msra.mxu0 %v13027_v38  ;;  %7956 = vmatpush1.bf16.msra.mxu1 %v13029_v39  ;;  %v1311_v38 = vld [vmem:[%s14566_s22 + $0x1b70] sm:$0xff]  ;;  %v1308_v39 = vld [vmem:[%s14566_s22 + $0x1b58] sm:$0xff] }
 0x460   : > { %7613 = vmatprep.subr.bf16.mxu0 %v13036_v40  ;;  %7957 = vmatprep.subr.bf16.mxu1 %v13038_v6  ;;  %v1312_v40 = vld [vmem:[%s14566_s22 + $0x1b78] sm:$0xff]  ;;  %v13091_v6 = vcombine.low %v1299_v28, %v1303_v30  ;;  %v13100_v46 = vcombine.high %v1307_v19, %v1311_v38 }
 0x461   : > { %v13102_v49 = vcombine.high %v1308_v39, %v1312_v40  ;;  %v13101_v29 = vcombine.low %v1308_v39, %v1312_v40  ;;  %v1375_v39 = vld [vmem:[%s14566_s22 + $0x1d70] sm:$0xff]  ;;  %v1372_v40 = vld [vmem:[%s14566_s22 + $0x1d58] sm:$0xff] }
 0x463   : > { %7614 = vmatpush1.bf16.msra.mxu0 %v13035_v51  ;;  %7958 = vmatpush1.bf16.msra.mxu1 %v13037_v52  ;;  %v1319_v51 = vld [vmem:[%s14566_s22 + $0x1bb0] sm:$0xff]  ;;  %v1316_v52 = vld [vmem:[%s14566_s22 + $0x1b98] sm:$0xff] }
 0x464   : > { %7615 = vmatprep.subr.bf16.mxu0 %v13044_v3  ;;  %7959 = vmatprep.subr.bf16.mxu1 %v13046_v53  ;;  %v1320_v3 = vld [vmem:[%s14566_s22 + $0x1bb8] sm:$0xff]  ;;  %v13099_v53 = vcombine.low %v1307_v19, %v1311_v38  ;;  %v13108_v31 = vcombine.high %v1315_v50, %v1319_v51  ;;  %v1371_v38 = vld [vmem:[%s14566_s22 + $0x1d50] sm:$0xff] }
 0x465   : > { %v13110_v54 = vcombine.high %v1316_v52, %v1320_v3  ;;  %v13109_v62 = vcombine.low %v1316_v52, %v1320_v3  ;;  %v1383_v52 = vld [vmem:[%s14566_s22 + $0x1db0] sm:$0xff]  ;;  %v1380_v3 = vld [vmem:[%s14566_s22 + $0x1d98] sm:$0xff] }
 0x467   : > { %7616 = vmatpush1.bf16.msra.mxu0 %v13043_v58  ;;  %7960 = vmatpush1.bf16.msra.mxu1 %v13045_v60  ;;  %v1327_v58 = vld [vmem:[%s14566_s22 + $0x1bf0] sm:$0xff]  ;;  %v1324_v60 = vld [vmem:[%s14566_s22 + $0x1bd8] sm:$0xff] }
 0x468   : > { %7617 = vmatprep.subr.bf16.mxu0 %v13052_v59  ;;  %7961 = vmatprep.subr.bf16.mxu1 %v13054_v61  ;;  %v1328_v59 = vld [vmem:[%s14566_s22 + $0x1bf8] sm:$0xff]  ;;  %v13107_v61 = vcombine.low %v1315_v50, %v1319_v51  ;;  %v13116_v4 = vcombine.high %v1323_v57, %v1327_v58  ;;  %v1379_v51 = vld [vmem:[%s14566_s22 + $0x1d90] sm:$0xff] }
 0x469   : > { %v13118_v20 = vcombine.high %v1324_v60, %v1328_v59  ;;  %v13117_v10 = vcombine.low %v1324_v60, %v1328_v59  ;;  %v1391_v60 = vld [vmem:[%s14566_s22 + $0x1df0] sm:$0xff]  ;;  %v1388_v59 = vld [vmem:[%s14566_s22 + $0x1dd8] sm:$0xff] }
 0x46b   : > { %7618 = vmatpush1.bf16.msra.mxu0 %v13051_v0  ;;  %7962 = vmatpush1.bf16.msra.mxu1 %v13053_v2  ;;  %v1335_v0 = vld [vmem:[%s14566_s22 + $0x1c30] sm:$0xff]  ;;  %v1332_v2 = vld [vmem:[%s14566_s22 + $0x1c18] sm:$0xff] }
 0x46c   : > { %7619 = vmatprep.subr.bf16.mxu0 %v13060_v8  ;;  %7963 = vmatprep.subr.bf16.mxu1 %v13062_v9  ;;  %v1336_v8 = vld [vmem:[%s14566_s22 + $0x1c38] sm:$0xff]  ;;  %v13115_v9 = vcombine.low %v1323_v57, %v1327_v58  ;;  %v13124_v11 = vcombine.high %v1331_v63, %v1335_v0  ;;  %v1387_v58 = vld [vmem:[%s14566_s22 + $0x1dd0] sm:$0xff] }
 0x46d   : > { %v13126_v48 = vcombine.high %v1332_v2, %v1336_v8  ;;  %v13125_v14 = vcombine.low %v1332_v2, %v1336_v8  ;;  %v1399_v2 = vld [vmem:[%s14566_s22 + $0x1e30] sm:$0xff]  ;;  %v1396_v8 = vld [vmem:[%s14566_s22 + $0x1e18] sm:$0xff] }
 0x46f   : > { %7620 = vmatpush1.bf16.msra.mxu0 %v13059_v35  ;;  %7964 = vmatpush1.bf16.msra.mxu1 %v13061_v47  ;;  %v1343_v35 = vld [vmem:[%s14566_s22 + $0x1c70] sm:$0xff]  ;;  %v1340_v47 = vld [vmem:[%s14566_s22 + $0x1c58] sm:$0xff] }
 0x470   : > { %7621 = vmatprep.subr.bf16.mxu0 %v13068_v13  ;;  %7965 = vmatprep.subr.bf16.mxu1 %v13070_v33  ;;  %v1344_v13 = vld [vmem:[%s14566_s22 + $0x1c78] sm:$0xff]  ;;  %v13123_v33 = vcombine.low %v1331_v63, %v1335_v0  ;;  %v13132_v45 = vcombine.high %v1339_v12, %v1343_v35  ;;  %v1395_v0 = vld [vmem:[%s14566_s22 + $0x1e10] sm:$0xff] }
 0x471   : > { %v13134_v15 = vcombine.high %v1340_v47, %v1344_v13  ;;  %v13133_v7 = vcombine.low %v1340_v47, %v1344_v13  ;;  %v1407_v47 = vld [vmem:[%s14566_s22 + $0x1e70] sm:$0xff]  ;;  %v1404_v13 = vld [vmem:[%s14566_s22 + $0x1e58] sm:$0xff] }
 0x473   : > { %7622 = vmatpush1.bf16.msra.mxu0 %v13067_v18  ;;  %7966 = vmatpush1.bf16.msra.mxu1 %v13069_v21  ;;  %v1351_v18 = vld [vmem:[%s14566_s22 + $0x1cb0] sm:$0xff]  ;;  %v1348_v21 = vld [vmem:[%s14566_s22 + $0x1c98] sm:$0xff] }
 0x474   : > { %7623 = vmatprep.subr.bf16.mxu0 %v13076_v22  ;;  %7967 = vmatprep.subr.bf16.mxu1 %v13078_v17  ;;  %v1352_v22 = vld [vmem:[%s14566_s22 + $0x1cb8] sm:$0xff]  ;;  %v13131_v17 = vcombine.low %v1339_v12, %v1343_v35  ;;  %v13140_v1 = vcombine.high %v1347_v16, %v1351_v18  ;;  %v1403_v35 = vld [vmem:[%s14566_s22 + $0x1e50] sm:$0xff] }
 0x475   : > { %v13142_v23 = vcombine.high %v1348_v21, %v1352_v22 }
 0x477   : > { %7624 = vmatpush1.bf16.msra.mxu0 %v13075_v32  ;;  %7968 = vmatpush1.bf16.msra.mxu1 %v13077_v55  ;;  %v1359_v32 = vld [vmem:[%s14566_s22 + $0x1cf0] sm:$0xff]  ;;  %v1356_v55 = vld [vmem:[%s14566_s22 + $0x1cd8] sm:$0xff] }
 0x478   : > { %7625 = vmatprep.subr.bf16.mxu0 %v13084_v26  ;;  %7969 = vmatprep.subr.bf16.mxu1 %v13086_v27  ;;  %v1360_v26 = vld [vmem:[%s14566_s22 + $0x1cf8] sm:$0xff]  ;;  %v13141_v27 = vcombine.low %v1348_v21, %v1352_v22  ;;  %v13148_v28 = vcombine.high %v1355_v25, %v1359_v32  ;;  %v1415_v21 = vld [vmem:[%s14566_s22 + $0x1eb0] sm:$0xff] }
 0x479   : > { %v13150_v30 = vcombine.high %v1356_v55, %v1360_v26  ;;  %v1412_v22 = vld [vmem:[%s14566_s22 + $0x1e98] sm:$0xff] }
 0x47b   : > { %7626 = vmatpush1.bf16.msra.mxu0 %v13083_v56  ;;  %7970 = vmatpush1.bf16.msra.mxu1 %v13085_v37  ;;  %v1364_v56 = vld [vmem:[%s14566_s22 + $0x1d18] sm:$0xff] }
 0x47c   : > { %7627 = vmatprep.subr.bf16.mxu0 %v13092_v43  ;;  %7971 = vmatprep.subr.bf16.mxu1 %v13094_v44  ;;  %v1368_v37 = vld [vmem:[%s14566_s22 + $0x1d38] sm:$0xff]  ;;  %v13147_v43 = vcombine.low %v1355_v25, %v1359_v32  ;;  %v13156_v44 = vcombine.high %v1363_v36, %v1367_v34  ;;  %v1419_v32 = vld [vmem:[%s14566_s22 + $0x1ed0] sm:$0xff] }
 0x47d   : > { %v13158_v19 = vcombine.high %v1364_v56, %v1368_v37 }
 0x47f   : > { %7628 = vmatpush1.bf16.msra.mxu0 %v13091_v6  ;;  %7972 = vmatpush1.bf16.msra.mxu1 %v13093_v42  ;;  %v1376_v6 = vld [vmem:[%s14566_s22 + $0x1d78] sm:$0xff]  ;;  %v13155_v42 = vcombine.low %v1363_v36, %v1367_v34  ;;  %v1427_v34 = vld [vmem:[%s14566_s22 + $0x1f10] sm:$0xff] }
 0x480   : > { %7629 = vmatprep.subr.bf16.mxu0 %v13100_v46  ;;  %7973 = vmatprep.subr.bf16.mxu1 %v13102_v49  ;;  %v13157_v46 = vcombine.low %v1364_v56, %v1368_v37  ;;  %v13164_v49 = vcombine.high %v1371_v38, %v1375_v39  ;;  %v13166_v50 = vcombine.high %v1372_v40, %v1376_v6  ;;  %v1431_v56 = vld [vmem:[%s14566_s22 + $0x1f30] sm:$0xff]  ;;  %v1428_v37 = vld [vmem:[%s14566_s22 + $0x1f18] sm:$0xff] }
 0x483   : > { %7630 = vmatpush1.bf16.msra.mxu0 %v13099_v53  ;;  %7974 = vmatpush1.bf16.msra.mxu1 %v13101_v29  ;;  %v1384_v53 = vld [vmem:[%s14566_s22 + $0x1db8] sm:$0xff]  ;;  %v13163_v29 = vcombine.low %v1371_v38, %v1375_v39  ;;  %v1435_v39 = vld [vmem:[%s14566_s22 + $0x1f50] sm:$0xff] }
 0x484   : > { %7631 = vmatprep.subr.bf16.mxu0 %v13108_v31  ;;  %7975 = vmatprep.subr.bf16.mxu1 %v13110_v54  ;;  %v13165_v31 = vcombine.low %v1372_v40, %v1376_v6  ;;  %v13172_v54 = vcombine.high %v1379_v51, %v1383_v52  ;;  %v13174_v57 = vcombine.high %v1380_v3, %v1384_v53  ;;  %v1439_v40 = vld [vmem:[%s14566_s22 + $0x1f70] sm:$0xff]  ;;  %v1436_v6 = vld [vmem:[%s14566_s22 + $0x1f58] sm:$0xff] }
 0x487   : > { %7632 = vmatpush1.bf16.msra.mxu0 %v13107_v61  ;;  %7976 = vmatpush1.bf16.msra.mxu1 %v13109_v62  ;;  %v1392_v61 = vld [vmem:[%s14566_s22 + $0x1df8] sm:$0xff]  ;;  %v13171_v62 = vcombine.low %v1379_v51, %v1383_v52  ;;  %v1443_v52 = vld [vmem:[%s14566_s22 + $0x1f90] sm:$0xff] }
 0x488   : > { %7633 = vmatprep.subr.bf16.mxu0 %v13116_v4  ;;  %7977 = vmatprep.subr.bf16.mxu1 %v13118_v20  ;;  %v13173_v4 = vcombine.low %v1380_v3, %v1384_v53  ;;  %v13180_v20 = vcombine.high %v1387_v58, %v1391_v60  ;;  %v13182_v63 = vcombine.high %v1388_v59, %v1392_v61  ;;  %v1447_v3 = vld [vmem:[%s14566_s22 + $0x1fb0] sm:$0xff]  ;;  %v1444_v53 = vld [vmem:[%s14566_s22 + $0x1f98] sm:$0xff] }
 0x48b   : > { %7634 = vmatpush1.bf16.msra.mxu0 %v13115_v9  ;;  %7978 = vmatpush1.bf16.msra.mxu1 %v13117_v10  ;;  %v1400_v9 = vld [vmem:[%s14566_s22 + $0x1e38] sm:$0xff]  ;;  %v13179_v10 = vcombine.low %v1387_v58, %v1391_v60  ;;  %v1451_v60 = vld [vmem:[%s14566_s22 + $0x1fd0] sm:$0xff] }
 0x48c   : > { %7646 = vmatprep.subr.bf16.mxu0 %v13124_v11  ;;  %7990 = vmatprep.subr.bf16.mxu1 %v13126_v48  ;;  %v13181_v11 = vcombine.low %v1388_v59, %v1392_v61  ;;  %v13188_v48 = vcombine.high %v1395_v0, %v1399_v2  ;;  %v13190_v12 = vcombine.high %v1396_v8, %v1400_v9  ;;  %v1455_v59 = vld [vmem:[%s14566_s22 + $0x1ff0] sm:$0xff]  ;;  %v1452_v61 = vld [vmem:[%s14566_s22 + $0x1fd8] sm:$0xff] }
 0x48e   : > { %7636 = vmatmul.mubr.bf16.vlgmr.msra.gmra.mrb[4].mxu0 %v15163_v41  ;;  %7980 = vmatmul.mubr.bf16.vlgmr.msra.gmra.mrb[4].mxu1 %v15163_v41  ;;  %v13139_v41 = vcombine.low %v1347_v16, %v1351_v18  ;;  %v1411_v18 = vld [vmem:[%s14566_s22 + $0x1e90] sm:$0xff] }
 0x48f   : > { %7647 = vmatpush1.bf16.msra.mxu0 %v13123_v33  ;;  %7991 = vmatpush1.bf16.msra.mxu1 %v13125_v14  ;;  %v1408_v33 = vld [vmem:[%s14566_s22 + $0x1e78] sm:$0xff]  ;;  %v13187_v14 = vcombine.low %v1395_v0, %v1399_v2  ;;  %v13243_v2 = vcombine.low %v1451_v60, %v1455_v59 }
 0x490   : > { %7648 = vmatprep.subr.bf16.mxu0 %v13132_v45  ;;  %7992 = vmatprep.subr.bf16.mxu1 %v13134_v15  ;;  %v13189_v45 = vcombine.low %v1396_v8, %v1400_v9  ;;  %v13196_v15 = vcombine.high %v1403_v35, %v1407_v47  ;;  %v13198_v16 = vcombine.high %v1404_v13, %v1408_v33  ;;  %v405_v9 = vld [vmem:[#allocation2 + $0x20] sm:$0xff] }
 0x491   : > { %7678 = vmatprep.mubr.bf16.mxu0 %v15176_v5  ;;  %8022 = vmatprep.mubr.bf16.mxu1 %v15176_v5  ;;  %v13149_v5 = vcombine.low %v1356_v55, %v1360_v26  ;;  %v1423_v55 = vld [vmem:[%s14566_s22 + $0x1ef0] sm:$0xff]  ;;  %v1420_v26 = vld [vmem:[%s14566_s22 + $0x1ed8] sm:$0xff] }
 0x493   : > { %7649 = vmatpush1.bf16.msra.mxu0 %v13131_v17  ;;  %7993 = vmatpush1.bf16.msra.mxu1 %v13133_v7  ;;  %v1416_v17 = vld [vmem:[%s14566_s22 + $0x1eb8] sm:$0xff]  ;;  %v13195_v7 = vcombine.low %v1403_v35, %v1407_v47 }
 0x494   : > { %7650 = vmatprep.subr.bf16.mxu0 %v13140_v1  ;;  %7994 = vmatprep.subr.bf16.mxu1 %v13142_v23  ;;  %v13197_v1 = vcombine.low %v1404_v13, %v1408_v33  ;;  %v13204_v23 = vcombine.high %v1411_v18, %v1415_v21  ;;  %v13206_v25 = vcombine.high %v1412_v22, %v1416_v17  ;;  %v413_v35 = vld [vmem:[#allocation2 + $0x60] sm:$0xff] }
 0x497   : > { %7651 = vmatpush1.bf16.msra.mxu0 %v13139_v41  ;;  %7995 = vmatpush1.bf16.msra.mxu1 %v13141_v27  ;;  %v1424_v41 = vld [vmem:[%s14566_s22 + $0x1ef8] sm:$0xff]  ;;  %v13203_v27 = vcombine.low %v1411_v18, %v1415_v21 }
 0x498   : > { %7652 = vmatprep.subr.bf16.mxu0 %v13148_v28  ;;  %7996 = vmatprep.subr.bf16.mxu1 %v13150_v30  ;;  %v13205_v28 = vcombine.low %v1412_v22, %v1416_v17  ;;  %v13212_v30 = vcombine.high %v1419_v32, %v1423_v55  ;;  %v13214_v36 = vcombine.high %v1420_v26, %v1424_v41  ;;  %v416_v22 = vld [vmem:[#allocation2 + $0x78] sm:$0xff] }
 0x49b   : > { %7653 = vmatpush1.bf16.msra.mxu0 %v13147_v43  ;;  %7997 = vmatpush1.bf16.msra.mxu1 %v13149_v5  ;;  %v1432_v43 = vld [vmem:[%s14566_s22 + $0x1f38] sm:$0xff]  ;;  %v13211_v5 = vcombine.low %v1419_v32, %v1423_v55 }
 0x49c   : > { %7654 = vmatprep.subr.bf16.mxu0 %v13156_v44  ;;  %7998 = vmatprep.subr.bf16.mxu1 %v13158_v19  ;;  %v13213_v44 = vcombine.low %v1420_v26, %v1424_v41  ;;  %v13220_v19 = vcombine.high %v1427_v34, %v1431_v56  ;;  %v13222_v38 = vcombine.high %v1428_v37, %v1432_v43  ;;  %v8167_v26 = vld [vmem:[#allocation9] sm:$0xff] (!%p13247_p2) }
 0x49d   : > { %v8171_v41 = vld [vmem:[#allocation9 + $0x20] sm:$0xff] (!%p13247_p2) }
 0x49f   : > { %7655 = vmatpush1.bf16.msra.mxu0 %v13155_v42  ;;  %7999 = vmatpush1.bf16.msra.mxu1 %v13157_v46  ;;  %v1440_v42 = vld [vmem:[%s14566_s22 + $0x1f78] sm:$0xff]  ;;  %v13219_v46 = vcombine.low %v1427_v34, %v1431_v56  ;;  %v8175_v34 = vld [vmem:[#allocation9 + $0x40] sm:$0xff] (!%p13247_p2) }
 0x4a0   : > { %7656 = vmatprep.subr.bf16.mxu0 %v13164_v49  ;;  %8000 = vmatprep.subr.bf16.mxu1 %v13166_v50  ;;  %v13221_v49 = vcombine.low %v1428_v37, %v1432_v43  ;;  %v13228_v50 = vcombine.high %v1435_v39, %v1439_v40  ;;  %v13230_v51 = vcombine.high %v1436_v6, %v1440_v42  ;;  %v8179_v56 = vld [vmem:[#allocation9 + $0x60] sm:$0xff] (!%p13247_p2) }
 0x4a3   : > { %7657 = vmatpush1.bf16.msra.mxu0 %v13163_v29  ;;  %8001 = vmatpush1.bf16.msra.mxu1 %v13165_v31  ;;  %v1448_v29 = vld [vmem:[%s14566_s22 + $0x1fb8] sm:$0xff]  ;;  %v13227_v31 = vcombine.low %v1435_v39, %v1439_v40  ;;  %v8187_v40 = vld [vmem:[#allocation9 + $0xa0] sm:$0xff] (!%p13247_p2) }
 0x4a4   : > { %7658 = vmatprep.subr.bf16.mxu0 %v13172_v54  ;;  %8002 = vmatprep.subr.bf16.mxu1 %v13174_v57  ;;  %v13229_v54 = vcombine.low %v1436_v6, %v1440_v42  ;;  %v13236_v57 = vcombine.high %v1443_v52, %v1447_v3  ;;  %v13238_v58 = vcombine.high %v1444_v53, %v1448_v29  ;;  %v8184_v6 = vld [vmem:[#allocation9 + $0x88] sm:$0xff] (!%p13247_p2) }
 0x4a5   : > { %v8188_v42 = vld [vmem:[#allocation9 + $0xa8] sm:$0xff] (!%p13247_p2) }
 0x4a7   : > { %7659 = vmatpush1.bf16.msra.mxu0 %v13171_v62  ;;  %8003 = vmatpush1.bf16.msra.mxu1 %v13173_v4  ;;  %v1456_v62 = vld [vmem:[%s14566_s22 + $0x1ff8] sm:$0xff]  ;;  %v13235_v4 = vcombine.low %v1443_v52, %v1447_v3  ;;  %v8191_v52 = vld [vmem:[#allocation9 + $0xc0] sm:$0xff] (!%p13247_p2) }
 0x4a8   : > { %7660 = vmatprep.subr.bf16.mxu0 %v13180_v20  ;;  %8004 = vmatprep.subr.bf16.mxu1 %v13182_v63  ;;  %v13237_v20 = vcombine.low %v1444_v53, %v1448_v29  ;;  %v13244_v63 = vcombine.high %v1451_v60, %v1455_v59  ;;  %v13246_v0 = vcombine.high %v1452_v61, %v1456_v62  ;;  %v8195_v3 = vld [vmem:[#allocation9 + $0xe0] sm:$0xff] (!%p13247_p2)  ;;  %v8192_v53 = vld [vmem:[#allocation9 + $0xc8] sm:$0xff] (!%p13247_p2) }
 0x4a9   : > { %v13245_v8 = vcombine.low %v1452_v61, %v1456_v62  ;;  %v8196_v29 = vld [vmem:[#allocation9 + $0xe8] sm:$0xff] (!%p13247_p2)  ;;  %v8199_v60 = vld [vmem:[#allocation9 + $0x100] sm:$0xff] (!%p13247_p2) }
 0x4aa   : > { %v8203_v59 = vld [vmem:[#allocation9 + $0x120] sm:$0xff] (!%p13247_p2)  ;;  %v8200_v61 = vld [vmem:[#allocation9 + $0x108] sm:$0xff] (!%p13247_p2) }
 0x4ab   : > { %7661 = vmatpush1.bf16.msra.mxu0 %v13179_v10  ;;  %8005 = vmatpush1.bf16.msra.mxu1 %v13181_v11  ;;  %v407_v10 = vld [vmem:[#allocation2 + $0x30] sm:$0xff]  ;;  %v406_v11 = vld [vmem:[#allocation2 + $0x28] sm:$0xff] }
 0x4ac   : > { %7662 = vmatprep.subr.bf16.mxu0 %v13188_v48  ;;  %8006 = vmatprep.subr.bf16.mxu1 %v13190_v12  ;;  %v408_v12 = vld [vmem:[#allocation2 + $0x38] sm:$0xff] }
 0x4ad   : > { %v8204_v62 = vld [vmem:[#allocation9 + $0x128] sm:$0xff] (!%p13247_p2) }
 0x4af   : > { %7663 = vmatpush1.bf16.msra.mxu0 %v13187_v14  ;;  %8007 = vmatpush1.bf16.msra.mxu1 %v13189_v45  ;;  %v415_v14 = vld [vmem:[#allocation2 + $0x70] sm:$0xff]  ;;  %v414_v45 = vld [vmem:[#allocation2 + $0x68] sm:$0xff] }
 0x4b0   : > { %7664 = vmatprep.subr.bf16.mxu0 %v13196_v15  ;;  %8008 = vmatprep.subr.bf16.mxu1 %v13198_v16 }
 0x4b3   : > { %7665 = vmatpush1.bf16.msra.mxu0 %v13195_v7  ;;  %8009 = vmatpush1.bf16.msra.mxu1 %v13197_v1 }
 0x4b4   : > { %7666 = vmatprep.subr.bf16.mxu0 %v13204_v23  ;;  %8010 = vmatprep.subr.bf16.mxu1 %v13206_v25 }
 0x4b7   : > { %7667 = vmatpush1.bf16.msra.mxu0 %v13203_v27  ;;  %8011 = vmatpush1.bf16.msra.mxu1 %v13205_v28  ;;  %v8168_v27 = vld [vmem:[#allocation9 + $0x8] sm:$0xff] (!%p13247_p2)  ;;  %v13249_v28 = vcombine.high (!%p13247_p2), %v8167_v26, %v8171_v41 }
 0x4b8   : > { %7668 = vmatprep.subr.bf16.mxu0 %v13212_v30  ;;  %8012 = vmatprep.subr.bf16.mxu1 %v13214_v36  ;;  %v8172_v30 = vld [vmem:[#allocation9 + $0x28] sm:$0xff] (!%p13247_p2)  ;;  %v13248_v36 = vcombine.low (!%p13247_p2), %v8167_v26, %v8171_v41 }
 0x4b9   : > { %v13251_v37 = vcombine.high (!%p13247_p2), %v8168_v27, %v8172_v30  ;;  %v13250_v43 = vcombine.low (!%p13247_p2), %v8168_v27, %v8172_v30 }
 0x4bb   : > { %7669 = vmatpush1.bf16.msra.mxu0 %v13211_v5  ;;  %8013 = vmatpush1.bf16.msra.mxu1 %v13213_v44  ;;  %v13257_v5 = vcombine.high (!%p13247_p2), %v8175_v34, %v8179_v56  ;;  %v8176_v44 = vld [vmem:[#allocation9 + $0x48] sm:$0xff] (!%p13247_p2) }
 0x4bc   : > { %7670 = vmatprep.subr.bf16.mxu0 %v13220_v19  ;;  %8014 = vmatprep.subr.bf16.mxu1 %v13222_v38  ;;  %v8180_v19 = vld [vmem:[#allocation9 + $0x68] sm:$0xff] (!%p13247_p2)  ;;  %v8183_v38 = vld [vmem:[#allocation9 + $0x80] sm:$0xff] (!%p13247_p2) }
 0x4bd   : > { %v13259_v39 = vcombine.high (!%p13247_p2), %v8176_v44, %v8180_v19 }
 0x4bf   : > { %7671 = vmatpush1.bf16.msra.mxu0 %v13219_v46  ;;  %8015 = vmatpush1.bf16.msra.mxu1 %v13221_v49  ;;  %v13256_v46 = vcombine.low (!%p13247_p2), %v8175_v34, %v8179_v56  ;;  %v13258_v49 = vcombine.low (!%p13247_p2), %v8176_v44, %v8180_v19  ;;  %v8231_v56 = vld [vmem:[#allocation9 + $0x200] sm:$0xff] (!%p13247_p2) }
 0x4c0   : > { %7672 = vmatprep.subr.bf16.mxu0 %v13228_v50  ;;  %8016 = vmatprep.subr.bf16.mxu1 %v13230_v51  ;;  %v13265_v50 = vcombine.high (!%p13247_p2), %v8183_v38, %v8187_v40  ;;  %v13267_v51 = vcombine.high (!%p13247_p2), %v8184_v6, %v8188_v42 }
 0x4c3   : > { %7673 = vmatpush1.bf16.msra.mxu0 %v13227_v31  ;;  %8017 = vmatpush1.bf16.msra.mxu1 %v13229_v54  ;;  %v13264_v31 = vcombine.low (!%p13247_p2), %v8183_v38, %v8187_v40  ;;  %v13266_v54 = vcombine.low (!%p13247_p2), %v8184_v6, %v8188_v42 }
 0x4c4   : > { %7674 = vmatprep.subr.bf16.mxu0 %v13236_v57  ;;  %8018 = vmatprep.subr.bf16.mxu1 %v13238_v58  ;;  %v13273_v57 = vcombine.high (!%p13247_p2), %v8191_v52, %v8195_v3  ;;  %v13275_v58 = vcombine.high (!%p13247_p2), %v8192_v53, %v8196_v29 }
 0x4c7   : > { %7675 = vmatpush1.bf16.msra.mxu0 %v13235_v4  ;;  %8019 = vmatpush1.bf16.msra.mxu1 %v13237_v20  ;;  %v8087_v4 = vlaneseq (!%p13247_p2)  ;;  %v13272_v20 = vcombine.low (!%p13247_p2), %v8191_v52, %v8195_v3 }
 0x4c8   : > { %7676 = vmatprep.subr.bf16.mxu0 %v13244_v63  ;;  %8020 = vmatprep.subr.bf16.mxu1 %v13246_v0  ;;  %v13274_v63 = vcombine.low (!%p13247_p2), %v8192_v53, %v8196_v29  ;;  %v13281_v0 = vcombine.high (!%p13247_p2), %v8199_v60, %v8203_v59 }
 0x4cb   : > { %7677 = vmatpush1.bf16.msra.mxu0 %v13243_v2  ;;  %8021 = vmatpush1.bf16.msra.mxu1 %v13245_v8  ;;  %v13283_v2 = vcombine.high (!%p13247_p2), %v8200_v61, %v8204_v62  ;;  %v8207_v8 = vld [vmem:[#allocation9 + $0x140] sm:$0xff] (!%p13247_p2) }
 0x4cc   : > { %11281 = vmatprep.subr.bf16.mxu0 (!%p13247_p2), %v13249_v28  ;;  %11453 = vmatprep.subr.bf16.mxu1 (!%p13247_p2), %v13251_v37  ;;  %v8235_v37 = vld [vmem:[#allocation9 + $0x220] sm:$0xff] (!%p13247_p2) }
 0x4cd   : > { %v13313_v40 = vcombine.high (!%p13247_p2), %v8231_v56, %v8235_v37  ;;  %v13312_v52 = vcombine.low (!%p13247_p2), %v8231_v56, %v8235_v37 }
 0x4ce   : > { %7679 = vmatmul.mubr.bf16.vlgmr.msra.gmra.mrb[4].mxu0 %v15244_v24  ;;  %8023 = vmatmul.mubr.bf16.vlgmr.msra.gmra.mrb[4].mxu1 %v15244_v24 }
 0x4cf   : > { %11282 = vmatpush1.bf16.msra.mxu0 (!%p13247_p2), %v13248_v36  ;;  %11454 = vmatpush1.bf16.msra.mxu1 (!%p13247_p2), %v13250_v43  ;;  %v8232_v43 = vld [vmem:[#allocation9 + $0x208] sm:$0xff] (!%p13247_p2) }
 0x4d0   : > { %11283 = vmatprep.subr.bf16.mxu0 (!%p13247_p2), %v13257_v5  ;;  %11455 = vmatprep.subr.bf16.mxu1 (!%p13247_p2), %v13259_v39  ;;  %v8236_v5 = vld [vmem:[#allocation9 + $0x228] sm:$0xff] (!%p13247_p2) }
 0x4d1   : > { %v13315_v42 = vcombine.high (!%p13247_p2), %v8232_v43, %v8236_v5  ;;  %v13314_v3 = vcombine.low (!%p13247_p2), %v8232_v43, %v8236_v5  ;;  %v8287_v5 = vld [vmem:[#allocation9 + $0x3c0] sm:$0xff] (!%p13247_p2) }
 0x4d3   : > { %11284 = vmatpush1.bf16.msra.mxu0 (!%p13247_p2), %v13256_v46  ;;  %11456 = vmatpush1.bf16.msra.mxu1 (!%p13247_p2), %v13258_v49  ;;  %v8239_v46 = vld [vmem:[#allocation9 + $0x240] sm:$0xff] (!%p13247_p2) }
 0x4d4   : > { %11285 = vmatprep.subr.bf16.mxu0 (!%p13247_p2), %v13265_v50  ;;  %11457 = vmatprep.subr.bf16.mxu1 (!%p13247_p2), %v13267_v51  ;;  %v8243_v49 = vld [vmem:[#allocation9 + $0x260] sm:$0xff] (!%p13247_p2)  ;;  %v8240_v50 = vld [vmem:[#allocation9 + $0x248] sm:$0xff] (!%p13247_p2) }
 0x4d5   : > { %v8244_v51 = vld [vmem:[#allocation9 + $0x268] sm:$0xff] (!%p13247_p2)  ;;  %v13321_v53 = vcombine.high (!%p13247_p2), %v8239_v46, %v8243_v49 }
 0x4d6   : > { %v13323_v29 = vcombine.high (!%p13247_p2), %v8240_v50, %v8244_v51 }
 0x4d7   : > { %11286 = vmatpush1.bf16.msra.mxu0 (!%p13247_p2), %v13264_v31  ;;  %11458 = vmatpush1.bf16.msra.mxu1 (!%p13247_p2), %v13266_v54  ;;  %v8247_v31 = vld [vmem:[#allocation9 + $0x280] sm:$0xff] (!%p13247_p2) }
 0x4d8   : > { %11287 = vmatprep.subr.bf16.mxu0 (!%p13247_p2), %v13273_v57  ;;  %11459 = vmatprep.subr.bf16.mxu1 (!%p13247_p2), %v13275_v58  ;;  %v8251_v54 = vld [vmem:[#allocation9 + $0x2a0] sm:$0xff] (!%p13247_p2)  ;;  %v8248_v57 = vld [vmem:[#allocation9 + $0x288] sm:$0xff] (!%p13247_p2) }
 0x4d9   : > { %v8252_v58 = vld [vmem:[#allocation9 + $0x2a8] sm:$0xff] (!%p13247_p2) }
 0x4db   : > { %11288 = vmatpush1.bf16.msra.mxu0 (!%p13247_p2), %v13272_v20  ;;  %11460 = vmatpush1.bf16.msra.mxu1 (!%p13247_p2), %v13274_v63  ;;  %v8259_v20 = vld [vmem:[#allocation9 + $0x2e0] sm:$0xff] (!%p13247_p2)  ;;  %v8256_v63 = vld [vmem:[#allocation9 + $0x2c8] sm:$0xff] (!%p13247_p2) }
 0x4dc   : > { %11289 = vmatprep.subr.bf16.mxu0 (!%p13247_p2), %v13281_v0  ;;  %11461 = vmatprep.subr.bf16.mxu1 (!%p13247_p2), %v13283_v2  ;;  %v8260_v0 = vld [vmem:[#allocation9 + $0x2e8] sm:$0xff] (!%p13247_p2)  ;;  %v13328_v2 = vcombine.low (!%p13247_p2), %v8247_v31, %v8251_v54 }
 0x5a1   : > { %v7680_v48 = vpop.f32.mrb[4].mxu0  ;;  %v8024_v13 = vpop.f32.mrb[4].mxu1  ;;  %8068 = sbr.rel (%p13247_p2) target bundleno = 2343 (0x927), region = 80 }
 0x5a2   : > { %v8037_v47 = vadd.f32 %v7680_v48, %v405_v9  ;;  %v7682_v33 = vpop.f32.mrb[5].mxu0  ;;  %v8039_v15 = vadd.f32 %v8024_v13, %v407_v10  ;;  %v8026_v18 = vpop.f32.mrb[5].mxu1  ;;  %v8211_v9 = vld [vmem:[#allocation9 + $0x160] sm:$0xff] (!%p13247_p2)  ;;  %v8208_v10 = vld [vmem:[#allocation9 + $0x148] sm:$0xff] (!%p13247_p2)  ;;  %v15787_v48 = vshrl.u32 (!%p13247_p2), %v8087_v4, 7 }
 0x5a3   : > { %v8038_v16 = vadd.f32 %v7682_v33, %v406_v11  ;;  %v7684_v21 = vpop.f32.mrb[6].mxu0  ;;  %v8040_v17 = vadd.f32 %v8026_v18, %v408_v12  ;;  %v8028_v24 = vpop.f32.mrb[6].mxu1  ;;  %v8212_v11 = vld [vmem:[#allocation9 + $0x168] sm:$0xff] (!%p13247_p2)  ;;  %v13280_v12 = vcombine.low (!%p13247_p2), %v8199_v60, %v8203_v59  ;;  %v8215_v33 = vld [vmem:[#allocation9 + $0x180] sm:$0xff] (!%p13247_p2)  ;;  %v13288_v18 = vcombine.low (!%p13247_p2), %v8207_v8, %v8211_v9 }
 0x5a4   : > { %8053 = vst [vmem:[#allocation2 + $0x20] sm:$0xff] %v8037_v47  ;;  %v8045_v7 = vadd.f32 %v7684_v21, %v413_v35  ;;  %v7686_v1 = vpop.f32.mrb[7].mxu0  ;;  %8055 = vst [vmem:[#allocation2 + $0x30] sm:$0xff] %v8039_v15  ;;  %v8047_v23 = vadd.f32 %v8028_v24, %v415_v14  ;;  %v8030_v32 = vpop.f32.mrb[7].mxu1  ;;  %v13282_v35 = vcombine.low (!%p13247_p2), %v8200_v61, %v8204_v62  ;;  %v8219_v14 = vld [vmem:[#allocation9 + $0x1a0] sm:$0xff] (!%p13247_p2)  ;;  %v8220_v15 = vld [vmem:[#allocation9 + $0x1a8] sm:$0xff] (!%p13247_p2) }
 0x5a5   : > { %8054 = vst [vmem:[#allocation2 + $0x28] sm:$0xff] %v8038_v16  ;;  %v8046_v25 = vadd.f32 %v7686_v1, %v414_v45  ;;  %8056 = vst [vmem:[#allocation2 + $0x38] sm:$0xff] %v8040_v17  ;;  %v8048_v55 = vadd.f32 %v8030_v32, %v416_v22  ;;  %v13289_v47 = vcombine.high (!%p13247_p2), %v8207_v8, %v8211_v9  ;;  %v8216_v45 = vld [vmem:[#allocation9 + $0x188] sm:$0xff] (!%p13247_p2)  ;;  %v15790_v16 = vsub.s32 (!%p13247_p2), 1, %v15787_v48  ;;  %v8223_v17 = vld [vmem:[#allocation9 + $0x1c0] sm:$0xff] (!%p13247_p2) }
 0x5a6   : > { %8061 = vst [vmem:[#allocation2 + $0x60] sm:$0xff] %v8045_v7  ;;  %8063 = vst [vmem:[#allocation2 + $0x70] sm:$0xff] %v8047_v23  ;;  %v13291_v13 = vcombine.high (!%p13247_p2), %v8208_v10, %v8212_v11  ;;  %11290 = vmatpush1.bf16.msra.mxu0 (!%p13247_p2), %v13280_v12  ;;  %11462 = vmatpush1.bf16.msra.mxu1 (!%p13247_p2), %v13282_v35  ;;  %v13290_v21 = vcombine.low (!%p13247_p2), %v8208_v10, %v8212_v11  ;;  %v8227_v7 = vld [vmem:[#allocation9 + $0x1e0] sm:$0xff] (!%p13247_p2)  ;;  %v8224_v32 = vld [vmem:[#allocation9 + $0x1c8] sm:$0xff] (!%p13247_p2) }
 0x5a7   : > { %8062 = vst [vmem:[#allocation2 + $0x68] sm:$0xff] %v8046_v25  ;;  %8064 = vst [vmem:[#allocation2 + $0x78] sm:$0xff] %v8048_v55  ;;  %11291 = vmatprep.subr.bf16.mxu0 (!%p13247_p2), %v13289_v47  ;;  %v13297_v22 = vcombine.high (!%p13247_p2), %v8215_v33, %v8219_v14  ;;  %v13299_v24 = vcombine.high (!%p13247_p2), %v8216_v45, %v8220_v15  ;;  %v8070_v1 = vld [vmem:[#allocation2 + $0x8] sm:$0xff] (!%p13247_p2)  ;;  %v8228_v55 = vld [vmem:[#allocation9 + $0x1e8] sm:$0xff] (!%p13247_p2)  ;;  %v13296_v41 = vcombine.low (!%p13247_p2), %v8215_v33, %v8219_v14 }
 0x5a8   : > { %11463 = vmatprep.subr.bf16.mxu1 %v13291_v13  ;;  %v8078_v23 = vld [vmem:[#allocation2 + $0x48] sm:$0xff]  ;;  %v13298_v27 = vcombine.low %v8216_v45, %v8220_v15  ;;  %v13305_v28 = vcombine.high %v8223_v17, %v8227_v7  ;;  %v13307_v34 = vcombine.high %v8224_v32, %v8228_v55  ;;  %v13304_v38 = vcombine.low %v8223_v17, %v8227_v7  ;;  %v8264_v35 = vld [vmem:[#allocation9 + $0x308] sm:$0xff] }
 0x5a9   : > { %v15792_v25 = vld [vmem:[#allocation8] sm:$0xff]  ;;  %v13306_v39 = vcombine.low %v8224_v32, %v8228_v55  ;;  %v13320_v60 = vcombine.low %v8239_v46, %v8243_v49  ;;  %v13322_v59 = vcombine.low %v8240_v50, %v8244_v51  ;;  %v13329_v61 = vcombine.high %v8247_v31, %v8251_v54  ;;  %v8255_v4 = vld [vmem:[#allocation9 + $0x2c0] sm:$0xff]  ;;  %v8268_v47 = vld [vmem:[#allocation9 + $0x328] sm:$0xff] }
 0x5aa   : > { %v8094_v26 = vrot.slane %v15792_v25, %v15790_v16  ;;  %11292 = vmatpush1.bf16.msra.mxu0 %v13288_v18  ;;  %11464 = vmatpush1.bf16.msra.mxu1 %v13290_v21  ;;  %v13331_v62 = vcombine.high %v8248_v57, %v8252_v58  ;;  %v13330_v8 = vcombine.low %v8248_v57, %v8252_v58  ;;  %v8263_v11 = vld [vmem:[#allocation9 + $0x300] sm:$0xff]  ;;  %v8272_v21 = vld [vmem:[#allocation9 + $0x348] sm:$0xff]  ;;  %v15801_v17 = vsub.s32 0, %v15787_v48 }
 0x5ab   : > { %11293 = vmatprep.subr.bf16.mxu0 %v13297_v22  ;;  %11465 = vmatprep.subr.bf16.mxu1 %v13299_v24  ;;  %v13337_v9 = vcombine.high %v8255_v4, %v8259_v20  ;;  %v13339_v10 = vcombine.high %v8256_v63, %v8260_v0  ;;  %v8267_v12 = vld [vmem:[#allocation9 + $0x320] sm:$0xff]  ;;  %v13336_v13 = vcombine.low %v8255_v4, %v8259_v20  ;;  %v8276_v22 = vld [vmem:[#allocation9 + $0x368] sm:$0xff] }
 0x5ac   : > { %v8128_v30 = vadd.f32 %v8094_v26, %v8070_v1  ;;  %v8136_v36 = vadd.f32 %v8094_v26, %v8078_v23  ;;  %v13338_v33 = vcombine.low %v8256_v63, %v8260_v0  ;;  %v13345_v14 = vcombine.high %v8263_v11, %v8267_v12  ;;  %v8271_v15 = vld [vmem:[#allocation9 + $0x340] sm:$0xff]  ;;  %v8072_v46 = vld [vmem:[#allocation2 + $0x18] sm:$0xff] }
 0x5ad   : > { %v13347_v45 = vcombine.high %v8264_v35, %v8268_v47  ;;  %v8275_v18 = vld [vmem:[#allocation9 + $0x360] sm:$0xff]  ;;  %v13344_v7 = vcombine.low %v8263_v11, %v8267_v12  ;;  %v13346_v24 = vcombine.low %v8264_v35, %v8268_v47  ;;  %v13355_v23 = vcombine.high %v8272_v21, %v8276_v22  ;;  %v8080_v49 = vld [vmem:[#allocation2 + $0x58] sm:$0xff] }
 0x5ae   : > { %v8144_v44 = vmax.f32 %v8128_v30, 0.0  ;;  %v8152_v19 = vmax.f32 %v8136_v36, 0.0  ;;  %11294 = vmatpush1.bf16.msra.mxu0 %v13296_v41  ;;  %11466 = vmatpush1.bf16.msra.mxu1 %v13298_v27  ;;  %v13353_v1 = vcombine.high %v8271_v15, %v8275_v18  ;;  %v8279_v32 = vld [vmem:[#allocation9 + $0x380] sm:$0xff]  ;;  %v15804_v26 = vsub.s32 3, %v15787_v48  ;;  %v8280_v41 = vld [vmem:[#allocation9 + $0x388] sm:$0xff]  ;;  %v8069_v36 = vld [vmem:[#allocation2] sm:$0xff] }
 0x5af   : > { %11295 = vmatprep.subr.bf16.mxu0 %v13305_v28  ;;  %11467 = vmatprep.subr.bf16.mxu1 %v13307_v34  ;;  %v8283_v55 = vld [vmem:[#allocation9 + $0x3a0] sm:$0xff]  ;;  %v8284_v27 = vld [vmem:[#allocation9 + $0x3a8] sm:$0xff]  ;;  %v8090_v28 = vrot.slane %v15792_v25, %v15801_v17  ;;  %v13352_v30 = vcombine.low %v8271_v15, %v8275_v18  ;;  %v8077_v34 = vld [vmem:[#allocation2 + $0x40] sm:$0xff]  ;;  %v13354_v56 = vcombine.low %v8272_v21, %v8276_v22 }
 0x5b0   : > { %v15796_v6 = vpack.c.bf16 %v8152_v19, %v8144_v44  ;;  %v13361_v37 = vcombine.high %v8279_v32, %v8283_v55  ;;  %v13363_v43 = vcombine.high %v8280_v41, %v8284_v27  ;;  %v8291_v44 = vld [vmem:[#allocation9 + $0x3e0] sm:$0xff]  ;;  %v8288_v19 = vld [vmem:[#allocation9 + $0x3c8] sm:$0xff]  ;;  %v13360_v50 = vcombine.low %v8279_v32, %v8283_v55 }
 0x5b1   : > { %v13362_v51 = vcombine.low %v8280_v41, %v8284_v27  ;;  %v8296_v57 = vld [vmem:[#allocation9 + $0x408] sm:$0xff]  ;;  %v8303_v63 = vld [vmem:[#allocation9 + $0x440] sm:$0xff] }
 0x5b2   : > { %11313 = vmatprep.mubr.bf16.mxu0 %v15796_v6  ;;  %11485 = vmatprep.mubr.bf16.mxu1 %v15796_v6  ;;  %v8300_v58 = vld [vmem:[#allocation9 + $0x428] sm:$0xff]  ;;  %v8307_v0 = vld [vmem:[#allocation9 + $0x460] sm:$0xff] }
 0x5b3   : > { %11296 = vmatpush1.bf16.msra.mxu0 %v13304_v38  ;;  %11468 = vmatpush1.bf16.msra.mxu1 %v13306_v39  ;;  %v8102_v38 = vrot.slane %v15792_v25, %v15804_v26  ;;  %v8292_v39 = vld [vmem:[#allocation9 + $0x3e8] sm:$0xff]  ;;  %v13379_v20 = vcombine.high %v8296_v57, %v8300_v58  ;;  %v13378_v35 = vcombine.low %v8296_v57, %v8300_v58 }
 0x5b4   : > { %11297 = vmatprep.subr.bf16.mxu0 %v13313_v40  ;;  %11469 = vmatprep.subr.bf16.mxu1 %v13315_v42  ;;  %v8127_v40 = vadd.f32 %v8090_v28, %v8069_v36  ;;  %v8135_v42 = vadd.f32 %v8090_v28, %v8077_v34  ;;  %v8308_v11 = vld [vmem:[#allocation9 + $0x468] sm:$0xff]  ;;  %v13385_v47 = vcombine.high %v8303_v63, %v8307_v0  ;;  %v8327_v36 = vld [vmem:[#allocation9 + $0x500] sm:$0xff] }
 0x5b5   : > { %v8130_v31 = vadd.f32 %v8102_v38, %v8072_v46  ;;  %v8138_v54 = vadd.f32 %v8102_v38, %v8080_v49  ;;  %v8312_v15 = vld [vmem:[#allocation9 + $0x488] sm:$0xff]  ;;  %v13384_v21 = vcombine.low %v8303_v63, %v8307_v0  ;;  %v8331_v34 = vld [vmem:[#allocation9 + $0x520] sm:$0xff] }
 0x5b6   : > { %v8316_v18 = vld [vmem:[#allocation9 + $0x4a8] sm:$0xff]  ;;  %v8335_v38 = vld [vmem:[#allocation9 + $0x540] sm:$0xff]  ;;  %v13408_v46 = vcombine.low %v8327_v36, %v8331_v34 }
 0x5b7   : > { %11298 = vmatpush1.bf16.msra.mxu0 %v13312_v52  ;;  %11470 = vmatpush1.bf16.msra.mxu1 %v13314_v3  ;;  %v13369_v52 = vcombine.high %v8287_v5, %v8291_v44  ;;  %v13371_v3 = vcombine.high %v8288_v19, %v8292_v39  ;;  %v8320_v32 = vld [vmem:[#allocation9 + $0x4c8] sm:$0xff]  ;;  %v13394_v27 = vcombine.low %v8312_v15, %v8316_v18 }
 0x5b8   : > { %11299 = vmatprep.subr.bf16.mxu0 %v13321_v53  ;;  %11471 = vmatprep.subr.bf16.mxu1 %v13323_v29  ;;  %v8295_v53 = vld [vmem:[#allocation9 + $0x400] sm:$0xff]  ;;  %v8324_v55 = vld [vmem:[#allocation9 + $0x4e8] sm:$0xff] }
 0x5b9   : > { %v8299_v29 = vld [vmem:[#allocation9 + $0x420] sm:$0xff] }
 0x5ba   : > { %v13377_v4 = vcombine.high %v8295_v53, %v8299_v29  ;;  %v13376_v12 = vcombine.low %v8295_v53, %v8299_v29  ;;  %v8344_v53 = vld [vmem:[#allocation9 + $0x588] sm:$0xff] }
 0x5bb   : > { %11300 = vmatpush1.bf16.msra.mxu0 %v13320_v60  ;;  %11472 = vmatpush1.bf16.msra.mxu1 %v13322_v59  ;;  %v8143_v60 = vmax.f32 %v8127_v40, 0.0  ;;  %v8151_v59 = vmax.f32 %v8135_v42, 0.0  ;;  %v8336_v40 = vld [vmem:[#allocation9 + $0x548] sm:$0xff] }
 0x5bc   : > { %11301 = vmatprep.subr.bf16.mxu0 %v13329_v61  ;;  %11473 = vmatprep.subr.bf16.mxu1 %v13331_v62  ;;  %v13368_v61 = vcombine.low %v8287_v5, %v8291_v44  ;;  %v13370_v62 = vcombine.low %v8288_v19, %v8292_v39  ;;  %v13402_v5 = vcombine.low %v8320_v32, %v8324_v55  ;;  %v8339_v39 = vld [vmem:[#allocation9 + $0x560] sm:$0xff]  ;;  %v8340_v42 = vld [vmem:[#allocation9 + $0x568] sm:$0xff] }
 0x5bd   : > { %v13409_v44 = vcombine.high %v8327_v36, %v8331_v34  ;;  %v8348_v29 = vld [vmem:[#allocation9 + $0x5a8] sm:$0xff]  ;;  %v8383_v36 = vld [vmem:[#allocation9 + $0x6c0] sm:$0xff] }
 0x5be   : > { %v13427_v58 = vcombine.high %v8344_v53, %v8348_v29  ;;  %v8387_v34 = vld [vmem:[#allocation9 + $0x6e0] sm:$0xff] }
 0x5bf   : > { %11302 = vmatpush1.bf16.msra.mxu0 %v13328_v2  ;;  %11474 = vmatpush1.bf16.msra.mxu1 %v13330_v8  ;;  %v8146_v2 = vmax.f32 %v8130_v31, 0.0  ;;  %v8154_v8 = vmax.f32 %v8138_v54, 0.0  ;;  %v13416_v31 = vcombine.low %v8335_v38, %v8339_v39  ;;  %v13418_v54 = vcombine.low %v8336_v40, %v8340_v42 }
 0x5c0   : > { %11303 = vmatprep.subr.bf16.mxu0 %v13337_v9  ;;  %11475 = vmatprep.subr.bf16.mxu1 %v13339_v10  ;;  %v15810_v9 = vpack.c.bf16 %v8151_v59, %v8143_v60  ;;  %v8304_v10 = vld [vmem:[#allocation9 + $0x448] sm:$0xff]  ;;  %v8351_v60 = vld [vmem:[#allocation9 + $0x5c0] sm:$0xff] }
 0x5c1   : > { %v13386_v22 = vcombine.low %v8304_v10, %v8308_v11  ;;  %v8355_v59 = vld [vmem:[#allocation9 + $0x5e0] sm:$0xff] }
 0x5c2   : > { %v13433_v63 = vcombine.high %v8351_v60, %v8355_v59 }
 0x5c3   : > { %11304 = vmatpush1.bf16.msra.mxu0 %v13336_v13  ;;  %11476 = vmatpush1.bf16.msra.mxu1 %v13338_v33  ;;  %v13387_v13 = vcombine.high %v8304_v10, %v8308_v11  ;;  %v8311_v33 = vld [vmem:[#allocation9 + $0x480] sm:$0xff]  ;;  %v8360_v10 = vld [vmem:[#allocation9 + $0x608] sm:$0xff] }
 0x5c4   : > { %11305 = vmatprep.subr.bf16.mxu0 %v13345_v14  ;;  %11477 = vmatprep.subr.bf16.mxu1 %v13347_v45  ;;  %v8315_v14 = vld [vmem:[#allocation9 + $0x4a0] sm:$0xff]  ;;  %v15812_v45 = vpack.c.bf16 %v8154_v8, %v8146_v2  ;;  %v8364_v11 = vld [vmem:[#allocation9 + $0x628] sm:$0xff] }
 0x5c5   : > { %v13392_v41 = vcombine.low %v8311_v33, %v8315_v14  ;;  %v8359_v2 = vld [vmem:[#allocation9 + $0x600] sm:$0xff] }
 0x5c6   : > { %v8363_v8 = vld [vmem:[#allocation9 + $0x620] sm:$0xff] }
 0x5c7   : > { %11306 = vmatpush1.bf16.msra.mxu0 %v13344_v7  ;;  %11478 = vmatpush1.bf16.msra.mxu1 %v13346_v24  ;;  %v13393_v7 = vcombine.high %v8311_v33, %v8315_v14  ;;  %v13395_v24 = vcombine.high %v8312_v15, %v8316_v18  ;;  %v8367_v33 = vld [vmem:[#allocation9 + $0x640] sm:$0xff]  ;;  %v8368_v15 = vld [vmem:[#allocation9 + $0x648] sm:$0xff] }
 0x5c8   : > { %11307 = vmatprep.subr.bf16.mxu0 %v13353_v1  ;;  %11479 = vmatprep.subr.bf16.mxu1 %v13355_v23  ;;  %v8319_v1 = vld [vmem:[#allocation9 + $0x4c0] sm:$0xff]  ;;  %v8372_v18 = vld [vmem:[#allocation9 + $0x668] sm:$0xff] }
 0x5c9   : > { %v8323_v23 = vld [vmem:[#allocation9 + $0x4e0] sm:$0xff] }
 0x5ca   : > { %v13401_v28 = vcombine.high %v8319_v1, %v8323_v23  ;;  %v8371_v14 = vld [vmem:[#allocation9 + $0x660] sm:$0xff] }
 0x5cb   : > { %11308 = vmatpush1.bf16.msra.mxu0 %v13352_v30  ;;  %11480 = vmatpush1.bf16.msra.mxu1 %v13354_v56  ;;  %v13403_v30 = vcombine.high %v8320_v32, %v8324_v55  ;;  %v8328_v56 = vld [vmem:[#allocation9 + $0x508] sm:$0xff] }
 0x5cc   : > { %11309 = vmatprep.subr.bf16.mxu0 %v13361_v37  ;;  %11481 = vmatprep.subr.bf16.mxu1 %v13363_v43  ;;  %v8332_v37 = vld [vmem:[#allocation9 + $0x528] sm:$0xff]  ;;  %v13400_v43 = vcombine.low %v8319_v1, %v8323_v23  ;;  %v8375_v1 = vld [vmem:[#allocation9 + $0x680] sm:$0xff] }
 0x5cd   : > { %v13411_v19 = vcombine.high %v8328_v56, %v8332_v37  ;;  %v13410_v49 = vcombine.low %v8328_v56, %v8332_v37  ;;  %v8379_v23 = vld [vmem:[#allocation9 + $0x6a0] sm:$0xff]  ;;  %v8376_v32 = vld [vmem:[#allocation9 + $0x688] sm:$0xff] }
 0x5ce   : > { %v8380_v55 = vld [vmem:[#allocation9 + $0x6a8] sm:$0xff] }
 0x5cf   : > { %11310 = vmatpush1.bf16.msra.mxu0 %v13360_v50  ;;  %11482 = vmatpush1.bf16.msra.mxu1 %v13362_v51  ;;  %v13417_v50 = vcombine.high %v8335_v38, %v8339_v39  ;;  %v13419_v51 = vcombine.high %v8336_v40, %v8340_v42  ;;  %v8384_v56 = vld [vmem:[#allocation9 + $0x6c8] sm:$0xff]  ;;  %v8391_v38 = vld [vmem:[#allocation9 + $0x700] sm:$0xff] }
 0x5d0   : > { %11311 = vmatprep.subr.bf16.mxu0 %v13369_v52  ;;  %11483 = vmatprep.subr.bf16.mxu1 %v13371_v3  ;;  %v8343_v52 = vld [vmem:[#allocation9 + $0x580] sm:$0xff]  ;;  %v8388_v37 = vld [vmem:[#allocation9 + $0x6e8] sm:$0xff] }
 0x5d1   : > { %v8347_v3 = vld [vmem:[#allocation9 + $0x5a0] sm:$0xff]  ;;  %v8392_v40 = vld [vmem:[#allocation9 + $0x708] sm:$0xff] }
 0x5d2   : > { %v13425_v57 = vcombine.high %v8343_v52, %v8347_v3  ;;  %v8395_v39 = vld [vmem:[#allocation9 + $0x720] sm:$0xff]  ;;  %v8396_v42 = vld [vmem:[#allocation9 + $0x728] sm:$0xff] }
 0x5d3   : > { %11312 = vmatpush1.bf16.msra.mxu0 %v13368_v61  ;;  %11484 = vmatpush1.bf16.msra.mxu1 %v13370_v62  ;;  %v8352_v61 = vld [vmem:[#allocation9 + $0x5c8] sm:$0xff] }
 0x5d4   : > { %11324 = vmatprep.subr.bf16.mxu0 %v13377_v4  ;;  %11496 = vmatprep.subr.bf16.mxu1 %v13379_v20  ;;  %v8356_v62 = vld [vmem:[#allocation9 + $0x5e8] sm:$0xff]  ;;  %v13424_v4 = vcombine.low %v8343_v52, %v8347_v3  ;;  %v13426_v20 = vcombine.low %v8344_v53, %v8348_v29  ;;  %v8399_v52 = vld [vmem:[#allocation9 + $0x740] sm:$0xff] }
 0x5d5   : > { %v13435_v0 = vcombine.high %v8352_v61, %v8356_v62  ;;  %v8403_v3 = vld [vmem:[#allocation9 + $0x760] sm:$0xff]  ;;  %v8400_v53 = vld [vmem:[#allocation9 + $0x748] sm:$0xff] }
 0x5d6   : > { %11314 = vmatmul.mubr.bf16.vlgmr.msra.gmra.mrb[0].mxu0 %v15810_v9  ;;  %11486 = vmatmul.mubr.bf16.vlgmr.msra.gmra.mrb[0].mxu1 %v15810_v9  ;;  %v8404_v29 = vld [vmem:[#allocation9 + $0x768] sm:$0xff] }
 0x5d7   : > { %11325 = vmatpush1.bf16.msra.mxu0 %v13376_v12  ;;  %11497 = vmatpush1.bf16.msra.mxu1 %v13378_v35  ;;  %v13432_v12 = vcombine.low %v8351_v60, %v8355_v59  ;;  %v13434_v35 = vcombine.low %v8352_v61, %v8356_v62  ;;  %v13483_v60 = vcombine.high %v8400_v53, %v8404_v29  ;;  %v8407_v59 = vld [vmem:[#allocation9 + $0x780] sm:$0xff]  ;;  %v15822_v62 = vsub.s32 5, %v15787_v48 }
 0x5d8   : > { %11326 = vmatprep.subr.bf16.mxu0 %v13385_v47  ;;  %11498 = vmatprep.subr.bf16.mxu1 %v13387_v13  ;;  %v13441_v47 = vcombine.high %v8359_v2, %v8363_v8  ;;  %v13443_v13 = vcombine.high %v8360_v10, %v8364_v11  ;;  %v8411_v61 = vld [vmem:[#allocation9 + $0x7a0] sm:$0xff] }
 0x5d9   : > { %11356 = vmatprep.mubr.bf16.mxu0 %v15812_v45  ;;  %11528 = vmatprep.mubr.bf16.mxu1 %v15812_v45 }
 0x5db   : > { %11327 = vmatpush1.bf16.msra.mxu0 %v13384_v21  ;;  %11499 = vmatpush1.bf16.msra.mxu1 %v13386_v22  ;;  %v13440_v21 = vcombine.low %v8359_v2, %v8363_v8  ;;  %v13442_v22 = vcombine.low %v8360_v10, %v8364_v11  ;;  %v8071_v2 = vld [vmem:[#allocation2 + $0x10] sm:$0xff]  ;;  %v13482_v10 = vcombine.low %v8400_v53, %v8404_v29 }
 0x5dc   : > { %11328 = vmatprep.subr.bf16.mxu0 %v13393_v7  ;;  %11500 = vmatprep.subr.bf16.mxu1 %v13395_v24  ;;  %v13449_v7 = vcombine.high %v8367_v33, %v8371_v14  ;;  %v13451_v24 = vcombine.high %v8368_v15, %v8372_v18  ;;  %v8079_v8 = vld [vmem:[#allocation2 + $0x50] sm:$0xff]  ;;  %v13489_v11 = vcombine.high %v8407_v59, %v8411_v61 }
 0x5dd   : > { %v8440_v29 = vld [vmem:[#allocation9 + $0x888] sm:$0xff] }
 0x5df   : > { %11329 = vmatpush1.bf16.msra.mxu0 %v13392_v41  ;;  %11501 = vmatpush1.bf16.msra.mxu1 %v13394_v27  ;;  %v13448_v41 = vcombine.low %v8367_v33, %v8371_v14  ;;  %v13450_v27 = vcombine.low %v8368_v15, %v8372_v18  ;;  %v8110_v33 = vrot.slane %v15792_v25, %v15822_v62  ;;  %v8420_v14 = vld [vmem:[#allocation9 + $0x7e8] sm:$0xff] }
 0x5e0   : > { %11330 = vmatprep.subr.bf16.mxu0 %v13401_v28  ;;  %11502 = vmatprep.subr.bf16.mxu1 %v13403_v30  ;;  %v13457_v28 = vcombine.high %v8375_v1, %v8379_v23  ;;  %v13459_v30 = vcombine.high %v8376_v32, %v8380_v55 }
 0x5e3   : > { %11331 = vmatpush1.bf16.msra.mxu0 %v13400_v43  ;;  %11503 = vmatpush1.bf16.msra.mxu1 %v13402_v5  ;;  %v13456_v43 = vcombine.low %v8375_v1, %v8379_v23  ;;  %v13458_v5 = vcombine.low %v8376_v32, %v8380_v55  ;;  %v8423_v32 = vld [vmem:[#allocation9 + $0x800] sm:$0xff] }
 0x5e4   : > { %11332 = vmatprep.subr.bf16.mxu0 %v13409_v44  ;;  %11504 = vmatprep.subr.bf16.mxu1 %v13411_v19  ;;  %v13465_v44 = vcombine.high %v8383_v36, %v8387_v34  ;;  %v13467_v19 = vcombine.high %v8384_v56, %v8388_v37  ;;  %v8427_v55 = vld [vmem:[#allocation9 + $0x820] sm:$0xff] }
 0x5e7   : > { %11333 = vmatpush1.bf16.msra.mxu0 %v13408_v46  ;;  %11505 = vmatpush1.bf16.msra.mxu1 %v13410_v49  ;;  %v13464_v46 = vcombine.low %v8383_v36, %v8387_v34  ;;  %v13466_v49 = vcombine.low %v8384_v56, %v8388_v37  ;;  %v13505_v37 = vcombine.high %v8423_v32, %v8427_v55 }
 0x5e8   : > { %11334 = vmatprep.subr.bf16.mxu0 %v13417_v50  ;;  %11506 = vmatprep.subr.bf16.mxu1 %v13419_v51  ;;  %v13473_v50 = vcombine.high %v8391_v38, %v8395_v39  ;;  %v13475_v51 = vcombine.high %v8392_v40, %v8396_v42 }
 0x5eb   : > { %11335 = vmatpush1.bf16.msra.mxu0 %v13416_v31  ;;  %11507 = vmatpush1.bf16.msra.mxu1 %v13418_v54  ;;  %v15819_v31 = vsub.s32 2, %v15787_v48  ;;  %v13472_v54 = vcombine.low %v8391_v38, %v8395_v39 }
 0x5ec   : > { %11336 = vmatprep.subr.bf16.mxu0 %v13425_v57  ;;  %11508 = vmatprep.subr.bf16.mxu1 %v13427_v58  ;;  %v13474_v57 = vcombine.low %v8392_v40, %v8396_v42  ;;  %v13481_v58 = vcombine.high %v8399_v52, %v8403_v3  ;;  %v8432_v40 = vld [vmem:[#allocation9 + $0x848] sm:$0xff] }
 0x5ed   : > { %v8436_v42 = vld [vmem:[#allocation9 + $0x868] sm:$0xff] }
 0x5ef   : > { %11337 = vmatpush1.bf16.msra.mxu0 %v13424_v4  ;;  %11509 = vmatpush1.bf16.msra.mxu1 %v13426_v20  ;;  %v8408_v4 = vld [vmem:[#allocation9 + $0x788] sm:$0xff] }
 0x5f0   : > { %11338 = vmatprep.subr.bf16.mxu0 %v13433_v63  ;;  %11510 = vmatprep.subr.bf16.mxu1 %v13435_v0  ;;  %v8412_v20 = vld [vmem:[#allocation9 + $0x7a8] sm:$0xff]  ;;  %v8098_v63 = vrot.slane %v15792_v25, %v15819_v31  ;;  %v13480_v0 = vcombine.low %v8399_v52, %v8403_v3  ;;  %v8439_v52 = vld [vmem:[#allocation9 + $0x880] sm:$0xff] }
 0x5f1   : > { %v8443_v3 = vld [vmem:[#allocation9 + $0x8a0] sm:$0xff] }
 0x5f2   : > { %v8129_v15 = vadd.f32 %v8098_v63, %v8071_v2  ;;  %v8137_v18 = vadd.f32 %v8098_v63, %v8079_v8  ;;  %v8452_v63 = vld [vmem:[#allocation9 + $0x8e8] sm:$0xff] }
 0x5f3   : > { %11339 = vmatpush1.bf16.msra.mxu0 %v13432_v12  ;;  %11511 = vmatpush1.bf16.msra.mxu1 %v13434_v35  ;;  %v13491_v12 = vcombine.high %v8408_v4, %v8412_v20  ;;  %v8415_v35 = vld [vmem:[#allocation9 + $0x7c0] sm:$0xff] }
 0x5f4   : > { %11340 = vmatprep.subr.bf16.mxu0 %v13441_v47  ;;  %11512 = vmatprep.subr.bf16.mxu1 %v13443_v13  ;;  %v8419_v47 = vld [vmem:[#allocation9 + $0x7e0] sm:$0xff]  ;;  %v8416_v13 = vld [vmem:[#allocation9 + $0x7c8] sm:$0xff]  ;;  %v8145_v25 = vmax.f32 %v8129_v15, 0.0  ;;  %v8153_v36 = vmax.f32 %v8137_v18, 0.0 }
 0x5f5   : > { %v13497_v1 = vcombine.high %v8415_v35, %v8419_v47  ;;  %v13499_v23 = vcombine.high %v8416_v13, %v8420_v14  ;;  %v13496_v34 = vcombine.low %v8415_v35, %v8419_v47  ;;  %v13498_v56 = vcombine.low %v8416_v13, %v8420_v14  ;;  %v8456_v35 = vld [vmem:[#allocation9 + $0x908] sm:$0xff]  ;;  %v8463_v18 = vld [vmem:[#allocation9 + $0x940] sm:$0xff] }
 0x5f6   : > { %v15828_v39 = vpack.c.bf16 %v8153_v36, %v8145_v25  ;;  %v8460_v47 = vld [vmem:[#allocation9 + $0x928] sm:$0xff] }
 0x5f7   : > { %11341 = vmatpush1.bf16.msra.mxu0 %v13440_v21  ;;  %11513 = vmatpush1.bf16.msra.mxu1 %v13442_v22  ;;  %v8074_v21 = vld [vmem:[#allocation2 + $0x28] sm:$0xff]  ;;  %v13539_v15 = vcombine.high %v8456_v35, %v8460_v47 }
 0x5f8   : > { %11342 = vmatprep.subr.bf16.mxu0 %v13449_v7  ;;  %11514 = vmatprep.subr.bf16.mxu1 %v13451_v24  ;;  %v8082_v22 = vld [vmem:[#allocation2 + $0x68] sm:$0xff]  ;;  %v13488_v7 = vcombine.low %v8407_v59, %v8411_v61  ;;  %v13490_v24 = vcombine.low %v8408_v4, %v8412_v20  ;;  %v8448_v20 = vld [vmem:[#allocation9 + $0x8c8] sm:$0xff] }
 0x5f9   : > { %v8447_v61 = vld [vmem:[#allocation9 + $0x8c0] sm:$0xff] }
 0x5fa   : > { %v8451_v4 = vld [vmem:[#allocation9 + $0x8e0] sm:$0xff] }
 0x5fb   : > { %11343 = vmatpush1.bf16.msra.mxu0 %v13448_v41  ;;  %11515 = vmatpush1.bf16.msra.mxu1 %v13450_v27  ;;  %v8132_v41 = vadd.f32 %v8110_v33, %v8074_v21  ;;  %v8140_v27 = vadd.f32 %v8110_v33, %v8082_v22  ;;  %v13529_v8 = vcombine.high %v8447_v61, %v8451_v4  ;;  %v8467_v21 = vld [vmem:[#allocation9 + $0x960] sm:$0xff]  ;;  %v8464_v22 = vld [vmem:[#allocation9 + $0x948] sm:$0xff] }
 0x5fc   : > { %11344 = vmatprep.subr.bf16.mxu0 %v13457_v28  ;;  %11516 = vmatprep.subr.bf16.mxu1 %v13459_v30  ;;  %v8424_v28 = vld [vmem:[#allocation9 + $0x808] sm:$0xff]  ;;  %v13528_v13 = vcombine.low %v8447_v61, %v8451_v4  ;;  %v13530_v33 = vcombine.low %v8448_v20, %v8452_v63 }
 0x5fd   : > { %v8428_v30 = vld [vmem:[#allocation9 + $0x828] sm:$0xff]  ;;  %v8156_v38 = vmax.f32 %v8140_v27, 0.0 }
 0x5fe   : > { %v8472_v27 = vld [vmem:[#allocation9 + $0x988] sm:$0xff] }
 0x5ff   : > { %11345 = vmatpush1.bf16.msra.mxu0 %v13456_v43  ;;  %11517 = vmatpush1.bf16.msra.mxu1 %v13458_v5  ;;  %v13507_v43 = vcombine.high %v8424_v28, %v8428_v30  ;;  %v8431_v5 = vld [vmem:[#allocation9 + $0x840] sm:$0xff] }
 0x600   : > { %11346 = vmatprep.subr.bf16.mxu0 %v13465_v44  ;;  %11518 = vmatprep.subr.bf16.mxu1 %v13467_v19  ;;  %v8435_v44 = vld [vmem:[#allocation9 + $0x860] sm:$0xff]  ;;  %v8148_v19 = vmax.f32 %v8132_v41, 0.0 }
 0x601   : > { %v8475_v41 = vld [vmem:[#allocation9 + $0x9a0] sm:$0xff] }
 0x602   : > { %v15830_v53 = vpack.c.bf16 %v8156_v38, %v8148_v19 }
 0x603   : > { %11347 = vmatpush1.bf16.msra.mxu0 %v13464_v46  ;;  %11519 = vmatpush1.bf16.msra.mxu1 %v13466_v49  ;;  %v13504_v46 = vcombine.low %v8423_v32, %v8427_v55  ;;  %v13506_v49 = vcombine.low %v8424_v28, %v8428_v30  ;;  %v8471_v55 = vld [vmem:[#allocation9 + $0x980] sm:$0xff]  ;;  %v8476_v28 = vld [vmem:[#allocation9 + $0x9a8] sm:$0xff]  ;;  %v13544_v30 = vcombine.low %v8463_v18, %v8467_v21 }
 0x604   : > { %11348 = vmatprep.subr.bf16.mxu0 %v13473_v50  ;;  %11520 = vmatprep.subr.bf16.mxu1 %v13475_v51  ;;  %v13513_v50 = vcombine.high %v8431_v5, %v8435_v44  ;;  %v13515_v51 = vcombine.high %v8432_v40, %v8436_v42  ;;  %v13553_v36 = vcombine.high %v8471_v55, %v8475_v41 }
 0x605   : > { %v13554_v19 = vcombine.low %v8472_v27, %v8476_v28 }
 0x607   : > { %11349 = vmatpush1.bf16.msra.mxu0 %v13472_v54  ;;  %11521 = vmatpush1.bf16.msra.mxu1 %v13474_v57  ;;  %v8444_v54 = vld [vmem:[#allocation9 + $0x8a8] sm:$0xff]  ;;  %v13512_v57 = vcombine.low %v8431_v5, %v8435_v44  ;;  %v13552_v44 = vcombine.low %v8471_v55, %v8475_v41 }
 0x608   : > { %11350 = vmatprep.subr.bf16.mxu0 %v13481_v58  ;;  %11522 = vmatprep.subr.bf16.mxu1 %v13483_v60  ;;  %v13514_v58 = vcombine.low %v8432_v40, %v8436_v42  ;;  %v13521_v60 = vcombine.high %v8439_v52, %v8443_v3  ;;  %v13523_v59 = vcombine.high %v8440_v29, %v8444_v54  ;;  %v8484_v5 = vld [vmem:[#allocation9 + $0x9e8] sm:$0xff]  ;;  %v8487_v42 = vld [vmem:[#allocation9 + $0xa00] sm:$0xff] }
 0x609   : > { %v13522_v2 = vcombine.low %v8440_v29, %v8444_v54  ;;  %v8495_v54 = vld [vmem:[#allocation9 + $0xa40] sm:$0xff] }
 0x60b   : > { %11351 = vmatpush1.bf16.msra.mxu0 %v13480_v0  ;;  %11523 = vmatpush1.bf16.msra.mxu1 %v13482_v10  ;;  %v13520_v0 = vcombine.low %v8439_v52, %v8443_v3  ;;  %v13531_v10 = vcombine.high %v8448_v20, %v8452_v63  ;;  %v8503_v63 = vld [vmem:[#allocation9 + $0xa80] sm:$0xff] }
 0x60c   : > { %11352 = vmatprep.subr.bf16.mxu0 %v13489_v11  ;;  %11524 = vmatprep.subr.bf16.mxu1 %v13491_v12  ;;  %v8455_v11 = vld [vmem:[#allocation9 + $0x900] sm:$0xff] }
 0x60d   : > { %v8459_v12 = vld [vmem:[#allocation9 + $0x920] sm:$0xff] }
 0x60e   : > { %v13537_v14 = vcombine.high %v8455_v11, %v8459_v12 }
 0x60f   : > { %11353 = vmatpush1.bf16.msra.mxu0 %v13488_v7  ;;  %11525 = vmatpush1.bf16.msra.mxu1 %v13490_v24  ;;  %v8468_v7 = vld [vmem:[#allocation9 + $0x968] sm:$0xff]  ;;  %v13536_v24 = vcombine.low %v8455_v11, %v8459_v12 }
 0x610   : > { %11354 = vmatprep.subr.bf16.mxu0 %v13497_v1  ;;  %11526 = vmatprep.subr.bf16.mxu1 %v13499_v23  ;;  %v13538_v1 = vcombine.low %v8456_v35, %v8460_v47  ;;  %v13545_v23 = vcombine.high %v8463_v18, %v8467_v21  ;;  %v13547_v32 = vcombine.high %v8464_v22, %v8468_v7  ;;  %v8511_v47 = vld [vmem:[#allocation9 + $0xac0] sm:$0xff] }
 0x611   : > { %v13546_v25 = vcombine.low %v8464_v22, %v8468_v7  ;;  %v8519_v7 = vld [vmem:[#allocation9 + $0xb00] sm:$0xff] }
 0x613   : > { %11355 = vmatpush1.bf16.msra.mxu0 %v13496_v34  ;;  %11527 = vmatpush1.bf16.msra.mxu1 %v13498_v56  ;;  %v13555_v34 = vcombine.high %v8472_v27, %v8476_v28  ;;  %v8479_v56 = vld [vmem:[#allocation9 + $0x9c0] sm:$0xff] }
 0x614   : > { %11367 = vmatprep.subr.bf16.mxu0 %v13505_v37  ;;  %11539 = vmatprep.subr.bf16.mxu1 %v13507_v43  ;;  %v8483_v37 = vld [vmem:[#allocation9 + $0x9e0] sm:$0xff]  ;;  %v8480_v43 = vld [vmem:[#allocation9 + $0x9c8] sm:$0xff] }
 0x615   : > { %v13561_v38 = vcombine.high %v8479_v56, %v8483_v37  ;;  %v13563_v40 = vcombine.high %v8480_v43, %v8484_v5  ;;  %v13562_v52 = vcombine.low %v8480_v43, %v8484_v5  ;;  %v8527_v28 = vld [vmem:[#allocation9 + $0xb40] sm:$0xff] }
 0x616   : > { %11357 = vmatmul.mubr.bf16.vlgmr.msra.gmra.mrb[0].mxu0 %v15828_v39  ;;  %11529 = vmatmul.mubr.bf16.vlgmr.msra.gmra.mrb[0].mxu1 %v15828_v39 }
 0x617   : > { %11368 = vmatpush1.bf16.msra.mxu0 %v13504_v46  ;;  %11540 = vmatpush1.bf16.msra.mxu1 %v13506_v49  ;;  %v8491_v46 = vld [vmem:[#allocation9 + $0xa20] sm:$0xff]  ;;  %v8488_v49 = vld [vmem:[#allocation9 + $0xa08] sm:$0xff] }
 0x618   : > { %11369 = vmatprep.subr.bf16.mxu0 %v13513_v50  ;;  %11541 = vmatprep.subr.bf16.mxu1 %v13515_v51  ;;  %v8492_v50 = vld [vmem:[#allocation9 + $0xa28] sm:$0xff]  ;;  %v13560_v51 = vcombine.low %v8479_v56, %v8483_v37  ;;  %v13569_v3 = vcombine.high %v8487_v42, %v8491_v46 }
 0x619   : > { %11399 = vmatprep.mubr.bf16.mxu0 %v15830_v53  ;;  %11571 = vmatprep.mubr.bf16.mxu1 %v15830_v53  ;;  %v13571_v29 = vcombine.high %v8488_v49, %v8492_v50  ;;  %v13570_v61 = vcombine.low %v8488_v49, %v8492_v50 }
 0x61b   : > { %11370 = vmatpush1.bf16.msra.mxu0 %v13512_v57  ;;  %11542 = vmatpush1.bf16.msra.mxu1 %v13514_v58  ;;  %v8499_v57 = vld [vmem:[#allocation9 + $0xa60] sm:$0xff]  ;;  %v8496_v58 = vld [vmem:[#allocation9 + $0xa48] sm:$0xff] }
 0x61c   : > { %11371 = vmatprep.subr.bf16.mxu0 %v13521_v60  ;;  %11543 = vmatprep.subr.bf16.mxu1 %v13523_v59  ;;  %v8500_v60 = vld [vmem:[#allocation9 + $0xa68] sm:$0xff]  ;;  %v13568_v59 = vcombine.low %v8487_v42, %v8491_v46  ;;  %v13577_v4 = vcombine.high %v8495_v54, %v8499_v57  ;;  %v15842_v46 = vld [vmem:[#allocation8] sm:$0xff] }
 0x61d   : > { %v13579_v20 = vcombine.high %v8496_v58, %v8500_v60  ;;  %v13578_v11 = vcombine.low %v8496_v58, %v8500_v60  ;;  %v8540_v42 = vld [vmem:[#allocation9 + $0xba8] sm:$0xff]  ;;  %v8547_v58 = vld [vmem:[#allocation9 + $0xbe0] sm:$0xff] }
 0x61e   : > { %v8544_v60 = vld [vmem:[#allocation9 + $0xbc8] sm:$0xff] }
 0x61f   : > { %11372 = vmatpush1.bf16.msra.mxu0 %v13520_v0  ;;  %11544 = vmatpush1.bf16.msra.mxu1 %v13522_v2  ;;  %v8507_v0 = vld [vmem:[#allocation9 + $0xaa0] sm:$0xff]  ;;  %v8504_v2 = vld [vmem:[#allocation9 + $0xa88] sm:$0xff] }
 0x620   : > { %11373 = vmatprep.subr.bf16.mxu0 %v13529_v8  ;;  %11545 = vmatprep.subr.bf16.mxu1 %v13531_v10  ;;  %v8508_v8 = vld [vmem:[#allocation9 + $0xaa8] sm:$0xff]  ;;  %v13576_v10 = vcombine.low %v8495_v54, %v8499_v57  ;;  %v13585_v12 = vcombine.high %v8503_v63, %v8507_v0  ;;  %v8543_v57 = vld [vmem:[#allocation9 + $0xbc0] sm:$0xff] }
 0x621   : > { %v13587_v35 = vcombine.high %v8504_v2, %v8508_v8  ;;  %v13586_v18 = vcombine.low %v8504_v2, %v8508_v8 }
 0x623   : > { %11374 = vmatpush1.bf16.msra.mxu0 %v13528_v13  ;;  %11546 = vmatpush1.bf16.msra.mxu1 %v13530_v33  ;;  %v8515_v13 = vld [vmem:[#allocation9 + $0xae0] sm:$0xff]  ;;  %v8512_v33 = vld [vmem:[#allocation9 + $0xac8] sm:$0xff] }
 0x624   : > { %11375 = vmatprep.subr.bf16.mxu0 %v13537_v14  ;;  %11547 = vmatprep.subr.bf16.mxu1 %v13539_v15  ;;  %v8516_v14 = vld [vmem:[#allocation9 + $0xae8] sm:$0xff]  ;;  %v13584_v15 = vcombine.low %v8503_v63, %v8507_v0  ;;  %v13593_v21 = vcombine.high %v8511_v47, %v8515_v13 }
 0x625   : > { %v13595_v22 = vcombine.high %v8512_v33, %v8516_v14  ;;  %v13594_v55 = vcombine.low %v8512_v33, %v8516_v14  ;;  %v8076_v63 = vld [vmem:[#allocation2 + $0x38] sm:$0xff] }
 0x626   : > { %v8084_v0 = vld [vmem:[#allocation2 + $0x78] sm:$0xff] }
 0x627   : > { %11376 = vmatpush1.bf16.msra.mxu0 %v13536_v24  ;;  %11548 = vmatpush1.bf16.msra.mxu1 %v13538_v1  ;;  %v8523_v24 = vld [vmem:[#allocation9 + $0xb20] sm:$0xff]  ;;  %v8520_v1 = vld [vmem:[#allocation9 + $0xb08] sm:$0xff] }
 0x628   : > { %11377 = vmatprep.subr.bf16.mxu0 %v13545_v23  ;;  %11549 = vmatprep.subr.bf16.mxu1 %v13547_v32  ;;  %v8524_v23 = vld [vmem:[#allocation9 + $0xb28] sm:$0xff]  ;;  %v13592_v32 = vcombine.low %v8511_v47, %v8515_v13  ;;  %v13601_v41 = vcombine.high %v8519_v7, %v8523_v24  ;;  %v13600_v56 = vcombine.low %v8519_v7, %v8523_v24 }
 0x629   : > { %v13603_v27 = vcombine.high %v8520_v1, %v8524_v23  ;;  %v13602_v37 = vcombine.low %v8520_v1, %v8524_v23  ;;  %v8552_v33 = vld [vmem:[#allocation9 + $0xc08] sm:$0xff]  ;;  %v8559_v1 = vld [vmem:[#allocation9 + $0xc40] sm:$0xff] }
 0x62a   : > { %v8556_v14 = vld [vmem:[#allocation9 + $0xc28] sm:$0xff]  ;;  %v8563_v23 = vld [vmem:[#allocation9 + $0xc60] sm:$0xff] }
 0x62b   : > { %11378 = vmatpush1.bf16.msra.mxu0 %v13544_v30  ;;  %11550 = vmatpush1.bf16.msra.mxu1 %v13546_v25  ;;  %v8531_v30 = vld [vmem:[#allocation9 + $0xb60] sm:$0xff]  ;;  %v8528_v25 = vld [vmem:[#allocation9 + $0xb48] sm:$0xff]  ;;  %v13635_v24 = vcombine.high %v8552_v33, %v8556_v14 }
 0x62c   : > { %11379 = vmatprep.subr.bf16.mxu0 %v13553_v36  ;;  %11551 = vmatprep.subr.bf16.mxu1 %v13555_v34  ;;  %v8532_v36 = vld [vmem:[#allocation9 + $0xb68] sm:$0xff]  ;;  %v15837_v34 = vsub.s32 4, %v15787_v48  ;;  %v13609_v43 = vcombine.high %v8527_v28, %v8531_v30  ;;  %v13608_v50 = vcombine.low %v8527_v28, %v8531_v30 }
 0x62d   : > { %v13611_v5 = vcombine.high %v8528_v25, %v8532_v36  ;;  %v8564_v28 = vld [vmem:[#allocation9 + $0xc68] sm:$0xff] }
 0x62e   : > { %v8106_v49 = vrot.slane %v15842_v46, %v15837_v34 }
 0x62f   : > { %11380 = vmatpush1.bf16.msra.mxu0 %v13552_v44  ;;  %11552 = vmatpush1.bf16.msra.mxu1 %v13554_v19  ;;  %v8535_v44 = vld [vmem:[#allocation9 + $0xb80] sm:$0xff] }
 0x630   : > { %11381 = vmatprep.subr.bf16.mxu0 %v13561_v38  ;;  %11553 = vmatprep.subr.bf16.mxu1 %v13563_v40  ;;  %v8539_v19 = vld [vmem:[#allocation9 + $0xba0] sm:$0xff]  ;;  %v15840_v38 = vsub.s32 7, %v15787_v48  ;;  %v8536_v40 = vld [vmem:[#allocation9 + $0xb88] sm:$0xff] }
 0x631   : > { %v13619_v54 = vcombine.high %v8536_v40, %v8540_v42  ;;  %v13616_v2 = vcombine.low %v8535_v44, %v8539_v19  ;;  %v13618_v8 = vcombine.low %v8536_v40, %v8540_v42  ;;  %v13640_v40 = vcombine.low %v8559_v1, %v8563_v23 }
 0x633   : > { %11382 = vmatpush1.bf16.msra.mxu0 %v13560_v51  ;;  %11554 = vmatpush1.bf16.msra.mxu1 %v13562_v52  ;;  %v8073_v51 = vld [vmem:[#allocation2 + $0x20] sm:$0xff] }
 0x634   : > { %11383 = vmatprep.subr.bf16.mxu0 %v13569_v3  ;;  %11555 = vmatprep.subr.bf16.mxu1 %v13571_v29  ;;  %v8081_v52 = vld [vmem:[#allocation2 + $0x60] sm:$0xff]  ;;  %v13610_v3 = vcombine.low %v8528_v25, %v8532_v36  ;;  %v13617_v29 = vcombine.high %v8535_v44, %v8539_v19  ;;  %v13634_v25 = vcombine.low %v8552_v33, %v8556_v14  ;;  %v8568_v44 = vld [vmem:[#allocation9 + $0xc88] sm:$0xff] }
 0x635   : > { %v13641_v36 = vcombine.high %v8559_v1, %v8563_v23  ;;  %v8572_v19 = vld [vmem:[#allocation9 + $0xca8] sm:$0xff] }
 0x637   : > { %11384 = vmatpush1.bf16.msra.mxu0 %v13568_v59  ;;  %11556 = vmatpush1.bf16.msra.mxu1 %v13570_v61  ;;  %v8118_v59 = vrot.slane %v15842_v46, %v15840_v38  ;;  %v8548_v61 = vld [vmem:[#allocation9 + $0xbe8] sm:$0xff] }
 0x638   : > { %11385 = vmatprep.subr.bf16.mxu0 %v13577_v4  ;;  %11557 = vmatprep.subr.bf16.mxu1 %v13579_v20  ;;  %v8131_v4 = vadd.f32 %v8106_v49, %v8073_v51  ;;  %v8139_v20 = vadd.f32 %v8106_v49, %v8081_v52  ;;  %v8575_v51 = vld [vmem:[#allocation9 + $0xcc0] sm:$0xff] }
 0x639   : > { %v8134_v47 = vadd.f32 %v8118_v59, %v8076_v63  ;;  %v8142_v13 = vadd.f32 %v8118_v59, %v8084_v0  ;;  %v8579_v52 = vld [vmem:[#allocation9 + $0xce0] sm:$0xff] }
 0x63a   : > { %v8583_v59 = vld [vmem:[#allocation9 + $0xd00] sm:$0xff]  ;;  %v13656_v63 = vcombine.low %v8575_v51, %v8579_v52 }
 0x63b   : > { %11386 = vmatpush1.bf16.msra.mxu0 %v13576_v10  ;;  %11558 = vmatpush1.bf16.msra.mxu1 %v13578_v11  ;;  %v13625_v10 = vcombine.high %v8543_v57, %v8547_v58  ;;  %v13627_v11 = vcombine.high %v8544_v60, %v8548_v61 }
 0x63c   : > { %11387 = vmatprep.subr.bf16.mxu0 %v13585_v12  ;;  %11559 = vmatprep.subr.bf16.mxu1 %v13587_v35  ;;  %v8551_v12 = vld [vmem:[#allocation9 + $0xc00] sm:$0xff] }
 0x63d   : > { %v8555_v35 = vld [vmem:[#allocation9 + $0xc20] sm:$0xff] }
 0x63e   : > { %v13633_v7 = vcombine.high %v8551_v12, %v8555_v35  ;;  %v13632_v30 = vcombine.low %v8551_v12, %v8555_v35  ;;  %v8592_v12 = vld [vmem:[#allocation9 + $0xd48] sm:$0xff] }
 0x63f   : > { %11388 = vmatpush1.bf16.msra.mxu0 %v13584_v15  ;;  %11560 = vmatpush1.bf16.msra.mxu1 %v13586_v18  ;;  %v8147_v15 = vmax.f32 %v8131_v4, 0.0  ;;  %v8155_v18 = vmax.f32 %v8139_v20, 0.0  ;;  %v8584_v4 = vld [vmem:[#allocation9 + $0xd08] sm:$0xff] }
 0x640   : > { %11389 = vmatprep.subr.bf16.mxu0 %v13593_v21  ;;  %11561 = vmatprep.subr.bf16.mxu1 %v13595_v22  ;;  %v13624_v21 = vcombine.low %v8543_v57, %v8547_v58  ;;  %v13626_v22 = vcombine.low %v8544_v60, %v8548_v61  ;;  %v13650_v57 = vcombine.low %v8568_v44, %v8572_v19  ;;  %v8587_v61 = vld [vmem:[#allocation9 + $0xd20] sm:$0xff]  ;;  %v8588_v20 = vld [vmem:[#allocation9 + $0xd28] sm:$0xff] }
 0x641   : > { %v13657_v58 = vcombine.high %v8575_v51, %v8579_v52  ;;  %v8596_v35 = vld [vmem:[#allocation9 + $0xd68] sm:$0xff]  ;;  %v8623_v51 = vld [vmem:[#allocation9 + $0xe40] sm:$0xff] }
 0x642   : > { %v13675_v14 = vcombine.high %v8592_v12, %v8596_v35  ;;  %v8627_v52 = vld [vmem:[#allocation9 + $0xe60] sm:$0xff] }
 0x643   : > { %11390 = vmatpush1.bf16.msra.mxu0 %v13592_v32  ;;  %11562 = vmatpush1.bf16.msra.mxu1 %v13594_v55  ;;  %v8150_v32 = vmax.f32 %v8134_v47, 0.0  ;;  %v8158_v55 = vmax.f32 %v8142_v13, 0.0  ;;  %v13664_v47 = vcombine.low %v8583_v59, %v8587_v61  ;;  %v13666_v13 = vcombine.low %v8584_v4, %v8588_v20 }
 0x644   : > { %11391 = vmatprep.subr.bf16.mxu0 %v13601_v41  ;;  %11563 = vmatprep.subr.bf16.mxu1 %v13603_v27  ;;  %v15848_v41 = vpack.c.bf16 %v8155_v18, %v8147_v15  ;;  %v8560_v27 = vld [vmem:[#allocation9 + $0xc48] sm:$0xff]  ;;  %v8599_v15 = vld [vmem:[#allocation9 + $0xd80] sm:$0xff] }
 0x645   : > { %v13642_v42 = vcombine.low %v8560_v27, %v8564_v28  ;;  %v8603_v18 = vld [vmem:[#allocation9 + $0xda0] sm:$0xff] }
 0x646   : > { %v13681_v1 = vcombine.high %v8599_v15, %v8603_v18 }
 0x647   : > { %11392 = vmatpush1.bf16.msra.mxu0 %v13600_v56  ;;  %11564 = vmatpush1.bf16.msra.mxu1 %v13602_v37  ;;  %v13643_v56 = vcombine.high %v8560_v27, %v8564_v28  ;;  %v8567_v37 = vld [vmem:[#allocation9 + $0xc80] sm:$0xff]  ;;  %v8608_v27 = vld [vmem:[#allocation9 + $0xdc8] sm:$0xff] }
 0x648   : > { %11393 = vmatprep.subr.bf16.mxu0 %v13609_v43  ;;  %11565 = vmatprep.subr.bf16.mxu1 %v13611_v5  ;;  %v8571_v43 = vld [vmem:[#allocation9 + $0xca0] sm:$0xff]  ;;  %v15850_v5 = vpack.c.bf16 %v8158_v55, %v8150_v32  ;;  %v8612_v28 = vld [vmem:[#allocation9 + $0xde8] sm:$0xff] }
 0x649   : > { %v13649_v49 = vcombine.high %v8567_v37, %v8571_v43  ;;  %v8607_v32 = vld [vmem:[#allocation9 + $0xdc0] sm:$0xff] }
 0x64a   : > { %v8611_v55 = vld [vmem:[#allocation9 + $0xde0] sm:$0xff] }
 0x64b   : > { %11394 = vmatpush1.bf16.msra.mxu0 %v13608_v50  ;;  %11566 = vmatpush1.bf16.msra.mxu1 %v13610_v3  ;;  %v13651_v50 = vcombine.high %v8568_v44, %v8572_v19  ;;  %v8576_v3 = vld [vmem:[#allocation9 + $0xcc8] sm:$0xff] }
 0x64c   : > { %11395 = vmatprep.subr.bf16.mxu0 %v13617_v29  ;;  %11567 = vmatprep.subr.bf16.mxu1 %v13619_v54  ;;  %v8580_v29 = vld [vmem:[#allocation9 + $0xce8] sm:$0xff]  ;;  %v13648_v54 = vcombine.low %v8567_v37, %v8571_v43  ;;  %v8615_v37 = vld [vmem:[#allocation9 + $0xe00] sm:$0xff] }
 0x64d   : > { %v13659_v60 = vcombine.high %v8576_v3, %v8580_v29  ;;  %v13658_v0 = vcombine.low %v8576_v3, %v8580_v29  ;;  %v8619_v43 = vld [vmem:[#allocation9 + $0xe20] sm:$0xff]  ;;  %v8616_v44 = vld [vmem:[#allocation9 + $0xe08] sm:$0xff] }
 0x64e   : > { %v8620_v19 = vld [vmem:[#allocation9 + $0xe28] sm:$0xff] }
 0x64f   : > { %11396 = vmatpush1.bf16.msra.mxu0 %v13616_v2  ;;  %11568 = vmatpush1.bf16.msra.mxu1 %v13618_v8  ;;  %v13665_v2 = vcombine.high %v8583_v59, %v8587_v61  ;;  %v13667_v8 = vcombine.high %v8584_v4, %v8588_v20  ;;  %v8624_v3 = vld [vmem:[#allocation9 + $0xe48] sm:$0xff]  ;;  %v8631_v59 = vld [vmem:[#allocation9 + $0xe80] sm:$0xff] }
 0x650   : > { %11397 = vmatprep.subr.bf16.mxu0 %v13625_v10  ;;  %11569 = vmatprep.subr.bf16.mxu1 %v13627_v11  ;;  %v8591_v10 = vld [vmem:[#allocation9 + $0xd40] sm:$0xff]  ;;  %v8628_v29 = vld [vmem:[#allocation9 + $0xe68] sm:$0xff] }
 0x651   : > { %v8595_v11 = vld [vmem:[#allocation9 + $0xd60] sm:$0xff]  ;;  %v8632_v4 = vld [vmem:[#allocation9 + $0xe88] sm:$0xff] }
 0x652   : > { %v13673_v33 = vcombine.high %v8591_v10, %v8595_v11  ;;  %v8635_v61 = vld [vmem:[#allocation9 + $0xea0] sm:$0xff]  ;;  %v8636_v20 = vld [vmem:[#allocation9 + $0xea8] sm:$0xff] }
 0x653   : > { %11398 = vmatpush1.bf16.msra.mxu0 %v13624_v21  ;;  %11570 = vmatpush1.bf16.msra.mxu1 %v13626_v22  ;;  %v8600_v21 = vld [vmem:[#allocation9 + $0xd88] sm:$0xff] }
 0x654   : > { %11410 = vmatprep.subr.bf16.mxu0 %v13633_v7  ;;  %11582 = vmatprep.subr.bf16.mxu1 %v13635_v24  ;;  %v8604_v22 = vld [vmem:[#allocation9 + $0xda8] sm:$0xff]  ;;  %v13672_v7 = vcombine.low %v8591_v10, %v8595_v11  ;;  %v13674_v24 = vcombine.low %v8592_v12, %v8596_v35  ;;  %v8639_v10 = vld [vmem:[#allocation9 + $0xec0] sm:$0xff] }
 0x655   : > { %v13683_v23 = vcombine.high %v8600_v21, %v8604_v22  ;;  %v8643_v11 = vld [vmem:[#allocation9 + $0xee0] sm:$0xff]  ;;  %v8640_v12 = vld [vmem:[#allocation9 + $0xec8] sm:$0xff] }
 0x656   : > { %11400 = vmatmul.mubr.bf16.vlgmr.msra.gmra.mrb[0].mxu0 %v15848_v41  ;;  %11572 = vmatmul.mubr.bf16.vlgmr.msra.gmra.mrb[0].mxu1 %v15848_v41  ;;  %v8644_v35 = vld [vmem:[#allocation9 + $0xee8] sm:$0xff] }
 0x657   : > { %11411 = vmatpush1.bf16.msra.mxu0 %v13632_v30  ;;  %11583 = vmatpush1.bf16.msra.mxu1 %v13634_v25  ;;  %v13680_v30 = vcombine.low %v8599_v15, %v8603_v18  ;;  %v13682_v25 = vcombine.low %v8600_v21, %v8604_v22  ;;  %v8647_v15 = vld [vmem:[#allocation9 + $0xf00] sm:$0xff]  ;;  %v8648_v21 = vld [vmem:[#allocation9 + $0xf08] sm:$0xff] }
 0x658   : > { %11412 = vmatprep.subr.bf16.mxu0 %v13641_v36  ;;  %11584 = vmatprep.subr.bf16.mxu1 %v13643_v56  ;;  %v13689_v36 = vcombine.high %v8607_v32, %v8611_v55  ;;  %v13691_v56 = vcombine.high %v8608_v27, %v8612_v28  ;;  %v8651_v18 = vld [vmem:[#allocation9 + $0xf20] sm:$0xff]  ;;  %v8652_v22 = vld [vmem:[#allocation9 + $0xf28] sm:$0xff] }
 0x659   : > { %11442 = vmatprep.mubr.bf16.mxu0 %v15850_v5  ;;  %11614 = vmatprep.mubr.bf16.mxu1 %v15850_v5 }
 0x65b   : > { %11413 = vmatpush1.bf16.msra.mxu0 %v13640_v40  ;;  %11585 = vmatpush1.bf16.msra.mxu1 %v13642_v42  ;;  %v13688_v40 = vcombine.low %v8607_v32, %v8611_v55  ;;  %v13690_v42 = vcombine.low %v8608_v27, %v8612_v28  ;;  %v8655_v32 = vld [vmem:[#allocation9 + $0xf40] sm:$0xff]  ;;  %v8656_v27 = vld [vmem:[#allocation9 + $0xf48] sm:$0xff] }
 0x65c   : > { %11414 = vmatprep.subr.bf16.mxu0 %v13649_v49  ;;  %11586 = vmatprep.subr.bf16.mxu1 %v13651_v50  ;;  %v13697_v49 = vcombine.high %v8615_v37, %v8619_v43  ;;  %v13699_v50 = vcombine.high %v8616_v44, %v8620_v19  ;;  %v8659_v55 = vld [vmem:[#allocation9 + $0xf60] sm:$0xff]  ;;  %v8660_v28 = vld [vmem:[#allocation9 + $0xf68] sm:$0xff] }
 0x65f   : > { %11415 = vmatpush1.bf16.msra.mxu0 %v13648_v54  ;;  %11587 = vmatpush1.bf16.msra.mxu1 %v13650_v57  ;;  %v13696_v54 = vcombine.low %v8615_v37, %v8619_v43  ;;  %v13698_v57 = vcombine.low %v8616_v44, %v8620_v19  ;;  %v13739_v37 = vcombine.high %v8656_v27, %v8660_v28  ;;  %v8663_v43 = vld [vmem:[#allocation9 + $0xf80] sm:$0xff]  ;;  %v8664_v19 = vld [vmem:[#allocation9 + $0xf88] sm:$0xff] }
 0x660   : > { %11416 = vmatprep.subr.bf16.mxu0 %v13657_v58  ;;  %11588 = vmatprep.subr.bf16.mxu1 %v13659_v60  ;;  %v13705_v58 = vcombine.high %v8623_v51, %v8627_v52  ;;  %v13707_v60 = vcombine.high %v8624_v3, %v8628_v29  ;;  %v8667_v44 = vld [vmem:[#allocation9 + $0xfa0] sm:$0xff] }
 0x663   : > { %11417 = vmatpush1.bf16.msra.mxu0 %v13656_v63  ;;  %11589 = vmatpush1.bf16.msra.mxu1 %v13658_v0  ;;  %v13704_v63 = vcombine.low %v8623_v51, %v8627_v52  ;;  %v13706_v0 = vcombine.low %v8624_v3, %v8628_v29  ;;  %v13738_v51 = vcombine.low %v8656_v27, %v8660_v28  ;;  %v8671_v29 = vld [vmem:[#allocation9 + $0xfc0] sm:$0xff]  ;;  %v8190_v27 = vld [vmem:[#allocation9 + $0xb8] sm:$0xff] }
 0x664   : > { %11418 = vmatprep.subr.bf16.mxu0 %v13665_v2  ;;  %11590 = vmatprep.subr.bf16.mxu1 %v13667_v8  ;;  %v13713_v2 = vcombine.high %v8631_v59, %v8635_v61  ;;  %v13715_v8 = vcombine.high %v8632_v4, %v8636_v20  ;;  %v13745_v52 = vcombine.high %v8663_v43, %v8667_v44 }
 0x667   : > { %11419 = vmatpush1.bf16.msra.mxu0 %v13664_v47  ;;  %11591 = vmatpush1.bf16.msra.mxu1 %v13666_v13  ;;  %v13712_v47 = vcombine.low %v8631_v59, %v8635_v61  ;;  %v13714_v13 = vcombine.low %v8632_v4, %v8636_v20  ;;  %v13744_v61 = vcombine.low %v8663_v43, %v8667_v44  ;;  %v8197_v43 = vld [vmem:[#allocation9 + $0xf0] sm:$0xff]  ;;  %v8194_v44 = vld [vmem:[#allocation9 + $0xd8] sm:$0xff] }
 0x668   : > { %11420 = vmatprep.subr.bf16.mxu0 %v13673_v33  ;;  %11592 = vmatprep.subr.bf16.mxu1 %v13675_v14  ;;  %v13721_v33 = vcombine.high %v8639_v10, %v8643_v11  ;;  %v13723_v14 = vcombine.high %v8640_v12, %v8644_v35 }
 0x66b   : > { %11421 = vmatpush1.bf16.msra.mxu0 %v13672_v7  ;;  %11593 = vmatpush1.bf16.msra.mxu1 %v13674_v24  ;;  %v13720_v7 = vcombine.low %v8639_v10, %v8643_v11  ;;  %v13722_v24 = vcombine.low %v8640_v12, %v8644_v35  ;;  %v8170_v10 = vld [vmem:[#allocation9 + $0x18] sm:$0xff] }
 0x66c   : > { %11422 = vmatprep.subr.bf16.mxu0 %v13681_v1  ;;  %11594 = vmatprep.subr.bf16.mxu1 %v13683_v23  ;;  %v13729_v1 = vcombine.high %v8647_v15, %v8651_v18  ;;  %v13731_v23 = vcombine.high %v8648_v21, %v8652_v22  ;;  %v8174_v11 = vld [vmem:[#allocation9 + $0x38] sm:$0xff] }
 0x66f   : > { %11423 = vmatpush1.bf16.msra.mxu0 %v13680_v30  ;;  %11595 = vmatpush1.bf16.msra.mxu1 %v13682_v25  ;;  %v15857_v30 = vsub.s32 6, %v15787_v48  ;;  %v13728_v25 = vcombine.low %v8647_v15, %v8651_v18  ;;  %v8083_v48 = vld [vmem:[#allocation2 + $0x70] sm:$0xff]  ;;  %v8178_v18 = vld [vmem:[#allocation9 + $0x58] sm:$0xff] }
 0x670   : > { %11424 = vmatprep.subr.bf16.mxu0 %v13689_v36  ;;  %11596 = vmatprep.subr.bf16.mxu1 %v13691_v56  ;;  %v13730_v36 = vcombine.low %v8648_v21, %v8652_v22  ;;  %v13737_v56 = vcombine.high %v8655_v32, %v8659_v55  ;;  %v8182_v21 = vld [vmem:[#allocation9 + $0x78] sm:$0xff] }
 0x673   : > { %11425 = vmatpush1.bf16.msra.mxu0 %v13688_v40  ;;  %11597 = vmatpush1.bf16.msra.mxu1 %v13690_v42  ;;  %v8668_v40 = vld [vmem:[#allocation9 + $0xfa8] sm:$0xff]  ;;  %v8114_v42 = vrot.slane %v15842_v46, %v15857_v30 }
 0x674   : > { %11426 = vmatprep.subr.bf16.mxu0 %v13697_v49  ;;  %11598 = vmatprep.subr.bf16.mxu1 %v13699_v50  ;;  %v13736_v49 = vcombine.low %v8655_v32, %v8659_v55  ;;  %v8075_v50 = vld [vmem:[#allocation2 + $0x30] sm:$0xff]  ;;  %v13747_v3 = vcombine.high %v8664_v19, %v8668_v40  ;;  %v13746_v46 = vcombine.low %v8664_v19, %v8668_v40  ;;  %v8189_v32 = vld [vmem:[#allocation9 + $0xb0] sm:$0xff]  ;;  %v8186_v55 = vld [vmem:[#allocation9 + $0x98] sm:$0xff] }
 0x675   : > { %v8141_v59 = vadd.f32 %v8114_v42, %v8083_v48  ;;  %v8198_v19 = vld [vmem:[#allocation9 + $0xf8] sm:$0xff]  ;;  %v8201_v48 = vld [vmem:[#allocation9 + $0x110] sm:$0xff] }
 0x677   : > { %11427 = vmatpush1.bf16.msra.mxu0 %v13696_v54  ;;  %11599 = vmatpush1.bf16.msra.mxu1 %v13698_v57  ;;  %v8675_v54 = vld [vmem:[#allocation9 + $0xfe0] sm:$0xff]  ;;  %v8672_v57 = vld [vmem:[#allocation9 + $0xfc8] sm:$0xff] }
 0x678   : > { %11428 = vmatprep.subr.bf16.mxu0 %v13705_v58  ;;  %11600 = vmatprep.subr.bf16.mxu1 %v13707_v60  ;;  %v8676_v58 = vld [vmem:[#allocation9 + $0xfe8] sm:$0xff]  ;;  %v8133_v60 = vadd.f32 %v8114_v42, %v8075_v50  ;;  %v13753_v4 = vcombine.high %v8671_v29, %v8675_v54  ;;  %v13752_v12 = vcombine.low %v8671_v29, %v8675_v54 }
 0x679   : > { %v13755_v20 = vcombine.high %v8672_v57, %v8676_v58  ;;  %v13754_v35 = vcombine.low %v8672_v57, %v8676_v58  ;;  %v13270_v42 = vcombine.low %v8186_v55, %v8190_v27  ;;  %v13279_v50 = vcombine.high %v8194_v44, %v8198_v19  ;;  %v8209_v58 = vld [vmem:[#allocation9 + $0x150] sm:$0xff] }
 0x67a   : > { %v13278_v54 = vcombine.low %v8194_v44, %v8198_v19  ;;  %v8246_v44 = vld [vmem:[#allocation9 + $0x278] sm:$0xff] }
 0x67b   : > { %11429 = vmatpush1.bf16.msra.mxu0 %v13704_v63  ;;  %11601 = vmatpush1.bf16.msra.mxu1 %v13706_v0  ;;  %v8169_v63 = vld [vmem:[#allocation9 + $0x10] sm:$0xff] }
 0x67c   : > { %11430 = vmatprep.subr.bf16.mxu0 %v13713_v2  ;;  %11602 = vmatprep.subr.bf16.mxu1 %v13715_v8  ;;  %v8173_v0 = vld [vmem:[#allocation9 + $0x30] sm:$0xff]  ;;  %v8149_v2 = vmax.f32 %v8133_v60, 0.0  ;;  %v8157_v8 = vmax.f32 %v8141_v59, 0.0  ;;  %v8210_v59 = vld [vmem:[#allocation9 + $0x158] sm:$0xff] }
 0x67d   : > { %v13252_v22 = vcombine.low %v8169_v63, %v8173_v0  ;;  %v8213_v60 = vld [vmem:[#allocation9 + $0x170] sm:$0xff] }
 0x67e   : > { %v15861_v15 = vpack.c.bf16 %v8157_v8, %v8149_v2  ;;  %v8221_v2 = vld [vmem:[#allocation9 + $0x1b0] sm:$0xff]  ;;  %v8218_v8 = vld [vmem:[#allocation9 + $0x198] sm:$0xff] }
 0x67f   : > { %11431 = vmatpush1.bf16.msra.mxu0 %v13712_v47  ;;  %11603 = vmatpush1.bf16.msra.mxu1 %v13714_v13  ;;  %v13253_v47 = vcombine.high %v8169_v63, %v8173_v0  ;;  %v13255_v13 = vcombine.high %v8170_v10, %v8174_v11  ;;  %v8217_v0 = vld [vmem:[#allocation9 + $0x190] sm:$0xff] }
 0x680   : > { %11432 = vmatprep.subr.bf16.mxu0 %v13721_v33  ;;  %11604 = vmatprep.subr.bf16.mxu1 %v13723_v14  ;;  %v8177_v33 = vld [vmem:[#allocation9 + $0x50] sm:$0xff] }
 0x681   : > { %v8181_v14 = vld [vmem:[#allocation9 + $0x70] sm:$0xff] }
 0x682   : > { %v13260_v28 = vcombine.low %v8177_v33, %v8181_v14 }
 0x683   : > { %11433 = vmatpush1.bf16.msra.mxu0 %v13720_v7  ;;  %11605 = vmatpush1.bf16.msra.mxu1 %v13722_v24  ;;  %v13254_v7 = vcombine.low %v8170_v10, %v8174_v11  ;;  %v13261_v24 = vcombine.high %v8177_v33, %v8181_v14  ;;  %v8222_v10 = vld [vmem:[#allocation9 + $0x1b8] sm:$0xff]  ;;  %v13292_v11 = vcombine.low %v8209_v58, %v8213_v60  ;;  %v8229_v33 = vld [vmem:[#allocation9 + $0x1f0] sm:$0xff] }
 0x684   : > { %11434 = vmatprep.subr.bf16.mxu0 %v13729_v1  ;;  %11606 = vmatprep.subr.bf16.mxu1 %v13731_v23  ;;  %v13263_v1 = vcombine.high %v8178_v18, %v8182_v21  ;;  %v8185_v23 = vld [vmem:[#allocation9 + $0x90] sm:$0xff]  ;;  %v8226_v14 = vld [vmem:[#allocation9 + $0x1d8] sm:$0xff] }
 0x685   : > { %v13268_v40 = vcombine.low %v8185_v23, %v8189_v32 }
 0x687   : > { %11435 = vmatpush1.bf16.msra.mxu0 %v13728_v25  ;;  %11607 = vmatpush1.bf16.msra.mxu1 %v13730_v36  ;;  %v13262_v25 = vcombine.low %v8178_v18, %v8182_v21  ;;  %v13269_v36 = vcombine.high %v8185_v23, %v8189_v32  ;;  %v8230_v18 = vld [vmem:[#allocation9 + $0x1f8] sm:$0xff]  ;;  %v13300_v21 = vcombine.low %v8217_v0, %v8221_v2  ;;  %v8237_v23 = vld [vmem:[#allocation9 + $0x230] sm:$0xff] }
 0x688   : > { %11436 = vmatprep.subr.bf16.mxu0 %v13737_v56  ;;  %11608 = vmatprep.subr.bf16.mxu1 %v13739_v37  ;;  %v13271_v56 = vcombine.high %v8186_v55, %v8190_v27  ;;  %v8193_v37 = vld [vmem:[#allocation9 + $0xd0] sm:$0xff]  ;;  %v8234_v32 = vld [vmem:[#allocation9 + $0x218] sm:$0xff] }
 0x689   : > { %v13276_v29 = vcombine.low %v8193_v37, %v8197_v43  ;;  %v8238_v55 = vld [vmem:[#allocation9 + $0x238] sm:$0xff] }
 0x68b   : > { %11437 = vmatpush1.bf16.msra.mxu0 %v13736_v49  ;;  %11609 = vmatpush1.bf16.msra.mxu1 %v13738_v51  ;;  %v13277_v49 = vcombine.high %v8193_v37, %v8197_v43  ;;  %v8205_v51 = vld [vmem:[#allocation9 + $0x130] sm:$0xff]  ;;  %v8242_v43 = vld [vmem:[#allocation9 + $0x258] sm:$0xff] }
 0x68c   : > { %11438 = vmatprep.subr.bf16.mxu0 %v13745_v52  ;;  %11610 = vmatprep.subr.bf16.mxu1 %v13747_v3  ;;  %v8202_v52 = vld [vmem:[#allocation9 + $0x118] sm:$0xff]  ;;  %v13285_v57 = vcombine.high %v8201_v48, %v8205_v51  ;;  %v8245_v37 = vld [vmem:[#allocation9 + $0x270] sm:$0xff] }
 0x68d   : > { %v8206_v3 = vld [vmem:[#allocation9 + $0x138] sm:$0xff] }
 0x68f   : > { %11439 = vmatpush1.bf16.msra.mxu0 %v13744_v61  ;;  %11611 = vmatpush1.bf16.msra.mxu1 %v13746_v46  ;;  %v8214_v61 = vld [vmem:[#allocation9 + $0x178] sm:$0xff]  ;;  %v13284_v46 = vcombine.low %v8201_v48, %v8205_v51  ;;  %v8253_v48 = vld [vmem:[#allocation9 + $0x2b0] sm:$0xff] }
 0x690   : > { %11440 = vmatprep.subr.bf16.mxu0 %v13753_v4  ;;  %11612 = vmatprep.subr.bf16.mxu1 %v13755_v20  ;;  %v13286_v4 = vcombine.low %v8202_v52, %v8206_v3  ;;  %v13293_v20 = vcombine.high %v8209_v58, %v8213_v60  ;;  %v13295_v63 = vcombine.high %v8210_v59, %v8214_v61  ;;  %v8250_v51 = vld [vmem:[#allocation9 + $0x298] sm:$0xff]  ;;  %v8261_v58 = vld [vmem:[#allocation9 + $0x2f0] sm:$0xff] }
 0x691   : > { %v8258_v60 = vld [vmem:[#allocation9 + $0x2d8] sm:$0xff] }
 0x693   : > { %11441 = vmatpush1.bf16.msra.mxu0 %v13752_v12  ;;  %11613 = vmatpush1.bf16.msra.mxu1 %v13754_v35  ;;  %v13294_v12 = vcombine.low %v8210_v59, %v8214_v61  ;;  %v13301_v35 = vcombine.high %v8217_v0, %v8221_v2  ;;  %v8262_v59 = vld [vmem:[#allocation9 + $0x2f8] sm:$0xff]  ;;  %v8269_v0 = vld [vmem:[#allocation9 + $0x330] sm:$0xff] }
 0x694   : > { %11625 = vmatprep.subr.bf16.mxu0 %v13253_v47  ;;  %11797 = vmatprep.subr.bf16.mxu1 %v13255_v13  ;;  %v13303_v47 = vcombine.high %v8218_v8, %v8222_v10  ;;  %v8225_v13 = vld [vmem:[#allocation9 + $0x1d0] sm:$0xff]  ;;  %v8266_v2 = vld [vmem:[#allocation9 + $0x318] sm:$0xff] }
 0x695   : > { %v13308_v27 = vcombine.low %v8225_v13, %v8229_v33 }
 0x696   : > { %11443 = vmatmul.mubr.bf16.vlgmr.msra.gmra.mrb[0].mxu0 %v15861_v15  ;;  %11615 = vmatmul.mubr.bf16.vlgmr.msra.gmra.mrb[0].mxu1 %v15861_v15 }
 0x697   : > { %11626 = vmatpush1.bf16.msra.mxu0 %v13252_v22  ;;  %11798 = vmatpush1.bf16.msra.mxu1 %v13254_v7  ;;  %v13302_v22 = vcombine.low %v8218_v8, %v8222_v10  ;;  %v13309_v7 = vcombine.high %v8225_v13, %v8229_v33  ;;  %v8270_v8 = vld [vmem:[#allocation9 + $0x338] sm:$0xff]  ;;  %v8277_v13 = vld [vmem:[#allocation9 + $0x370] sm:$0xff] }
 0x698   : > { %11627 = vmatprep.subr.bf16.mxu0 %v13261_v24  ;;  %11799 = vmatprep.subr.bf16.mxu1 %v13263_v1  ;;  %v13311_v24 = vcombine.high %v8226_v14, %v8230_v18  ;;  %v8233_v1 = vld [vmem:[#allocation9 + $0x210] sm:$0xff]  ;;  %v8274_v33 = vld [vmem:[#allocation9 + $0x358] sm:$0xff] }
 0x699   : > { %11657 = vmatprep.mubr.bf16.mxu0 %v15796_v6  ;;  %11829 = vmatprep.mubr.bf16.mxu1 %v15796_v6  ;;  %v13287_v6 = vcombine.high %v8202_v52, %v8206_v3  ;;  %v13316_v19 = vcombine.low %v8233_v1, %v8237_v23  ;;  %v8254_v52 = vld [vmem:[#allocation9 + $0x2b8] sm:$0xff] }
 0x69b   : > { %11628 = vmatpush1.bf16.msra.mxu0 %v13260_v28  ;;  %11800 = vmatpush1.bf16.msra.mxu1 %v13262_v25  ;;  %v13310_v28 = vcombine.low %v8226_v14, %v8230_v18  ;;  %v13317_v25 = vcombine.high %v8233_v1, %v8237_v23  ;;  %v8278_v14 = vld [vmem:[#allocation9 + $0x378] sm:$0xff]  ;;  %v8285_v1 = vld [vmem:[#allocation9 + $0x3b0] sm:$0xff] }
 0x69c   : > { %11629 = vmatprep.subr.bf16.mxu0 %v13269_v36  ;;  %11801 = vmatprep.subr.bf16.mxu1 %v13271_v56  ;;  %v13319_v36 = vcombine.high %v8234_v32, %v8238_v55  ;;  %v8241_v56 = vld [vmem:[#allocation9 + $0x250] sm:$0xff]  ;;  %v8282_v23 = vld [vmem:[#allocation9 + $0x398] sm:$0xff] }
 0x69d   : > { %v13324_v3 = vcombine.low %v8241_v56, %v8245_v37 }
 0x69f   : > { %11630 = vmatpush1.bf16.msra.mxu0 %v13268_v40  ;;  %11802 = vmatpush1.bf16.msra.mxu1 %v13270_v42  ;;  %v13318_v40 = vcombine.low %v8234_v32, %v8238_v55  ;;  %v13325_v42 = vcombine.high %v8241_v56, %v8245_v37  ;;  %v8286_v32 = vld [vmem:[#allocation9 + $0x3b8] sm:$0xff]  ;;  %v8293_v56 = vld [vmem:[#allocation9 + $0x3f0] sm:$0xff] }
 0x6a0   : > { %11631 = vmatprep.subr.bf16.mxu0 %v13277_v49  ;;  %11803 = vmatprep.subr.bf16.mxu1 %v13279_v50  ;;  %v13327_v49 = vcombine.high %v8242_v43, %v8246_v44  ;;  %v8249_v50 = vld [vmem:[#allocation9 + $0x290] sm:$0xff]  ;;  %v8290_v37 = vld [vmem:[#allocation9 + $0x3d8] sm:$0xff] }
 0x6a1   : > { %v13332_v61 = vcombine.low %v8249_v50, %v8253_v48 }
 0x6a3   : > { %11632 = vmatpush1.bf16.msra.mxu0 %v13276_v29  ;;  %11804 = vmatpush1.bf16.msra.mxu1 %v13278_v54  ;;  %v13326_v29 = vcombine.low %v8242_v43, %v8246_v44  ;;  %v13333_v54 = vcombine.high %v8249_v50, %v8253_v48  ;;  %v8294_v43 = vld [vmem:[#allocation9 + $0x3f8] sm:$0xff]  ;;  %v8301_v50 = vld [vmem:[#allocation9 + $0x430] sm:$0xff] }
 0x6a4   : > { %11633 = vmatprep.subr.bf16.mxu0 %v13285_v57  ;;  %11805 = vmatprep.subr.bf16.mxu1 %v13287_v6  ;;  %v13335_v57 = vcombine.high %v8250_v51, %v8254_v52  ;;  %v8257_v6 = vld [vmem:[#allocation9 + $0x2d0] sm:$0xff]  ;;  %v8298_v48 = vld [vmem:[#allocation9 + $0x418] sm:$0xff] }
 0x6a5   : > { %v13340_v10 = vcombine.low %v8257_v6, %v8261_v58 }
 0x6a7   : > { %11634 = vmatpush1.bf16.msra.mxu0 %v13284_v46  ;;  %11806 = vmatpush1.bf16.msra.mxu1 %v13286_v4  ;;  %v13334_v46 = vcombine.low %v8250_v51, %v8254_v52  ;;  %v13341_v4 = vcombine.high %v8257_v6, %v8261_v58  ;;  %v8302_v51 = vld [vmem:[#allocation9 + $0x438] sm:$0xff]  ;;  %v8309_v6 = vld [vmem:[#allocation9 + $0x470] sm:$0xff] }
 0x6a8   : > { %11635 = vmatprep.subr.bf16.mxu0 %v13293_v20  ;;  %11807 = vmatprep.subr.bf16.mxu1 %v13295_v63  ;;  %v13343_v20 = vcombine.high %v8258_v60, %v8262_v59  ;;  %v8265_v63 = vld [vmem:[#allocation9 + $0x310] sm:$0xff]  ;;  %v8306_v58 = vld [vmem:[#allocation9 + $0x458] sm:$0xff] }
 0x6a9   : > { %v13348_v18 = vcombine.low %v8265_v63, %v8269_v0 }
 0x6ab   : > { %11636 = vmatpush1.bf16.msra.mxu0 %v13292_v11  ;;  %11808 = vmatpush1.bf16.msra.mxu1 %v13294_v12  ;;  %v13342_v11 = vcombine.low %v8258_v60, %v8262_v59  ;;  %v13349_v12 = vcombine.high %v8265_v63, %v8269_v0  ;;  %v8310_v60 = vld [vmem:[#allocation9 + $0x478] sm:$0xff]  ;;  %v8317_v63 = vld [vmem:[#allocation9 + $0x4b0] sm:$0xff] }
 0x6ac   : > { %11637 = vmatprep.subr.bf16.mxu0 %v13301_v35  ;;  %11809 = vmatprep.subr.bf16.mxu1 %v13303_v47  ;;  %v13351_v35 = vcombine.high %v8266_v2, %v8270_v8  ;;  %v8273_v47 = vld [vmem:[#allocation9 + $0x350] sm:$0xff]  ;;  %v8314_v0 = vld [vmem:[#allocation9 + $0x498] sm:$0xff] }
 0x6ad   : > { %v13356_v55 = vcombine.low %v8273_v47, %v8277_v13 }
 0x6af   : > { %11638 = vmatpush1.bf16.msra.mxu0 %v13300_v21  ;;  %11810 = vmatpush1.bf16.msra.mxu1 %v13302_v22  ;;  %v13350_v21 = vcombine.low %v8266_v2, %v8270_v8  ;;  %v13357_v22 = vcombine.high %v8273_v47, %v8277_v13  ;;  %v8318_v2 = vld [vmem:[#allocation9 + $0x4b8] sm:$0xff]  ;;  %v8325_v47 = vld [vmem:[#allocation9 + $0x4f0] sm:$0xff] }
 0x6b0   : > { %11639 = vmatprep.subr.bf16.mxu0 %v13309_v7  ;;  %11811 = vmatprep.subr.bf16.mxu1 %v13311_v24  ;;  %v13359_v7 = vcombine.high %v8274_v33, %v8278_v14  ;;  %v8281_v24 = vld [vmem:[#allocation9 + $0x390] sm:$0xff]  ;;  %v8322_v13 = vld [vmem:[#allocation9 + $0x4d8] sm:$0xff] }
 0x6b1   : > { %v13364_v44 = vcombine.low %v8281_v24, %v8285_v1 }
 0x6b3   : > { %11640 = vmatpush1.bf16.msra.mxu0 %v13308_v27  ;;  %11812 = vmatpush1.bf16.msra.mxu1 %v13310_v28  ;;  %v13358_v27 = vcombine.low %v8274_v33, %v8278_v14  ;;  %v13365_v28 = vcombine.high %v8281_v24, %v8285_v1  ;;  %v8326_v33 = vld [vmem:[#allocation9 + $0x4f8] sm:$0xff] }
 0x6b4   : > { %11641 = vmatprep.subr.bf16.mxu0 %v13317_v25  ;;  %11813 = vmatprep.subr.bf16.mxu1 %v13319_v36  ;;  %v13367_v25 = vcombine.high %v8282_v23, %v8286_v32  ;;  %v8289_v36 = vld [vmem:[#allocation9 + $0x3d0] sm:$0xff]  ;;  %v8330_v24 = vld [vmem:[#allocation9 + $0x518] sm:$0xff] }
 0x6b5   : > { %v13372_v52 = vcombine.low %v8289_v36, %v8293_v56  ;;  %v8334_v1 = vld [vmem:[#allocation9 + $0x538] sm:$0xff] }
 0x6b7   : > { %11642 = vmatpush1.bf16.msra.mxu0 %v13316_v19  ;;  %11814 = vmatpush1.bf16.msra.mxu1 %v13318_v40  ;;  %v13366_v19 = vcombine.low %v8282_v23, %v8286_v32  ;;  %v13373_v40 = vcombine.high %v8289_v36, %v8293_v56  ;;  %v13406_v32 = vcombine.low %v8322_v13, %v8326_v33  ;;  %v8342_v36 = vld [vmem:[#allocation9 + $0x578] sm:$0xff] }
 0x6b8   : > { %11643 = vmatprep.subr.bf16.mxu0 %v13325_v42  ;;  %11815 = vmatprep.subr.bf16.mxu1 %v13327_v49  ;;  %v13375_v42 = vcombine.high %v8290_v37, %v8294_v43  ;;  %v8297_v49 = vld [vmem:[#allocation9 + $0x410] sm:$0xff] }
 0x6b9   : > { %v13380_v59 = vcombine.low %v8297_v49, %v8301_v50 }
 0x6bb   : > { %11644 = vmatpush1.bf16.msra.mxu0 %v13324_v3  ;;  %11816 = vmatpush1.bf16.msra.mxu1 %v13326_v29  ;;  %v13374_v3 = vcombine.low %v8290_v37, %v8294_v43  ;;  %v13381_v29 = vcombine.high %v8297_v49, %v8301_v50  ;;  %v13414_v37 = vcombine.low %v8330_v24, %v8334_v1  ;;  %v8350_v49 = vld [vmem:[#allocation9 + $0x5b8] sm:$0xff] }
 0x6bc   : > { %11645 = vmatprep.subr.bf16.mxu0 %v13333_v54  ;;  %11817 = vmatprep.subr.bf16.mxu1 %v13335_v57  ;;  %v13383_v54 = vcombine.high %v8298_v48, %v8302_v51  ;;  %v8305_v57 = vld [vmem:[#allocation9 + $0x450] sm:$0xff] }
 0x6bd   : > { %v13388_v8 = vcombine.low %v8305_v57, %v8309_v6 }
 0x6bf   : > { %11646 = vmatpush1.bf16.msra.mxu0 %v13332_v61  ;;  %11818 = vmatpush1.bf16.msra.mxu1 %v13334_v46  ;;  %v13382_v61 = vcombine.low %v8298_v48, %v8302_v51  ;;  %v13389_v46 = vcombine.high %v8305_v57, %v8309_v6  ;;  %v8358_v57 = vld [vmem:[#allocation9 + $0x5f8] sm:$0xff] }
 0x6c0   : > { %11647 = vmatprep.subr.bf16.mxu0 %v13341_v4  ;;  %11819 = vmatprep.subr.bf16.mxu1 %v13343_v20  ;;  %v13391_v4 = vcombine.high %v8306_v58, %v8310_v60  ;;  %v8313_v20 = vld [vmem:[#allocation9 + $0x490] sm:$0xff] }
 0x6c1   : > { %v13396_v14 = vcombine.low %v8313_v20, %v8317_v63 }
 0x6c3   : > { %11648 = vmatpush1.bf16.msra.mxu0 %v13340_v10  ;;  %11820 = vmatpush1.bf16.msra.mxu1 %v13342_v11  ;;  %v13390_v10 = vcombine.low %v8306_v58, %v8310_v60  ;;  %v13397_v11 = vcombine.high %v8313_v20, %v8317_v63  ;;  %v8366_v20 = vld [vmem:[#allocation9 + $0x638] sm:$0xff] }
 0x6c4   : > { %11649 = vmatprep.subr.bf16.mxu0 %v13349_v12  ;;  %11821 = vmatprep.subr.bf16.mxu1 %v13351_v35  ;;  %v13399_v12 = vcombine.high %v8314_v0, %v8318_v2  ;;  %v8321_v35 = vld [vmem:[#allocation9 + $0x4d0] sm:$0xff] }
 0x6c5   : > { %v13404_v23 = vcombine.low %v8321_v35, %v8325_v47 }
 0x6c7   : > { %11650 = vmatpush1.bf16.msra.mxu0 %v13348_v18  ;;  %11822 = vmatpush1.bf16.msra.mxu1 %v13350_v21  ;;  %v13405_v18 = vcombine.high %v8321_v35, %v8325_v47  ;;  %v13407_v21 = vcombine.high %v8322_v13, %v8326_v33  ;;  %v8374_v35 = vld [vmem:[#allocation9 + $0x678] sm:$0xff] }
 0x6c8   : > { %11651 = vmatprep.subr.bf16.mxu0 %v13357_v22  ;;  %11823 = vmatprep.subr.bf16.mxu1 %v13359_v7  ;;  %v8329_v22 = vld [vmem:[#allocation9 + $0x510] sm:$0xff] }
 0x6c9   : > { %v8333_v7 = vld [vmem:[#allocation9 + $0x530] sm:$0xff] }
 0x6ca   : > { %v13412_v56 = vcombine.low %v8329_v22, %v8333_v7 }
 0x6cb   : > { %11652 = vmatpush1.bf16.msra.mxu0 %v13356_v55  ;;  %11824 = vmatpush1.bf16.msra.mxu1 %v13358_v27  ;;  %v13413_v55 = vcombine.high %v8329_v22, %v8333_v7  ;;  %v8337_v27 = vld [vmem:[#allocation9 + $0x550] sm:$0xff]  ;;  %v8382_v22 = vld [vmem:[#allocation9 + $0x6b8] sm:$0xff] }
 0x6cc   : > { %11653 = vmatprep.subr.bf16.mxu0 %v13365_v28  ;;  %11825 = vmatprep.subr.bf16.mxu1 %v13367_v25  ;;  %v8341_v28 = vld [vmem:[#allocation9 + $0x570] sm:$0xff]  ;;  %v8338_v25 = vld [vmem:[#allocation9 + $0x558] sm:$0xff] }
 0x6cd   : > { %v13421_v43 = vcombine.high %v8337_v27, %v8341_v28  ;;  %v13420_v50 = vcombine.low %v8337_v27, %v8341_v28  ;;  %v13422_v48 = vcombine.low %v8338_v25, %v8342_v36  ;;  %v8390_v27 = vld [vmem:[#allocation9 + $0x6f8] sm:$0xff] }
 0x6cf   : > { %11654 = vmatpush1.bf16.msra.mxu0 %v13364_v44  ;;  %11826 = vmatpush1.bf16.msra.mxu1 %v13366_v19  ;;  %v13423_v44 = vcombine.high %v8338_v25, %v8342_v36  ;;  %v8345_v19 = vld [vmem:[#allocation9 + $0x590] sm:$0xff] }
 0x6d0   : > { %11655 = vmatprep.subr.bf16.mxu0 %v13373_v40  ;;  %11827 = vmatprep.subr.bf16.mxu1 %v13375_v42  ;;  %v8349_v40 = vld [vmem:[#allocation9 + $0x5b0] sm:$0xff]  ;;  %v8346_v42 = vld [vmem:[#allocation9 + $0x598] sm:$0xff] }
 0x6d1   : > { %v13429_v51 = vcombine.high %v8345_v19, %v8349_v40  ;;  %v13428_v6 = vcombine.low %v8345_v19, %v8349_v40  ;;  %v13430_v58 = vcombine.low %v8346_v42, %v8350_v49  ;;  %v8398_v19 = vld [vmem:[#allocation9 + $0x738] sm:$0xff] }
 0x6d3   : > { %11656 = vmatpush1.bf16.msra.mxu0 %v13372_v52  ;;  %11828 = vmatpush1.bf16.msra.mxu1 %v13374_v3  ;;  %v13431_v52 = vcombine.high %v8346_v42, %v8350_v49  ;;  %v8353_v3 = vld [vmem:[#allocation9 + $0x5d0] sm:$0xff] }
 0x6d4   : > { %11668 = vmatprep.subr.bf16.mxu0 %v13381_v29  ;;  %11840 = vmatprep.subr.bf16.mxu1 %v13383_v54  ;;  %v8357_v29 = vld [vmem:[#allocation9 + $0x5f0] sm:$0xff]  ;;  %v8354_v54 = vld [vmem:[#allocation9 + $0x5d8] sm:$0xff] }
 0x6d5   : > { %v13437_v60 = vcombine.high %v8353_v3, %v8357_v29  ;;  %v13436_v63 = vcombine.low %v8353_v3, %v8357_v29  ;;  %v8406_v3 = vld [vmem:[#allocation9 + $0x778] sm:$0xff] }
 0x6d6   : > { %11658 = vmatmul.mubr.bf16.vlgmr.msra.gmra.mrb[4].mxu0 %v15810_v9  ;;  %11830 = vmatmul.mubr.bf16.vlgmr.msra.gmra.mrb[4].mxu1 %v15810_v9  ;;  %v13398_v9 = vcombine.low %v8314_v0, %v8318_v2  ;;  %v13438_v0 = vcombine.low %v8354_v54, %v8358_v57 }
 0x6d7   : > { %11669 = vmatpush1.bf16.msra.mxu0 %v13380_v59  ;;  %11841 = vmatpush1.bf16.msra.mxu1 %v13382_v61  ;;  %v13439_v59 = vcombine.high %v8354_v54, %v8358_v57  ;;  %v8361_v61 = vld [vmem:[#allocation9 + $0x610] sm:$0xff] }
 0x6d8   : > { %11670 = vmatprep.subr.bf16.mxu0 %v13389_v46  ;;  %11842 = vmatprep.subr.bf16.mxu1 %v13391_v4  ;;  %v8365_v46 = vld [vmem:[#allocation9 + $0x630] sm:$0xff]  ;;  %v8362_v4 = vld [vmem:[#allocation9 + $0x618] sm:$0xff] }
 0x6d9   : > { %11700 = vmatprep.mubr.bf16.mxu0 %v15812_v45  ;;  %11872 = vmatprep.mubr.bf16.mxu1 %v15812_v45  ;;  %v13415_v45 = vcombine.high %v8330_v24, %v8334_v1  ;;  %v13445_v2 = vcombine.high %v8361_v61, %v8365_v46  ;;  %v13444_v47 = vcombine.low %v8361_v61, %v8365_v46  ;;  %v8414_v61 = vld [vmem:[#allocation9 + $0x7b8] sm:$0xff] }
 0x6da   : > { %v13446_v13 = vcombine.low %v8362_v4, %v8366_v20 }
 0x6db   : > { %11671 = vmatpush1.bf16.msra.mxu0 %v13388_v8  ;;  %11843 = vmatpush1.bf16.msra.mxu1 %v13390_v10  ;;  %v13447_v8 = vcombine.high %v8362_v4, %v8366_v20  ;;  %v8369_v10 = vld [vmem:[#allocation9 + $0x650] sm:$0xff] }
 0x6dc   : > { %11672 = vmatprep.subr.bf16.mxu0 %v13397_v11  ;;  %11844 = vmatprep.subr.bf16.mxu1 %v13399_v12  ;;  %v8373_v11 = vld [vmem:[#allocation9 + $0x670] sm:$0xff]  ;;  %v8370_v12 = vld [vmem:[#allocation9 + $0x658] sm:$0xff] }
 0x6dd   : > { %v13453_v33 = vcombine.high %v8369_v10, %v8373_v11  ;;  %v13452_v7 = vcombine.low %v8369_v10, %v8373_v11  ;;  %v13454_v24 = vcombine.low %v8370_v12, %v8374_v35  ;;  %v8422_v10 = vld [vmem:[#allocation9 + $0x7f8] sm:$0xff] }
 0x6df   : > { %11673 = vmatpush1.bf16.msra.mxu0 %v13396_v14  ;;  %11845 = vmatpush1.bf16.msra.mxu1 %v13398_v9  ;;  %v13455_v14 = vcombine.high %v8370_v12, %v8374_v35  ;;  %v8377_v9 = vld [vmem:[#allocation9 + $0x690] sm:$0xff] }
 0x6e0   : > { %11674 = vmatprep.subr.bf16.mxu0 %v13405_v18  ;;  %11846 = vmatprep.subr.bf16.mxu1 %v13407_v21  ;;  %v8381_v18 = vld [vmem:[#allocation9 + $0x6b0] sm:$0xff]  ;;  %v8378_v21 = vld [vmem:[#allocation9 + $0x698] sm:$0xff] }
 0x6e1   : > { %v13461_v1 = vcombine.high %v8377_v9, %v8381_v18  ;;  %v13460_v28 = vcombine.low %v8377_v9, %v8381_v18  ;;  %v13462_v25 = vcombine.low %v8378_v21, %v8382_v22  ;;  %v8430_v9 = vld [vmem:[#allocation9 + $0x838] sm:$0xff] }
 0x6e3   : > { %11675 = vmatpush1.bf16.msra.mxu0 %v13404_v23  ;;  %11847 = vmatpush1.bf16.msra.mxu1 %v13406_v32  ;;  %v13463_v23 = vcombine.high %v8378_v21, %v8382_v22  ;;  %v8385_v32 = vld [vmem:[#allocation9 + $0x6d0] sm:$0xff] }
 0x6e4   : > { %11676 = vmatprep.subr.bf16.mxu0 %v13413_v55  ;;  %11848 = vmatprep.subr.bf16.mxu1 %v13415_v45  ;;  %v8389_v55 = vld [vmem:[#allocation9 + $0x6f0] sm:$0xff]  ;;  %v8386_v45 = vld [vmem:[#allocation9 + $0x6d8] sm:$0xff] }
 0x6e5   : > { %v13469_v36 = vcombine.high %v8385_v32, %v8389_v55  ;;  %v13468_v40 = vcombine.low %v8385_v32, %v8389_v55  ;;  %v13470_v42 = vcombine.low %v8386_v45, %v8390_v27  ;;  %v8438_v32 = vld [vmem:[#allocation9 + $0x878] sm:$0xff] }
 0x6e7   : > { %11677 = vmatpush1.bf16.msra.mxu0 %v13412_v56  ;;  %11849 = vmatpush1.bf16.msra.mxu1 %v13414_v37  ;;  %v13471_v56 = vcombine.high %v8386_v45, %v8390_v27  ;;  %v8393_v37 = vld [vmem:[#allocation9 + $0x710] sm:$0xff] }
 0x6e8   : > { %11678 = vmatprep.subr.bf16.mxu0 %v13421_v43  ;;  %11850 = vmatprep.subr.bf16.mxu1 %v13423_v44  ;;  %v8397_v43 = vld [vmem:[#allocation9 + $0x730] sm:$0xff]  ;;  %v8394_v44 = vld [vmem:[#allocation9 + $0x718] sm:$0xff] }
 0x6e9   : > { %v13477_v49 = vcombine.high %v8393_v37, %v8397_v43  ;;  %v13476_v29 = vcombine.low %v8393_v37, %v8397_v43  ;;  %v13478_v54 = vcombine.low %v8394_v44, %v8398_v19  ;;  %v8446_v37 = vld [vmem:[#allocation9 + $0x8b8] sm:$0xff] }
 0x6eb   : > { %11679 = vmatpush1.bf16.msra.mxu0 %v13420_v50  ;;  %11851 = vmatpush1.bf16.msra.mxu1 %v13422_v48  ;;  %v13479_v50 = vcombine.high %v8394_v44, %v8398_v19  ;;  %v8401_v48 = vld [vmem:[#allocation9 + $0x750] sm:$0xff] }
 0x6ec   : > { %11680 = vmatprep.subr.bf16.mxu0 %v13429_v51  ;;  %11852 = vmatprep.subr.bf16.mxu1 %v13431_v52  ;;  %v8405_v51 = vld [vmem:[#allocation9 + $0x770] sm:$0xff]  ;;  %v8402_v52 = vld [vmem:[#allocation9 + $0x758] sm:$0xff] }
 0x6ed   : > { %v13485_v57 = vcombine.high %v8401_v48, %v8405_v51  ;;  %v13484_v46 = vcombine.low %v8401_v48, %v8405_v51  ;;  %v13486_v4 = vcombine.low %v8402_v52, %v8406_v3  ;;  %v8454_v48 = vld [vmem:[#allocation9 + $0x8f8] sm:$0xff] }
 0x6ef   : > { %11681 = vmatpush1.bf16.msra.mxu0 %v13428_v6  ;;  %11853 = vmatpush1.bf16.msra.mxu1 %v13430_v58  ;;  %v13487_v6 = vcombine.high %v8402_v52, %v8406_v3  ;;  %v8409_v58 = vld [vmem:[#allocation9 + $0x790] sm:$0xff] }
 0x6f0   : > { %11682 = vmatprep.subr.bf16.mxu0 %v13437_v60  ;;  %11854 = vmatprep.subr.bf16.mxu1 %v13439_v59  ;;  %v8413_v60 = vld [vmem:[#allocation9 + $0x7b0] sm:$0xff]  ;;  %v8410_v59 = vld [vmem:[#allocation9 + $0x798] sm:$0xff] }
 0x6f1   : > { %v13493_v20 = vcombine.high %v8409_v58, %v8413_v60  ;;  %v13492_v11 = vcombine.low %v8409_v58, %v8413_v60  ;;  %v13494_v12 = vcombine.low %v8410_v59, %v8414_v61 }
 0x6f3   : > { %11683 = vmatpush1.bf16.msra.mxu0 %v13436_v63  ;;  %11855 = vmatpush1.bf16.msra.mxu1 %v13438_v0  ;;  %v13495_v63 = vcombine.high %v8410_v59, %v8414_v61  ;;  %v8417_v0 = vld [vmem:[#allocation9 + $0x7d0] sm:$0xff] }
 0x6f4   : > { %11684 = vmatprep.subr.bf16.mxu0 %v13445_v2  ;;  %11856 = vmatprep.subr.bf16.mxu1 %v13447_v8  ;;  %v8421_v2 = vld [vmem:[#allocation9 + $0x7f0] sm:$0xff]  ;;  %v8418_v8 = vld [vmem:[#allocation9 + $0x7d8] sm:$0xff] }
 0x6f5   : > { %v13501_v35 = vcombine.high %v8417_v0, %v8421_v2  ;;  %v13500_v18 = vcombine.low %v8417_v0, %v8421_v2  ;;  %v13502_v21 = vcombine.low %v8418_v8, %v8422_v10  ;;  %v8465_v61 = vld [vmem:[#allocation9 + $0x950] sm:$0xff] }
 0x6f7   : > { %11685 = vmatpush1.bf16.msra.mxu0 %v13444_v47  ;;  %11857 = vmatpush1.bf16.msra.mxu1 %v13446_v13  ;;  %v13503_v47 = vcombine.high %v8418_v8, %v8422_v10  ;;  %v8425_v13 = vld [vmem:[#allocation9 + $0x810] sm:$0xff] }
 0x6f8   : > { %11686 = vmatprep.subr.bf16.mxu0 %v13453_v33  ;;  %11858 = vmatprep.subr.bf16.mxu1 %v13455_v14  ;;  %v8429_v33 = vld [vmem:[#allocation9 + $0x830] sm:$0xff]  ;;  %v8426_v14 = vld [vmem:[#allocation9 + $0x818] sm:$0xff] }
 0x6f9   : > { %v13509_v22 = vcombine.high %v8425_v13, %v8429_v33  ;;  %v13508_v55 = vcombine.low %v8425_v13, %v8429_v33  ;;  %v13510_v45 = vcombine.low %v8426_v14, %v8430_v9  ;;  %v8473_v10 = vld [vmem:[#allocation9 + $0x990] sm:$0xff] }
 0x6fb   : > { %11687 = vmatpush1.bf16.msra.mxu0 %v13452_v7  ;;  %11859 = vmatpush1.bf16.msra.mxu1 %v13454_v24  ;;  %v13511_v7 = vcombine.high %v8426_v14, %v8430_v9  ;;  %v8433_v24 = vld [vmem:[#allocation9 + $0x850] sm:$0xff] }
 0x6fc   : > { %11688 = vmatprep.subr.bf16.mxu0 %v13461_v1  ;;  %11860 = vmatprep.subr.bf16.mxu1 %v13463_v23  ;;  %v8437_v1 = vld [vmem:[#allocation9 + $0x870] sm:$0xff]  ;;  %v8434_v23 = vld [vmem:[#allocation9 + $0x858] sm:$0xff] }
 0x6fd   : > { %v13517_v27 = vcombine.high %v8433_v24, %v8437_v1  ;;  %v13516_v43 = vcombine.low %v8433_v24, %v8437_v1  ;;  %v13518_v44 = vcombine.low %v8434_v23, %v8438_v32  ;;  %v8481_v9 = vld [vmem:[#allocation9 + $0x9d0] sm:$0xff] }
 0x6ff   : > { %11689 = vmatpush1.bf16.msra.mxu0 %v13460_v28  ;;  %11861 = vmatpush1.bf16.msra.mxu1 %v13462_v25  ;;  %v13519_v28 = vcombine.high %v8434_v23, %v8438_v32  ;;  %v8441_v25 = vld [vmem:[#allocation9 + $0x890] sm:$0xff] }
 0x700   : > { %11690 = vmatprep.subr.bf16.mxu0 %v13469_v36  ;;  %11862 = vmatprep.subr.bf16.mxu1 %v13471_v56  ;;  %v8445_v36 = vld [vmem:[#allocation9 + $0x8b0] sm:$0xff]  ;;  %v8442_v56 = vld [vmem:[#allocation9 + $0x898] sm:$0xff] }
 0x701   : > { %v13525_v19 = vcombine.high %v8441_v25, %v8445_v36  ;;  %v13524_v51 = vcombine.low %v8441_v25, %v8445_v36  ;;  %v8489_v32 = vld [vmem:[#allocation9 + $0xa10] sm:$0xff] }
 0x703   : > { %11691 = vmatpush1.bf16.msra.mxu0 %v13468_v40  ;;  %11863 = vmatpush1.bf16.msra.mxu1 %v13470_v42  ;;  %v13527_v40 = vcombine.high %v8442_v56, %v8446_v37  ;;  %v8449_v42 = vld [vmem:[#allocation9 + $0x8d0] sm:$0xff] }
 0x704   : > { %11692 = vmatprep.subr.bf16.mxu0 %v13477_v49  ;;  %11864 = vmatprep.subr.bf16.mxu1 %v13479_v50  ;;  %v8453_v49 = vld [vmem:[#allocation9 + $0x8f0] sm:$0xff]  ;;  %v8450_v50 = vld [vmem:[#allocation9 + $0x8d8] sm:$0xff] }
 0x705   : > { %v13533_v52 = vcombine.high %v8449_v42, %v8453_v49  ;;  %v13535_v3 = vcombine.high %v8450_v50, %v8454_v48  ;;  %v13532_v58 = vcombine.low %v8449_v42, %v8453_v49  ;;  %v13534_v60 = vcombine.low %v8450_v50, %v8454_v48  ;;  %v8505_v48 = vld [vmem:[#allocation9 + $0xa90] sm:$0xff] }
 0x707   : > { %11693 = vmatpush1.bf16.msra.mxu0 %v13476_v29  ;;  %11865 = vmatpush1.bf16.msra.mxu1 %v13478_v54  ;;  %v8457_v29 = vld [vmem:[#allocation9 + $0x910] sm:$0xff] }
 0x708   : > { %11694 = vmatprep.subr.bf16.mxu0 %v13485_v57  ;;  %11866 = vmatprep.subr.bf16.mxu1 %v13487_v6  ;;  %v8461_v54 = vld [vmem:[#allocation9 + $0x930] sm:$0xff]  ;;  %v8458_v57 = vld [vmem:[#allocation9 + $0x918] sm:$0xff] }
 0x709   : > { %v8462_v6 = vld [vmem:[#allocation9 + $0x938] sm:$0xff]  ;;  %v13541_v59 = vcombine.high %v8457_v29, %v8461_v54 }
 0x70a   : > { %v13542_v0 = vcombine.low %v8458_v57, %v8462_v6 }
 0x70b   : > { %11695 = vmatpush1.bf16.msra.mxu0 %v13484_v46  ;;  %11867 = vmatpush1.bf16.msra.mxu1 %v13486_v4  ;;  %v8469_v46 = vld [vmem:[#allocation9 + $0x970] sm:$0xff]  ;;  %v8466_v4 = vld [vmem:[#allocation9 + $0x958] sm:$0xff] }
 0x70c   : > { %11696 = vmatprep.subr.bf16.mxu0 %v13493_v20  ;;  %11868 = vmatprep.subr.bf16.mxu1 %v13495_v63  ;;  %v8470_v20 = vld [vmem:[#allocation9 + $0x978] sm:$0xff]  ;;  %v13540_v63 = vcombine.low %v8457_v29, %v8461_v54  ;;  %v13549_v2 = vcombine.high %v8465_v61, %v8469_v46 }
 0x70d   : > { %v13551_v8 = vcombine.high %v8466_v4, %v8470_v20  ;;  %v13550_v13 = vcombine.low %v8466_v4, %v8470_v20  ;;  %v8521_v20 = vld [vmem:[#allocation9 + $0xb10] sm:$0xff] }
 0x70f   : > { %11697 = vmatpush1.bf16.msra.mxu0 %v13492_v11  ;;  %11869 = vmatpush1.bf16.msra.mxu1 %v13494_v12  ;;  %v8477_v11 = vld [vmem:[#allocation9 + $0x9b0] sm:$0xff]  ;;  %v8474_v12 = vld [vmem:[#allocation9 + $0x998] sm:$0xff] }
 0x710   : > { %11698 = vmatprep.subr.bf16.mxu0 %v13501_v35  ;;  %11870 = vmatprep.subr.bf16.mxu1 %v13503_v47  ;;  %v8478_v35 = vld [vmem:[#allocation9 + $0x9b8] sm:$0xff]  ;;  %v13548_v47 = vcombine.low %v8465_v61, %v8469_v46  ;;  %v13557_v33 = vcombine.high %v8473_v10, %v8477_v11 }
 0x711   : > { %v13559_v14 = vcombine.high %v8474_v12, %v8478_v35  ;;  %v13558_v24 = vcombine.low %v8474_v12, %v8478_v35  ;;  %v8529_v35 = vld [vmem:[#allocation9 + $0xb50] sm:$0xff] }
 0x713   : > { %11699 = vmatpush1.bf16.msra.mxu0 %v13500_v18  ;;  %11871 = vmatpush1.bf16.msra.mxu1 %v13502_v21  ;;  %v8485_v18 = vld [vmem:[#allocation9 + $0x9f0] sm:$0xff]  ;;  %v8482_v21 = vld [vmem:[#allocation9 + $0x9d8] sm:$0xff] }
 0x714   : > { %11711 = vmatprep.subr.bf16.mxu0 %v13509_v22  ;;  %11883 = vmatprep.subr.bf16.mxu1 %v13511_v7  ;;  %v8486_v22 = vld [vmem:[#allocation9 + $0x9f8] sm:$0xff]  ;;  %v13556_v7 = vcombine.low %v8473_v10, %v8477_v11  ;;  %v13565_v1 = vcombine.high %v8481_v9, %v8485_v18 }
 0x715   : > { %v13567_v23 = vcombine.high %v8482_v21, %v8486_v22  ;;  %v13566_v25 = vcombine.low %v8482_v21, %v8486_v22  ;;  %v8537_v22 = vld [vmem:[#allocation9 + $0xb90] sm:$0xff] }
 0x716   : > { %11701 = vmatmul.mubr.bf16.vlgmr.msra.gmra.mrb[4].mxu0 %v15828_v39  ;;  %11873 = vmatmul.mubr.bf16.vlgmr.msra.gmra.mrb[4].mxu1 %v15828_v39  ;;  %v13526_v39 = vcombine.low %v8442_v56, %v8446_v37  ;;  %v8497_v37 = vld [vmem:[#allocation9 + $0xa50] sm:$0xff] }
 0x717   : > { %11712 = vmatpush1.bf16.msra.mxu0 %v13508_v55  ;;  %11884 = vmatpush1.bf16.msra.mxu1 %v13510_v45  ;;  %v8493_v55 = vld [vmem:[#allocation9 + $0xa30] sm:$0xff]  ;;  %v8490_v45 = vld [vmem:[#allocation9 + $0xa18] sm:$0xff] }
 0x718   : > { %11713 = vmatprep.subr.bf16.mxu0 %v13517_v27  ;;  %11885 = vmatprep.subr.bf16.mxu1 %v13519_v28  ;;  %v8494_v27 = vld [vmem:[#allocation9 + $0xa38] sm:$0xff]  ;;  %v13564_v28 = vcombine.low %v8481_v9, %v8485_v18  ;;  %v13573_v36 = vcombine.high %v8489_v32, %v8493_v55 }
 0x719   : > { %11743 = vmatprep.mubr.bf16.mxu0 %v15830_v53  ;;  %11915 = vmatprep.mubr.bf16.mxu1 %v15830_v53  ;;  %v13543_v53 = vcombine.high %v8458_v57, %v8462_v6  ;;  %v13575_v56 = vcombine.high %v8490_v45, %v8494_v27  ;;  %v13574_v42 = vcombine.low %v8490_v45, %v8494_v27  ;;  %v8513_v6 = vld [vmem:[#allocation9 + $0xad0] sm:$0xff] }
 0x71a   : > { %v8545_v27 = vld [vmem:[#allocation9 + $0xbd0] sm:$0xff] }
 0x71b   : > { %11714 = vmatpush1.bf16.msra.mxu0 %v13516_v43  ;;  %11886 = vmatpush1.bf16.msra.mxu1 %v13518_v44  ;;  %v8501_v43 = vld [vmem:[#allocation9 + $0xa70] sm:$0xff]  ;;  %v8498_v44 = vld [vmem:[#allocation9 + $0xa58] sm:$0xff] }
 0x71c   : > { %11715 = vmatprep.subr.bf16.mxu0 %v13525_v19  ;;  %11887 = vmatprep.subr.bf16.mxu1 %v13527_v40  ;;  %v8502_v19 = vld [vmem:[#allocation9 + $0xa78] sm:$0xff]  ;;  %v13572_v40 = vcombine.low %v8489_v32, %v8493_v55  ;;  %v13581_v49 = vcombine.high %v8497_v37, %v8501_v43 }
 0x71d   : > { %v13583_v50 = vcombine.high %v8498_v44, %v8502_v19  ;;  %v13582_v29 = vcombine.low %v8498_v44, %v8502_v19  ;;  %v8553_v19 = vld [vmem:[#allocation9 + $0xc10] sm:$0xff] }
 0x71f   : > { %11716 = vmatpush1.bf16.msra.mxu0 %v13524_v51  ;;  %11888 = vmatpush1.bf16.msra.mxu1 %v13526_v39  ;;  %v8509_v51 = vld [vmem:[#allocation9 + $0xab0] sm:$0xff]  ;;  %v8506_v39 = vld [vmem:[#allocation9 + $0xa98] sm:$0xff] }
 0x720   : > { %11717 = vmatprep.subr.bf16.mxu0 %v13533_v52  ;;  %11889 = vmatprep.subr.bf16.mxu1 %v13535_v3  ;;  %v8510_v52 = vld [vmem:[#allocation9 + $0xab8] sm:$0xff]  ;;  %v13580_v3 = vcombine.low %v8497_v37, %v8501_v43  ;;  %v13589_v54 = vcombine.high %v8505_v48, %v8509_v51 }
 0x721   : > { %v13591_v57 = vcombine.high %v8506_v39, %v8510_v52  ;;  %v13590_v61 = vcombine.low %v8506_v39, %v8510_v52  ;;  %v8561_v52 = vld [vmem:[#allocation9 + $0xc50] sm:$0xff] }
 0x723   : > { %11718 = vmatpush1.bf16.msra.mxu0 %v13532_v58  ;;  %11890 = vmatpush1.bf16.msra.mxu1 %v13534_v60  ;;  %v8517_v58 = vld [vmem:[#allocation9 + $0xaf0] sm:$0xff]  ;;  %v8514_v60 = vld [vmem:[#allocation9 + $0xad8] sm:$0xff] }
 0x724   : > { %11719 = vmatprep.subr.bf16.mxu0 %v13541_v59  ;;  %11891 = vmatprep.subr.bf16.mxu1 %v13543_v53  ;;  %v8518_v59 = vld [vmem:[#allocation9 + $0xaf8] sm:$0xff]  ;;  %v13588_v53 = vcombine.low %v8505_v48, %v8509_v51  ;;  %v13597_v46 = vcombine.high %v8513_v6, %v8517_v58 }
 0x725   : > { %v13599_v4 = vcombine.high %v8514_v60, %v8518_v59  ;;  %v13598_v10 = vcombine.low %v8514_v60, %v8518_v59  ;;  %v8569_v59 = vld [vmem:[#allocation9 + $0xc90] sm:$0xff] }
 0x727   : > { %11720 = vmatpush1.bf16.msra.mxu0 %v13540_v63  ;;  %11892 = vmatpush1.bf16.msra.mxu1 %v13542_v0  ;;  %v8525_v63 = vld [vmem:[#allocation9 + $0xb30] sm:$0xff]  ;;  %v8522_v0 = vld [vmem:[#allocation9 + $0xb18] sm:$0xff] }
 0x728   : > { %11721 = vmatprep.subr.bf16.mxu0 %v13549_v2  ;;  %11893 = vmatprep.subr.bf16.mxu1 %v13551_v8  ;;  %v8526_v2 = vld [vmem:[#allocation9 + $0xb38] sm:$0xff]  ;;  %v13596_v8 = vcombine.low %v8513_v6, %v8517_v58  ;;  %v13605_v11 = vcombine.high %v8521_v20, %v8525_v63 }
 0x729   : > { %v13607_v12 = vcombine.high %v8522_v0, %v8526_v2  ;;  %v13606_v9 = vcombine.low %v8522_v0, %v8526_v2  ;;  %v8577_v2 = vld [vmem:[#allocation9 + $0xcd0] sm:$0xff] }
 0x72b   : > { %11722 = vmatpush1.bf16.msra.mxu0 %v13548_v47  ;;  %11894 = vmatpush1.bf16.msra.mxu1 %v13550_v13  ;;  %v8533_v47 = vld [vmem:[#allocation9 + $0xb70] sm:$0xff]  ;;  %v8530_v13 = vld [vmem:[#allocation9 + $0xb58] sm:$0xff] }
 0x72c   : > { %11723 = vmatprep.subr.bf16.mxu0 %v13557_v33  ;;  %11895 = vmatprep.subr.bf16.mxu1 %v13559_v14  ;;  %v8534_v33 = vld [vmem:[#allocation9 + $0xb78] sm:$0xff]  ;;  %v13604_v14 = vcombine.low %v8521_v20, %v8525_v63  ;;  %v13613_v18 = vcombine.high %v8529_v35, %v8533_v47 }
 0x72d   : > { %v13615_v21 = vcombine.high %v8530_v13, %v8534_v33  ;;  %v13614_v32 = vcombine.low %v8530_v13, %v8534_v33  ;;  %v8585_v13 = vld [vmem:[#allocation9 + $0xd10] sm:$0xff] }
 0x72e   : > { %v8589_v33 = vld [vmem:[#allocation9 + $0xd30] sm:$0xff] }
 0x72f   : > { %11724 = vmatpush1.bf16.msra.mxu0 %v13556_v7  ;;  %11896 = vmatpush1.bf16.msra.mxu1 %v13558_v24  ;;  %v8541_v7 = vld [vmem:[#allocation9 + $0xbb0] sm:$0xff]  ;;  %v8538_v24 = vld [vmem:[#allocation9 + $0xb98] sm:$0xff] }
 0x730   : > { %11725 = vmatprep.subr.bf16.mxu0 %v13565_v1  ;;  %11897 = vmatprep.subr.bf16.mxu1 %v13567_v23  ;;  %v8542_v1 = vld [vmem:[#allocation9 + $0xbb8] sm:$0xff]  ;;  %v13612_v23 = vcombine.low %v8529_v35, %v8533_v47  ;;  %v13621_v55 = vcombine.high %v8537_v22, %v8541_v7 }
 0x731   : > { %v13623_v45 = vcombine.high %v8538_v24, %v8542_v1  ;;  %v13622_v37 = vcombine.low %v8538_v24, %v8542_v1  ;;  %v8597_v24 = vld [vmem:[#allocation9 + $0xd70] sm:$0xff]  ;;  %v8594_v1 = vld [vmem:[#allocation9 + $0xd58] sm:$0xff] }
 0x733   : > { %11726 = vmatpush1.bf16.msra.mxu0 %v13564_v28  ;;  %11898 = vmatpush1.bf16.msra.mxu1 %v13566_v25  ;;  %v8549_v28 = vld [vmem:[#allocation9 + $0xbf0] sm:$0xff]  ;;  %v8546_v25 = vld [vmem:[#allocation9 + $0xbd8] sm:$0xff] }
 0x734   : > { %11727 = vmatprep.subr.bf16.mxu0 %v13573_v36  ;;  %11899 = vmatprep.subr.bf16.mxu1 %v13575_v56  ;;  %v8550_v36 = vld [vmem:[#allocation9 + $0xbf8] sm:$0xff]  ;;  %v13620_v56 = vcombine.low %v8537_v22, %v8541_v7  ;;  %v13629_v43 = vcombine.high %v8545_v27, %v8549_v28  ;;  %v13669_v22 = vcombine.high %v8585_v13, %v8589_v33  ;;  %v8593_v7 = vld [vmem:[#allocation9 + $0xd50] sm:$0xff] }
 0x735   : > { %v13631_v44 = vcombine.high %v8546_v25, %v8550_v36  ;;  %v13630_v48 = vcombine.low %v8546_v25, %v8550_v36  ;;  %v15881_v25 = vld [vmem:[#allocation9 + $0xd90] sm:$0xff] }
 0x736   : > { %v15883_v36 = vld [vmem:[#allocation9 + $0xdb0] sm:$0xff] }
 0x737   : > { %11728 = vmatpush1.bf16.msra.mxu0 %v13572_v40  ;;  %11900 = vmatpush1.bf16.msra.mxu1 %v13574_v42  ;;  %v8557_v40 = vld [vmem:[#allocation9 + $0xc30] sm:$0xff]  ;;  %v8554_v42 = vld [vmem:[#allocation9 + $0xc18] sm:$0xff] }
 0x738   : > { %11729 = vmatprep.subr.bf16.mxu0 %v13581_v49  ;;  %11901 = vmatprep.subr.bf16.mxu1 %v13583_v50  ;;  %v8558_v49 = vld [vmem:[#allocation9 + $0xc38] sm:$0xff]  ;;  %v13628_v50 = vcombine.low %v8545_v27, %v8549_v28  ;;  %v13637_v51 = vcombine.high %v8553_v19, %v8557_v40  ;;  %v13677_v27 = vcombine.high %v8593_v7, %v8597_v24 }
 0x739   : > { %v13639_v39 = vcombine.high %v8554_v42, %v8558_v49  ;;  %v13638_v6 = vcombine.low %v8554_v42, %v8558_v49  ;;  %v13676_v42 = vcombine.low %v8593_v7, %v8597_v24 }
 0x73b   : > { %11730 = vmatpush1.bf16.msra.mxu0 %v13580_v3  ;;  %11902 = vmatpush1.bf16.msra.mxu1 %v13582_v29  ;;  %v8565_v3 = vld [vmem:[#allocation9 + $0xc70] sm:$0xff]  ;;  %v8562_v29 = vld [vmem:[#allocation9 + $0xc58] sm:$0xff] }
 0x73c   : > { %11731 = vmatprep.subr.bf16.mxu0 %v13589_v54  ;;  %11903 = vmatprep.subr.bf16.mxu1 %v13591_v57  ;;  %v8566_v54 = vld [vmem:[#allocation9 + $0xc78] sm:$0xff]  ;;  %v13636_v57 = vcombine.low %v8553_v19, %v8557_v40  ;;  %v13645_v58 = vcombine.high %v8561_v52, %v8565_v3 }
 0x73d   : > { %v13647_v60 = vcombine.high %v8562_v29, %v8566_v54  ;;  %v13646_v20 = vcombine.low %v8562_v29, %v8566_v54 }
 0x73f   : > { %11732 = vmatpush1.bf16.msra.mxu0 %v13588_v53  ;;  %11904 = vmatpush1.bf16.msra.mxu1 %v13590_v61  ;;  %v8573_v53 = vld [vmem:[#allocation9 + $0xcb0] sm:$0xff]  ;;  %v8570_v61 = vld [vmem:[#allocation9 + $0xc98] sm:$0xff] }
 0x740   : > { %11733 = vmatprep.subr.bf16.mxu0 %v13597_v46  ;;  %11905 = vmatprep.subr.bf16.mxu1 %v13599_v4  ;;  %v8574_v46 = vld [vmem:[#allocation9 + $0xcb8] sm:$0xff]  ;;  %v13644_v4 = vcombine.low %v8561_v52, %v8565_v3  ;;  %v13653_v63 = vcombine.high %v8569_v59, %v8573_v53 }
 0x741   : > { %v13655_v0 = vcombine.high %v8570_v61, %v8574_v46 }
 0x743   : > { %11734 = vmatpush1.bf16.msra.mxu0 %v13596_v8  ;;  %11906 = vmatpush1.bf16.msra.mxu1 %v13598_v10  ;;  %v8581_v8 = vld [vmem:[#allocation9 + $0xcf0] sm:$0xff]  ;;  %v8578_v10 = vld [vmem:[#allocation9 + $0xcd8] sm:$0xff] }
 0x744   : > { %11735 = vmatprep.subr.bf16.mxu0 %v13605_v11  ;;  %11907 = vmatprep.subr.bf16.mxu1 %v13607_v12  ;;  %v8582_v11 = vld [vmem:[#allocation9 + $0xcf8] sm:$0xff]  ;;  %v13652_v12 = vcombine.low %v8569_v59, %v8573_v53  ;;  %v13661_v35 = vcombine.high %v8577_v2, %v8581_v8 }
 0x745   : > { %v13663_v47 = vcombine.high %v8578_v10, %v8582_v11 }
 0x747   : > { %11736 = vmatpush1.bf16.msra.mxu0 %v13604_v14  ;;  %11908 = vmatpush1.bf16.msra.mxu1 %v13606_v9  ;;  %v8586_v14 = vld [vmem:[#allocation9 + $0xd18] sm:$0xff] }
 0x748   : > { %11737 = vmatprep.subr.bf16.mxu0 %v13613_v18  ;;  %11909 = vmatprep.subr.bf16.mxu1 %v13615_v21  ;;  %v8590_v9 = vld [vmem:[#allocation9 + $0xd38] sm:$0xff]  ;;  %v13660_v18 = vcombine.low %v8577_v2, %v8581_v8  ;;  %v13662_v21 = vcombine.low %v8578_v10, %v8582_v11 }
 0x74b   : > { %11738 = vmatpush1.bf16.msra.mxu0 %v13612_v23  ;;  %11910 = vmatpush1.bf16.msra.mxu1 %v13614_v32  ;;  %v8598_v23 = vld [vmem:[#allocation9 + $0xd78] sm:$0xff]  ;;  %v13668_v32 = vcombine.low %v8585_v13, %v8589_v33 }
 0x74c   : > { %11739 = vmatprep.subr.bf16.mxu0 %v13621_v55  ;;  %11911 = vmatprep.subr.bf16.mxu1 %v13623_v45  ;;  %v15879_v55 = vld [vmem:[#allocation11] sm:$0xff]  ;;  %v13670_v45 = vcombine.low %v8586_v14, %v8590_v9  ;;  %v13679_v28 = vcombine.high %v8594_v1, %v8598_v23 }
 0x74d   : > { %v8692_v19 = vrot.slane %v15879_v55, %v15819_v31  ;;  %v8688_v40 = vrot.slane %v15879_v55, %v15790_v16  ;;  %v8696_v49 = vrot.slane %v15879_v55, %v15804_v26 }
 0x74f   : > { %11740 = vmatpush1.bf16.msra.mxu0 %v13620_v56  ;;  %11912 = vmatpush1.bf16.msra.mxu1 %v13622_v37  ;;  %v8684_v56 = vrot.slane %v15879_v55, %v15801_v17  ;;  %v15887_v37 = vld [vmem:[#allocation12] sm:$0xff] }
 0x750   : > { %11741 = vmatprep.subr.bf16.mxu0 %v13629_v43  ;;  %11913 = vmatprep.subr.bf16.mxu1 %v13631_v44  ;;  %v8602_v43 = vld [vmem:[#allocation9 + $0xd98] sm:$0xff]  ;;  %v11990_v3 = vrot.slane %v15887_v37, %v15801_v17  ;;  %v15905_v29 = vrot.slane %v15887_v37, %v15819_v31  ;;  %v11994_v54 = vrot.slane %v15887_v37, %v15790_v16 }
 0x751   : > { %v8606_v44 = vld [vmem:[#allocation9 + $0xdb8] sm:$0xff]  ;;  %v13684_v17 = vcombine.low %v15881_v25, %v15883_v36 }
 0x753   : > { %11742 = vmatpush1.bf16.msra.mxu0 %v13628_v50  ;;  %11914 = vmatpush1.bf16.msra.mxu1 %v13630_v48  ;;  %v13678_v50 = vcombine.low %v8594_v1, %v8598_v23  ;;  %v13685_v48 = vcombine.high %v15881_v25, %v15883_v36 }
 0x754   : > { %11754 = vmatprep.subr.bf16.mxu0 %v13637_v51  ;;  %11926 = vmatprep.subr.bf16.mxu1 %v13639_v39  ;;  %v15897_v51 = vld [vmem:[#allocation9 + $0xdd0] sm:$0xff] }
 0x755   : > { %v15899_v39 = vld [vmem:[#allocation9 + $0xdf0] sm:$0xff] }
 0x756   : > { %11744 = vmatmul.mubr.bf16.vlgmr.msra.gmra.mrb[4].mxu0 %v15848_v41  ;;  %11916 = vmatmul.mubr.bf16.vlgmr.msra.gmra.mrb[4].mxu1 %v15848_v41  ;;  %v13654_v41 = vcombine.low %v8570_v61, %v8574_v46  ;;  %v12002_v61 = vrot.slane %v15887_v37, %v15804_v26  ;;  %v13686_v46 = vcombine.low %v8602_v43, %v8606_v44 }
 0x757   : > { %11755 = vmatpush1.bf16.msra.mxu0 %v13636_v57  ;;  %11927 = vmatpush1.bf16.msra.mxu1 %v13638_v6  ;;  %v13687_v57 = vcombine.high %v8602_v43, %v8606_v44  ;;  %v8610_v6 = vld [vmem:[#allocation9 + $0xdd8] sm:$0xff]  ;;  %v13692_v16 = vcombine.low %v15897_v51, %v15899_v39 }
 0x758   : > { %11756 = vmatprep.subr.bf16.mxu0 %v13645_v58  ;;  %11928 = vmatprep.subr.bf16.mxu1 %v13647_v60  ;;  %v8614_v58 = vld [vmem:[#allocation9 + $0xdf8] sm:$0xff] }
 0x759   : > { %11786 = vmatprep.mubr.bf16.mxu0 %v15850_v5  ;;  %11958 = vmatprep.mubr.bf16.mxu1 %v15850_v5  ;;  %v13671_v5 = vcombine.high %v8586_v14, %v8590_v9  ;;  %v8621_v9 = vld [vmem:[#allocation9 + $0xe30] sm:$0xff]  ;;  %v13694_v24 = vcombine.low %v8610_v6, %v8614_v58 }
 0x75b   : > { %11757 = vmatpush1.bf16.msra.mxu0 %v13644_v4  ;;  %11929 = vmatpush1.bf16.msra.mxu1 %v13646_v20 }
 0x75c   : > { %11758 = vmatprep.subr.bf16.mxu0 %v13653_v63  ;;  %11930 = vmatprep.subr.bf16.mxu1 %v13655_v0  ;;  %v13693_v0 = vcombine.high %v15897_v51, %v15899_v39 }
 0x75f   : > { %11759 = vmatpush1.bf16.msra.mxu0 %v13652_v12  ;;  %11931 = vmatpush1.bf16.msra.mxu1 %v13654_v41  ;;  %v13695_v12 = vcombine.high %v8610_v6, %v8614_v58  ;;  %v8617_v41 = vld [vmem:[#allocation9 + $0xe10] sm:$0xff] }
 0x760   : > { %11760 = vmatprep.subr.bf16.mxu0 %v13661_v35  ;;  %11932 = vmatprep.subr.bf16.mxu1 %v13663_v47 }
 0x763   : > { %11761 = vmatpush1.bf16.msra.mxu0 %v13660_v18  ;;  %11933 = vmatpush1.bf16.msra.mxu1 %v13662_v21  ;;  %v8618_v18 = vld [vmem:[#allocation9 + $0xe18] sm:$0xff] }
 0x764   : > { %11762 = vmatprep.subr.bf16.mxu0 %v13669_v22  ;;  %11934 = vmatprep.subr.bf16.mxu1 %v13671_v5  ;;  %v8622_v21 = vld [vmem:[#allocation9 + $0xe38] sm:$0xff] }
 0x765   : > { %v13703_v25 = vcombine.high %v8618_v18, %v8622_v21 }
 0x767   : > { %11763 = vmatpush1.bf16.msra.mxu0 %v13668_v32  ;;  %11935 = vmatpush1.bf16.msra.mxu1 %v13670_v45 }
 0x768   : > { %11764 = vmatprep.subr.bf16.mxu0 %v13677_v27  ;;  %11936 = vmatprep.subr.bf16.mxu1 %v13679_v28  ;;  %v13701_v28 = vcombine.high %v8617_v41, %v8621_v9 }
 0x769   : > { %v11444_v52 = vpop.f32.mrb[0].mxu0  ;;  %v11616_v59 = vpop.f32.mrb[0].mxu1 }
 0x76a   : > { %v13880_v60 = vadd.f32 %v11444_v52, %v8684_v56  ;;  %v11446_v53 = vpop.f32.mrb[1].mxu0  ;;  %v13884_v4 = vadd.f32 %v11616_v59, %v8692_v19  ;;  %v11618_v20 = vpop.f32.mrb[1].mxu1  ;;  %v8633_v59 = vld [vmem:[#allocation9 + $0xe90] sm:$0xff] }
 0x76b   : > { %v13881_v31 = vadd.f32 %v11446_v53, %v8688_v40  ;;  %v11448_v63 = vpop.f32.mrb[2].mxu0  ;;  %11765 = vmatpush1.bf16.msra.mxu0 %v13676_v42  ;;  %v13885_v8 = vadd.f32 %v11618_v20, %v8696_v49  ;;  %v11620_v11 = vpop.f32.mrb[2].mxu1  ;;  %11937 = vmatpush1.bf16.msra.mxu1 %v13678_v50  ;;  %v13700_v42 = vcombine.low %v8617_v41, %v8621_v9  ;;  %v8630_v50 = vld [vmem:[#allocation9 + $0xe78] sm:$0xff]  ;;  %v8637_v53 = vld [vmem:[#allocation9 + $0xeb0] sm:$0xff] }
 0x76c   : > { %v11969_v2 = vmax.f32 %v13880_v60, 0.0  ;;  %v13882_v10 = vadd.f32 %v11448_v63, %v8684_v56  ;;  %v11450_v26 = vpop.f32.mrb[3].mxu0  ;;  %11766 = vmatprep.subr.bf16.mxu0 %v13685_v48  ;;  %v11971_v35 = vmax.f32 %v13884_v4, 0.0  ;;  %v13886_v13 = vadd.f32 %v11620_v11, %v8692_v19  ;;  %v11622_v14 = vpop.f32.mrb[3].mxu1  ;;  %11938 = vmatprep.subr.bf16.mxu1 %v13687_v57  ;;  %v8625_v19 = vld [vmem:[#allocation9 + $0xe50] sm:$0xff] }
 0x76d   : > { %v11970_v47 = vmax.f32 %v13881_v31, 0.0  ;;  %v13883_v33 = vadd.f32 %v11450_v26, %v8688_v40  ;;  %v13887_v7 = vadd.f32 %v11622_v14, %v8696_v49  ;;  %v11972_v23 = vmax.f32 %v13885_v8, 0.0  ;;  %v8629_v40 = vld [vmem:[#allocation9 + $0xe70] sm:$0xff]  ;;  %v8626_v49 = vld [vmem:[#allocation9 + $0xe58] sm:$0xff] }
 0x76e   : > { %v12027_v22 = vmul.f32 %v11990_v3, %v11969_v2  ;;  %v11977_v5 = vmax.f32 %v13882_v10, 0.0  ;;  %v11979_v32 = vmax.f32 %v13886_v13, 0.0  ;;  %v12029_v36 = vmul.f32 %v15905_v29, %v11971_v35  ;;  %v8646_v2 = vld [vmem:[#allocation9 + $0xef8] sm:$0xff]  ;;  %v8653_v41 = vld [vmem:[#allocation9 + $0xf30] sm:$0xff] }
 0x76f   : > { %v12028_v1 = vmul.f32 %v11994_v54, %v11970_v47  ;;  %v11978_v45 = vmax.f32 %v13883_v33, 0.0  ;;  %11767 = vmatpush1.bf16.msra.mxu0 %v13684_v17  ;;  %11939 = vmatpush1.bf16.msra.mxu1 %v13686_v46  ;;  %v11980_v44 = vmax.f32 %v13887_v7, 0.0  ;;  %v12030_v48 = vmul.f32 %v12002_v61, %v11972_v23  ;;  %v8634_v17 = vld [vmem:[#allocation9 + $0xe98] sm:$0xff] }
 0x770   : > { %v12035_v27 = vmul.f32 %v11990_v3, %v11977_v5  ;;  %11768 = vmatprep.subr.bf16.mxu0 %v13693_v0  ;;  %11940 = vmatprep.subr.bf16.mxu1 %v13695_v12  ;;  %v12037_v39 = vmul.f32 %v15905_v29, %v11979_v32  ;;  %v13702_v3 = vcombine.low %v8618_v18, %v8622_v21  ;;  %v8638_v46 = vld [vmem:[#allocation9 + $0xeb8] sm:$0xff]  ;;  %v8645_v0 = vld [vmem:[#allocation9 + $0xef0] sm:$0xff] }
 0x771   : > { %v12043_v56 = vadd.f32 %v12028_v1, %v12027_v22  ;;  %v12036_v43 = vmul.f32 %v11994_v54, %v11978_v45  ;;  %v13709_v57 = vcombine.high %v8625_v19, %v8629_v40  ;;  %v12038_v54 = vmul.f32 %v12002_v61, %v11980_v44  ;;  %v8642_v61 = vld [vmem:[#allocation9 + $0xed8] sm:$0xff]  ;;  %v8649_v12 = vld [vmem:[#allocation9 + $0xf10] sm:$0xff] }
 0x772   : > { %v13711_v60 = vcombine.high %v8626_v49, %v8630_v50  ;;  %v13708_v29 = vcombine.low %v8625_v19, %v8629_v40  ;;  %v13710_v31 = vcombine.low %v8626_v49, %v8630_v50  ;;  %v13717_v20 = vcombine.high %v8633_v59, %v8637_v53  ;;  %v8650_v35 = vld [vmem:[#allocation9 + $0xf18] sm:$0xff]  ;;  %v8657_v18 = vld [vmem:[#allocation9 + $0xf50] sm:$0xff] }
 0x773   : > { %v12044_v51 = vadd.f32 %v12043_v56, %v12029_v36  ;;  %v12052_v52 = vadd.f32 %v12036_v43, %v12035_v27  ;;  %11769 = vmatpush1.bf16.msra.mxu0 %v13692_v16  ;;  %11941 = vmatpush1.bf16.msra.mxu1 %v13694_v24  ;;  %v13719_v63 = vcombine.high %v8634_v17, %v8638_v46  ;;  %v8641_v16 = vld [vmem:[#allocation9 + $0xed0] sm:$0xff]  ;;  %v8654_v47 = vld [vmem:[#allocation9 + $0xf38] sm:$0xff] }
 0x774   : > { %11770 = vmatprep.subr.bf16.mxu0 %v13701_v28  ;;  %11942 = vmatprep.subr.bf16.mxu1 %v13703_v25  ;;  %v13716_v8 = vcombine.low %v8633_v59, %v8637_v53  ;;  %v13718_v10 = vcombine.low %v8634_v17, %v8638_v46  ;;  %v13725_v11 = vcombine.high %v8641_v16, %v8645_v0  ;;  %v8661_v21 = vld [vmem:[#allocation9 + $0xf70] sm:$0xff]  ;;  %v8658_v22 = vld [vmem:[#allocation9 + $0xf58] sm:$0xff] }
 0x775   : > { %v15919_v6 = vadd.f32 %v12044_v51, %v12030_v48  ;;  %v12053_v58 = vadd.f32 %v12052_v52, %v12037_v39  ;;  %v13727_v26 = vcombine.high %v8642_v61, %v8646_v2  ;;  %v13724_v13 = vcombine.low %v8641_v16, %v8645_v0  ;;  %v8662_v5 = vld [vmem:[#allocation9 + $0xf78] sm:$0xff]  ;;  %v8665_v32 = vld [vmem:[#allocation9 + $0xf90] sm:$0xff] }
 0x776   : > { %v13726_v33 = vcombine.low %v8642_v61, %v8646_v2  ;;  %v13733_v14 = vcombine.high %v8649_v12, %v8653_v41  ;;  %v13735_v9 = vcombine.high %v8650_v35, %v8654_v47  ;;  %v13732_v7 = vcombine.low %v8649_v12, %v8653_v41  ;;  %v8669_v45 = vld [vmem:[#allocation9 + $0xfb0] sm:$0xff]  ;;  %v8666_v27 = vld [vmem:[#allocation9 + $0xf98] sm:$0xff] }
 0x777   : > { %v15921_v4 = vadd.f32 %v12053_v58, %v12038_v54  ;;  %11771 = vmatpush1.bf16.msra.mxu0 %v13700_v42  ;;  %11943 = vmatpush1.bf16.msra.mxu1 %v13702_v3  ;;  %v13734_v24 = vcombine.low %v8650_v35, %v8654_v47  ;;  %v13741_v1 = vcombine.high %v8657_v18, %v8661_v21  ;;  %v8670_v28 = vld [vmem:[#allocation9 + $0xfb8] sm:$0xff]  ;;  %v8673_v44 = vld [vmem:[#allocation9 + $0xfd0] sm:$0xff] }
 0x778   : > { %11772 = vmatprep.subr.bf16.mxu0 %v13709_v57  ;;  %11944 = vmatprep.subr.bf16.mxu1 %v13711_v60  ;;  %v13743_v23 = vcombine.high %v8658_v22, %v8662_v5  ;;  %v13740_v25 = vcombine.low %v8657_v18, %v8661_v21  ;;  %v13742_v36 = vcombine.low %v8658_v22, %v8662_v5  ;;  %v8677_v19 = vld [vmem:[#allocation9 + $0xff0] sm:$0xff]  ;;  %v8674_v40 = vld [vmem:[#allocation9 + $0xfd8] sm:$0xff] }
 0x779   : > { %v13749_v56 = vcombine.high %v8665_v32, %v8669_v45  ;;  %v13751_v43 = vcombine.high %v8666_v27, %v8670_v28  ;;  %v8678_v42 = vld [vmem:[#allocation9 + $0xff8] sm:$0xff]  ;;  %v13748_v49 = vcombine.low %v8665_v32, %v8669_v45  ;;  %v13750_v50 = vcombine.low %v8666_v27, %v8670_v28 }
 0x77a   : > { %v13757_v48 = vcombine.high %v8673_v44, %v8677_v19  ;;  %v13759_v51 = vcombine.high %v8674_v40, %v8678_v42  ;;  %v13756_v39 = vcombine.low %v8673_v44, %v8677_v19  ;;  %v13758_v52 = vcombine.low %v8674_v40, %v8678_v42 }
 0x77b   : > { %11773 = vmatpush1.bf16.msra.mxu0 %v13708_v29  ;;  %11945 = vmatpush1.bf16.msra.mxu1 %v13710_v31  ;;  %v8700_v3 = vrot.slane %v15879_v55, %v15837_v34  ;;  %v8708_v57 = vrot.slane %v15879_v55, %v15857_v30  ;;  %v8704_v54 = vrot.slane %v15879_v55, %v15822_v62 }
 0x77c   : > { %11774 = vmatprep.subr.bf16.mxu0 %v13717_v20  ;;  %11946 = vmatprep.subr.bf16.mxu1 %v13719_v63  ;;  %v8712_v58 = vrot.slane %v15879_v55, %v15840_v38  ;;  %v12006_v53 = vrot.slane %v15887_v37, %v15837_v34  ;;  %v12010_v31 = vrot.slane %v15887_v37, %v15822_v62 }
 0x77d   : > { %v12014_v55 = vrot.slane %v15887_v37, %v15857_v30 }
 0x77f   : > { %11775 = vmatpush1.bf16.msra.mxu0 %v13716_v8  ;;  %11947 = vmatpush1.bf16.msra.mxu1 %v13718_v10 }
 0x780   : > { %11776 = vmatprep.subr.bf16.mxu0 %v13725_v11  ;;  %11948 = vmatprep.subr.bf16.mxu1 %v13727_v26 }
 0x783   : > { %11777 = vmatpush1.bf16.msra.mxu0 %v13724_v13  ;;  %11949 = vmatpush1.bf16.msra.mxu1 %v13726_v33  ;;  %v12018_v33 = vrot.slane %v15887_v37, %v15840_v38  ;;  %v13760_v37 = vld [vmem:[#allocation3] ss:$0 sm:$0xff] }
 0x784   : > { %11778 = vmatprep.subr.bf16.mxu0 %v13733_v14  ;;  %11950 = vmatprep.subr.bf16.mxu1 %v13735_v9 }
 0x787   : > { %11779 = vmatpush1.bf16.msra.mxu0 %v13732_v7  ;;  %11951 = vmatpush1.bf16.msra.mxu1 %v13734_v24 }
 0x788   : > { %11780 = vmatprep.subr.bf16.mxu0 %v13741_v1  ;;  %11952 = vmatprep.subr.bf16.mxu1 %v13743_v23 }
 0x78b   : > { %11781 = vmatpush1.bf16.msra.mxu0 %v13740_v25  ;;  %11953 = vmatpush1.bf16.msra.mxu1 %v13742_v36 }
 0x78c   : > { %11782 = vmatprep.subr.bf16.mxu0 %v13749_v56  ;;  %11954 = vmatprep.subr.bf16.mxu1 %v13751_v43 }
 0x78f   : > { %11783 = vmatpush1.bf16.msra.mxu0 %v13748_v49  ;;  %11955 = vmatpush1.bf16.msra.mxu1 %v13750_v50 }
 0x790   : > { %11784 = vmatprep.subr.bf16.mxu0 %v13757_v48  ;;  %11956 = vmatprep.subr.bf16.mxu1 %v13759_v51 }
 0x793   : > { %11785 = vmatpush1.bf16.msra.mxu0 %v13756_v39  ;;  %11957 = vmatpush1.bf16.msra.mxu1 %v13758_v52 }
 0x796   : > { %11787 = vmatmul.mubr.bf16.vlgmr.msra.gmra.mrb[4].mxu0 %v15861_v15  ;;  %11959 = vmatmul.mubr.bf16.vlgmr.msra.gmra.mrb[4].mxu1 %v15861_v15 }
 0x869   : > { %v11788_v60 = vpop.f32.mrb[4].mxu0  ;;  %v11960_v17 = vpop.f32.mrb[4].mxu1 }
 0x86a   : > { %v13888_v59 = vadd.f32 %v11788_v60, %v8700_v3  ;;  %v11790_v46 = vpop.f32.mrb[5].mxu0  ;;  %v13892_v15 = vadd.f32 %v11960_v17, %v8708_v57  ;;  %v11962_v20 = vpop.f32.mrb[5].mxu1 }
 0x86b   : > { %v13889_v29 = vadd.f32 %v11790_v46, %v8704_v54  ;;  %v11792_v63 = vpop.f32.mrb[6].mxu0  ;;  %v13893_v0 = vadd.f32 %v11962_v20, %v8712_v58  ;;  %v11964_v2 = vpop.f32.mrb[6].mxu1 }
 0x86c   : > { %v11973_v16 = vmax.f32 %v13888_v59, 0.0  ;;  %v13890_v61 = vadd.f32 %v11792_v63, %v8700_v3  ;;  %v11794_v8 = vpop.f32.mrb[7].mxu0  ;;  %v13894_v11 = vadd.f32 %v11964_v2, %v8708_v57  ;;  %v11966_v26 = vpop.f32.mrb[7].mxu1  ;;  %v11975_v41 = vmax.f32 %v13892_v15, 0.0 }
 0x86d   : > { %v11974_v10 = vmax.f32 %v13889_v29, 0.0  ;;  %v13891_v34 = vadd.f32 %v11794_v8, %v8704_v54  ;;  %v13895_v47 = vadd.f32 %v11966_v26, %v8712_v58  ;;  %v11976_v9 = vmax.f32 %v13893_v0, 0.0 }
 0x86e   : > { %v12031_v12 = vmul.f32 %v12006_v53, %v11973_v16  ;;  %v11981_v35 = vmax.f32 %v13890_v61, 0.0  ;;  %v11983_v21 = vmax.f32 %v13894_v11, 0.0  ;;  %v12033_v30 = vmul.f32 %v12014_v55, %v11975_v41 }
 0x86f   : > { %v12032_v13 = vmul.f32 %v12010_v31, %v11974_v10  ;;  %v11982_v62 = vmax.f32 %v13891_v34, 0.0  ;;  %v11984_v7 = vmax.f32 %v13895_v47, 0.0  ;;  %v12034_v32 = vmul.f32 %v12018_v33, %v11976_v9 }
 0x870   : > { %v12046_v14 = vadd.f32 %v15919_v6, %v12031_v12  ;;  %v12039_v18 = vmul.f32 %v12006_v53, %v11981_v35  ;;  %v12041_v1 = vmul.f32 %v12014_v55, %v11983_v21 }
 0x871   : > { %v12040_v22 = vmul.f32 %v12010_v31, %v11982_v62  ;;  %v12042_v27 = vmul.f32 %v12018_v33, %v11984_v7 }
 0x872   : > { %v12055_v5 = vadd.f32 %v15921_v4, %v12039_v18  ;;  %v12047_v24 = vadd.f32 %v12046_v14, %v12032_v13 }
 0x874   : > { %v12056_v23 = vadd.f32 %v12055_v5, %v12040_v22  ;;  %v12048_v45 = vadd.f32 %v12047_v24, %v12033_v30 }
 0x876   : > { %v12049_v28 = vadd.f32 %v12048_v45, %v12034_v32  ;;  %v12057_v25 = vadd.f32 %v12056_v23, %v12041_v1 }
 0x878   : > { %12050 = vadd.xlane.f32.xlu0 %v12049_v28  ;;  %v12058_v38 = vadd.f32 %v12057_v25, %v12042_v27 }
 0x87c   : > { %12059 = vadd.xlane.f32.xlu0 %v12058_v38 }
 0x905   : > { %v12051_v6 = vpop.xlane.xlu0 %12050 }
 0x906   : > { %v12068_v36 = vadd.f32 %v13760_v37, %v12051_v6 }
 0x908   : > { %v13761_v56 = vmul.f32 -1.442695, %v12068_v36 }
 0x909   : > { %v12060_v43 = vpop.xlane.xlu0 %12059 }
 0x90a   : > { %14035 = vpow2.f32 %v13761_v56  ;;  %v12069_v44 = vadd.f32 %v13760_v37, %v12060_v43 }
 0x90c   : > { %v13762_v4 = vmul.f32 -1.442695, %v12069_v44 }
 0x90e   : > { %14037 = vpow2.f32 %v13762_v4 }
 0x914   : > { %v14036_v19 = vpop.eup %14035 }
 0x915   : > { %v12076_v40 = vadd.f32 1.0, %v14036_v19 }
 0x917   : > { %14039 = vrcp.f32 %v12076_v40 }
 0x918   : > { %v14038_v42 = vpop.eup %14037 }
 0x919   : > { %v12077_v49 = vadd.f32 1.0, %v14038_v42 }
 0x91b   : > { %14041 = vrcp.f32 %v12077_v49 }
 0x921   : > { %v14040_v50 = vpop.eup %14039 }
 0x922   : > { %12083 = vst.msk [vmem:[%s15969_s7] sm:$0xff] %vm12082_vm0, %v14040_v50 }
 0x925   : > { %v14042_v48 = vpop.eup %14041 }
 0x926   : > { %12084 = vst.msk [vmem:[%s15969_s7 + $0x8] sm:$0xff] %vm12082_vm0, %v14042_v48 }
 0x927 PF: > { %p24_p13 = scmp.ge.s32.totalorder %s14459_s21, 4   ;;  %s15995_s26 = smov %s14258_s27 }
 0x928   : > { %s15996_s27 = smov %s14262_s28  ;;  %s15997_s28 = smov %s14472_s10 }
 0x929   : > { %s15998_s29 = smov %s14459_s21  ;;  %26 = sbr.rel (!%p24_p13) target bundleno = 10 (0xa), region = 121 }
 0x930   :  { %12096 = vsyncpa [#allocation5], 1 }
 0x931   :  { %12098 = vsyncpa [#allocation5 + $0x1], 1 }
 0x932   :  { %12099 = vsyncpa [#allocation7], 1 }
 0x933   :  { %12101 = vsyncpa [#allocation7 + $0x1], 1 }
 0x934   :  { %12102 = vsyncpa [#allocation10], 1 }
 0x935   :  { %12103 = vsyncpa [#allocation13], 1 }

</bundles_post_ra>
